<compile_context>
chip_gen: v5e
topology: v5e:2x2
jax: 0.10.0
libtpu: 0.0.40
codegen_flags: <defaults>
</compile_context>

<pallas_src>
import jax
import jax.numpy as jnp
from jax.experimental import pallas as pl
from jax.experimental.pallas import tpu as pltpu


def pointnet_kernel(x_ref, *rest):
    """One grid step processes a block of `bb` point clouds.

    x_ref: (bb, C_pad, N) — PyTorch Conv1d layout, lane-dense along N.
    rest:  29 parameter refs, then seg_ref (bb, seg_pad, N), cls_ref (bb, 1, cls_dim).
    """
    *param_refs, seg_ref, cls_ref = rest
    (w1a, b1a, w2ap, b2a, w3a, b3a,        # feat1 (conv2 fused w/ feat2.conv1 point-side)
     w1bg, b1b, w2bp, b2b, w3b, b3b,       # feat2 (conv2 fused w/ feat3.conv1 point-side)
     w1cg, b1c, w2cp, b2c, w3c, b3c,       # feat3 (conv2 fused w/ seg-fc1 point-side)
     bf1, wf2, bf2, wf3, bf3,              # seg head
     wg3, bc1, wc2, bc2, wc3, bc3) = [r[...] for r in param_refs]

    bb, cpad, n = x_ref.shape

    def mm(a, w):                           # MXU: bf16 x bf16 -> f32 accumulate
        return jnp.dot(a, w, preferred_element_type=jnp.float32)

    def relu_bf16(a):                       # bias/ReLU math in f32, store bf16 once
        return jnp.maximum(a, 0.0).astype(jnp.bfloat16)

    def cloud_max(h):                       # (bb*n, D) f32 -> per-cloud max (bb, D)
        return jnp.max(h.reshape(bb, n, h.shape[-1]), axis=1)

    def add_cloud(p, g):                    # p: (bb*n, D) f32, g: (bb, D) f32
        d = p.shape[-1]
        return (p.reshape(bb, n, d) + g[:, None, :]).reshape(bb * n, d)

    # --- (bb, C, N) -> points-major (bb*n, C): tiny per-cloud C x N transposes ---
    xt = jnp.concatenate([x_ref[b].T for b in range(bb)], axis=0)
    xt = xt.astype(jnp.bfloat16)            # (bb*n, C_pad)

    # --- encoder 1 (C -> 64 -> 128 -> max_dim) ---
    pf = relu_bf16(mm(xt, w1a) + b1a)                       # pointfeat1 (bb*n, 64)
    hc = mm(pf, w2ap)                                       # fused [conv2 | feat2.conv1 pt]
    h = relu_bf16(hc[:, :128] + b2a)
    side = hc[:, 128:]                                      # (bb*n, 64) f32
    g = cloud_max(mm(h, w3a) + b3a)                         # g1 (bb, max_dim)

    # --- encoder 2: conv1(concat([g1, pointfeat1])) done algebraically ---
    pf = relu_bf16(add_cloud(side, mm(g.astype(jnp.bfloat16), w1bg) + b1b))
    hc = mm(pf, w2bp)
    h = relu_bf16(hc[:, :128] + b2b)
    side = hc[:, 128:]
    g = cloud_max(mm(h, w3b) + b3b)                         # g2

    # --- encoder 3 ---
    pf = relu_bf16(add_cloud(side, mm(g.astype(jnp.bfloat16), w1cg) + b1c))
    hc = mm(pf, w2cp)                                       # fused [conv2 | seg-fc1 pt]
    h = relu_bf16(hc[:, :128] + b2c)
    s_pt = hc[:, 128:]                                      # (bb*n, 512) f32
    g = cloud_max(mm(h, w3c) + b3c)                         # g3 (bb, max_dim) global feature

    # --- heads: fused g3 matmul [cls fc1 | seg fc1 global-side] ---
    gh = mm(g.astype(jnp.bfloat16), wg3)                    # (bb, 1024)
    c = relu_bf16(gh[:, :512] + bc1)                        # cls fc1
    sg = gh[:, 512:] + bf1                                  # seg fc1 global-side (bb, 512)

    # --- segmentation head ---
    s = relu_bf16(add_cloud(s_pt, sg))                      # (bb*n, 512)
    s = relu_bf16(mm(s, wf2) + bf2)                         # (bb*n, 256)
    seg = mm(s, wf3) + bf3                                  # (bb*n, seg_pad) f32
    seg3 = seg.reshape(bb, n, seg.shape[-1])
    for b in range(bb):                                     # lane-dense (seg_pad, N) store
        seg_ref[b] = seg3[b].T

    # --- classification head (M = bb) ---
    c = relu_bf16(mm(c, wc2) + bc2)                         # (bb, 256)
    cls_ref[:, 0, :] = mm(c, wc3) + bc3


def _round_up(v, m):
    return ((v + m - 1) // m) * m


def _vmem_limit_bytes():
    """Generation-aware scoped-VMEM limit (v5e/v6e: 128 MiB, v7x: 64 MiB physical)."""
    try:
        cap = int(pltpu.get_tpu_info().vmem_capacity_bytes)
    except Exception:
        cap = 64 << 20                      # conservative default (v7x per-core VMEM)
    if cap <= 0:
        cap = 64 << 20
    return min(cap * 3 // 4, 100 << 20)


def _choose_bb(B, N, max_dim, c_pad, seg_pad, vmem_limit, weight_bytes):
    """Largest clouds-per-step fitting the activation budget, keeping >= 2 grid
    steps (v7x megacore uses both TensorCores) and preferring divisors of B."""
    # Conservative live-f32 bytes per point at the peak (encoder-3 / seg head),
    # plus double-buffered input / seg-output blocks.
    per_point = 4 * max_dim + 8192 + 2 * 4 * (c_pad + seg_pad)
    budget = vmem_limit - 2 * weight_bytes - (2 << 20)
    fit = int(max(1, budget // (per_point * N)))
    cap = (B + 1) // 2 if B >= 2 else 1
    bb0 = int(max(1, min(B, fit, cap, 32)))
    # TODO(synk): if even bb=1 exceeds the budget (huge N*max_dim), stream over
    # an N-tile grid axis with a running per-cloud max instead.
    for d in range(bb0, max(1, bb0 // 2) - 1, -1):
        if B % d == 0:
            return d
    return bb0


def pointnet_seg_and_cls(x_bcn, params, *, seg_dim=1, cls_dim=5):
    """x_bcn: (B, C, N) float32 — the PyTorch Conv1d input layout (kept as-is)."""
    B, C, N = x_bcn.shape
    max_dim = params[12][0].shape[0]          # cls fc1 input dim == max_dim
    c_pad = _round_up(max(C, 1), 8)
    seg_pad = _round_up(max(seg_dim, 1), 8)
    f32, bf16 = jnp.float32, jnp.bfloat16

    def W(a):                                 # matmul weights -> bf16 for the MXU
        return a.astype(bf16)

    def Bv(a):                                # biases stay f32, shaped (1, C_out)
        return a.reshape(1, -1).astype(f32)

    (w1a, b1a), (w2a, b2a), (w3a, b3a) = params[0], params[1], params[2]
    (w1b, b1b), (w2b, b2b), (w3b, b3b) = params[3], params[4], params[5]
    (w1c, b1c), (w2c, b2c), (w3c, b3c) = params[6], params[7], params[8]
    (wf1, bf1), (wf2, bf2), (wf3, bf3) = params[9], params[10], params[11]
    (wc1, bc1), (wc2, bc2), (wc3, bc3) = params[12], params[13], params[14]

    # PyTorch encoder concat order is [global (max_dim), pointfeat (64)], so the
    # first max_dim input rows of feat2.conv1 / feat3.conv1 / seg fc1 are the
    # global-feature side of the weight.
    w1bg, w1bp = w1b[:max_dim], w1b[max_dim:]
    w1cg, w1cp = w1c[:max_dim], w1c[max_dim:]
    wf1g, wf1p = wf1[:max_dim], wf1[max_dim:]

    flat = [
        W(jnp.pad(w1a, ((0, c_pad - C), (0, 0)))), Bv(b1a),
        W(jnp.concatenate([w2a, w1bp], axis=1)), Bv(b2a),      # (64, 128+64)
        W(w3a), Bv(b3a),
        W(w1bg), Bv(b1b),
        W(jnp.concatenate([w2b, w1cp], axis=1)), Bv(b2b),      # (64, 128+64)
        W(w3b), Bv(b3b),
        W(w1cg), Bv(b1c),
        W(jnp.concatenate([w2c, wf1p], axis=1)), Bv(b2c),      # (64, 128+512)
        W(w3c), Bv(b3c),
        Bv(bf1),
        W(wf2), Bv(bf2),
        W(jnp.pad(wf3, ((0, 0), (0, seg_pad - seg_dim)))),
        Bv(jnp.pad(bf3, ((0, seg_pad - seg_dim),))),
        W(jnp.concatenate([wc1, wf1g], axis=1)), Bv(bc1),      # (max_dim, 1024)
        W(wc2), Bv(bc2),
        W(wc3), Bv(bc3),
    ]
    weight_bytes = int(sum(int(a.size) * a.dtype.itemsize for a in flat))

    vmem_limit = _vmem_limit_bytes()
    bb = _choose_bb(B, N, max_dim, c_pad, seg_pad, vmem_limit, weight_bytes)
    b_pad = _round_up(B, bb)

    # Keep the PyTorch (B, C, N) layout (lane-dense along N); pad channels to a
    # sublane multiple and batch to a multiple of bb (extra clouds sliced off).
    x = jnp.pad(x_bcn.astype(f32), ((0, b_pad - B), (0, c_pad - C), (0, 0)))

    def in_specs(single_buffer_weights):
        specs = [pl.BlockSpec((bb, c_pad, N), lambda i: (i, 0, 0))]
        for a in flat:
            if single_buffer_weights:
                specs.append(pl.BlockSpec(a.shape, lambda i: (0, 0),
                                          pipeline_mode=pl.Buffered(1)))
            else:
                specs.append(pl.BlockSpec(a.shape, lambda i: (0, 0)))
        return specs

    out_shape = (jax.ShapeDtypeStruct((b_pad, seg_pad, N), f32),
                 jax.ShapeDtypeStruct((b_pad, 1, cls_dim), f32))
    out_specs = (pl.BlockSpec((bb, seg_pad, N), lambda i: (i, 0, 0)),
                 pl.BlockSpec((bb, 1, cls_dim), lambda i: (i, 0, 0)))
    cparams = pltpu.CompilerParams(dimension_semantics=("parallel",),
                                   vmem_limit_bytes=vmem_limit)

    def run(single_buffer_weights):
        out = pl.pallas_call(
            pointnet_kernel,
            grid=(b_pad // bb,),
            in_specs=in_specs(single_buffer_weights),
            out_specs=out_specs,
            out_shape=out_shape,
            compiler_params=cparams,
        )(x, *flat)
        jax.block_until_ready(out)
        return out

    try:
        seg, cls = run(True)      # constant weights single-buffered (fetched once)
    except Exception:
        # TODO(synk): pl.Buffered(1) single-buffering rejected on this JAX/libtpu;
        # fall back to default double-buffered constant blocks.
        seg, cls = run(False)

    # PyTorch: pseudo_inputs = fc3(x).unsqueeze(-1).transpose(1, 2) -> (B, seg_dim, N, 1)
    pseudo_inputs = seg[:B, :seg_dim, :, None]
    categorical_logits = cls[:B, 0, :]
    return pseudo_inputs, categorical_logits


def init_params(key, *, channel=3, max_dim=128, seg_dim=1, cls_dim=5):
    """Deterministic synthetic parameters; shapes follow the PyTorch module.

    Weights are stored (C_in, C_out), i.e. transposed vs. PyTorch Conv1d/Linear.
    """
    layer_dims = [
        # feat1 (channel -> 64 -> 128 -> max_dim)
        (channel, 64), (64, 128), (128, max_dim),
        # feat2 (max_dim+64 -> 64 -> 128 -> max_dim)
        (max_dim + 64, 64), (64, 128), (128, max_dim),
        # feat3
        (max_dim + 64, 64), (64, 128), (128, max_dim),
        # seg head: fc1, fc2, fc3
        (max_dim + 64, 512), (512, 256), (256, seg_dim),
        # cls head: fc1_cl, fc2_cl, fc3_cl
        (max_dim, 512), (512, 256), (256, cls_dim),
    ]
    params = []
    for cin, cout in layer_dims:
        key, wk, bk = jax.random.split(key, 3)
        w = jax.random.normal(wk, (cin, cout), jnp.float32) * (1.0 / jnp.sqrt(cin))
        b = jax.random.normal(bk, (cout,), jnp.float32) * 0.01
        params.append((w, b))
    return params


if __name__ == "__main__":
    # Small shapes consistent with the module: batch=2, channel=3 point clouds
    # of N=16 points, max_dim reduced to 128 (module default is 1024).
    B, C, N, MAXD = 2, 3, 16, 128
    SEG_DIM, CLS_DIM = 1, 5

    key = jax.random.PRNGKey(0)
    kx, kp = jax.random.split(key)
    x = jax.random.normal(kx, (B, C, N), jnp.float32)
    params = init_params(kp, channel=C, max_dim=MAXD, seg_dim=SEG_DIM, cls_dim=CLS_DIM)

    pseudo_inputs, categorical_logits = pointnet_seg_and_cls(
        x, params, seg_dim=SEG_DIM, cls_dim=CLS_DIM)
    jax.block_until_ready((pseudo_inputs, categorical_logits))

    assert pseudo_inputs.shape == (B, SEG_DIM, N, 1), pseudo_inputs.shape
    assert categorical_logits.shape == (B, CLS_DIM), categorical_logits.shape
    assert bool(jnp.all(jnp.isfinite(pseudo_inputs)))
    assert bool(jnp.all(jnp.isfinite(categorical_logits)))
    print("KERNEL_OK")
</pallas_src>

<mosaic_0001>
module attributes {stable_mosaic.version = 11 : i64} {
  func.func @pointnet_kernel(%arg0: i32, %arg1: memref<1x8x16xf32, #tpu.memory_space<vmem>>, %arg2: memref<8x64xbf16, #tpu.memory_space<vmem>>, %arg3: memref<1x64xf32, #tpu.memory_space<vmem>>, %arg4: memref<64x192xbf16, #tpu.memory_space<vmem>>, %arg5: memref<1x128xf32, #tpu.memory_space<vmem>>, %arg6: memref<128x128xbf16, #tpu.memory_space<vmem>>, %arg7: memref<1x128xf32, #tpu.memory_space<vmem>>, %arg8: memref<128x64xbf16, #tpu.memory_space<vmem>>, %arg9: memref<1x64xf32, #tpu.memory_space<vmem>>, %arg10: memref<64x192xbf16, #tpu.memory_space<vmem>>, %arg11: memref<1x128xf32, #tpu.memory_space<vmem>>, %arg12: memref<128x128xbf16, #tpu.memory_space<vmem>>, %arg13: memref<1x128xf32, #tpu.memory_space<vmem>>, %arg14: memref<128x64xbf16, #tpu.memory_space<vmem>>, %arg15: memref<1x64xf32, #tpu.memory_space<vmem>>, %arg16: memref<64x640xbf16, #tpu.memory_space<vmem>>, %arg17: memref<1x128xf32, #tpu.memory_space<vmem>>, %arg18: memref<128x128xbf16, #tpu.memory_space<vmem>>, %arg19: memref<1x128xf32, #tpu.memory_space<vmem>>, %arg20: memref<1x512xf32, #tpu.memory_space<vmem>>, %arg21: memref<512x256xbf16, #tpu.memory_space<vmem>>, %arg22: memref<1x256xf32, #tpu.memory_space<vmem>>, %arg23: memref<256x8xbf16, #tpu.memory_space<vmem>>, %arg24: memref<1x8xf32, #tpu.memory_space<vmem>>, %arg25: memref<128x1024xbf16, #tpu.memory_space<vmem>>, %arg26: memref<1x512xf32, #tpu.memory_space<vmem>>, %arg27: memref<512x256xbf16, #tpu.memory_space<vmem>>, %arg28: memref<1x256xf32, #tpu.memory_space<vmem>>, %arg29: memref<256x5xbf16, #tpu.memory_space<vmem>>, %arg30: memref<1x5xf32, #tpu.memory_space<vmem>>, %arg31: memref<1x8x16xf32, #tpu.memory_space<vmem>>, %arg32: memref<1x1x5xf32, #tpu.memory_space<vmem>>) attributes {dimension_semantics = [#tpu.dimension_semantics<parallel>], iteration_bounds = array<i64: 2>, scalar_prefetch = 0 : i64, scratch_operands = 0 : i64, tpu.core_type = #tpu.core_type<tc>, window_params = [{transform_indices = @transform_0, window_bounds = array<i64: 1, 8, 16>}, {pipeline_mode = #tpu.pipeline_mode<synchronous>, transform_indices = @transform_1, window_bounds = array<i64: 8, 64>}, {pipeline_mode = #tpu.pipeline_mode<synchronous>, transform_indices = @transform_2, window_bounds = array<i64: 1, 64>}, {pipeline_mode = #tpu.pipeline_mode<synchronous>, transform_indices = @transform_3, window_bounds = array<i64: 64, 192>}, {pipeline_mode = #tpu.pipeline_mode<synchronous>, transform_indices = @transform_4, window_bounds = array<i64: 1, 128>}, {pipeline_mode = #tpu.pipeline_mode<synchronous>, transform_indices = @transform_5, window_bounds = array<i64: 128, 128>}, {pipeline_mode = #tpu.pipeline_mode<synchronous>, transform_indices = @transform_6, window_bounds = array<i64: 1, 128>}, {pipeline_mode = #tpu.pipeline_mode<synchronous>, transform_indices = @transform_7, window_bounds = array<i64: 128, 64>}, {pipeline_mode = #tpu.pipeline_mode<synchronous>, transform_indices = @transform_8, window_bounds = array<i64: 1, 64>}, {pipeline_mode = #tpu.pipeline_mode<synchronous>, transform_indices = @transform_9, window_bounds = array<i64: 64, 192>}, {pipeline_mode = #tpu.pipeline_mode<synchronous>, transform_indices = @transform_10, window_bounds = array<i64: 1, 128>}, {pipeline_mode = #tpu.pipeline_mode<synchronous>, transform_indices = @transform_11, window_bounds = array<i64: 128, 128>}, {pipeline_mode = #tpu.pipeline_mode<synchronous>, transform_indices = @transform_12, window_bounds = array<i64: 1, 128>}, {pipeline_mode = #tpu.pipeline_mode<synchronous>, transform_indices = @transform_13, window_bounds = array<i64: 128, 64>}, {pipeline_mode = #tpu.pipeline_mode<synchronous>, transform_indices = @transform_14, window_bounds = array<i64: 1, 64>}, {pipeline_mode = #tpu.pipeline_mode<synchronous>, transform_indices = @transform_15, window_bounds = array<i64: 64, 640>}, {pipeline_mode = #tpu.pipeline_mode<synchronous>, transform_indices = @transform_16, window_bounds = array<i64: 1, 128>}, {pipeline_mode = #tpu.pipeline_mode<synchronous>, transform_indices = @transform_17, window_bounds = array<i64: 128, 128>}, {pipeline_mode = #tpu.pipeline_mode<synchronous>, transform_indices = @transform_18, window_bounds = array<i64: 1, 128>}, {pipeline_mode = #tpu.pipeline_mode<synchronous>, transform_indices = @transform_19, window_bounds = array<i64: 1, 512>}, {pipeline_mode = #tpu.pipeline_mode<synchronous>, transform_indices = @transform_20, window_bounds = array<i64: 512, 256>}, {pipeline_mode = #tpu.pipeline_mode<synchronous>, transform_indices = @transform_21, window_bounds = array<i64: 1, 256>}, {pipeline_mode = #tpu.pipeline_mode<synchronous>, transform_indices = @transform_22, window_bounds = array<i64: 256, 8>}, {pipeline_mode = #tpu.pipeline_mode<synchronous>, transform_indices = @transform_23, window_bounds = array<i64: 1, 8>}, {pipeline_mode = #tpu.pipeline_mode<synchronous>, transform_indices = @transform_24, window_bounds = array<i64: 128, 1024>}, {pipeline_mode = #tpu.pipeline_mode<synchronous>, transform_indices = @transform_25, window_bounds = array<i64: 1, 512>}, {pipeline_mode = #tpu.pipeline_mode<synchronous>, transform_indices = @transform_26, window_bounds = array<i64: 512, 256>}, {pipeline_mode = #tpu.pipeline_mode<synchronous>, transform_indices = @transform_27, window_bounds = array<i64: 1, 256>}, {pipeline_mode = #tpu.pipeline_mode<synchronous>, transform_indices = @transform_28, window_bounds = array<i64: 256, 5>}, {pipeline_mode = #tpu.pipeline_mode<synchronous>, transform_indices = @transform_29, window_bounds = array<i64: 1, 5>}, {transform_indices = @transform_30, window_bounds = array<i64: 1, 8, 16>}, {transform_indices = @transform_31, window_bounds = array<i64: 1, 1, 5>}]} {
    %c0 = arith.constant 0 : index
    %c0_0 = arith.constant 0 : index
    %0 = vector.load %arg2[%c0, %c0_0] : memref<8x64xbf16, #tpu.memory_space<vmem>>, vector<8x64xbf16>
    %c0_1 = arith.constant 0 : index
    %c0_2 = arith.constant 0 : index
    %1 = vector.load %arg3[%c0_1, %c0_2] : memref<1x64xf32, #tpu.memory_space<vmem>>, vector<1x64xf32>
    %c0_3 = arith.constant 0 : index
    %c0_4 = arith.constant 0 : index
    %2 = vector.load %arg4[%c0_3, %c0_4] : memref<64x192xbf16, #tpu.memory_space<vmem>>, vector<64x192xbf16>
    %c0_5 = arith.constant 0 : index
    %c0_6 = arith.constant 0 : index
    %3 = vector.load %arg5[%c0_5, %c0_6] : memref<1x128xf32, #tpu.memory_space<vmem>>, vector<1x128xf32>
    %c0_7 = arith.constant 0 : index
    %c0_8 = arith.constant 0 : index
    %4 = vector.load %arg6[%c0_7, %c0_8] : memref<128x128xbf16, #tpu.memory_space<vmem>>, vector<128x128xbf16>
    %c0_9 = arith.constant 0 : index
    %c0_10 = arith.constant 0 : index
    %5 = vector.load %arg7[%c0_9, %c0_10] : memref<1x128xf32, #tpu.memory_space<vmem>>, vector<1x128xf32>
    %c0_11 = arith.constant 0 : index
    %c0_12 = arith.constant 0 : index
    %6 = vector.load %arg8[%c0_11, %c0_12] : memref<128x64xbf16, #tpu.memory_space<vmem>>, vector<128x64xbf16>
    %c0_13 = arith.constant 0 : index
    %c0_14 = arith.constant 0 : index
    %7 = vector.load %arg9[%c0_13, %c0_14] : memref<1x64xf32, #tpu.memory_space<vmem>>, vector<1x64xf32>
    %c0_15 = arith.constant 0 : index
    %c0_16 = arith.constant 0 : index
    %8 = vector.load %arg10[%c0_15, %c0_16] : memref<64x192xbf16, #tpu.memory_space<vmem>>, vector<64x192xbf16>
    %c0_17 = arith.constant 0 : index
    %c0_18 = arith.constant 0 : index
    %9 = vector.load %arg11[%c0_17, %c0_18] : memref<1x128xf32, #tpu.memory_space<vmem>>, vector<1x128xf32>
    %c0_19 = arith.constant 0 : index
    %c0_20 = arith.constant 0 : index
    %10 = vector.load %arg12[%c0_19, %c0_20] : memref<128x128xbf16, #tpu.memory_space<vmem>>, vector<128x128xbf16>
    %c0_21 = arith.constant 0 : index
    %c0_22 = arith.constant 0 : index
    %11 = vector.load %arg13[%c0_21, %c0_22] : memref<1x128xf32, #tpu.memory_space<vmem>>, vector<1x128xf32>
    %c0_23 = arith.constant 0 : index
    %c0_24 = arith.constant 0 : index
    %12 = vector.load %arg14[%c0_23, %c0_24] : memref<128x64xbf16, #tpu.memory_space<vmem>>, vector<128x64xbf16>
    %c0_25 = arith.constant 0 : index
    %c0_26 = arith.constant 0 : index
    %13 = vector.load %arg15[%c0_25, %c0_26] : memref<1x64xf32, #tpu.memory_space<vmem>>, vector<1x64xf32>
    %c0_27 = arith.constant 0 : index
    %c0_28 = arith.constant 0 : index
    %14 = vector.load %arg16[%c0_27, %c0_28] : memref<64x640xbf16, #tpu.memory_space<vmem>>, vector<64x640xbf16>
    %c0_29 = arith.constant 0 : index
    %c0_30 = arith.constant 0 : index
    %15 = vector.load %arg17[%c0_29, %c0_30] : memref<1x128xf32, #tpu.memory_space<vmem>>, vector<1x128xf32>
    %c0_31 = arith.constant 0 : index
    %c0_32 = arith.constant 0 : index
    %16 = vector.load %arg18[%c0_31, %c0_32] : memref<128x128xbf16, #tpu.memory_space<vmem>>, vector<128x128xbf16>
    %c0_33 = arith.constant 0 : index
    %c0_34 = arith.constant 0 : index
    %17 = vector.load %arg19[%c0_33, %c0_34] : memref<1x128xf32, #tpu.memory_space<vmem>>, vector<1x128xf32>
    %c0_35 = arith.constant 0 : index
    %c0_36 = arith.constant 0 : index
    %18 = vector.load %arg20[%c0_35, %c0_36] : memref<1x512xf32, #tpu.memory_space<vmem>>, vector<1x512xf32>
    %c0_37 = arith.constant 0 : index
    %c0_38 = arith.constant 0 : index
    %19 = vector.load %arg21[%c0_37, %c0_38] : memref<512x256xbf16, #tpu.memory_space<vmem>>, vector<512x256xbf16>
    %c0_39 = arith.constant 0 : index
    %c0_40 = arith.constant 0 : index
    %20 = vector.load %arg22[%c0_39, %c0_40] : memref<1x256xf32, #tpu.memory_space<vmem>>, vector<1x256xf32>
    %c0_41 = arith.constant 0 : index
    %c0_42 = arith.constant 0 : index
    %21 = vector.load %arg23[%c0_41, %c0_42] : memref<256x8xbf16, #tpu.memory_space<vmem>>, vector<256x8xbf16>
    %c0_43 = arith.constant 0 : index
    %c0_44 = arith.constant 0 : index
    %22 = vector.load %arg24[%c0_43, %c0_44] : memref<1x8xf32, #tpu.memory_space<vmem>>, vector<1x8xf32>
    %c0_45 = arith.constant 0 : index
    %c0_46 = arith.constant 0 : index
    %23 = vector.load %arg25[%c0_45, %c0_46] : memref<128x1024xbf16, #tpu.memory_space<vmem>>, vector<128x1024xbf16>
    %c0_47 = arith.constant 0 : index
    %c0_48 = arith.constant 0 : index
    %24 = vector.load %arg26[%c0_47, %c0_48] : memref<1x512xf32, #tpu.memory_space<vmem>>, vector<1x512xf32>
    %c0_49 = arith.constant 0 : index
    %c0_50 = arith.constant 0 : index
    %25 = vector.load %arg27[%c0_49, %c0_50] : memref<512x256xbf16, #tpu.memory_space<vmem>>, vector<512x256xbf16>
    %c0_51 = arith.constant 0 : index
    %c0_52 = arith.constant 0 : index
    %26 = vector.load %arg28[%c0_51, %c0_52] : memref<1x256xf32, #tpu.memory_space<vmem>>, vector<1x256xf32>
    %c0_53 = arith.constant 0 : index
    %c0_54 = arith.constant 0 : index
    %27 = vector.load %arg29[%c0_53, %c0_54] : memref<256x5xbf16, #tpu.memory_space<vmem>>, vector<256x5xbf16>
    %c0_55 = arith.constant 0 : index
    %c0_56 = arith.constant 0 : index
    %28 = vector.load %arg30[%c0_55, %c0_56] : memref<1x5xf32, #tpu.memory_space<vmem>>, vector<1x5xf32>
    %c0_57 = arith.constant 0 : index
    %c0_58 = arith.constant 0 : index
    %c0_59 = arith.constant 0 : index
    %29 = vector.load %arg1[%c0_57, %c0_58, %c0_59] : memref<1x8x16xf32, #tpu.memory_space<vmem>>, vector<1x8x16xf32>
    %30 = vector.shape_cast %29 : vector<1x8x16xf32> to vector<8x16xf32>
    %31 = tpu.transpose %30, [1, 0] : vector<8x16xf32> -> vector<16x8xf32>
    %32 = arith.truncf %31 : vector<16x8xf32> to vector<16x8xbf16>
    %cst = arith.constant dense<0.000000e+00> : vector<16x64xf32>
    %33 = tpu.matmul %32, %0, %cst {dimension_numbers = #tpu.dot_dimension_numbers<[1], [0], [0], [1], [0, 0, 1, 1], [], []>} : vector<16x8xbf16>, vector<8x64xbf16>, vector<16x64xf32> -> vector<16x64xf32>
    %34 = vector.broadcast %1 : vector<1x64xf32> to vector<16x64xf32>
    %35 = arith.addf %33, %34 : vector<16x64xf32>
    %cst_60 = arith.constant 0.000000e+00 : f32
    %36 = vector.broadcast %cst_60 : f32 to vector<16x64xf32>
    %37 = arith.maximumf %35, %36 : vector<16x64xf32>
    %38 = arith.truncf %37 : vector<16x64xf32> to vector<16x64xbf16>
    %cst_61 = arith.constant dense<0.000000e+00> : vector<16x192xf32>
    %39 = tpu.matmul %38, %2, %cst_61 {dimension_numbers = #tpu.dot_dimension_numbers<[1], [0], [0], [1], [0, 0, 1, 1], [], []>} : vector<16x64xbf16>, vector<64x192xbf16>, vector<16x192xf32> -> vector<16x192xf32>
    %40 = vector.extract_strided_slice %39 {offsets = [0, 0], sizes = [16, 128], strides = [1, 1]} : vector<16x192xf32> to vector<16x128xf32>
    %41 = vector.broadcast %3 : vector<1x128xf32> to vector<16x128xf32>
    %42 = arith.addf %40, %41 : vector<16x128xf32>
    %cst_62 = arith.constant 0.000000e+00 : f32
    %43 = vector.broadcast %cst_62 : f32 to vector<16x128xf32>
    %44 = arith.maximumf %42, %43 : vector<16x128xf32>
    %45 = arith.truncf %44 : vector<16x128xf32> to vector<16x128xbf16>
    %46 = vector.extract_strided_slice %39 {offsets = [0, 128], sizes = [16, 64], strides = [1, 1]} : vector<16x192xf32> to vector<16x64xf32>
    %cst_63 = arith.constant dense<0.000000e+00> : vector<16x128xf32>
    %47 = tpu.matmul %45, %4, %cst_63 {dimension_numbers = #tpu.dot_dimension_numbers<[1], [0], [0], [1], [0, 0, 1, 1], [], []>} : vector<16x128xbf16>, vector<128x128xbf16>, vector<16x128xf32> -> vector<16x128xf32>
    %48 = vector.broadcast %5 : vector<1x128xf32> to vector<16x128xf32>
    %49 = arith.addf %47, %48 : vector<16x128xf32>
    %50 = vector.shape_cast %49 : vector<16x128xf32> to vector<1x16x128xf32>
    %cst_64 = arith.constant dense<0xFF800000> : vector<1x128xf32>
    %51 = vector.multi_reduction <maximumf>, %50, %cst_64 [1] : vector<1x16x128xf32> to vector<1x128xf32>
    %52 = arith.truncf %51 : vector<1x128xf32> to vector<1x128xbf16>
    %cst_65 = arith.constant dense<0.000000e+00> : vector<1x64xf32>
    %53 = tpu.matmul %52, %6, %cst_65 {dimension_numbers = #tpu.dot_dimension_numbers<[1], [0], [0], [1], [0, 0, 1, 1], [], []>} : vector<1x128xbf16>, vector<128x64xbf16>, vector<1x64xf32> -> vector<1x64xf32>
    %54 = arith.addf %53, %7 : vector<1x64xf32>
    %55 = vector.shape_cast %46 : vector<16x64xf32> to vector<1x16x64xf32>
    %56 = vector.shape_cast %54 : vector<1x64xf32> to vector<1x1x64xf32>
    %57 = vector.broadcast %56 : vector<1x1x64xf32> to vector<1x16x64xf32>
    %58 = arith.addf %55, %57 : vector<1x16x64xf32>
    %59 = vector.shape_cast %58 : vector<1x16x64xf32> to vector<16x64xf32>
    %cst_66 = arith.constant 0.000000e+00 : f32
    %60 = vector.broadcast %cst_66 : f32 to vector<16x64xf32>
    %61 = arith.maximumf %59, %60 : vector<16x64xf32>
    %62 = arith.truncf %61 : vector<16x64xf32> to vector<16x64xbf16>
    %cst_67 = arith.constant dense<0.000000e+00> : vector<16x192xf32>
    %63 = tpu.matmul %62, %8, %cst_67 {dimension_numbers = #tpu.dot_dimension_numbers<[1], [0], [0], [1], [0, 0, 1, 1], [], []>} : vector<16x64xbf16>, vector<64x192xbf16>, vector<16x192xf32> -> vector<16x192xf32>
    %64 = vector.extract_strided_slice %63 {offsets = [0, 0], sizes = [16, 128], strides = [1, 1]} : vector<16x192xf32> to vector<16x128xf32>
    %65 = vector.broadcast %9 : vector<1x128xf32> to vector<16x128xf32>
    %66 = arith.addf %64, %65 : vector<16x128xf32>
    %cst_68 = arith.constant 0.000000e+00 : f32
    %67 = vector.broadcast %cst_68 : f32 to vector<16x128xf32>
    %68 = arith.maximumf %66, %67 : vector<16x128xf32>
    %69 = arith.truncf %68 : vector<16x128xf32> to vector<16x128xbf16>
    %70 = vector.extract_strided_slice %63 {offsets = [0, 128], sizes = [16, 64], strides = [1, 1]} : vector<16x192xf32> to vector<16x64xf32>
    %cst_69 = arith.constant dense<0.000000e+00> : vector<16x128xf32>
    %71 = tpu.matmul %69, %10, %cst_69 {dimension_numbers = #tpu.dot_dimension_numbers<[1], [0], [0], [1], [0, 0, 1, 1], [], []>} : vector<16x128xbf16>, vector<128x128xbf16>, vector<16x128xf32> -> vector<16x128xf32>
    %72 = vector.broadcast %11 : vector<1x128xf32> to vector<16x128xf32>
    %73 = arith.addf %71, %72 : vector<16x128xf32>
    %74 = vector.shape_cast %73 : vector<16x128xf32> to vector<1x16x128xf32>
    %cst_70 = arith.constant dense<0xFF800000> : vector<1x128xf32>
    %75 = vector.multi_reduction <maximumf>, %74, %cst_70 [1] : vector<1x16x128xf32> to vector<1x128xf32>
    %76 = arith.truncf %75 : vector<1x128xf32> to vector<1x128xbf16>
    %cst_71 = arith.constant dense<0.000000e+00> : vector<1x64xf32>
    %77 = tpu.matmul %76, %12, %cst_71 {dimension_numbers = #tpu.dot_dimension_numbers<[1], [0], [0], [1], [0, 0, 1, 1], [], []>} : vector<1x128xbf16>, vector<128x64xbf16>, vector<1x64xf32> -> vector<1x64xf32>
    %78 = arith.addf %77, %13 : vector<1x64xf32>
    %79 = vector.shape_cast %70 : vector<16x64xf32> to vector<1x16x64xf32>
    %80 = vector.shape_cast %78 : vector<1x64xf32> to vector<1x1x64xf32>
    %81 = vector.broadcast %80 : vector<1x1x64xf32> to vector<1x16x64xf32>
    %82 = arith.addf %79, %81 : vector<1x16x64xf32>
    %83 = vector.shape_cast %82 : vector<1x16x64xf32> to vector<16x64xf32>
    %cst_72 = arith.constant 0.000000e+00 : f32
    %84 = vector.broadcast %cst_72 : f32 to vector<16x64xf32>
    %85 = arith.maximumf %83, %84 : vector<16x64xf32>
    %86 = arith.truncf %85 : vector<16x64xf32> to vector<16x64xbf16>
    %cst_73 = arith.constant dense<0.000000e+00> : vector<16x640xf32>
    %87 = tpu.matmul %86, %14, %cst_73 {dimension_numbers = #tpu.dot_dimension_numbers<[1], [0], [0], [1], [0, 0, 1, 1], [], []>} : vector<16x64xbf16>, vector<64x640xbf16>, vector<16x640xf32> -> vector<16x640xf32>
    %88 = vector.extract_strided_slice %87 {offsets = [0, 0], sizes = [16, 128], strides = [1, 1]} : vector<16x640xf32> to vector<16x128xf32>
    %89 = vector.broadcast %15 : vector<1x128xf32> to vector<16x128xf32>
    %90 = arith.addf %88, %89 : vector<16x128xf32>
    %cst_74 = arith.constant 0.000000e+00 : f32
    %91 = vector.broadcast %cst_74 : f32 to vector<16x128xf32>
    %92 = arith.maximumf %90, %91 : vector<16x128xf32>
    %93 = arith.truncf %92 : vector<16x128xf32> to vector<16x128xbf16>
    %94 = vector.extract_strided_slice %87 {offsets = [0, 128], sizes = [16, 512], strides = [1, 1]} : vector<16x640xf32> to vector<16x512xf32>
    %cst_75 = arith.constant dense<0.000000e+00> : vector<16x128xf32>
    %95 = tpu.matmul %93, %16, %cst_75 {dimension_numbers = #tpu.dot_dimension_numbers<[1], [0], [0], [1], [0, 0, 1, 1], [], []>} : vector<16x128xbf16>, vector<128x128xbf16>, vector<16x128xf32> -> vector<16x128xf32>
    %96 = vector.broadcast %17 : vector<1x128xf32> to vector<16x128xf32>
    %97 = arith.addf %95, %96 : vector<16x128xf32>
    %98 = vector.shape_cast %97 : vector<16x128xf32> to vector<1x16x128xf32>
    %cst_76 = arith.constant dense<0xFF800000> : vector<1x128xf32>
    %99 = vector.multi_reduction <maximumf>, %98, %cst_76 [1] : vector<1x16x128xf32> to vector<1x128xf32>
    %100 = arith.truncf %99 : vector<1x128xf32> to vector<1x128xbf16>
    %cst_77 = arith.constant dense<0.000000e+00> : vector<1x1024xf32>
    %101 = tpu.matmul %100, %23, %cst_77 {dimension_numbers = #tpu.dot_dimension_numbers<[1], [0], [0], [1], [0, 0, 1, 1], [], []>} : vector<1x128xbf16>, vector<128x1024xbf16>, vector<1x1024xf32> -> vector<1x1024xf32>
    %102 = vector.extract_strided_slice %101 {offsets = [0, 0], sizes = [1, 512], strides = [1, 1]} : vector<1x1024xf32> to vector<1x512xf32>
    %103 = arith.addf %102, %24 : vector<1x512xf32>
    %cst_78 = arith.constant 0.000000e+00 : f32
    %104 = vector.broadcast %cst_78 : f32 to vector<1x512xf32>
    %105 = arith.maximumf %103, %104 : vector<1x512xf32>
    %106 = arith.truncf %105 : vector<1x512xf32> to vector<1x512xbf16>
    %107 = vector.extract_strided_slice %101 {offsets = [0, 512], sizes = [1, 512], strides = [1, 1]} : vector<1x1024xf32> to vector<1x512xf32>
    %108 = arith.addf %107, %18 : vector<1x512xf32>
    %109 = vector.shape_cast %94 : vector<16x512xf32> to vector<1x16x512xf32>
    %110 = vector.shape_cast %108 : vector<1x512xf32> to vector<1x1x512xf32>
    %111 = vector.broadcast %110 : vector<1x1x512xf32> to vector<1x16x512xf32>
    %112 = arith.addf %109, %111 : vector<1x16x512xf32>
    %113 = vector.shape_cast %112 : vector<1x16x512xf32> to vector<16x512xf32>
    %cst_79 = arith.constant 0.000000e+00 : f32
    %114 = vector.broadcast %cst_79 : f32 to vector<16x512xf32>
    %115 = arith.maximumf %113, %114 : vector<16x512xf32>
    %116 = arith.truncf %115 : vector<16x512xf32> to vector<16x512xbf16>
    %cst_80 = arith.constant dense<0.000000e+00> : vector<16x256xf32>
    %117 = tpu.matmul %116, %19, %cst_80 {dimension_numbers = #tpu.dot_dimension_numbers<[1], [0], [0], [1], [0, 0, 1, 1], [], []>} : vector<16x512xbf16>, vector<512x256xbf16>, vector<16x256xf32> -> vector<16x256xf32>
    %118 = vector.broadcast %20 : vector<1x256xf32> to vector<16x256xf32>
    %119 = arith.addf %117, %118 : vector<16x256xf32>
    %cst_81 = arith.constant 0.000000e+00 : f32
    %120 = vector.broadcast %cst_81 : f32 to vector<16x256xf32>
    %121 = arith.maximumf %119, %120 : vector<16x256xf32>
    %122 = arith.truncf %121 : vector<16x256xf32> to vector<16x256xbf16>
    %cst_82 = arith.constant dense<0.000000e+00> : vector<16x8xf32>
    %123 = tpu.matmul %122, %21, %cst_82 {dimension_numbers = #tpu.dot_dimension_numbers<[1], [0], [0], [1], [0, 0, 1, 1], [], []>} : vector<16x256xbf16>, vector<256x8xbf16>, vector<16x8xf32> -> vector<16x8xf32>
    %124 = vector.broadcast %22 : vector<1x8xf32> to vector<16x8xf32>
    %125 = arith.addf %123, %124 : vector<16x8xf32>
    %126 = vector.shape_cast %125 : vector<16x8xf32> to vector<1x16x8xf32>
    %127 = vector.shape_cast %126 : vector<1x16x8xf32> to vector<16x8xf32>
    %128 = tpu.transpose %127, [1, 0] : vector<16x8xf32> -> vector<8x16xf32>
    %c0_83 = arith.constant 0 : index
    %c0_84 = arith.constant 0 : index
    %c0_85 = arith.constant 0 : index
    %129 = vector.load %arg31[%c0_83, %c0_84, %c0_85] : memref<1x8x16xf32, #tpu.memory_space<vmem>>, vector<1x8x16xf32>
    %130 = vector.shape_cast %129 : vector<1x8x16xf32> to vector<8x16xf32>
    %131 = vector.shape_cast %128 : vector<8x16xf32> to vector<1x8x16xf32>
    tpu.vector_store %arg31[%c0_83, %c0_84, %c0_85], %131 {strides = array<i32>} : memref<1x8x16xf32, #tpu.memory_space<vmem>>, vector<1x8x16xf32>,
    %cst_86 = arith.constant dense<0.000000e+00> : vector<1x256xf32>
    %132 = tpu.matmul %106, %25, %cst_86 {dimension_numbers = #tpu.dot_dimension_numbers<[1], [0], [0], [1], [0, 0, 1, 1], [], []>} : vector<1x512xbf16>, vector<512x256xbf16>, vector<1x256xf32> -> vector<1x256xf32>
    %133 = arith.addf %132, %26 : vector<1x256xf32>
    %cst_87 = arith.constant 0.000000e+00 : f32
    %134 = vector.broadcast %cst_87 : f32 to vector<1x256xf32>
    %135 = arith.maximumf %133, %134 : vector<1x256xf32>
    %136 = arith.truncf %135 : vector<1x256xf32> to vector<1x256xbf16>
    %cst_88 = arith.constant dense<0.000000e+00> : vector<1x5xf32>
    %137 = tpu.matmul %136, %27, %cst_88 {dimension_numbers = #tpu.dot_dimension_numbers<[1], [0], [0], [1], [0, 0, 1, 1], [], []>} : vector<1x256xbf16>, vector<256x5xbf16>, vector<1x5xf32> -> vector<1x5xf32>
    %138 = arith.addf %137, %28 : vector<1x5xf32>
    %c0_89 = arith.constant 0 : index
    %c0_90 = arith.constant 0 : index
    %c0_91 = arith.constant 0 : index
    %139 = vector.load %arg32[%c0_89, %c0_90, %c0_91] : memref<1x1x5xf32, #tpu.memory_space<vmem>>, vector<1x1x5xf32>
    %140 = vector.shape_cast %139 : vector<1x1x5xf32> to vector<1x5xf32>
    %141 = vector.shape_cast %138 : vector<1x5xf32> to vector<1x1x5xf32>
    tpu.vector_store %arg32[%c0_89, %c0_90, %c0_91], %141 {strides = array<i32>} : memref<1x1x5xf32, #tpu.memory_space<vmem>>, vector<1x1x5xf32>,
    return
  }
  func.func @transform_0(%arg0: i32) -> (i32, i32, i32) {
    %c0_i32 = arith.constant 0 : i32
    %c0_i32_0 = arith.constant 0 : i32
    %c0_i32_1 = arith.constant 0 : i32
    return %arg0, %c0_i32, %c0_i32_0 : i32, i32, i32
  }
  func.func @transform_1(%arg0: i32) -> (i32, i32) {
    %c0_i32 = arith.constant 0 : i32
    %c0_i32_0 = arith.constant 0 : i32
    %c0_i32_1 = arith.constant 0 : i32
    return %c0_i32, %c0_i32_0 : i32, i32
  }
  func.func @transform_2(%arg0: i32) -> (i32, i32) {
    %c0_i32 = arith.constant 0 : i32
    %c0_i32_0 = arith.constant 0 : i32
    %c0_i32_1 = arith.constant 0 : i32
    return %c0_i32, %c0_i32_0 : i32, i32
  }
  func.func @transform_3(%arg0: i32) -> (i32, i32) {
    %c0_i32 = arith.constant 0 : i32
    %c0_i32_0 = arith.constant 0 : i32
    %c0_i32_1 = arith.constant 0 : i32
    return %c0_i32, %c0_i32_0 : i32, i32
  }
  func.func @transform_4(%arg0: i32) -> (i32, i32) {
    %c0_i32 = arith.constant 0 : i32
    %c0_i32_0 = arith.constant 0 : i32
    %c0_i32_1 = arith.constant 0 : i32
    return %c0_i32, %c0_i32_0 : i32, i32
  }
  func.func @transform_5(%arg0: i32) -> (i32, i32) {
    %c0_i32 = arith.constant 0 : i32
    %c0_i32_0 = arith.constant 0 : i32
    %c0_i32_1 = arith.constant 0 : i32
    return %c0_i32, %c0_i32_0 : i32, i32
  }
  func.func @transform_6(%arg0: i32) -> (i32, i32) {
    %c0_i32 = arith.constant 0 : i32
    %c0_i32_0 = arith.constant 0 : i32
    %c0_i32_1 = arith.constant 0 : i32
    return %c0_i32, %c0_i32_0 : i32, i32
  }
  func.func @transform_7(%arg0: i32) -> (i32, i32) {
    %c0_i32 = arith.constant 0 : i32
    %c0_i32_0 = arith.constant 0 : i32
    %c0_i32_1 = arith.constant 0 : i32
    return %c0_i32, %c0_i32_0 : i32, i32
  }
  func.func @transform_8(%arg0: i32) -> (i32, i32) {
    %c0_i32 = arith.constant 0 : i32
    %c0_i32_0 = arith.constant 0 : i32
    %c0_i32_1 = arith.constant 0 : i32
    return %c0_i32, %c0_i32_0 : i32, i32
  }
  func.func @transform_9(%arg0: i32) -> (i32, i32) {
    %c0_i32 = arith.constant 0 : i32
    %c0_i32_0 = arith.constant 0 : i32
    %c0_i32_1 = arith.constant 0 : i32
    return %c0_i32, %c0_i32_0 : i32, i32
  }
  func.func @transform_10(%arg0: i32) -> (i32, i32) {
    %c0_i32 = arith.constant 0 : i32
    %c0_i32_0 = arith.constant 0 : i32
    %c0_i32_1 = arith.constant 0 : i32
    return %c0_i32, %c0_i32_0 : i32, i32
  }
  func.func @transform_11(%arg0: i32) -> (i32, i32) {
    %c0_i32 = arith.constant 0 : i32
    %c0_i32_0 = arith.constant 0 : i32
    %c0_i32_1 = arith.constant 0 : i32
    return %c0_i32, %c0_i32_0 : i32, i32
  }
  func.func @transform_12(%arg0: i32) -> (i32, i32) {
    %c0_i32 = arith.constant 0 : i32
    %c0_i32_0 = arith.constant 0 : i32
    %c0_i32_1 = arith.constant 0 : i32
    return %c0_i32, %c0_i32_0 : i32, i32
  }
  func.func @transform_13(%arg0: i32) -> (i32, i32) {
    %c0_i32 = arith.constant 0 : i32
    %c0_i32_0 = arith.constant 0 : i32
    %c0_i32_1 = arith.constant 0 : i32
    return %c0_i32, %c0_i32_0 : i32, i32
  }
  func.func @transform_14(%arg0: i32) -> (i32, i32) {
    %c0_i32 = arith.constant 0 : i32
    %c0_i32_0 = arith.constant 0 : i32
    %c0_i32_1 = arith.constant 0 : i32
    return %c0_i32, %c0_i32_0 : i32, i32
  }
  func.func @transform_15(%arg0: i32) -> (i32, i32) {
    %c0_i32 = arith.constant 0 : i32
    %c0_i32_0 = arith.constant 0 : i32
    %c0_i32_1 = arith.constant 0 : i32
    return %c0_i32, %c0_i32_0 : i32, i32
  }
  func.func @transform_16(%arg0: i32) -> (i32, i32) {
    %c0_i32 = arith.constant 0 : i32
    %c0_i32_0 = arith.constant 0 : i32
    %c0_i32_1 = arith.constant 0 : i32
    return %c0_i32, %c0_i32_0 : i32, i32
  }
  func.func @transform_17(%arg0: i32) -> (i32, i32) {
    %c0_i32 = arith.constant 0 : i32
    %c0_i32_0 = arith.constant 0 : i32
    %c0_i32_1 = arith.constant 0 : i32
    return %c0_i32, %c0_i32_0 : i32, i32
  }
  func.func @transform_18(%arg0: i32) -> (i32, i32) {
    %c0_i32 = arith.constant 0 : i32
    %c0_i32_0 = arith.constant 0 : i32
    %c0_i32_1 = arith.constant 0 : i32
    return %c0_i32, %c0_i32_0 : i32, i32
  }
  func.func @transform_19(%arg0: i32) -> (i32, i32) {
    %c0_i32 = arith.constant 0 : i32
    %c0_i32_0 = arith.constant 0 : i32
    %c0_i32_1 = arith.constant 0 : i32
    return %c0_i32, %c0_i32_0 : i32, i32
  }
  func.func @transform_20(%arg0: i32) -> (i32, i32) {
    %c0_i32 = arith.constant 0 : i32
    %c0_i32_0 = arith.constant 0 : i32
    %c0_i32_1 = arith.constant 0 : i32
    return %c0_i32, %c0_i32_0 : i32, i32
  }
  func.func @transform_21(%arg0: i32) -> (i32, i32) {
    %c0_i32 = arith.constant 0 : i32
    %c0_i32_0 = arith.constant 0 : i32
    %c0_i32_1 = arith.constant 0 : i32
    return %c0_i32, %c0_i32_0 : i32, i32
  }
  func.func @transform_22(%arg0: i32) -> (i32, i32) {
    %c0_i32 = arith.constant 0 : i32
    %c0_i32_0 = arith.constant 0 : i32
    %c0_i32_1 = arith.constant 0 : i32
    return %c0_i32, %c0_i32_0 : i32, i32
  }
  func.func @transform_23(%arg0: i32) -> (i32, i32) {
    %c0_i32 = arith.constant 0 : i32
    %c0_i32_0 = arith.constant 0 : i32
    %c0_i32_1 = arith.constant 0 : i32
    return %c0_i32, %c0_i32_0 : i32, i32
  }
  func.func @transform_24(%arg0: i32) -> (i32, i32) {
    %c0_i32 = arith.constant 0 : i32
    %c0_i32_0 = arith.constant 0 : i32
    %c0_i32_1 = arith.constant 0 : i32
    return %c0_i32, %c0_i32_0 : i32, i32
  }
  func.func @transform_25(%arg0: i32) -> (i32, i32) {
    %c0_i32 = arith.constant 0 : i32
    %c0_i32_0 = arith.constant 0 : i32
    %c0_i32_1 = arith.constant 0 : i32
    return %c0_i32, %c0_i32_0 : i32, i32
  }
  func.func @transform_26(%arg0: i32) -> (i32, i32) {
    %c0_i32 = arith.constant 0 : i32
    %c0_i32_0 = arith.constant 0 : i32
    %c0_i32_1 = arith.constant 0 : i32
    return %c0_i32, %c0_i32_0 : i32, i32
  }
  func.func @transform_27(%arg0: i32) -> (i32, i32) {
    %c0_i32 = arith.constant 0 : i32
    %c0_i32_0 = arith.constant 0 : i32
    %c0_i32_1 = arith.constant 0 : i32
    return %c0_i32, %c0_i32_0 : i32, i32
  }
  func.func @transform_28(%arg0: i32) -> (i32, i32) {
    %c0_i32 = arith.constant 0 : i32
    %c0_i32_0 = arith.constant 0 : i32
    %c0_i32_1 = arith.constant 0 : i32
    return %c0_i32, %c0_i32_0 : i32, i32
  }
  func.func @transform_29(%arg0: i32) -> (i32, i32) {
    %c0_i32 = arith.constant 0 : i32
    %c0_i32_0 = arith.constant 0 : i32
    %c0_i32_1 = arith.constant 0 : i32
    return %c0_i32, %c0_i32_0 : i32, i32
  }
  func.func @transform_30(%arg0: i32) -> (i32, i32, i32) {
    %c0_i32 = arith.constant 0 : i32
    %c0_i32_0 = arith.constant 0 : i32
    %c0_i32_1 = arith.constant 0 : i32
    return %arg0, %c0_i32, %c0_i32_0 : i32, i32, i32
  }
  func.func @transform_31(%arg0: i32) -> (i32, i32, i32) {
    %c0_i32 = arith.constant 0 : i32
    %c0_i32_0 = arith.constant 0 : i32
    %c0_i32_1 = arith.constant 0 : i32
    return %arg0, %c0_i32, %c0_i32_0 : i32, i32, i32
  }
}

module attributes {stable_mosaic.version = 11 : i64} {
  func.func @pointnet_kernel(%arg0: i32, %arg1: memref<1x8x16xf32, #tpu.memory_space<vmem>>, %arg2: memref<8x64xbf16, #tpu.memory_space<vmem>>, %arg3: memref<1x64xf32, #tpu.memory_space<vmem>>, %arg4: memref<64x192xbf16, #tpu.memory_space<vmem>>, %arg5: memref<1x128xf32, #tpu.memory_space<vmem>>, %arg6: memref<128x128xbf16, #tpu.memory_space<vmem>>, %arg7: memref<1x128xf32, #tpu.memory_space<vmem>>, %arg8: memref<128x64xbf16, #tpu.memory_space<vmem>>, %arg9: memref<1x64xf32, #tpu.memory_space<vmem>>, %arg10: memref<64x192xbf16, #tpu.memory_space<vmem>>, %arg11: memref<1x128xf32, #tpu.memory_space<vmem>>, %arg12: memref<128x128xbf16, #tpu.memory_space<vmem>>, %arg13: memref<1x128xf32, #tpu.memory_space<vmem>>, %arg14: memref<128x64xbf16, #tpu.memory_space<vmem>>, %arg15: memref<1x64xf32, #tpu.memory_space<vmem>>, %arg16: memref<64x640xbf16, #tpu.memory_space<vmem>>, %arg17: memref<1x128xf32, #tpu.memory_space<vmem>>, %arg18: memref<128x128xbf16, #tpu.memory_space<vmem>>, %arg19: memref<1x128xf32, #tpu.memory_space<vmem>>, %arg20: memref<1x512xf32, #tpu.memory_space<vmem>>, %arg21: memref<512x256xbf16, #tpu.memory_space<vmem>>, %arg22: memref<1x256xf32, #tpu.memory_space<vmem>>, %arg23: memref<256x8xbf16, #tpu.memory_space<vmem>>, %arg24: memref<1x8xf32, #tpu.memory_space<vmem>>, %arg25: memref<128x1024xbf16, #tpu.memory_space<vmem>>, %arg26: memref<1x512xf32, #tpu.memory_space<vmem>>, %arg27: memref<512x256xbf16, #tpu.memory_space<vmem>>, %arg28: memref<1x256xf32, #tpu.memory_space<vmem>>, %arg29: memref<256x5xbf16, #tpu.memory_space<vmem>>, %arg30: memref<1x5xf32, #tpu.memory_space<vmem>>, %arg31: memref<1x8x16xf32, #tpu.memory_space<vmem>>, %arg32: memref<1x1x5xf32, #tpu.memory_space<vmem>>) attributes {dimension_semantics = [#tpu.dimension_semantics<parallel>], iteration_bounds = array<i64: 2>, scalar_prefetch = 0 : i64, scratch_operands = 0 : i64, tpu.core_type = #tpu.core_type<tc>, window_params = [{transform_indices = @transform_0, window_bounds = array<i64: 1, 8, 16>}, {pipeline_mode = #tpu.pipeline_mode<synchronous>, transform_indices = @transform_1, window_bounds = array<i64: 8, 64>}, {pipeline_mode = #tpu.pipeline_mode<synchronous>, transform_indices = @transform_2, window_bounds = array<i64: 1, 64>}, {pipeline_mode = #tpu.pipeline_mode<synchronous>, transform_indices = @transform_3, window_bounds = array<i64: 64, 192>}, {pipeline_mode = #tpu.pipeline_mode<synchronous>, transform_indices = @transform_4, window_bounds = array<i64: 1, 128>}, {pipeline_mode = #tpu.pipeline_mode<synchronous>, transform_indices = @transform_5, window_bounds = array<i64: 128, 128>}, {pipeline_mode = #tpu.pipeline_mode<synchronous>, transform_indices = @transform_6, window_bounds = array<i64: 1, 128>}, {pipeline_mode = #tpu.pipeline_mode<synchronous>, transform_indices = @transform_7, window_bounds = array<i64: 128, 64>}, {pipeline_mode = #tpu.pipeline_mode<synchronous>, transform_indices = @transform_8, window_bounds = array<i64: 1, 64>}, {pipeline_mode = #tpu.pipeline_mode<synchronous>, transform_indices = @transform_9, window_bounds = array<i64: 64, 192>}, {pipeline_mode = #tpu.pipeline_mode<synchronous>, transform_indices = @transform_10, window_bounds = array<i64: 1, 128>}, {pipeline_mode = #tpu.pipeline_mode<synchronous>, transform_indices = @transform_11, window_bounds = array<i64: 128, 128>}, {pipeline_mode = #tpu.pipeline_mode<synchronous>, transform_indices = @transform_12, window_bounds = array<i64: 1, 128>}, {pipeline_mode = #tpu.pipeline_mode<synchronous>, transform_indices = @transform_13, window_bounds = array<i64: 128, 64>}, {pipeline_mode = #tpu.pipeline_mode<synchronous>, transform_indices = @transform_14, window_bounds = array<i64: 1, 64>}, {pipeline_mode = #tpu.pipeline_mode<synchronous>, transform_indices = @transform_15, window_bounds = array<i64: 64, 640>}, {pipeline_mode = #tpu.pipeline_mode<synchronous>, transform_indices = @transform_16, window_bounds = array<i64: 1, 128>}, {pipeline_mode = #tpu.pipeline_mode<synchronous>, transform_indices = @transform_17, window_bounds = array<i64: 128, 128>}, {pipeline_mode = #tpu.pipeline_mode<synchronous>, transform_indices = @transform_18, window_bounds = array<i64: 1, 128>}, {pipeline_mode = #tpu.pipeline_mode<synchronous>, transform_indices = @transform_19, window_bounds = array<i64: 1, 512>}, {pipeline_mode = #tpu.pipeline_mode<synchronous>, transform_indices = @transform_20, window_bounds = array<i64: 512, 256>}, {pipeline_mode = #tpu.pipeline_mode<synchronous>, transform_indices = @transform_21, window_bounds = array<i64: 1, 256>}, {pipeline_mode = #tpu.pipeline_mode<synchronous>, transform_indices = @transform_22, window_bounds = array<i64: 256, 8>}, {pipeline_mode = #tpu.pipeline_mode<synchronous>, transform_indices = @transform_23, window_bounds = array<i64: 1, 8>}, {pipeline_mode = #tpu.pipeline_mode<synchronous>, transform_indices = @transform_24, window_bounds = array<i64: 128, 1024>}, {pipeline_mode = #tpu.pipeline_mode<synchronous>, transform_indices = @transform_25, window_bounds = array<i64: 1, 512>}, {pipeline_mode = #tpu.pipeline_mode<synchronous>, transform_indices = @transform_26, window_bounds = array<i64: 512, 256>}, {pipeline_mode = #tpu.pipeline_mode<synchronous>, transform_indices = @transform_27, window_bounds = array<i64: 1, 256>}, {pipeline_mode = #tpu.pipeline_mode<synchronous>, transform_indices = @transform_28, window_bounds = array<i64: 256, 5>}, {pipeline_mode = #tpu.pipeline_mode<synchronous>, transform_indices = @transform_29, window_bounds = array<i64: 1, 5>}, {transform_indices = @transform_30, window_bounds = array<i64: 1, 8, 16>}, {transform_indices = @transform_31, window_bounds = array<i64: 1, 1, 5>}]} {
    %c0 = arith.constant 0 : index
    %c0_0 = arith.constant 0 : index
    %0 = vector.load %arg2[%c0, %c0_0] : memref<8x64xbf16, #tpu.memory_space<vmem>>, vector<8x64xbf16>
    %c0_1 = arith.constant 0 : index
    %c0_2 = arith.constant 0 : index
    %1 = vector.load %arg3[%c0_1, %c0_2] : memref<1x64xf32, #tpu.memory_space<vmem>>, vector<1x64xf32>
    %c0_3 = arith.constant 0 : index
    %c0_4 = arith.constant 0 : index
    %2 = vector.load %arg4[%c0_3, %c0_4] : memref<64x192xbf16, #tpu.memory_space<vmem>>, vector<64x192xbf16>
    %c0_5 = arith.constant 0 : index
    %c0_6 = arith.constant 0 : index
    %3 = vector.load %arg5[%c0_5, %c0_6] : memref<1x128xf32, #tpu.memory_space<vmem>>, vector<1x128xf32>
    %c0_7 = arith.constant 0 : index
    %c0_8 = arith.constant 0 : index
    %4 = vector.load %arg6[%c0_7, %c0_8] : memref<128x128xbf16, #tpu.memory_space<vmem>>, vector<128x128xbf16>
    %c0_9 = arith.constant 0 : index
    %c0_10 = arith.constant 0 : index
    %5 = vector.load %arg7[%c0_9, %c0_10] : memref<1x128xf32, #tpu.memory_space<vmem>>, vector<1x128xf32>
    %c0_11 = arith.constant 0 : index
    %c0_12 = arith.constant 0 : index
    %6 = vector.load %arg8[%c0_11, %c0_12] : memref<128x64xbf16, #tpu.memory_space<vmem>>, vector<128x64xbf16>
    %c0_13 = arith.constant 0 : index
    %c0_14 = arith.constant 0 : index
    %7 = vector.load %arg9[%c0_13, %c0_14] : memref<1x64xf32, #tpu.memory_space<vmem>>, vector<1x64xf32>
    %c0_15 = arith.constant 0 : index
    %c0_16 = arith.constant 0 : index
    %8 = vector.load %arg10[%c0_15, %c0_16] : memref<64x192xbf16, #tpu.memory_space<vmem>>, vector<64x192xbf16>
    %c0_17 = arith.constant 0 : index
    %c0_18 = arith.constant 0 : index
    %9 = vector.load %arg11[%c0_17, %c0_18] : memref<1x128xf32, #tpu.memory_space<vmem>>, vector<1x128xf32>
    %c0_19 = arith.constant 0 : index
    %c0_20 = arith.constant 0 : index
    %10 = vector.load %arg12[%c0_19, %c0_20] : memref<128x128xbf16, #tpu.memory_space<vmem>>, vector<128x128xbf16>
    %c0_21 = arith.constant 0 : index
    %c0_22 = arith.constant 0 : index
    %11 = vector.load %arg13[%c0_21, %c0_22] : memref<1x128xf32, #tpu.memory_space<vmem>>, vector<1x128xf32>
    %c0_23 = arith.constant 0 : index
    %c0_24 = arith.constant 0 : index
    %12 = vector.load %arg14[%c0_23, %c0_24] : memref<128x64xbf16, #tpu.memory_space<vmem>>, vector<128x64xbf16>
    %c0_25 = arith.constant 0 : index
    %c0_26 = arith.constant 0 : index
    %13 = vector.load %arg15[%c0_25, %c0_26] : memref<1x64xf32, #tpu.memory_space<vmem>>, vector<1x64xf32>
    %c0_27 = arith.constant 0 : index
    %c0_28 = arith.constant 0 : index
    %14 = vector.load %arg16[%c0_27, %c0_28] : memref<64x640xbf16, #tpu.memory_space<vmem>>, vector<64x640xbf16>
    %c0_29 = arith.constant 0 : index
    %c0_30 = arith.constant 0 : index
    %15 = vector.load %arg17[%c0_29, %c0_30] : memref<1x128xf32, #tpu.memory_space<vmem>>, vector<1x128xf32>
    %c0_31 = arith.constant 0 : index
    %c0_32 = arith.constant 0 : index
    %16 = vector.load %arg18[%c0_31, %c0_32] : memref<128x128xbf16, #tpu.memory_space<vmem>>, vector<128x128xbf16>
    %c0_33 = arith.constant 0 : index
    %c0_34 = arith.constant 0 : index
    %17 = vector.load %arg19[%c0_33, %c0_34] : memref<1x128xf32, #tpu.memory_space<vmem>>, vector<1x128xf32>
    %c0_35 = arith.constant 0 : index
    %c0_36 = arith.constant 0 : index
    %18 = vector.load %arg20[%c0_35, %c0_36] : memref<1x512xf32, #tpu.memory_space<vmem>>, vector<1x512xf32>
    %c0_37 = arith.constant 0 : index
    %c0_38 = arith.constant 0 : index
    %19 = vector.load %arg21[%c0_37, %c0_38] : memref<512x256xbf16, #tpu.memory_space<vmem>>, vector<512x256xbf16>
    %c0_39 = arith.constant 0 : index
    %c0_40 = arith.constant 0 : index
    %20 = vector.load %arg22[%c0_39, %c0_40] : memref<1x256xf32, #tpu.memory_space<vmem>>, vector<1x256xf32>
    %c0_41 = arith.constant 0 : index
    %c0_42 = arith.constant 0 : index
    %21 = vector.load %arg23[%c0_41, %c0_42] : memref<256x8xbf16, #tpu.memory_space<vmem>>, vector<256x8xbf16>
    %c0_43 = arith.constant 0 : index
    %c0_44 = arith.constant 0 : index
    %22 = vector.load %arg24[%c0_43, %c0_44] : memref<1x8xf32, #tpu.memory_space<vmem>>, vector<1x8xf32>
    %c0_45 = arith.constant 0 : index
    %c0_46 = arith.constant 0 : index
    %23 = vector.load %arg25[%c0_45, %c0_46] : memref<128x1024xbf16, #tpu.memory_space<vmem>>, vector<128x1024xbf16>
    %c0_47 = arith.constant 0 : index
    %c0_48 = arith.constant 0 : index
    %24 = vector.load %arg26[%c0_47, %c0_48] : memref<1x512xf32, #tpu.memory_space<vmem>>, vector<1x512xf32>
    %c0_49 = arith.constant 0 : index
    %c0_50 = arith.constant 0 : index
    %25 = vector.load %arg27[%c0_49, %c0_50] : memref<512x256xbf16, #tpu.memory_space<vmem>>, vector<512x256xbf16>
    %c0_51 = arith.constant 0 : index
    %c0_52 = arith.constant 0 : index
    %26 = vector.load %arg28[%c0_51, %c0_52] : memref<1x256xf32, #tpu.memory_space<vmem>>, vector<1x256xf32>
    %c0_53 = arith.constant 0 : index
    %c0_54 = arith.constant 0 : index
    %27 = vector.load %arg29[%c0_53, %c0_54] : memref<256x5xbf16, #tpu.memory_space<vmem>>, vector<256x5xbf16>
    %c0_55 = arith.constant 0 : index
    %c0_56 = arith.constant 0 : index
    %28 = vector.load %arg30[%c0_55, %c0_56] : memref<1x5xf32, #tpu.memory_space<vmem>>, vector<1x5xf32>
    %c0_57 = arith.constant 0 : index
    %c0_58 = arith.constant 0 : index
    %c0_59 = arith.constant 0 : index
    %29 = vector.load %arg1[%c0_57, %c0_58, %c0_59] : memref<1x8x16xf32, #tpu.memory_space<vmem>>, vector<1x8x16xf32>
    %30 = vector.shape_cast %29 : vector<1x8x16xf32> to vector<8x16xf32>
    %31 = tpu.transpose %30, [1, 0] : vector<8x16xf32> -> vector<16x8xf32>
    %32 = arith.truncf %31 : vector<16x8xf32> to vector<16x8xbf16>
    %cst = arith.constant dense<0.000000e+00> : vector<16x64xf32>
    %33 = tpu.matmul %32, %0, %cst {dimension_numbers = #tpu.dot_dimension_numbers<[1], [0], [0], [1], [0, 0, 1, 1], [], []>} : vector<16x8xbf16>, vector<8x64xbf16>, vector<16x64xf32> -> vector<16x64xf32>
    %34 = vector.broadcast %1 : vector<1x64xf32> to vector<16x64xf32>
    %35 = arith.addf %33, %34 : vector<16x64xf32>
    %cst_60 = arith.constant 0.000000e+00 : f32
    %36 = vector.broadcast %cst_60 : f32 to vector<16x64xf32>
    %37 = arith.maximumf %35, %36 : vector<16x64xf32>
    %38 = arith.truncf %37 : vector<16x64xf32> to vector<16x64xbf16>
    %cst_61 = arith.constant dense<0.000000e+00> : vector<16x192xf32>
    %39 = tpu.matmul %38, %2, %cst_61 {dimension_numbers = #tpu.dot_dimension_numbers<[1], [0], [0], [1], [0, 0, 1, 1], [], []>} : vector<16x64xbf16>, vector<64x192xbf16>, vector<16x192xf32> -> vector<16x192xf32>
    %40 = vector.extract_strided_slice %39 {offsets = [0, 0], sizes = [16, 128], strides = [1, 1]} : vector<16x192xf32> to vector<16x128xf32>
    %41 = vector.broadcast %3 : vector<1x128xf32> to vector<16x128xf32>
    %42 = arith.addf %40, %41 : vector<16x128xf32>
    %cst_62 = arith.constant 0.000000e+00 : f32
    %43 = vector.broadcast %cst_62 : f32 to vector<16x128xf32>
    %44 = arith.maximumf %42, %43 : vector<16x128xf32>
    %45 = arith.truncf %44 : vector<16x128xf32> to vector<16x128xbf16>
    %46 = vector.extract_strided_slice %39 {offsets = [0, 128], sizes = [16, 64], strides = [1, 1]} : vector<16x192xf32> to vector<16x64xf32>
    %cst_63 = arith.constant dense<0.000000e+00> : vector<16x128xf32>
    %47 = tpu.matmul %45, %4, %cst_63 {dimension_numbers = #tpu.dot_dimension_numbers<[1], [0], [0], [1], [0, 0, 1, 1], [], []>} : vector<16x128xbf16>, vector<128x128xbf16>, vector<16x128xf32> -> vector<16x128xf32>
    %48 = vector.broadcast %5 : vector<1x128xf32> to vector<16x128xf32>
    %49 = arith.addf %47, %48 : vector<16x128xf32>
    %50 = vector.shape_cast %49 : vector<16x128xf32> to vector<1x16x128xf32>
    %cst_64 = arith.constant dense<0xFF800000> : vector<1x128xf32>
    %51 = vector.multi_reduction <maximumf>, %50, %cst_64 [1] : vector<1x16x128xf32> to vector<1x128xf32>
    %52 = arith.truncf %51 : vector<1x128xf32> to vector<1x128xbf16>
    %cst_65 = arith.constant dense<0.000000e+00> : vector<1x64xf32>
    %53 = tpu.matmul %52, %6, %cst_65 {dimension_numbers = #tpu.dot_dimension_numbers<[1], [0], [0], [1], [0, 0, 1, 1], [], []>} : vector<1x128xbf16>, vector<128x64xbf16>, vector<1x64xf32> -> vector<1x64xf32>
    %54 = arith.addf %53, %7 : vector<1x64xf32>
    %55 = vector.shape_cast %46 : vector<16x64xf32> to vector<1x16x64xf32>
    %56 = vector.shape_cast %54 : vector<1x64xf32> to vector<1x1x64xf32>
    %57 = vector.broadcast %56 : vector<1x1x64xf32> to vector<1x16x64xf32>
    %58 = arith.addf %55, %57 : vector<1x16x64xf32>
    %59 = vector.shape_cast %58 : vector<1x16x64xf32> to vector<16x64xf32>
    %cst_66 = arith.constant 0.000000e+00 : f32
    %60 = vector.broadcast %cst_66 : f32 to vector<16x64xf32>
    %61 = arith.maximumf %59, %60 : vector<16x64xf32>
    %62 = arith.truncf %61 : vector<16x64xf32> to vector<16x64xbf16>
    %cst_67 = arith.constant dense<0.000000e+00> : vector<16x192xf32>
    %63 = tpu.matmul %62, %8, %cst_67 {dimension_numbers = #tpu.dot_dimension_numbers<[1], [0], [0], [1], [0, 0, 1, 1], [], []>} : vector<16x64xbf16>, vector<64x192xbf16>, vector<16x192xf32> -> vector<16x192xf32>
    %64 = vector.extract_strided_slice %63 {offsets = [0, 0], sizes = [16, 128], strides = [1, 1]} : vector<16x192xf32> to vector<16x128xf32>
    %65 = vector.broadcast %9 : vector<1x128xf32> to vector<16x128xf32>
    %66 = arith.addf %64, %65 : vector<16x128xf32>
    %cst_68 = arith.constant 0.000000e+00 : f32
    %67 = vector.broadcast %cst_68 : f32 to vector<16x128xf32>
    %68 = arith.maximumf %66, %67 : vector<16x128xf32>
    %69 = arith.truncf %68 : vector<16x128xf32> to vector<16x128xbf16>
    %70 = vector.extract_strided_slice %63 {offsets = [0, 128], sizes = [16, 64], strides = [1, 1]} : vector<16x192xf32> to vector<16x64xf32>
    %cst_69 = arith.constant dense<0.000000e+00> : vector<16x128xf32>
    %71 = tpu.matmul %69, %10, %cst_69 {dimension_numbers = #tpu.dot_dimension_numbers<[1], [0], [0], [1], [0, 0, 1, 1], [], []>} : vector<16x128xbf16>, vector<128x128xbf16>, vector<16x128xf32> -> vector<16x128xf32>
    %72 = vector.broadcast %11 : vector<1x128xf32> to vector<16x128xf32>
    %73 = arith.addf %71, %72 : vector<16x128xf32>
    %74 = vector.shape_cast %73 : vector<16x128xf32> to vector<1x16x128xf32>
    %cst_70 = arith.constant dense<0xFF800000> : vector<1x128xf32>
    %75 = vector.multi_reduction <maximumf>, %74, %cst_70 [1] : vector<1x16x128xf32> to vector<1x128xf32>
    %76 = arith.truncf %75 : vector<1x128xf32> to vector<1x128xbf16>
    %cst_71 = arith.constant dense<0.000000e+00> : vector<1x64xf32>
    %77 = tpu.matmul %76, %12, %cst_71 {dimension_numbers = #tpu.dot_dimension_numbers<[1], [0], [0], [1], [0, 0, 1, 1], [], []>} : vector<1x128xbf16>, vector<128x64xbf16>, vector<1x64xf32> -> vector<1x64xf32>
    %78 = arith.addf %77, %13 : vector<1x64xf32>
    %79 = vector.shape_cast %70 : vector<16x64xf32> to vector<1x16x64xf32>
    %80 = vector.shape_cast %78 : vector<1x64xf32> to vector<1x1x64xf32>
    %81 = vector.broadcast %80 : vector<1x1x64xf32> to vector<1x16x64xf32>
    %82 = arith.addf %79, %81 : vector<1x16x64xf32>
    %83 = vector.shape_cast %82 : vector<1x16x64xf32> to vector<16x64xf32>
    %cst_72 = arith.constant 0.000000e+00 : f32
    %84 = vector.broadcast %cst_72 : f32 to vector<16x64xf32>
    %85 = arith.maximumf %83, %84 : vector<16x64xf32>
    %86 = arith.truncf %85 : vector<16x64xf32> to vector<16x64xbf16>
    %cst_73 = arith.constant dense<0.000000e+00> : vector<16x640xf32>
    %87 = tpu.matmul %86, %14, %cst_73 {dimension_numbers = #tpu.dot_dimension_numbers<[1], [0], [0], [1], [0, 0, 1, 1], [], []>} : vector<16x64xbf16>, vector<64x640xbf16>, vector<16x640xf32> -> vector<16x640xf32>
    %88 = vector.extract_strided_slice %87 {offsets = [0, 0], sizes = [16, 128], strides = [1, 1]} : vector<16x640xf32> to vector<16x128xf32>
    %89 = vector.broadcast %15 : vector<1x128xf32> to vector<16x128xf32>
    %90 = arith.addf %88, %89 : vector<16x128xf32>
    %cst_74 = arith.constant 0.000000e+00 : f32
    %91 = vector.broadcast %cst_74 : f32 to vector<16x128xf32>
    %92 = arith.maximumf %90, %91 : vector<16x128xf32>
    %93 = arith.truncf %92 : vector<16x128xf32> to vector<16x128xbf16>
    %94 = vector.extract_strided_slice %87 {offsets = [0, 128], sizes = [16, 512], strides = [1, 1]} : vector<16x640xf32> to vector<16x512xf32>
    %cst_75 = arith.constant dense<0.000000e+00> : vector<16x128xf32>
    %95 = tpu.matmul %93, %16, %cst_75 {dimension_numbers = #tpu.dot_dimension_numbers<[1], [0], [0], [1], [0, 0, 1, 1], [], []>} : vector<16x128xbf16>, vector<128x128xbf16>, vector<16x128xf32> -> vector<16x128xf32>
    %96 = vector.broadcast %17 : vector<1x128xf32> to vector<16x128xf32>
    %97 = arith.addf %95, %96 : vector<16x128xf32>
    %98 = vector.shape_cast %97 : vector<16x128xf32> to vector<1x16x128xf32>
    %cst_76 = arith.constant dense<0xFF800000> : vector<1x128xf32>
    %99 = vector.multi_reduction <maximumf>, %98, %cst_76 [1] : vector<1x16x128xf32> to vector<1x128xf32>
    %100 = arith.truncf %99 : vector<1x128xf32> to vector<1x128xbf16>
    %cst_77 = arith.constant dense<0.000000e+00> : vector<1x1024xf32>
    %101 = tpu.matmul %100, %23, %cst_77 {dimension_numbers = #tpu.dot_dimension_numbers<[1], [0], [0], [1], [0, 0, 1, 1], [], []>} : vector<1x128xbf16>, vector<128x1024xbf16>, vector<1x1024xf32> -> vector<1x1024xf32>
    %102 = vector.extract_strided_slice %101 {offsets = [0, 0], sizes = [1, 512], strides = [1, 1]} : vector<1x1024xf32> to vector<1x512xf32>
    %103 = arith.addf %102, %24 : vector<1x512xf32>
    %cst_78 = arith.constant 0.000000e+00 : f32
    %104 = vector.broadcast %cst_78 : f32 to vector<1x512xf32>
    %105 = arith.maximumf %103, %104 : vector<1x512xf32>
    %106 = arith.truncf %105 : vector<1x512xf32> to vector<1x512xbf16>
    %107 = vector.extract_strided_slice %101 {offsets = [0, 512], sizes = [1, 512], strides = [1, 1]} : vector<1x1024xf32> to vector<1x512xf32>
    %108 = arith.addf %107, %18 : vector<1x512xf32>
    %109 = vector.shape_cast %94 : vector<16x512xf32> to vector<1x16x512xf32>
    %110 = vector.shape_cast %108 : vector<1x512xf32> to vector<1x1x512xf32>
    %111 = vector.broadcast %110 : vector<1x1x512xf32> to vector<1x16x512xf32>
    %112 = arith.addf %109, %111 : vector<1x16x512xf32>
    %113 = vector.shape_cast %112 : vector<1x16x512xf32> to vector<16x512xf32>
    %cst_79 = arith.constant 0.000000e+00 : f32
    %114 = vector.broadcast %cst_79 : f32 to vector<16x512xf32>
    %115 = arith.maximumf %113, %114 : vector<16x512xf32>
    %116 = arith.truncf %115 : vector<16x512xf32> to vector<16x512xbf16>
    %cst_80 = arith.constant dense<0.000000e+00> : vector<16x256xf32>
    %117 = tpu.matmul %116, %19, %cst_80 {dimension_numbers = #tpu.dot_dimension_numbers<[1], [0], [0], [1], [0, 0, 1, 1], [], []>} : vector<16x512xbf16>, vector<512x256xbf16>, vector<16x256xf32> -> vector<16x256xf32>
    %118 = vector.broadcast %20 : vector<1x256xf32> to vector<16x256xf32>
    %119 = arith.addf %117, %118 : vector<16x256xf32>
    %cst_81 = arith.constant 0.000000e+00 : f32
    %120 = vector.broadcast %cst_81 : f32 to vector<16x256xf32>
    %121 = arith.maximumf %119, %120 : vector<16x256xf32>
    %122 = arith.truncf %121 : vector<16x256xf32> to vector<16x256xbf16>
    %cst_82 = arith.constant dense<0.000000e+00> : vector<16x8xf32>
    %123 = tpu.matmul %122, %21, %cst_82 {dimension_numbers = #tpu.dot_dimension_numbers<[1], [0], [0], [1], [0, 0, 1, 1], [], []>} : vector<16x256xbf16>, vector<256x8xbf16>, vector<16x8xf32> -> vector<16x8xf32>
    %124 = vector.broadcast %22 : vector<1x8xf32> to vector<16x8xf32>
    %125 = arith.addf %123, %124 : vector<16x8xf32>
    %126 = vector.shape_cast %125 : vector<16x8xf32> to vector<1x16x8xf32>
    %127 = vector.shape_cast %126 : vector<1x16x8xf32> to vector<16x8xf32>
    %128 = tpu.transpose %127, [1, 0] : vector<16x8xf32> -> vector<8x16xf32>
    %c0_83 = arith.constant 0 : index
    %c0_84 = arith.constant 0 : index
    %c0_85 = arith.constant 0 : index
    %129 = vector.load %arg31[%c0_83, %c0_84, %c0_85] : memref<1x8x16xf32, #tpu.memory_space<vmem>>, vector<1x8x16xf32>
    %130 = vector.shape_cast %129 : vector<1x8x16xf32> to vector<8x16xf32>
    %131 = vector.shape_cast %128 : vector<8x16xf32> to vector<1x8x16xf32>
    tpu.vector_store %arg31[%c0_83, %c0_84, %c0_85], %131 {strides = array<i32>} : memref<1x8x16xf32, #tpu.memory_space<vmem>>, vector<1x8x16xf32>,
    %cst_86 = arith.constant dense<0.000000e+00> : vector<1x256xf32>
    %132 = tpu.matmul %106, %25, %cst_86 {dimension_numbers = #tpu.dot_dimension_numbers<[1], [0], [0], [1], [0, 0, 1, 1], [], []>} : vector<1x512xbf16>, vector<512x256xbf16>, vector<1x256xf32> -> vector<1x256xf32>
    %133 = arith.addf %132, %26 : vector<1x256xf32>
    %cst_87 = arith.constant 0.000000e+00 : f32
    %134 = vector.broadcast %cst_87 : f32 to vector<1x256xf32>
    %135 = arith.maximumf %133, %134 : vector<1x256xf32>
    %136 = arith.truncf %135 : vector<1x256xf32> to vector<1x256xbf16>
    %cst_88 = arith.constant dense<0.000000e+00> : vector<1x5xf32>
    %137 = tpu.matmul %136, %27, %cst_88 {dimension_numbers = #tpu.dot_dimension_numbers<[1], [0], [0], [1], [0, 0, 1, 1], [], []>} : vector<1x256xbf16>, vector<256x5xbf16>, vector<1x5xf32> -> vector<1x5xf32>
    %138 = arith.addf %137, %28 : vector<1x5xf32>
    %c0_89 = arith.constant 0 : index
    %c0_90 = arith.constant 0 : index
    %c0_91 = arith.constant 0 : index
    %139 = vector.load %arg32[%c0_89, %c0_90, %c0_91] : memref<1x1x5xf32, #tpu.memory_space<vmem>>, vector<1x1x5xf32>
    %140 = vector.shape_cast %139 : vector<1x1x5xf32> to vector<1x5xf32>
    %141 = vector.shape_cast %138 : vector<1x5xf32> to vector<1x1x5xf32>
    tpu.vector_store %arg32[%c0_89, %c0_90, %c0_91], %141 {strides = array<i32>} : memref<1x1x5xf32, #tpu.memory_space<vmem>>, vector<1x1x5xf32>,
    return
  }
  func.func @transform_0(%arg0: i32) -> (i32, i32, i32) {
    %c0_i32 = arith.constant 0 : i32
    %c0_i32_0 = arith.constant 0 : i32
    %c0_i32_1 = arith.constant 0 : i32
    return %arg0, %c0_i32, %c0_i32_0 : i32, i32, i32
  }
  func.func @transform_1(%arg0: i32) -> (i32, i32) {
    %c0_i32 = arith.constant 0 : i32
    %c0_i32_0 = arith.constant 0 : i32
    %c0_i32_1 = arith.constant 0 : i32
    return %c0_i32, %c0_i32_0 : i32, i32
  }
  func.func @transform_2(%arg0: i32) -> (i32, i32) {
    %c0_i32 = arith.constant 0 : i32
    %c0_i32_0 = arith.constant 0 : i32
    %c0_i32_1 = arith.constant 0 : i32
    return %c0_i32, %c0_i32_0 : i32, i32
  }
  func.func @transform_3(%arg0: i32) -> (i32, i32) {
    %c0_i32 = arith.constant 0 : i32
    %c0_i32_0 = arith.constant 0 : i32
    %c0_i32_1 = arith.constant 0 : i32
    return %c0_i32, %c0_i32_0 : i32, i32
  }
  func.func @transform_4(%arg0: i32) -> (i32, i32) {
    %c0_i32 = arith.constant 0 : i32
    %c0_i32_0 = arith.constant 0 : i32
    %c0_i32_1 = arith.constant 0 : i32
    return %c0_i32, %c0_i32_0 : i32, i32
  }
  func.func @transform_5(%arg0: i32) -> (i32, i32) {
    %c0_i32 = arith.constant 0 : i32
    %c0_i32_0 = arith.constant 0 : i32
    %c0_i32_1 = arith.constant 0 : i32
    return %c0_i32, %c0_i32_0 : i32, i32
  }
  func.func @transform_6(%arg0: i32) -> (i32, i32) {
    %c0_i32 = arith.constant 0 : i32
    %c0_i32_0 = arith.constant 0 : i32
    %c0_i32_1 = arith.constant 0 : i32
    return %c0_i32, %c0_i32_0 : i32, i32
  }
  func.func @transform_7(%arg0: i32) -> (i32, i32) {
    %c0_i32 = arith.constant 0 : i32
    %c0_i32_0 = arith.constant 0 : i32
    %c0_i32_1 = arith.constant 0 : i32
    return %c0_i32, %c0_i32_0 : i32, i32
  }
  func.func @transform_8(%arg0: i32) -> (i32, i32) {
    %c0_i32 = arith.constant 0 : i32
    %c0_i32_0 = arith.constant 0 : i32
    %c0_i32_1 = arith.constant 0 : i32
    return %c0_i32, %c0_i32_0 : i32, i32
  }
  func.func @transform_9(%arg0: i32) -> (i32, i32) {
    %c0_i32 = arith.constant 0 : i32
    %c0_i32_0 = arith.constant 0 : i32
    %c0_i32_1 = arith.constant 0 : i32
    return %c0_i32, %c0_i32_0 : i32, i32
  }
  func.func @transform_10(%arg0: i32) -> (i32, i32) {
    %c0_i32 = arith.constant 0 : i32
    %c0_i32_0 = arith.constant 0 : i32
    %c0_i32_1 = arith.constant 0 : i32
    return %c0_i32, %c0_i32_0 : i32, i32
  }
  func.func @transform_11(%arg0: i32) -> (i32, i32) {
    %c0_i32 = arith.constant 0 : i32
    %c0_i32_0 = arith.constant 0 : i32
    %c0_i32_1 = arith.constant 0 : i32
    return %c0_i32, %c0_i32_0 : i32, i32
  }
  func.func @transform_12(%arg0: i32) -> (i32, i32) {
    %c0_i32 = arith.constant 0 : i32
    %c0_i32_0 = arith.constant 0 : i32
    %c0_i32_1 = arith.constant 0 : i32
    return %c0_i32, %c0_i32_0 : i32, i32
  }
  func.func @transform_13(%arg0: i32) -> (i32, i32) {
    %c0_i32 = arith.constant 0 : i32
    %c0_i32_0 = arith.constant 0 : i32
    %c0_i32_1 = arith.constant 0 : i32
    return %c0_i32, %c0_i32_0 : i32, i32
  }
  func.func @transform_14(%arg0: i32) -> (i32, i32) {
    %c0_i32 = arith.constant 0 : i32
    %c0_i32_0 = arith.constant 0 : i32
    %c0_i32_1 = arith.constant 0 : i32
    return %c0_i32, %c0_i32_0 : i32, i32
  }
  func.func @transform_15(%arg0: i32) -> (i32, i32) {
    %c0_i32 = arith.constant 0 : i32
    %c0_i32_0 = arith.constant 0 : i32
    %c0_i32_1 = arith.constant 0 : i32
    return %c0_i32, %c0_i32_0 : i32, i32
  }
  func.func @transform_16(%arg0: i32) -> (i32, i32) {
    %c0_i32 = arith.constant 0 : i32
    %c0_i32_0 = arith.constant 0 : i32
    %c0_i32_1 = arith.constant 0 : i32
    return %c0_i32, %c0_i32_0 : i32, i32
  }
  func.func @transform_17(%arg0: i32) -> (i32, i32) {
    %c0_i32 = arith.constant 0 : i32
    %c0_i32_0 = arith.constant 0 : i32
    %c0_i32_1 = arith.constant 0 : i32
    return %c0_i32, %c0_i32_0 : i32, i32
  }
  func.func @transform_18(%arg0: i32) -> (i32, i32) {
    %c0_i32 = arith.constant 0 : i32
    %c0_i32_0 = arith.constant 0 : i32
    %c0_i32_1 = arith.constant 0 : i32
    return %c0_i32, %c0_i32_0 : i32, i32
  }
  func.func @transform_19(%arg0: i32) -> (i32, i32) {
    %c0_i32 = arith.constant 0 : i32
    %c0_i32_0 = arith.constant 0 : i32
    %c0_i32_1 = arith.constant 0 : i32
    return %c0_i32, %c0_i32_0 : i32, i32
  }
  func.func @transform_20(%arg0: i32) -> (i32, i32) {
    %c0_i32 = arith.constant 0 : i32
    %c0_i32_0 = arith.constant 0 : i32
    %c0_i32_1 = arith.constant 0 : i32
    return %c0_i32, %c0_i32_0 : i32, i32
  }
  func.func @transform_21(%arg0: i32) -> (i32, i32) {
    %c0_i32 = arith.constant 0 : i32
    %c0_i32_0 = arith.constant 0 : i32
    %c0_i32_1 = arith.constant 0 : i32
    return %c0_i32, %c0_i32_0 : i32, i32
  }
  func.func @transform_22(%arg0: i32) -> (i32, i32) {
    %c0_i32 = arith.constant 0 : i32
    %c0_i32_0 = arith.constant 0 : i32
    %c0_i32_1 = arith.constant 0 : i32
    return %c0_i32, %c0_i32_0 : i32, i32
  }
  func.func @transform_23(%arg0: i32) -> (i32, i32) {
    %c0_i32 = arith.constant 0 : i32
    %c0_i32_0 = arith.constant 0 : i32
    %c0_i32_1 = arith.constant 0 : i32
    return %c0_i32, %c0_i32_0 : i32, i32
  }
  func.func @transform_24(%arg0: i32) -> (i32, i32) {
    %c0_i32 = arith.constant 0 : i32
    %c0_i32_0 = arith.constant 0 : i32
    %c0_i32_1 = arith.constant 0 : i32
    return %c0_i32, %c0_i32_0 : i32, i32
  }
  func.func @transform_25(%arg0: i32) -> (i32, i32) {
    %c0_i32 = arith.constant 0 : i32
    %c0_i32_0 = arith.constant 0 : i32
    %c0_i32_1 = arith.constant 0 : i32
    return %c0_i32, %c0_i32_0 : i32, i32
  }
  func.func @transform_26(%arg0: i32) -> (i32, i32) {
    %c0_i32 = arith.constant 0 : i32
    %c0_i32_0 = arith.constant 0 : i32
    %c0_i32_1 = arith.constant 0 : i32
    return %c0_i32, %c0_i32_0 : i32, i32
  }
  func.func @transform_27(%arg0: i32) -> (i32, i32) {
    %c0_i32 = arith.constant 0 : i32
    %c0_i32_0 = arith.constant 0 : i32
    %c0_i32_1 = arith.constant 0 : i32
    return %c0_i32, %c0_i32_0 : i32, i32
  }
  func.func @transform_28(%arg0: i32) -> (i32, i32) {
    %c0_i32 = arith.constant 0 : i32
    %c0_i32_0 = arith.constant 0 : i32
    %c0_i32_1 = arith.constant 0 : i32
    return %c0_i32, %c0_i32_0 : i32, i32
  }
  func.func @transform_29(%arg0: i32) -> (i32, i32) {
    %c0_i32 = arith.constant 0 : i32
    %c0_i32_0 = arith.constant 0 : i32
    %c0_i32_1 = arith.constant 0 : i32
    return %c0_i32, %c0_i32_0 : i32, i32
  }
  func.func @transform_30(%arg0: i32) -> (i32, i32, i32) {
    %c0_i32 = arith.constant 0 : i32
    %c0_i32_0 = arith.constant 0 : i32
    %c0_i32_1 = arith.constant 0 : i32
    return %arg0, %c0_i32, %c0_i32_0 : i32, i32, i32
  }
  func.func @transform_31(%arg0: i32) -> (i32, i32, i32) {
    %c0_i32 = arith.constant 0 : i32
    %c0_i32_0 = arith.constant 0 : i32
    %c0_i32_1 = arith.constant 0 : i32
    return %arg0, %c0_i32, %c0_i32_0 : i32, i32, i32
  }
}

</mosaic_0001>

<bundles_post_ra>
// kernel: tpu_custom_call.1
= control target key start
LH: loop header
LB: loop body
LE: loop exit
PB: predicated region body
PF: predicated region fallthrough
CT: control target
= control target key end

     0   :  { %s6452_s6 = smov 1   ;;  %s6453_s10 = smov 2   ;;  %s7177_s0 = inlined_call_operand.smem [shape: u32[32], index: -1, kind: input, shape index: {}] }
   0x1   :  { %s6508_s5 = sld [smem:[%s7177_s0]]   ;;  %s6454_s14 = smov 3  }
   0x2   :  { %s6513_s9 = sld [smem:[%s7177_s0 + %s6452_s6]]   ;;  %s6455_s18 = smov 4  }
   0x3   :  { %s6518_s13 = sld [smem:[%s7177_s0 + %s6453_s10]]   ;;  %s6456_s22 = smov 5  }
   0x4   :  { %s6523_s17 = sld [smem:[%s7177_s0 + %s6454_s14]]   ;;  %s6457_s26 = smov 6  }
   0x5   :  { %s6528_s21 = sld [smem:[%s7177_s0 + %s6455_s18]]   ;;  %s6458_s30 = smov 7  }
   0x6   :  { %s6533_s25 = sld [smem:[%s7177_s0 + %s6456_s22]]   ;;  %s6459_s4 = smov 8  }
   0x7   :  { %7205 = sst [smem:[#allocation34_spill]] %s6508_s5  ;;  %s6460_s10 = smov 9  }
   0x8   :  { %7206 = sst [smem:[#allocation35_spill]] %s6513_s9  ;;  %s6461_s15 = smov 10  }
   0x9   :  { %7207 = sst [smem:[#allocation36_spill]] %s6518_s13  ;;  %s6462_s20 = smov 11  }
   0xa   :  { %s6538_s29 = sld [smem:[%s7177_s0 + %s6457_s26]]   ;;  %s6463_s26 = smov 12  }
   0xb   :  { %s6543_s3 = sld [smem:[%s7177_s0 + %s6458_s30]]   ;;  %s6464_s1 = smov 13  }
   0xc   :  { %s6548_s8 = sld [smem:[%s7177_s0 + %s6459_s4]]   ;;  %s6465_s7 = smov 14  }
   0xd   :  { %s6553_s14 = sld [smem:[%s7177_s0 + %s6460_s10]]   ;;  %s6467_s22 = smov 16  }
   0xe   :  { %s6558_s19 = sld [smem:[%s7177_s0 + %s6461_s15]]   ;;  %s6466_s15 = smov 15  }
   0xf   :  { %s6563_s24 = sld [smem:[%s7177_s0 + %s6462_s20]]   ;;  %s6468_s28 = smov 17  }
  0x10   :  { %7208 = sst [smem:[#allocation37_spill]] %s6538_s29 }
  0x11   :  { %7209 = sst [smem:[#allocation38_spill]] %s6543_s3 }
  0x12   :  { %7210 = sst [smem:[#allocation39_spill]] %s6548_s8 }
  0x13   :  { %7211 = sst [smem:[#allocation40_spill]] %s6553_s14 }
  0x14   :  { %s6568_s30 = sld [smem:[%s7177_s0 + %s6463_s26]]  }
  0x15   :  { %7212 = sst [smem:[#allocation41_spill]] %s6563_s24 }
  0x16   :  { %s6573_s6 = sld [smem:[%s7177_s0 + %s6464_s1]]  }
  0x17   :  { %s6578_s12 = sld [smem:[%s7177_s0 + %s6465_s7]]   ;;  %s6469_s7 = smov 18  }
  0x18   :  { %s6583_s20 = sld [smem:[%s7177_s0 + %s6466_s15]]   ;;  %s6470_s15 = smov 19  }
  0x19   :  { %s6588_s27 = sld [smem:[%s7177_s0 + %s6467_s22]]   ;;  %s6471_s22 = smov 20  }
  0x1a   :  { %s6593_s4 = sld [smem:[%s7177_s0 + %s6468_s28]]   ;;  %s6472_s28 = smov 21  }
  0x1b   :  { %s6613_s24 = sld [smem:[%s7177_s0 + %s6472_s28]]   ;;  %s6476_s28 = smov 25  }
  0x1c   :  { %7213 = sst [smem:[#allocation42_spill]] %s6573_s6 }
  0x1d   :  { %7214 = sst [smem:[#allocation43_spill]] %s6578_s12 }
  0x1e   :  { %7215 = sst [smem:[#allocation44_spill]] %s6583_s20 }
  0x1f   :  { %7216 = sst [smem:[#allocation45_spill]] %s6588_s27 }
  0x20   :  { %7217 = sst [smem:[#allocation46_spill]] %s6593_s4 }
  0x21   :  { %s6598_s6 = sld [smem:[%s7177_s0 + %s6469_s7]]   ;;  %s6473_s7 = smov 22  }
  0x22   :  { %s6603_s20 = sld [smem:[%s7177_s0 + %s6470_s15]]   ;;  %s6474_s15 = smov 23  }
  0x23   :  { %s6608_s27 = sld [smem:[%s7177_s0 + %s6471_s22]]   ;;  %s6475_s22 = smov 24  }
  0x24   :  { %7220 = sst [smem:[#allocation49_spill]] %s6613_s24 }
  0x25   :  { %s6628_s29 = sld [smem:[%s7177_s0 + %s6475_s22]]   ;;  %s6479_s22 = smov 28  }
  0x26   :  { %s6633_s24 = sld [smem:[%s7177_s0 + %s6476_s28]]   ;;  %s6480_s28 = smov 29  }
  0x27   :  { %7218 = sst [smem:[#allocation47_spill]] %s6598_s6 }
  0x28   :  { %7219 = sst [smem:[#allocation48_spill]] %s6603_s20 }
  0x29   :  { %s6618_s6 = sld [smem:[%s7177_s0 + %s6473_s7]]   ;;  %s6477_s7 = smov 26  }
  0x2a   :  { %s6623_s20 = sld [smem:[%s7177_s0 + %s6474_s15]]   ;;  %s6478_s15 = smov 27  }
  0x2b   :  { %s6648_s14 = sld [smem:[%s7177_s0 + %s6479_s22]]  }
  0x2c   :  { %7223 = sst [smem:[#allocation52_spill]] %s6633_s24 }
  0x2d   :  { %s6653_s24 = sld [smem:[%s7177_s0 + %s6480_s28]]  }
  0x2f   :  { %7221 = sst [smem:[#allocation50_spill]] %s6618_s6 }
  0x30   :  { %7222 = sst [smem:[#allocation51_spill]] %s6623_s20 }
  0x31   :  { %s6638_s6 = sld [smem:[%s7177_s0 + %s6477_s7]]   ;;  %s6481_s7 = smov 30  }
  0x32   :  { %s6643_s20 = sld [smem:[%s7177_s0 + %s6478_s15]]   ;;  %s6482_s15 = smov 31  }
  0x33   :  { %7226 = sst [smem:[#allocation55_spill]] %s6648_s14 }
  0x34   :  { %7227 = sst [smem:[#allocation56_spill]] %s6653_s24 }
  0x35   :  { %s6658_s3 = sld [smem:[%s7177_s0 + %s6481_s7]]  }
  0x37   :  { %7224 = sst [smem:[#allocation53_spill]] %s6638_s6 }
  0x38   :  { %7225 = sst [smem:[#allocation54_spill]] %s6643_s20 }
  0x39   :  { %s6663_s20 = sld [smem:[%s7177_s0 + %s6482_s15]]  }
  0x3b   :  { %7228 = sst [smem:[#allocation57_spill]] %s6658_s3 }
  0x3f   :  { %7229 = sst [smem:[#allocation58_spill]] %s6663_s20 }
  0x40   :  { %69 = vsyncpa [#allocation3], 0 }
  0x41   :  { %71 = vsyncpa [#allocation3 + $0x1], 0 }
  0x42   :  { %72 = vsyncpa [#allocation6], 0 }
  0x43   :  { %73 = vsyncpa [#allocation9], 0 }
  0x44   :  { %74 = vsyncpa [#allocation12], 0 }
  0x45   :  { %75 = vsyncpa [#allocation15], 0 }
  0x46   :  { %76 = vsyncpa [#allocation18], 0 }
  0x47   :  { %77 = vsyncpa [#allocation21], 0 }
  0x48   :  { %78 = vsyncpa [#allocation4], 0 }
  0x49   :  { %80 = vsyncpa [#allocation4 + $0x1], 0 }
  0x4a   :  { %81 = vsyncpa [#allocation24], 0 }
  0x4b   :  { %83 = vsyncpa [#allocation24 + $0x1], 0  ;;  %s6665_s22 = smov 0   ;;  %s6667_s23 = smov 0  }
  0x4c   :  { %s6669_s26 = smov 0   ;;  %s6671_s0 = smov 0  }
  0x4d LB: > { %s7230_s13 = sld [smem:[#allocation36_spill]]  ;;  %s6689_s1 = sadd.s32 4294967295, %s6450_s0   ;;  %s6446_s26 = sphi %s6669_s26, %s7284_s26   ;;  %s6442_s23 = sphi %s6667_s23, %s7283_s23   ;;  %s6438_s22 = sphi %s6665_s22, %s7282_s22   ;;  %s6450_s0 = sphi %s6671_s0, %s7285_s0  }
  0x4e   : > { %s7231_s5 = sld [smem:[#allocation34_spill]]  ;;  %p4217_p0 = scmp.ge.s32.totalorder %s6450_s0, 1 }
  0x4f   : > { %s7232_s8 = sld [smem:[#allocation39_spill]]  ;;  %p7195_p1 = scmp.eq.s32.totalorder %s6689_s1, 0 }
  0x50   : > { %s7233_s6 = sld [smem:[#allocation53_spill]]  ;;  %p781_p2 = scmp.lt.s32.totalorder %s6450_s0, 3 }
  0x51   : > { %s7234_s4 = sld [smem:[#allocation46_spill]]  ;;  %s6483_s7 = smov [#allocation5]  }
  0x52   : > { %s7235_s12 = sld [smem:[#allocation43_spill]]  ;;  %p6694_p3 = pnand %p4217_p0, %p781_p2 }
  0x53   : > { %s7236_s9 = sld [smem:[#allocation35_spill]]  ;;  %s795_s10 = sshll.u32 %s6483_s7, 4  ;;  %s796_s10 = int_to_ptr.vmem [resolvable:$true] %s795_s10 }
  0x54   : > { %p5810_p5 = pneg %p6694_p3  ;;  %s820_s11 = sshll.u32 %s6528_s21, 4  ;;  %s6702_s11 = int_to_ptr.hbm [resolvable:$true] %s820_s11 }
  0x55   : > { %s6484_s16 = smov [#allocation8]   ;;  %s856_s7 = sshll.u32 %s6558_s19, 4  ;;  %s6714_s7 = int_to_ptr.hbm [resolvable:$true] %s856_s7 }
  0x56   : > { %p6706_p6 = pnand %p5810_p5, %p7195_p1  ;;  %s6710_s18 = sshll.u32 %s6484_s16, 4 }
  0x57   : > { %7239 = sst [smem:[#allocation59_spill]] %s6710_s18 }
  0x58   : > { %p6719_p8 = pneg %p6706_p6 }
  0x59   : > { %s793_s28 = sshll.u32 %s7236_s9, 4  ;;  %s5975_s16 = scalar_lea.hbm %s7236_s9, 4  ;;  %s6686_s28 = int_to_ptr.hbm [resolvable:$true] %s793_s28 }
  0x5a   : > { %s5968_s24 = sshra.s32 %s6686_s28, 4  ;;  %s5969_s24 = int_to_ptr.hbm [resolvable:$true] %s5968_s24 }
  0x5b   : > { %s5970_s20 = scalar_lea.hbm %s5969_s24, 4  ;;  %p5976_p11 = scmp.lt.s32.totalorder %s5969_s24, %s7236_s9 }
  0x5c   : > { %p5971_p7 = scmp.ne.s32.totalorder %s5969_s24, %s5970_s20  ;;  %p5977_p12 = scmp.lt.s32.totalorder %s5975_s16, %s5970_s20 }
  0x5e   : > { %p5973_p9 = pnand %p6719_p8, %p5971_p7  ;;  %p5978_p13 = por %p5977_p12, %p5976_p11 }
  0x60   : > { %p5974_p10 = pneg %p5973_p9 }
  0x62   : > { %p5979_p0 = pnand %p5978_p13, %p5974_p10 }
  0x64   : > { %5982 = shalt.err (!%p5979_p0)
}
  0x65   : > { %5813 = dma.hbm_to_vmem [thread:$0]  (!%p6706_p6), %s6686_s28, 64, %s796_s10, [#allocation6]  }
  0x66   : > { %s5998_s18 = sshra.s32 %s6702_s11, 4  ;;  %s6005_s24 = scalar_lea.hbm %s6528_s21, 1  ;;  %s5999_s18 = int_to_ptr.hbm [resolvable:$true] %s5998_s18 }
  0x67   : > { %s6000_s14 = scalar_lea.hbm %s5999_s18, 1  ;;  %p6006_p9 = scmp.lt.s32.totalorder %s5999_s18, %s6528_s21 }
  0x68   : > { %p6001_p2 = scmp.ne.s32.totalorder %s5999_s18, %s6000_s14  ;;  %p6007_p11 = scmp.lt.s32.totalorder %s6005_s24, %s6000_s14 }
  0x6a   : > { %p6003_p5 = pnand %p6001_p2, %p6719_p8  ;;  %p6008_p10 = por %p6007_p11, %p6006_p9 }
  0x6c   : > { %p6004_p7 = pneg %p6003_p5 }
  0x6e   : > { %p6009_p12 = pnand %p6008_p10, %p6004_p7 }
  0x70   : > { %6012 = shalt.err (!%p6009_p12)
}
  0x71   : > { %s7241_s20 = sld [smem:[#allocation59_spill]]  ;;  %s886_s28 = sshll.u32 %s7235_s12, 4  ;;  %s6741_s28 = int_to_ptr.hbm [resolvable:$true] %s886_s28 }
  0x72   : > { %s6485_s10 = smov [#allocation11]   ;;  %s6028_s14 = sshra.s32 %s6714_s7, 4  ;;  %s6029_s14 = int_to_ptr.hbm [resolvable:$true] %s6028_s14 }
  0x73   : > { %s858_s9 = sshll.u32 %s6485_s10, 4  ;;  %s6030_s18 = scalar_lea.hbm %s6029_s14, 1  ;;  %s859_s9 = int_to_ptr.vmem [resolvable:$true] %s858_s9 }
  0x74   : > { %p6031_p13 = scmp.ne.s32.totalorder %s6029_s14, %s6030_s18  ;;  %s6035_s24 = scalar_lea.hbm %s6558_s19, 1 }
  0x75   : > { %p6036_p5 = scmp.lt.s32.totalorder %s6029_s14, %s6558_s19  ;;  %p6037_p7 = scmp.lt.s32.totalorder %s6035_s24, %s6030_s18 }
  0x76   : > { %p6033_p0 = pnand %p6031_p13, %p6719_p8 }
  0x77   : > { %s7242_s16 = int_to_ptr.vmem [resolvable:$true] %s7241_s20  ;;  %p6038_p9 = por %p6037_p7, %p6036_p5 }
  0x78   : > { %5819 = dma.hbm_to_vmem [thread:$0]  (!%p6706_p6), %s6702_s11, 16, %s7242_s16, [#allocation9]  }
  0x79   : > { %p6034_p2 = pneg %p6033_p0 }
  0x7b   : > { %p6039_p11 = pnand %p6038_p9, %p6034_p2 }
  0x7d   : > { %6042 = shalt.err (!%p6039_p11)
}
  0x7e   : > { %5825 = dma.hbm_to_vmem [thread:$0]  (!%p6706_p6), %s6714_s7, 16, %s859_s9, [#allocation12]  }
  0x7f   : > { %s6486_s11 = smov [#allocation14]   ;;  %s923_s16 = sshll.u32 %s6608_s27, 4  ;;  %s6752_s16 = int_to_ptr.hbm [resolvable:$true] %s923_s16 }
  0x80   : > { %s888_s20 = sshll.u32 %s6486_s11, 4  ;;  %s6058_s10 = sshra.s32 %s6741_s28, 4  ;;  %s889_s20 = int_to_ptr.vmem [resolvable:$true] %s888_s20  ;;  %s6059_s10 = int_to_ptr.hbm [resolvable:$true] %s6058_s10 }
  0x81   : > { %s6060_s14 = scalar_lea.hbm %s6059_s10, 1  ;;  %s6065_s18 = scalar_lea.hbm %s7235_s12, 1 }
  0x82   : > { %p6061_p10 = scmp.ne.s32.totalorder %s6059_s10, %s6060_s14  ;;  %p6066_p0 = scmp.lt.s32.totalorder %s6059_s10, %s7235_s12 }
  0x83   : > { %p6067_p2 = scmp.lt.s32.totalorder %s6065_s18, %s6060_s14 }
  0x84   : > { %p6063_p12 = pnand %p6061_p10, %p6719_p8 }
  0x85   : > { %p6068_p5 = por %p6067_p2, %p6066_p0 }
  0x86   : > { %p6064_p13 = pneg %p6063_p12 }
  0x88   : > { %p6069_p7 = pnand %p6068_p5, %p6064_p13 }
  0x8a   : > { %6072 = shalt.err (!%p6069_p7)
}
  0x8b   : > { %5831 = dma.hbm_to_vmem [thread:$0]  (!%p6706_p6), %s6741_s28, 16, %s889_s20, [#allocation15]  }
  0x8c   : > { %s6487_s9 = smov [#allocation17]   ;;  %s805_s24 = sshll.u32 %s7230_s13, 4  ;;  %s806_s24 = int_to_ptr.hbm [resolvable:$true] %s805_s24 }
  0x8d   : > { %s925_s7 = sshll.u32 %s6487_s9, 4  ;;  %s6088_s11 = sshra.s32 %s6752_s16, 4  ;;  %s926_s7 = int_to_ptr.vmem [resolvable:$true] %s925_s7  ;;  %s6089_s11 = int_to_ptr.hbm [resolvable:$true] %s6088_s11 }
  0x8e   : > { %s6090_s10 = scalar_lea.hbm %s6089_s11, 512  ;;  %s6095_s14 = scalar_lea.hbm %s6608_s27, 512 }
  0x8f   : > { %p6091_p9 = scmp.ne.s32.totalorder %s6089_s11, %s6090_s10  ;;  %p6096_p12 = scmp.lt.s32.totalorder %s6089_s11, %s6608_s27 }
  0x90   : > { %p6097_p13 = scmp.lt.s32.totalorder %s6095_s14, %s6090_s10 }
  0x91   : > { %p6093_p11 = pnand %p6091_p9, %p6719_p8 }
  0x92   : > { %p6098_p0 = por %p6097_p13, %p6096_p12 }
  0x93   : > { %p6094_p10 = pneg %p6093_p11 }
  0x95   : > { %p6099_p2 = pnand %p6098_p0, %p6094_p10 }
  0x97   : > { %6102 = shalt.err (!%p6099_p2)
}
  0x98   : > { %s7190_s18 = smov 128   ;;  %s7191_s28 = smov 8  }
  0x99   : > { %5837 = dma.hbm_to_vmem [thread:$0]  (!%p6706_p6), %s6752_s16, 8192, %s926_s7, [#allocation18], %s7190_s18, %s7190_s18, %s7191_s28  }
  0x9a   : > { %s6490_s20 = smov [#allocation7]   ;;  %s841_s11 = sshll.u32 %s7232_s8, 4  ;;  %s6775_s11 = int_to_ptr.hbm [resolvable:$true] %s841_s11 }
  0x9b   : > { %s807_s9 = sshll.u32 %s6490_s20, 4  ;;  %s6118_s10 = sshra.s32 %s806_s24, 4  ;;  %s808_s9 = int_to_ptr.vmem [resolvable:$true] %s807_s9  ;;  %s6119_s10 = int_to_ptr.hbm [resolvable:$true] %s6118_s10 }
  0x9c   : > { %s6120_s14 = scalar_lea.hbm %s6119_s10, 1  ;;  %s6125_s12 = scalar_lea.hbm %s7230_s13, 1 }
  0x9d   : > { %p6121_p5 = scmp.ne.s32.totalorder %s6119_s10, %s6120_s14  ;;  %p6126_p11 = scmp.lt.s32.totalorder %s6119_s10, %s7230_s13 }
  0x9e   : > { %p6127_p10 = scmp.lt.s32.totalorder %s6125_s12, %s6120_s14 }
  0x9f   : > { %p6123_p7 = pnand %p6121_p5, %p6719_p8 }
  0xa0   : > { %p6128_p12 = por %p6127_p10, %p6126_p11 }
  0xa1   : > { %p6124_p9 = pneg %p6123_p7 }
  0xa3   : > { %p6129_p13 = pnand %p6128_p12, %p6124_p9 }
  0xa5   : > { %6132 = shalt.err (!%p6129_p13)
}
  0xa6   : > { %5816 = dma.hbm_to_vmem [thread:$0]  (!%p6706_p6), %s806_s24, 16, %s808_s9, [#allocation6]  }
  0xa7   : > { %s871_s16 = sshll.u32 %s6568_s30, 4  ;;  %s6491_s7 = smov [#allocation10]   ;;  %s6784_s16 = int_to_ptr.hbm [resolvable:$true] %s871_s16 }
  0xa8   : > { %s843_s20 = sshll.u32 %s6491_s7, 4  ;;  %s6148_s18 = sshra.s32 %s6775_s11, 4  ;;  %s844_s20 = int_to_ptr.vmem [resolvable:$true] %s843_s20  ;;  %s6149_s18 = int_to_ptr.hbm [resolvable:$true] %s6148_s18 }
  0xa9   : > { %s6150_s12 = scalar_lea.hbm %s6149_s18, 1  ;;  %s6155_s10 = scalar_lea.hbm %s7232_s8, 1 }
  0xaa   : > { %p6151_p0 = scmp.ne.s32.totalorder %s6149_s18, %s6150_s12  ;;  %p6156_p7 = scmp.lt.s32.totalorder %s6149_s18, %s7232_s8 }
  0xab   : > { %p6157_p9 = scmp.lt.s32.totalorder %s6155_s10, %s6150_s12 }
  0xac   : > { %p6153_p2 = pnand %p6151_p0, %p6719_p8 }
  0xad   : > { %p6158_p11 = por %p6157_p9, %p6156_p7 }
  0xae   : > { %p6154_p5 = pneg %p6153_p2 }
  0xb0   : > { %p6159_p10 = pnand %p6158_p11, %p6154_p5 }
  0xb2   : > { %6162 = shalt.err (!%p6159_p10)
}
  0xb3   : > { %5822 = dma.hbm_to_vmem [thread:$0]  (!%p6706_p6), %s6775_s11, 16, %s844_s20, [#allocation9]  }
  0xb4   : > { %s6492_s24 = smov [#allocation13]   ;;  %s903_s14 = sshll.u32 %s7234_s4, 4  ;;  %s6795_s14 = int_to_ptr.hbm [resolvable:$true] %s903_s14 }
  0xb5   : > { %s873_s9 = sshll.u32 %s6492_s24, 4  ;;  %s6178_s18 = sshra.s32 %s6784_s16, 4  ;;  %s874_s9 = int_to_ptr.vmem [resolvable:$true] %s873_s9  ;;  %s6179_s18 = int_to_ptr.hbm [resolvable:$true] %s6178_s18 }
  0xb6   : > { %s6180_s7 = scalar_lea.hbm %s6179_s18, 1  ;;  %s6185_s12 = scalar_lea.hbm %s6568_s30, 1 }
  0xb7   : > { %p6181_p12 = scmp.ne.s32.totalorder %s6179_s18, %s6180_s7  ;;  %p6186_p2 = scmp.lt.s32.totalorder %s6179_s18, %s6568_s30 }
  0xb8   : > { %p6187_p5 = scmp.lt.s32.totalorder %s6185_s12, %s6180_s7 }
  0xb9   : > { %p6183_p13 = pnand %p6181_p12, %p6719_p8 }
  0xba   : > { %p6188_p7 = por %p6187_p5, %p6186_p2 }
  0xbb   : > { %p6184_p0 = pneg %p6183_p13 }
  0xbd   : > { %p6189_p9 = pnand %p6188_p7, %p6184_p0 }
  0xbf   : > { %6192 = shalt.err (!%p6189_p9)
}
  0xc0   : > { %5828 = dma.hbm_to_vmem [thread:$0]  (!%p6706_p6), %s6784_s16, 16, %s874_s9, [#allocation12]  }
  0xc1   : > { %s6493_s11 = smov [#allocation16]   ;;  %s946_s10 = sshll.u32 %s6628_s29, 4  ;;  %s947_s10 = int_to_ptr.hbm [resolvable:$true] %s946_s10 }
  0xc2   : > { %s905_s20 = sshll.u32 %s6493_s11, 4  ;;  %s6208_s24 = sshra.s32 %s6795_s14, 4  ;;  %s906_s20 = int_to_ptr.vmem [resolvable:$true] %s905_s20  ;;  %s6209_s24 = int_to_ptr.hbm [resolvable:$true] %s6208_s24 }
  0xc3   : > { %s6210_s18 = scalar_lea.hbm %s6209_s24, 64  ;;  %s6215_s7 = scalar_lea.hbm %s7234_s4, 64 }
  0xc4   : > { %p6211_p11 = scmp.ne.s32.totalorder %s6209_s24, %s6210_s18  ;;  %p6216_p13 = scmp.lt.s32.totalorder %s6209_s24, %s7234_s4 }
  0xc5   : > { %p6217_p0 = scmp.lt.s32.totalorder %s6215_s7, %s6210_s18 }
  0xc6   : > { %p6213_p10 = pnand %p6211_p11, %p6719_p8 }
  0xc7   : > { %p6218_p2 = por %p6217_p0, %p6216_p13 }
  0xc8   : > { %p6214_p12 = pneg %p6213_p10 }
  0xca   : > { %p6219_p5 = pnand %p6218_p2, %p6214_p12 }
  0xcc   : > { %6222 = shalt.err (!%p6219_p5)
}
  0xcd   : > { %s6494_s12 = smov 64   ;;  %s6495_s16 = smov 4  }
  0xce   : > { %5834 = dma.hbm_to_vmem [thread:$0]  (!%p6706_p6), %s6795_s14, 1024, %s906_s20, [#allocation15], %s6494_s12, %s6494_s12, %s6495_s16  }
  0xcf   : > { %s6496_s9 = smov [#allocation19]   ;;  %s6238_s28 = sshra.s32 %s947_s10, 4  ;;  %s6239_s28 = int_to_ptr.hbm [resolvable:$true] %s6238_s28 }
  0xd0   : > { %s948_s11 = sshll.u32 %s6496_s9, 4  ;;  %s6240_s24 = scalar_lea.hbm %s6239_s28, 512  ;;  %s949_s11 = int_to_ptr.vmem [resolvable:$true] %s948_s11 }
  0xd1   : > { %p6241_p7 = scmp.ne.s32.totalorder %s6239_s28, %s6240_s24  ;;  %s6245_s18 = scalar_lea.hbm %s6628_s29, 512 }
  0xd2   : > { %p6246_p10 = scmp.lt.s32.totalorder %s6239_s28, %s6628_s29  ;;  %p6247_p12 = scmp.lt.s32.totalorder %s6245_s18, %s6240_s24 }
  0xd3   : > { %p6243_p9 = pnand %p6241_p7, %p6719_p8 }
  0xd4   : > { %p6248_p13 = por %p6247_p12, %p6246_p10 }
  0xd5   : > { %p6244_p11 = pneg %p6243_p9 }
  0xd7   : > { %p6249_p0 = pnand %p6248_p13, %p6244_p11 }
  0xd9   : > { %6252 = shalt.err (!%p6249_p0)
}
  0xda   : > { %s6497_s7 = smov 512   ;;  %s6498_s14 = smov 32  }
  0xdb   : > { %5840 = dma.hbm_to_vmem [thread:$0]  (!%p6706_p6), %s947_s10, 8192, %s949_s11, [#allocation18], %s6497_s7, %s6497_s7, %s6498_s14  }
  0xdc   : > { %s963_s20 = sshll.u32 %s7233_s6, 4  ;;  %s6499_s12 = smov [#allocation20]   ;;  %s964_s20 = int_to_ptr.hbm [resolvable:$true] %s963_s20 }
  0xdd   : > { %s965_s16 = sshll.u32 %s6499_s12, 4  ;;  %s6268_s9 = sshra.s32 %s964_s20, 4  ;;  %s966_s16 = int_to_ptr.vmem [resolvable:$true] %s965_s16  ;;  %s6269_s9 = int_to_ptr.hbm [resolvable:$true] %s6268_s9 }
  0xde   : > { %s6270_s28 = scalar_lea.hbm %s6269_s9, 512  ;;  %s6275_s24 = scalar_lea.hbm %s7233_s6, 512 }
  0xdf   : > { %p6271_p2 = scmp.ne.s32.totalorder %s6269_s9, %s6270_s28  ;;  %p6276_p9 = scmp.lt.s32.totalorder %s6269_s9, %s7233_s6 }
  0xe0   : > { %p6277_p11 = scmp.lt.s32.totalorder %s6275_s24, %s6270_s28 }
  0xe1   : > { %p6273_p5 = pnand %p6271_p2, %p6719_p8 }
  0xe2   : > { %p6278_p10 = por %p6277_p11, %p6276_p9 }
  0xe3   : > { %p6274_p7 = pneg %p6273_p5 }
  0xe5   : > { %p6279_p12 = pnand %p6278_p10, %p6274_p7 }
  0xe7   : > { %6282 = shalt.err (!%p6279_p12)
}
  0xe8   : > { %s7243_s10 = smov 8   ;;  %s7244_s11 = smov 128  }
  0xe9   : > { %5843 = dma.hbm_to_vmem [thread:$0]  (!%p6706_p6), %s964_s20, 8192, %s966_s16, [#allocation21], %s7244_s11, %s7244_s11, %s7243_s10  }
  0xea   : > { %s4216_s3 = sadd.s32 4294967294, %s6450_s0   ;;  %s6832_s15 = sadd.s32 1, %s6450_s0  }
  0xeb   : > { %s96_s18 = sadd.s32 1, %s6446_s26  ;;  %s93_s7 = ssub.s32 %s6450_s0, %s6832_s15 }
  0xec   : > { %p103_p8 = scmp.ne.s32.totalorder %s6446_s26, %s6442_s23  ;;  %p94_p13 = scmp.eq.s32.totalorder %s93_s7, 0 }
  0xed   : > { %p104_p0 = scmp.eq.s32.totalorder %s6450_s0, 0  ;;  %p109_p2 = scmp.ne.s32.totalorder %s6442_s23, %s6438_s22 }
  0xee   : > { %p742_p5 = scmp.eq.s32.totalorder %s6689_s1, 1  ;;  %p748_p9 = scmp.eq.s32.totalorder %s4216_s3, 1 }
  0xef   : > { %s6844_s14 = scalar_select %p94_p13, %s6446_s26, %s96_s18  }
  0xf0   : > { %p6848_p7 = por %p7195_p1, %p109_p2  ;;  %p6852_p6 = por %p742_p5, %p103_p8 }
  0xf1   : > { %p105_p11 = por %p104_p0, %p103_p8  ;;  %s988_s16 = sand.u32 1, %s6446_s26  }
  0xf2   : > { %p6857_p10 = por %p748_p9, %p109_p2  ;;  %p5866_p12 = scmp.lt.s32.totalorder %s6450_s0, 2 }
  0xf3   : > { %s4230_s28 = sshll.u32 %s988_s16, 3  ;;  %s4231_s24 = sshll.u32 %s6450_s0, 3 }
  0xf4   : > { %s7247_s9 = scalar_select %p6857_p10, 1, 0 }
  0xf5   : > { %s996_s10 = scalar_lea.hbm %s7231_s5, %s4231_s24  ;;  %s992_s18 = scalar_lea.vmem [#allocation2], %s4230_s28 }
  0xf6   : > { %s998_s11 = sshll.u32 %s996_s10, 4  ;;  %s1000_s7 = sshll.u32 %s992_s18, 4  ;;  %s999_s11 = int_to_ptr.hbm [resolvable:$true] %s998_s11  ;;  %s1001_s7 = int_to_ptr.vmem [resolvable:$true] %s1000_s7 }
  0xf7   : > { %p6864_p13 = pnand %p5866_p12, %p105_p11  ;;  %s989_s3 = scalar_lea.sflag [#allocation3], %s988_s16 }
  0xf8   : > { %s6298_s6 = sshra.s32 %s999_s11, 4  ;;  %s6305_s24 = scalar_lea.hbm %s7231_s5, 16  ;;  %s6299_s6 = int_to_ptr.hbm [resolvable:$true] %s6298_s6 }
  0xf9   : > { %s6300_s8 = scalar_lea.hbm %s6299_s6, 8  ;;  %p6302_p0 = pneg %p6864_p13 }
  0xfa   : > { %p6301_p8 = scmp.ne.s32.totalorder %s6299_s6, %s6300_s8  ;;  %p6306_p9 = scmp.lt.s32.totalorder %s6299_s6, %s7231_s5 }
  0xfb   : > { %p6307_p4 = scmp.lt.s32.totalorder %s6305_s24, %s6300_s8 }
  0xfc   : > { %p6303_p2 = pnand %p6302_p0, %p6301_p8 }
  0xfd   : > { %p6308_p1 = por %p6307_p4, %p6306_p9 }
  0xfe   : > { %p6304_p5 = pneg %p6303_p2 }
 0x100   : > { %p6309_p10 = pnand %p6308_p1, %p6304_p5 }
 0x102   : > { %6312 = shalt.err (!%p6309_p10)
}
 0x103   : > { %5847 = dma.hbm_to_vmem [thread:$0]  (!%p6864_p13), %s999_s11, 128, %s1001_s7, %s989_s3  }
 0x104   : > { %1009 = sbr.rel (%p6694_p3) target bundleno = 2407 (0x967), region = 140  ;;  %s6877_s16 = sand.u32 (!%p6694_p3), 1, %s6442_s23  }
 0x105   : > { %s7196_s28 = sshll.u32 (!%p6694_p3), %s6877_s16, 3  ;;  %s1012_s10 = scalar_lea.sflag (!%p6694_p3), [#allocation3], %s6877_s16 }
 0x106   : > { %s1015_s8 = scalar_lea.vmem (!%p6694_p3), [#allocation2], %s7196_s28 }
 0x109   : > { %6401 = dma.done.wait (%p6848_p7), %s1012_s10, 128  }
 0x10a   : > { %6403 = vsyncadd (%p6848_p7), %s1012_s10, 4294967168  ;;  %p7249_p1 = scmp.eq.s32.totalorder %s6689_s1, 0 }
 0x10c   : > { %6405 = dma.done.wait (%p7249_p1), [#allocation6], 80   ;;  %p7250_p3 = pmov %p7249_p1 }
 0x10d   : > { %p7251_p4 = pmov %p7249_p1 }
 0x10e   : > { %6407 = vsyncadd (%p7250_p3), [#allocation6], 4294967216 }
 0x10f   : > { %6409 = dma.done.wait (%p7251_p4), [#allocation9], 32   ;;  %p7252_p11 = pmov %p7249_p1 }
 0x110   : > { %p7253_p10 = pmov %p7249_p1 }
 0x111   : > { %6411 = vsyncadd (%p7252_p11), [#allocation9], 4294967264 }
 0x112   : > { %6413 = dma.done.wait (%p7253_p10), [#allocation12], 32   ;;  %p7254_p12 = pmov %p7249_p1 }
 0x113   : > { %p7255_p7 = pmov %p7249_p1 }
 0x114   : > { %6415 = vsyncadd (%p7254_p12), [#allocation12], 4294967264 }
 0x115   : > { %6417 = dma.done.wait (%p7255_p7), [#allocation15], 1040   ;;  %p7256_p13 = pmov %p7249_p1 }
 0x116   : > { %p7257_p8 = pmov %p7249_p1 }
 0x117   : > { %6419 = vsyncadd (%p7256_p13), [#allocation15], 4294966256 }
 0x118   : > { %6421 = dma.done.wait (%p7257_p8), [#allocation18], 16384   ;;  %p7258_p0 = pmov %p7249_p1 }
 0x11a   : > { %6423 = vsyncadd (%p7258_p0), [#allocation18], 4294950912  ;;  %p7259_p2 = pmov %p7258_p0 }
 0x11b   : > { %p7260_p5 = pmov %p7258_p0 }
 0x11c   : > { %6425 = dma.done.wait (%p7259_p2), [#allocation21], 8192  }
 0x11d   : > { %6427 = vsyncadd (%p7260_p5), [#allocation21], 4294959104  ;;  %v1547_v0 = vld [vmem:[%s1015_s8] sm:$0xff]  ;;  %v1155_v1 = vld [vmem:[#allocation5] sm:$0xf]  ;;  %vm1588_vm0 = vcmask 1043456  }
 0x11e   : > { %1548 = vxpose.xlu0.b32.start.end [1/1] (short) (narrow) %v1547_v0, 16  ;;  %v1590_v2 = vsel %vm1588_vm0, %v1155_v1, 0  ;;  %vm1584_vm1 = vcmask 64512   ;;  %v4273_v6 = vld [vmem:[%s6523_s17 + $0x30] sm:$0xf]  ;;  %v5475_v30 = vld [vmem:[%s6533_s25 + $0x38] sm:$0xff] }
 0x11f   : > { %1599 = vmatpush.bf16.msra.mxu0 %v1590_v2  ;;  %v5467_v7 = vld [vmem:[%s6523_s17 + $0x34] sm:$0xf0]  ;;  %v5466_v8 = vld [vmem:[%s6523_s17 + $0x34] sm:$0xf]  ;;  %v4275_v10 = vld [vmem:[%s6523_s17 + $0x38] sm:$0xf0] }
 0x120   : > { %v4274_v9 = vor.u32 %v5467_v7, %v4273_v6  ;;  %v4278_v11 = vor.u32 %v5466_v8, %v4275_v10  ;;  %v4265_v12 = vld [vmem:[%s6523_s17 + $0x20] sm:$0xf]  ;;  %v5465_v13 = vld [vmem:[%s6523_s17 + $0x24] sm:$0xf0]  ;;  %v5464_v14 = vld [vmem:[%s6523_s17 + $0x24] sm:$0xf] }
 0x121   : > { %v4266_v15 = vor.u32 %v5465_v13, %v4265_v12  ;;  %v4267_v16 = vld [vmem:[%s6523_s17 + $0x28] sm:$0xf0]  ;;  %v4257_v18 = vld [vmem:[%s6523_s17 + $0x10] sm:$0xf]  ;;  %v5463_v19 = vld [vmem:[%s6523_s17 + $0x14] sm:$0xf0] }
 0x122   : > { %1657 = vmatpush.bf16.msra.mxu1 %v4274_v9  ;;  %1671 = vmatpush.bf16.msra.mxu3 %v4278_v11  ;;  %v4270_v17 = vor.u32 %v5464_v14, %v4267_v16  ;;  %v5462_v20 = vld [vmem:[%s6523_s17 + $0x14] sm:$0xf]  ;;  %v4258_v21 = vor.u32 %v5463_v19, %v4257_v18  ;;  %v4259_v22 = vld [vmem:[%s6523_s17 + $0x18] sm:$0xf0]  ;;  %v4249_v24 = vld [vmem:[%s6523_s17] sm:$0xf] }
 0x123   : > { %v4262_v23 = vor.u32 %v5462_v20, %v4259_v22  ;;  %v5461_v25 = vld [vmem:[%s6523_s17 + $0x4] sm:$0xf0]  ;;  %v5460_v26 = vld [vmem:[%s6523_s17 + $0x4] sm:$0xf]  ;;  %v4251_v28 = vld [vmem:[%s6523_s17 + $0x8] sm:$0xf0] }
 0x124   : > { %v4250_v27 = vor.u32 %v5461_v25, %v4249_v24  ;;  %v4254_v29 = vor.u32 %v5460_v26, %v4251_v28  ;;  %v5474_v31 = vld [vmem:[%s6533_s25 + $0x30] sm:$0xff]  ;;  %v5473_v32 = vld [vmem:[%s6533_s25 + $0x28] sm:$0xff]  ;;  %v5472_v33 = vld [vmem:[%s6533_s25 + $0x20] sm:$0xff]  ;;  %s7261_s6 = sld [smem:[#allocation38_spill]]  ;;  %vm1649_vm2 = vcmask 523264   ;;  %vm3390_vm3 = vcmask 130048  }
 0x125   : > { %v5960_v35 = vld [vmem:[#allocation7] ss:$0 sm:$0xff]  ;;  %v5471_v42 = vld [vmem:[%s6533_s25 + $0x18] sm:$0xff]  ;;  %v5469_v44 = vld [vmem:[%s6533_s25 + $0x8] sm:$0xff]  ;;  %s7262_s4 = sld [smem:[#allocation40_spill]] }
 0x126   : > { %1658 = vmatpush.bf16.msra.mxu1 %v4266_v15  ;;  %1672 = vmatpush.bf16.msra.mxu3 %v4270_v17  ;;  %v5470_v43 = vld [vmem:[%s6533_s25 + $0x10] sm:$0xff]  ;;  %v5468_v45 = vld [vmem:[%s6533_s25] sm:$0xff]  ;;  %s7263_s2 = sld [smem:[#allocation37_spill]] }
 0x127   : > { %v5961_v48 = vld [vmem:[#allocation8] ss:$0 sm:$0xff]  ;;  %s7264_s12 = sld [smem:[#allocation41_spill]] }
 0x128   : > { %s7265_s11 = sld [smem:[#allocation42_spill]] }
 0x129   : > { %s7266_s18 = sld [smem:[#allocation44_spill]] }
 0x12a   : > { %1659 = vmatpush.bf16.msra.mxu1 %v4258_v21  ;;  %1673 = vmatpush.bf16.msra.mxu3 %v4262_v23  ;;  %v5483_v46 = vld [vmem:[%s7261_s6 + $0x38] sm:$0xff]  ;;  %v5482_v55 = vld [vmem:[%s7261_s6 + $0x30] sm:$0xff]  ;;  %v5481_v56 = vld [vmem:[%s7261_s6 + $0x28] sm:$0xff]  ;;  %s7267_s7 = sld [smem:[#allocation45_spill]] }
 0x12b   : > { %1810 = vmatpush.bf16.msrb.mxu0 %v5483_v46  ;;  %v5480_v57 = vld [vmem:[%s7261_s6 + $0x20] sm:$0xff]  ;;  %v5479_v58 = vld [vmem:[%s7261_s6 + $0x18] sm:$0xff]  ;;  %v5478_v60 = vld [vmem:[%s7261_s6 + $0x10] sm:$0xff]  ;;  %s7268_s3 = sld [smem:[#allocation47_spill]] }
 0x12c   : > { %v5477_v61 = vld [vmem:[%s7261_s6 + $0x8] sm:$0xff]  ;;  %v5476_v62 = vld [vmem:[%s7261_s6] sm:$0xff]  ;;  %v4371_v0 = vld [vmem:[%s7262_s4 + $0x30] sm:$0xf]  ;;  %s7269_s24 = sld [smem:[#allocation52_spill]] }
 0x12d   : > { %v5491_v1 = vld [vmem:[%s7262_s4 + $0x34] sm:$0xf0]  ;;  %v5490_v2 = vld [vmem:[%s7262_s4 + $0x34] sm:$0xf]  ;;  %v5489_v6 = vld [vmem:[%s7262_s4 + $0x24] sm:$0xf0] }
 0x12e   : > { %1660 = vmatpush.bf16.msra.mxu1 %v4250_v27  ;;  %1674 = vmatpush.bf16.msra.mxu3 %v4254_v29  ;;  %v5962_v10 = vld [vmem:[%s7263_s2] ss:$0 sm:$0xff]  ;;  %v5488_v22 = vld [vmem:[%s7262_s4 + $0x24] sm:$0xf]  ;;  %v4365_v23 = vld [vmem:[%s7262_s4 + $0x28] sm:$0xf0] }
 0x12f   : > { %1811 = vmatpush.bf16.msrb.mxu0 %v5482_v55  ;;  %v4368_v24 = vor.u32 %v5488_v22, %v4365_v23  ;;  %v4355_v25 = vld [vmem:[%s7262_s4 + $0x10] sm:$0xf]  ;;  %v5487_v26 = vld [vmem:[%s7262_s4 + $0x14] sm:$0xf0]  ;;  %v5486_v27 = vld [vmem:[%s7262_s4 + $0x14] sm:$0xf] }
 0x130   : > { %v4356_v28 = vor.u32 %v5487_v26, %v4355_v25  ;;  %v4357_v29 = vld [vmem:[%s7262_s4 + $0x18] sm:$0xf0]  ;;  %s7270_s10 = sld [smem:[#allocation48_spill]] }
 0x131   : > { %v5507_v55 = vld [vmem:[%s7265_s11 + $0x38] sm:$0xff]  ;;  %s7271_s8 = sld [smem:[#allocation50_spill]] }
 0x132   : > { %1740 = vmatpush.bf16.msrb.mxu3 %v5475_v30  ;;  %v4360_v30 = vor.u32 %v5486_v27, %v4357_v29  ;;  %s7272_s2 = sld [smem:[#allocation49_spill]] }
 0x133   : > { %1812 = vmatpush.bf16.msrb.mxu0 %v5481_v56 }
 0x136   : > { %1741 = vmatpush.bf16.msrb.mxu3 %v5474_v31  ;;  %v4347_v31 = vld [vmem:[%s7262_s4] sm:$0xf] }
 0x137   : > { %1813 = vmatpush.bf16.msrb.mxu0 %v5480_v57  ;;  %v5963_v57 = vld [vmem:[#allocation11] ss:$0 sm:$0xff] }
 0x13a   : > { %1742 = vmatpush.bf16.msrb.mxu3 %v5473_v32  ;;  %v5485_v32 = vld [vmem:[%s7262_s4 + $0x4] sm:$0xf0] }
 0x13b   : > { %1814 = vmatpush.bf16.msrb.mxu0 %v5479_v58 }
 0x13e   : > { %1743 = vmatpush.bf16.msrb.mxu3 %v5472_v33  ;;  %v5484_v33 = vld [vmem:[%s7262_s4 + $0x4] sm:$0xf] }
 0x13f   : > { %1815 = vmatpush.bf16.msrb.mxu0 %v5478_v60 }
 0x142   : > { %1744 = vmatpush.bf16.msrb.mxu3 %v5471_v42 }
 0x143   : > { %1816 = vmatpush.bf16.msrb.mxu0 %v5477_v61 }
 0x146   : > { %1745 = vmatpush.bf16.msrb.mxu3 %v5470_v43 }
 0x147   : > { %1817 = vmatpush.bf16.msrb.mxu0 %v5476_v62 }
 0x14a   : > { %1746 = vmatpush.bf16.msrb.mxu3 %v5469_v44 }
 0x14e   : > { %1747 = vmatpush.bf16.msrb.mxu3 %v5468_v45 }
 0x1c2   : > { %v1564_v3 = vpop.trf.xlu0 }
 0x1ca   : > { %v1565_v4 = vpop.trf.xlu0 }
 0x1cb   : > { %v1580_v5 = vpack.c.bf16 %v1565_v4, %v1564_v3  ;;  %v4372_v3 = vor.u32 %v5491_v1, %v4371_v0  ;;  %v4373_v4 = vld [vmem:[%s7262_s4 + $0x38] sm:$0xf0]  ;;  %v5506_v0 = vld [vmem:[%s7265_s11 + $0x30] sm:$0xff]  ;;  %v5505_v1 = vld [vmem:[%s7265_s11 + $0x28] sm:$0xff] }
 0x1cc   : > { %v4376_v7 = vor.u32 %v5490_v2, %v4373_v4  ;;  %v5504_v2 = vld [vmem:[%s7265_s11 + $0x20] sm:$0xff]  ;;  %v5502_v4 = vld [vmem:[%s7265_s11 + $0x10] sm:$0xff] }
 0x1cd   : > { %4246 = vmatmul.msk.bf16.vlgmr.msra.gmra.mxu0 %vm1584_vm1, %v1580_v5  ;;  %v4363_v5 = vld [vmem:[%s7262_s4 + $0x20] sm:$0xf]  ;;  %1876 = vmatpush.bf16.msrb.mxu1 %v4372_v3  ;;  %v5503_v3 = vld [vmem:[%s7265_s11 + $0x18] sm:$0xff] }
 0x1ce   : > { %v4364_v8 = vor.u32 %v5489_v6, %v4363_v5  ;;  %1890 = vmatpush.bf16.msra.mxu2 %v4376_v7  ;;  %v5501_v5 = vld [vmem:[%s7265_s11 + $0x8] sm:$0xff]  ;;  %v5500_v6 = vld [vmem:[%s7265_s11] sm:$0xff]  ;;  %v4505_v7 = vld [vmem:[%s7266_s18 + $0x78] sm:$0xf]  ;;  %s1153_s11 = scalar_lea.vmem [#allocation23], %s6877_s16 }
 0x1d1   : > { %1877 = vmatpush.bf16.msrb.mxu1 %v4364_v8  ;;  %v5525_v8 = vld [vmem:[%s7266_s18 + $0x88] sm:$0xf0] }
 0x1d2   : > { %1891 = vmatpush.bf16.msra.mxu2 %v4368_v24 }
 0x1d5   : > { %1878 = vmatpush.bf16.msrb.mxu1 %v4356_v28 }
 0x1d6   : > { %1892 = vmatpush.bf16.msra.mxu2 %v4360_v30 }
 0x24a   : > { %v1601_v34 = vpop.f32.mrf.mxu0 }
 0x24b   : > { %v1602_v36 = vadd.f32 %v5960_v35, %v1601_v34  ;;  %v4348_v34 = vor.u32 %v5485_v32, %v4347_v31  ;;  %v5518_v32 = vld [vmem:[%s7266_s18 + $0x54] sm:$0xf] }
 0x24d   : > { %v1606_v39 = vmax.f32 %v1602_v36, 0.0  ;;  %1879 = vmatpush.bf16.msrb.mxu1 %v4348_v34  ;;  %v4501_v34 = vld [vmem:[%s7266_s18 + $0x60] sm:$0xf] }
 0x252   : > { %v1603_v37 = vpop.f32.mrf.mxu0 }
 0x253   : > { %v1604_v38 = vadd.f32 %v5960_v35, %v1603_v37  ;;  %v4349_v35 = vld [vmem:[%s7262_s4 + $0x8] sm:$0xf0]  ;;  %v5499_v37 = vld [vmem:[%s7264_s12 + $0x38] sm:$0xff] }
 0x254   : > { %v4352_v36 = vor.u32 %v5484_v33, %v4349_v35  ;;  %v4487_v33 = vld [vmem:[%s7266_s18 + $0x64] sm:$0xf0] }
 0x255   : > { %v1607_v40 = vmax.f32 %v1604_v38, 0.0  ;;  %v5498_v38 = vld [vmem:[%s7264_s12 + $0x30] sm:$0xff]  ;;  %v4490_v35 = vor.u32 %v5518_v32, %v4487_v33  ;;  %v5531_v32 = vld [vmem:[#allocation16 + $0x18] sm:$0xff] }
 0x256   : > { %1893 = vmatpush.bf16.msra.mxu2 %v4352_v36  ;;  %v5522_v36 = vld [vmem:[%s7266_s18 + $0x70] sm:$0xf0] }
 0x257   : > { %v1608_v41 = vpack.c.bf16 %v1607_v40, %v1606_v39  ;;  %v5497_v39 = vld [vmem:[%s7264_s12 + $0x28] sm:$0xff]  ;;  %v5496_v40 = vld [vmem:[%s7264_s12 + $0x20] sm:$0xff]  ;;  %v5530_v33 = vld [vmem:[#allocation16 + $0x10] sm:$0xff] }
 0x259   : > { %4279 = vmatmul.msk.bf16.vlgmr.msra.gmra.mxu1 %vm1649_vm2, %v1608_v41  ;;  %4280 = vmatmul.msk.bf16.vlgmr.msra.gmra.mxu3 %vm1649_vm2, %v1608_v41  ;;  %v1199_v41 = vld [vmem:[#allocation10] sm:$0x1] }
 0x25a   : > { %1959 = vmatpush.bf16.msra.mxu1 %v5499_v37  ;;  %2029 = vmatpush.bf16.msrb.mxu2 %v5507_v55  ;;  %v4502_v37 = vor.u32 %v5522_v36, %v4501_v34  ;;  %v5529_v34 = vld [vmem:[#allocation16 + $0x8] sm:$0xff]  ;;  %v4786_v36 = vld [vmem:[#allocation19 + $0x1c0] sm:$0xf] }
 0x25e   : > { %1960 = vmatpush.bf16.msra.mxu1 %v5498_v38  ;;  %2030 = vmatpush.bf16.msrb.mxu2 %v5506_v0  ;;  %v4465_v38 = vld [vmem:[%s7266_s18 + $0x28] sm:$0xf]  ;;  %v5519_v0 = vld [vmem:[%s7266_s18 + $0x5c] sm:$0xf] }
 0x262   : > { %1961 = vmatpush.bf16.msra.mxu1 %v5497_v39  ;;  %2031 = vmatpush.bf16.msrb.mxu2 %v5505_v1  ;;  %v5515_v39 = vld [vmem:[%s7266_s18 + $0x38] sm:$0xf0] }
 0x266   : > { %1962 = vmatpush.bf16.msra.mxu1 %v5496_v40  ;;  %2032 = vmatpush.bf16.msrb.mxu2 %v5504_v2  ;;  %v5513_v40 = vld [vmem:[%s7266_s18 + $0x2c] sm:$0xf]  ;;  %v4495_v2 = vld [vmem:[%s7266_s18 + $0x6c] sm:$0xf0] }
 0x26a   : > { %2033 = vmatpush.bf16.msrb.mxu2 %v5503_v3 }
 0x26e   : > { %2034 = vmatpush.bf16.msrb.mxu2 %v5502_v4  ;;  %v4498_v4 = vor.u32 %v5519_v0, %v4495_v2  ;;  %v4730_v0 = vld [vmem:[#allocation19 + $0x148] sm:$0xf] }
 0x26f   : > { %v5661_v2 = vld [vmem:[#allocation19 + $0x164] sm:$0xf0] }
 0x272   : > { %2035 = vmatpush.bf16.msrb.mxu2 %v5501_v5  ;;  %v4473_v5 = vld [vmem:[%s7266_s18 + $0x30] sm:$0xf] }
 0x276   : > { %2036 = vmatpush.bf16.msrb.mxu2 %v5500_v6  ;;  %v5516_v6 = vld [vmem:[%s7266_s18 + $0x40] sm:$0xf0] }
 0x2d6   : > { %v1662_v47 = vpop.f32.mrf.mxu1 }
 0x2d7   : > { %v1684_v49 = vadd.f32 %v5961_v48, %v1662_v47 }
 0x2d9   : > { %v1686_v52 = vmax.f32 %v1684_v49, 0.0 }
 0x2dc   : > { %v6942_v59 = vpop.f32.mrf.mxu3 }
 0x2de   : > { %v1664_v50 = vpop.f32.mrf.mxu1 }
 0x2df   : > { %v1685_v51 = vadd.f32 %v5961_v48, %v1664_v50 }
 0x2e1   : > { %v1687_v53 = vmax.f32 %v1685_v51, 0.0  ;;  %v5495_v51 = vld [vmem:[%s7264_s12 + $0x18] sm:$0xff] }
 0x2e2   : > { %1963 = vmatpush.bf16.msra.mxu1 %v5495_v51  ;;  %v4447_v51 = vld [vmem:[%s7266_s18 + $0x14] sm:$0xf0] }
 0x2e3   : > { %v1688_v54 = vpack.c.bf16 %v1687_v53, %v1686_v52  ;;  %v5494_v52 = vld [vmem:[%s7264_s12 + $0x10] sm:$0xff]  ;;  %v5493_v53 = vld [vmem:[%s7264_s12 + $0x8] sm:$0xff] }
 0x2e4   : > { %v1678_v63 = vpop.f32.mrf.mxu3 }
 0x2e5   : > { %1748 = vmatmul.bf16.vlgmr.msrb.gmra.mxu3 %v1688_v54  ;;  %v5492_v54 = vld [vmem:[%s7264_s12] sm:$0xff]  ;;  %s7139_s12 = sshll.u32 %s1153_s11, 4  ;;  %s3980_s12 = int_to_ptr.vmem [resolvable:$true] %s7139_s12 }
 0x2e6   : > { %1964 = vmatpush.bf16.msra.mxu1 %v5494_v52  ;;  %v4461_v52 = vld [vmem:[%s7266_s18 + $0x10] sm:$0xf] }
 0x2ea   : > { %1965 = vmatpush.bf16.msra.mxu1 %v5493_v53  ;;  %v5512_v53 = vld [vmem:[%s7266_s18 + $0x20] sm:$0xf0] }
 0x2eb   : > { %v4462_v55 = vor.u32 %v5512_v53, %v4461_v52 }
 0x2ee   : > { %1966 = vmatpush.bf16.msra.mxu1 %v5492_v54 }
 0x368   : > { %v1749_v9 = vpop.f32.mrf.mxu3 }
 0x369   : > { %v1750_v12 = vadd.f32 %v5962_v10, %v1749_v9  ;;  %v5523_v9 = vld [vmem:[%s7266_s18 + $0x7c] sm:$0xf] }
 0x370   : > { %v1751_v11 = vpop.f32.mrf.mxu3 }
 0x371   : > { %v1752_v13 = vadd.f32 %v5962_v10, %v1751_v11  ;;  %v4506_v10 = vor.u32 %v5525_v8, %v4505_v7  ;;  %v4507_v11 = vld [vmem:[%s7266_s18 + $0x8c] sm:$0xf0]  ;;  %v5514_v7 = vld [vmem:[%s7266_s18 + $0x34] sm:$0xf]  ;;  %v4475_v8 = vld [vmem:[%s7266_s18 + $0x44] sm:$0xf0] }
 0x373   : > { %v1754_v14 = vmax.f32 %v1750_v12, %v1752_v13  ;;  %v4521_v12 = vld [vmem:[%s7266_s18 + $0x88] sm:$0xf]  ;;  %v5527_v13 = vld [vmem:[%s7266_s18 + $0x98] sm:$0xf0]  ;;  %2159 = vmatpush.bf16.msra.mxu3 %v4506_v10  ;;  %v4478_v10 = vor.u32 %v5514_v7, %v4475_v8  ;;  %v4731_v7 = vor.u32 %v5661_v2, %v4730_v0  ;;  %v4690_v8 = vld [vmem:[#allocation19 + $0x100] sm:$0xf] }
 0x374   : > { %v4562_v0 = vld [vmem:[#allocation19] sm:$0xf]  ;;  %v5616_v2 = vld [vmem:[#allocation19 + $0x4] sm:$0xf] }
 0x375   : > { %v1755_v15 = vrot.slane %v1754_v14, 4 }
 0x377   : > { %v1756_v16 = vmax.f32 %v1754_v14, %v1755_v15  ;;  %v4510_v14 = vor.u32 %v5523_v9, %v4507_v11  ;;  %v4522_v15 = vor.u32 %v5527_v13, %v4521_v12  ;;  %v4474_v9 = vor.u32 %v5516_v6, %v4473_v5  ;;  %v4453_v11 = vld [vmem:[%s7266_s18 + $0x8] sm:$0xf]  ;;  %v5511_v12 = vld [vmem:[%s7266_s18 + $0x18] sm:$0xf0]  ;;  %v5509_v13 = vld [vmem:[%s7266_s18 + $0xc] sm:$0xf] }
 0x379   : > { %v1757_v17 = vrot.slane %v1756_v16, 2  ;;  %2173 = vmatpush.bf16.msra.mxu0 %v4510_v14  ;;  %v4455_v14 = vld [vmem:[%s7266_s18 + $0x1c] sm:$0xf0] }
 0x37b   : > { %v1758_v18 = vmax.f32 %v1756_v16, %v1757_v17  ;;  %v4485_v16 = vld [vmem:[%s7266_s18 + $0x50] sm:$0xf]  ;;  %v5520_v17 = vld [vmem:[%s7266_s18 + $0x60] sm:$0xf0] }
 0x37d   : > { %v1759_v19 = vrot.slane %v1758_v18, 1  ;;  %2174 = vmatpush.bf16.msra.mxu0 %v4490_v35  ;;  %v5528_v35 = vld [vmem:[#allocation16] sm:$0xff] }
 0x37f   : > { %v1760_v20 = vmax.f32 %v1758_v18, %v1759_v19  ;;  %v4486_v18 = vor.u32 %v5520_v17, %v4485_v16  ;;  %v4458_v16 = vor.u32 %v5509_v13, %v4455_v14  ;;  %v4698_v13 = vld [vmem:[#allocation19 + $0x108] sm:$0xf] }
 0x380   : > { %v5653_v14 = vld [vmem:[#allocation19 + $0x124] sm:$0xf0] }
 0x381   : > { %v1761_v21 = vpack.c.bf16 %v1760_v20, %v1760_v20  ;;  %2160 = vmatpush.bf16.msra.mxu3 %v4486_v18  ;;  %v5964_v20 = vld [vmem:[#allocation13] ss:$0 sm:$0xff] }
 0x382   : > { %v5535_v18 = vld [vmem:[#allocation16 + $0x38] sm:$0xff] }
 0x383   : > { %1818 = vmatmul.bf16.vlgmr.msrb.gmra.mxu0 %v1761_v21 }
 0x400   : > { %v1819_v42 = vpop.f32.mrf.mxu0 }
 0x401   : > { %v1820_v43 = vadd.f32 %v1819_v42, %v1199_v41  ;;  %v4466_v41 = vor.u32 %v5515_v39, %v4465_v38  ;;  %v4467_v42 = vld [vmem:[%s7266_s18 + $0x3c] sm:$0xf0]  ;;  %v5672_v38 = vld [vmem:[#allocation19 + $0x1c4] sm:$0xf] }
 0x403   : > { %v1823_v44 = vperm.slane %v1820_v43, 0  ;;  %v4481_v43 = vld [vmem:[%s7266_s18 + $0x38] sm:$0xf]  ;;  %2161 = vmatpush.bf16.msra.mxu3 %v4466_v41  ;;  %v4794_v41 = vld [vmem:[#allocation19 + $0x1c8] sm:$0xf] }
 0x405   : > { %v1824_v45 = vadd.f32 %v1823_v44, %v6942_v59  ;;  %v1825_v46 = vadd.f32 %v1823_v44, %v1678_v63  ;;  %v5517_v44 = vld [vmem:[%s7266_s18 + $0x48] sm:$0xf0] }
 0x407   : > { %v1826_v47 = vmax.f32 %v1824_v45, 0.0  ;;  %v1827_v48 = vmax.f32 %v1825_v46, 0.0  ;;  %v4470_v45 = vor.u32 %v5513_v40, %v4467_v42  ;;  %v4482_v46 = vor.u32 %v5517_v44, %v4481_v43  ;;  %v4788_v40 = vld [vmem:[#allocation19 + $0x1e0] sm:$0xf0]  ;;  %v5677_v42 = vld [vmem:[#allocation19 + $0x1e4] sm:$0xf0] }
 0x408   : > { %v1821_v49 = vpop.f32.mrf.mxu0  ;;  %v4791_v43 = vor.u32 %v5672_v38, %v4788_v40  ;;  %v4795_v44 = vor.u32 %v5677_v42, %v4794_v41  ;;  %v4626_v40 = vld [vmem:[#allocation19 + $0x80] sm:$0xf]  ;;  %v5632_v42 = vld [vmem:[#allocation19 + $0x84] sm:$0xf] }
 0x409   : > { %v1828_v50 = vpack.c.bf16 %v1827_v48, %v1826_v47  ;;  %2175 = vmatpush.bf16.msra.mxu0 %v4470_v45  ;;  %v4445_v47 = vld [vmem:[%s7266_s18] sm:$0xf]  ;;  %v5510_v48 = vld [vmem:[%s7266_s18 + $0x10] sm:$0xf0]  ;;  %v5508_v49 = vld [vmem:[%s7266_s18 + $0x4] sm:$0xf] }
 0x40a   : > { %v4450_v54 = vor.u32 %v5508_v49, %v4447_v51  ;;  %v5673_v45 = vld [vmem:[#allocation19 + $0x1cc] sm:$0xf]  ;;  %v5668_v49 = vld [vmem:[#allocation19 + $0x19c] sm:$0xf0]  ;;  %v4756_v51 = vld [vmem:[#allocation19 + $0x1a0] sm:$0xf0] }
 0x40b   : > { %4377 = vmatmul.msk.bf16.vlgmr.msrb.gmra.mxu1 %vm1649_vm2, %v1828_v50  ;;  %4378 = vmatmul.msk.bf16.vlgmr.msra.gmra.mxu2 %vm1649_vm2, %v1828_v50  ;;  %v4446_v50 = vor.u32 %v5510_v48, %v4445_v47  ;;  %v4754_v47 = vld [vmem:[#allocation19 + $0x180] sm:$0xf] }
 0x40c   : > { %2215 = vmatpush.bf16.msrb.mxu1 %v4522_v15  ;;  %v4454_v15 = vor.u32 %v5511_v12, %v4453_v11  ;;  %2284 = vmatpush.bf16.msra.mxu2 %v5535_v18  ;;  %v4755_v52 = vor.u32 %v5668_v49, %v4754_v47  ;;  %v4692_v12 = vld [vmem:[#allocation19 + $0x120] sm:$0xf0]  ;;  %v5636_v41 = vld [vmem:[#allocation19 + $0x9c] sm:$0xf0]  ;;  %v5633_v49 = vld [vmem:[#allocation19 + $0x8c] sm:$0xf] }
 0x40d   : > { %2162 = vmatpush.bf16.msra.mxu3 %v4446_v50  ;;  %2176 = vmatpush.bf16.msra.mxu0 %v4450_v54  ;;  %v5664_v50 = vld [vmem:[#allocation19 + $0x184] sm:$0xf]  ;;  %v4762_v54 = vld [vmem:[#allocation19 + $0x188] sm:$0xf] }
 0x40e   : > { %v4759_v53 = vor.u32 %v5664_v50, %v4756_v51  ;;  %v4636_v50 = vld [vmem:[#allocation19 + $0xa8] sm:$0xf0]  ;;  %v4594_v51 = vld [vmem:[#allocation19 + $0x40] sm:$0xf] }
 0x410   : > { %2216 = vmatpush.bf16.msrb.mxu1 %v4502_v37  ;;  %v5676_v37 = vld [vmem:[#allocation19 + $0x1dc] sm:$0xf0] }
 0x411   : > { %v4787_v39 = vor.u32 %v5676_v37, %v4786_v36 }
 0x414   : > { %2217 = vmatpush.bf16.msrb.mxu1 %v4482_v46  ;;  %v4796_v46 = vld [vmem:[#allocation19 + $0x1e8] sm:$0xf0] }
 0x415   : > { %v4799_v48 = vor.u32 %v5673_v45, %v4796_v46  ;;  %v4634_v45 = vld [vmem:[#allocation19 + $0x88] sm:$0xf] }
 0x416   : > { %v5637_v46 = vld [vmem:[#allocation19 + $0xa4] sm:$0xf0] }
 0x418   : > { %2218 = vmatpush.bf16.msrb.mxu1 %v4462_v55  ;;  %v5669_v55 = vld [vmem:[#allocation19 + $0x1a4] sm:$0xf0] }
 0x488   : > { %v1881_v56 = vpop.f32.mrf.mxu1 }
 0x489   : > { %v1903_v58 = vadd.f32 %v5963_v57, %v1881_v56  ;;  %v4513_v56 = vld [vmem:[%s7266_s18 + $0x80] sm:$0xf] }
 0x48b   : > { %v1905_v61 = vmax.f32 %v1903_v58, 0.0  ;;  %v5524_v58 = vld [vmem:[%s7266_s18 + $0x84] sm:$0xf] }
 0x48e   : > { %v1895_v3 = vpop.f32.mrf.mxu2 }
 0x490   : > { %v1883_v59 = vpop.f32.mrf.mxu1 }
 0x491   : > { %v1904_v60 = vadd.f32 %v5963_v57, %v1883_v59  ;;  %v5526_v57 = vld [vmem:[%s7266_s18 + $0x90] sm:$0xf0] }
 0x492   : > { %v4514_v59 = vor.u32 %v5526_v57, %v4513_v56  ;;  %v5665_v56 = vld [vmem:[#allocation19 + $0x18c] sm:$0xf]  ;;  %v4763_v57 = vor.u32 %v5669_v55, %v4762_v54  ;;  %v5624_v54 = vld [vmem:[#allocation19 + $0x44] sm:$0xf] }
 0x493   : > { %v1906_v62 = vmax.f32 %v1904_v60, 0.0  ;;  %v4515_v60 = vld [vmem:[%s7266_s18 + $0x94] sm:$0xf0]  ;;  %v4596_v55 = vld [vmem:[#allocation19 + $0x60] sm:$0xf0] }
 0x494   : > { %2187 = vmatpush.bf16.msrb.mxu3 %v4514_v59  ;;  %v4722_v59 = vld [vmem:[#allocation19 + $0x140] sm:$0xf] }
 0x495   : > { %v1907_v63 = vpack.c.bf16 %v1906_v62, %v1905_v61  ;;  %v4518_v61 = vor.u32 %v5524_v58, %v4515_v60  ;;  %v4493_v62 = vld [vmem:[%s7266_s18 + $0x58] sm:$0xf]  ;;  %v4764_v58 = vld [vmem:[#allocation19 + $0x1a8] sm:$0xf0]  ;;  %v5660_v60 = vld [vmem:[#allocation19 + $0x15c] sm:$0xf0] }
 0x496   : > { %v1897_v17 = vpop.f32.mrf.mxu2 }
 0x497   : > { %1967 = vmatmul.bf16.vlgmr.msra.gmra.mxu1 %v1907_v63  ;;  %v5521_v63 = vld [vmem:[%s7266_s18 + $0x68] sm:$0xf0]  ;;  %2201 = vmatpush.bf16.msrb.mxu0 %v4518_v61  ;;  %v4767_v61 = vor.u32 %v5665_v56, %v4764_v58  ;;  %v4602_v58 = vld [vmem:[#allocation19 + $0x48] sm:$0xf] }
 0x498   : > { %v4494_v1 = vor.u32 %v5521_v63, %v4493_v62  ;;  %2652 = vmatpush.bf16.msra.mxu1 %v4795_v44  ;;  %v5656_v62 = vld [vmem:[#allocation19 + $0x144] sm:$0xf] }
 0x499   : > { %v4724_v63 = vld [vmem:[#allocation19 + $0x160] sm:$0xf0] }
 0x49a   : > { %2188 = vmatpush.bf16.msrb.mxu3 %v4494_v1  ;;  %v4723_v1 = vor.u32 %v5660_v60, %v4722_v59  ;;  %v4727_v6 = vor.u32 %v5656_v62, %v4724_v63  ;;  %v4628_v44 = vld [vmem:[#allocation19 + $0xa0] sm:$0xf0]  ;;  %v5629_v59 = vld [vmem:[#allocation19 + $0x64] sm:$0xf0]  ;;  %v5625_v60 = vld [vmem:[#allocation19 + $0x4c] sm:$0xf] }
 0x49b   : > { %2202 = vmatpush.bf16.msrb.mxu0 %v4498_v4  ;;  %v4732_v4 = vld [vmem:[#allocation19 + $0x168] sm:$0xf0]  ;;  %v4631_v47 = vor.u32 %v5632_v42, %v4628_v44  ;;  %v5663_v42 = vld [vmem:[#allocation19 + $0x174] sm:$0xf0] }
 0x49c   : > { %2653 = vmatpush.bf16.msra.mxu1 %v4763_v57  ;;  %v4599_v57 = vor.u32 %v5624_v54, %v4596_v55  ;;  %v4604_v62 = vld [vmem:[#allocation19 + $0x68] sm:$0xf0]  ;;  %v5655_v54 = vld [vmem:[#allocation19 + $0x134] sm:$0xf0] }
 0x49d   : > { %v4607_v63 = vor.u32 %v5625_v60, %v4604_v62  ;;  %v4674_v60 = vld [vmem:[#allocation19 + $0xd0] sm:$0xf]  ;;  %v5642_v62 = vld [vmem:[#allocation19 + $0xd4] sm:$0xf] }
 0x49e   : > { %2189 = vmatpush.bf16.msrb.mxu3 %v4474_v9  ;;  %v5652_v9 = vld [vmem:[#allocation19 + $0x11c] sm:$0xf0] }
 0x49f   : > { %2203 = vmatpush.bf16.msrb.mxu0 %v4478_v10  ;;  %v5648_v10 = vld [vmem:[#allocation19 + $0x104] sm:$0xf]  ;;  %v4691_v18 = vor.u32 %v5652_v9, %v4690_v8  ;;  %v5617_v9 = vld [vmem:[#allocation19 + $0xc] sm:$0xf] }
 0x4a0   : > { %2654 = vmatpush.bf16.msra.mxu1 %v4731_v7 }
 0x4a2   : > { %2190 = vmatpush.bf16.msrb.mxu3 %v4454_v15  ;;  %v5649_v15 = vld [vmem:[#allocation19 + $0x10c] sm:$0xf] }
 0x4a3   : > { %2204 = vmatpush.bf16.msrb.mxu0 %v4458_v16  ;;  %v4700_v16 = vld [vmem:[#allocation19 + $0x128] sm:$0xf0] }
 0x514   : > { %v1968_v19 = vpop.f32.mrf.mxu1 }
 0x515   : > { %v1969_v22 = vadd.f32 %v5964_v20, %v1968_v19  ;;  %v5534_v19 = vld [vmem:[#allocation16 + $0x30] sm:$0xff] }
 0x516   : > { %2285 = vmatpush.bf16.msra.mxu2 %v5534_v19  ;;  %v4695_v19 = vor.u32 %v5648_v10, %v4692_v12  ;;  %v4572_v10 = vld [vmem:[#allocation19 + $0x28] sm:$0xf0] }
 0x517   : > { %v4575_v12 = vor.u32 %v5617_v9, %v4572_v10  ;;  %v5638_v9 = vld [vmem:[#allocation19 + $0xac] sm:$0xf0]  ;;  %v5634_v10 = vld [vmem:[#allocation19 + $0x94] sm:$0xf] }
 0x51c   : > { %v1970_v21 = vpop.f32.mrf.mxu1 }
 0x51d   : > { %v1971_v23 = vadd.f32 %v5964_v20, %v1970_v21  ;;  %v1242_v20 = vld [vmem:[#allocation14] sm:$0x1] }
 0x51f   : > { %v1973_v24 = vmax.f32 %v1969_v22, %v1971_v23  ;;  %v5533_v23 = vld [vmem:[#allocation16 + $0x28] sm:$0xff] }
 0x520   : > { %2286 = vmatpush.bf16.msra.mxu2 %v5533_v23  ;;  %v5640_v23 = vld [vmem:[#allocation19 + $0xc4] sm:$0xf] }
 0x521   : > { %v1974_v25 = vrot.slane %v1973_v24, 4 }
 0x523   : > { %v1975_v26 = vmax.f32 %v1973_v24, %v1974_v25 }
 0x525   : > { %v1976_v27 = vrot.slane %v1975_v26, 2 }
 0x527   : > { %v1977_v28 = vmax.f32 %v1975_v26, %v1976_v27 }
 0x529   : > { %v1978_v29 = vrot.slane %v1977_v28, 1 }
 0x52b   : > { %v1979_v30 = vmax.f32 %v1977_v28, %v1978_v29 }
 0x52d   : > { %v1980_v31 = vpack.c.bf16 %v1979_v30, %v1979_v30 }
 0x52f   : > { %2037 = vmatmul.bf16.vlgmr.msrb.gmra.mxu2 %v1980_v31  ;;  %v5532_v31 = vld [vmem:[#allocation16 + $0x20] sm:$0xff] }
 0x530   : > { %2287 = vmatpush.bf16.msra.mxu2 %v5532_v31 }
 0x534   : > { %2288 = vmatpush.bf16.msra.mxu2 %v5531_v32 }
 0x538   : > { %2289 = vmatpush.bf16.msra.mxu2 %v5530_v33 }
 0x53c   : > { %2290 = vmatpush.bf16.msra.mxu2 %v5529_v34 }
 0x540   : > { %2291 = vmatpush.bf16.msra.mxu2 %v5528_v35 }
 0x544   : > { %2665 = vmatpush.bf16.msrb.mxu2 %v4799_v48  ;;  %v4635_v48 = vor.u32 %v5637_v46, %v4634_v45  ;;  %v5659_v45 = vld [vmem:[#allocation19 + $0x15c] sm:$0xf] }
 0x545   : > { %v4748_v46 = vld [vmem:[#allocation19 + $0x178] sm:$0xf0] }
 0x548   : > { %2666 = vmatpush.bf16.msrb.mxu2 %v4767_v61  ;;  %v4603_v61 = vor.u32 %v5629_v59, %v4602_v58  ;;  %v4716_v58 = vld [vmem:[#allocation19 + $0x138] sm:$0xf0] }
 0x5b2   : > { %v2038_v21 = vpop.f32.mrf.mxu2 }
 0x5b3   : > { %v2039_v22 = vadd.f32 %v2038_v21, %v1242_v20  ;;  %v4699_v20 = vor.u32 %v5653_v14, %v4698_v13  ;;  %v4658_v21 = vld [vmem:[#allocation19 + $0xc0] sm:$0xf]  ;;  %v5678_v13 = vld [vmem:[#allocation19 + $0x1ec] sm:$0xf0]  ;;  %v5674_v14 = vld [vmem:[#allocation19 + $0x1d4] sm:$0xf] }
 0x5b5   : > { %v2042_v24 = vperm.slane %v2039_v22, 0  ;;  %v5644_v22 = vld [vmem:[#allocation19 + $0xdc] sm:$0xf0]  ;;  %2655 = vmatpush.bf16.msra.mxu1 %v4699_v20  ;;  %v5675_v20 = vld [vmem:[#allocation19 + $0x1dc] sm:$0xf] }
 0x5b6   : > { %v4659_v31 = vor.u32 %v5644_v22, %v4658_v21  ;;  %v4812_v22 = vld [vmem:[#allocation19 + $0x1f8] sm:$0xf0] }
 0x5b7   : > { %v2043_v25 = vadd.f32 %v2042_v24, %v1895_v3  ;;  %v2044_v26 = vadd.f32 %v2042_v24, %v1897_v17  ;;  %v5657_v3 = vld [vmem:[#allocation19 + $0x14c] sm:$0xf]  ;;  %v5965_v17 = vld [vmem:[%s7267_s7] ss:$0 sm:$0xff]  ;;  %v4703_v24 = vor.u32 %v5649_v15, %v4700_v16  ;;  %v4804_v15 = vld [vmem:[#allocation19 + $0x1f0] sm:$0xf0] }
 0x5b8   : > { %v4735_v11 = vor.u32 %v5657_v3, %v4732_v4  ;;  %v4564_v4 = vld [vmem:[#allocation19 + $0x20] sm:$0xf0]  ;;  %s7273_s7 = sld [smem:[#allocation54_spill]] }
 0x5b9   : > { %v2045_v27 = vmax.f32 %v2043_v25, 0.0  ;;  %v2046_v28 = vmax.f32 %v2044_v26, 0.0  ;;  %v4660_v25 = vld [vmem:[#allocation19 + $0xe0] sm:$0xf0]  ;;  %v4666_v26 = vld [vmem:[#allocation19 + $0xc8] sm:$0xf]  ;;  %v4567_v7 = vor.u32 %v5616_v2, %v4564_v4 }
 0x5ba   : > { %v2040_v29 = vpop.f32.mrf.mxu2  ;;  %2667 = vmatpush.bf16.msrb.mxu2 %v4735_v11  ;;  %v4663_v33 = vor.u32 %v5640_v23, %v4660_v25  ;;  %v4802_v11 = vld [vmem:[#allocation19 + $0x1d0] sm:$0xf]  ;;  %v4815_v25 = vor.u32 %v5675_v20, %v4812_v22  ;;  %v5647_v2 = vld [vmem:[#allocation19 + $0xf4] sm:$0xf0]  ;;  %v5626_v22 = vld [vmem:[#allocation19 + $0x54] sm:$0xf] }
 0x5bb   : > { %v2047_v30 = vpack.c.bf16 %v2046_v28, %v2045_v27  ;;  %v5645_v27 = vld [vmem:[#allocation19 + $0xe4] sm:$0xf0]  ;;  %v5641_v28 = vld [vmem:[#allocation19 + $0xcc] sm:$0xf]  ;;  %v4803_v16 = vor.u32 %v5678_v13, %v4802_v11  ;;  %v4770_v23 = vld [vmem:[#allocation19 + $0x190] sm:$0xf] }
 0x5bc   : > { %v4668_v29 = vld [vmem:[#allocation19 + $0xe8] sm:$0xf0]  ;;  %v4667_v34 = vor.u32 %v5645_v27, %v4666_v26  ;;  %v5666_v27 = vld [vmem:[#allocation19 + $0x194] sm:$0xf]  ;;  %v5639_v13 = vld [vmem:[#allocation19 + $0xb4] sm:$0xf0] }
 0x5bd   : > { %4523 = vmatmul.msk.bf16.vlgmr.msra.gmra.mxu3 %vm1649_vm2, %v2047_v30  ;;  %4524 = vmatmul.msk.bf16.vlgmr.msra.gmra.mxu0 %vm1649_vm2, %v2047_v30  ;;  %v4671_v36 = vor.u32 %v5641_v28, %v4668_v29  ;;  %v4772_v28 = vld [vmem:[#allocation19 + $0x1b0] sm:$0xf0]  ;;  %v4778_v29 = vld [vmem:[#allocation19 + $0x198] sm:$0xf] }
 0x5be   : > { %4527 = vmatmul.msk.bf16.vlgmr.msrb.gmra.mxu1 %vm1649_vm2, %v2047_v30  ;;  %2626 = vmatpush.bf16.msra.mxu3 %v4787_v39  ;;  %v4644_v11 = vld [vmem:[#allocation19 + $0xb0] sm:$0xf0] }
 0x5bf   : > { %2639 = vmatpush.bf16.msra.mxu0 %v4791_v43  ;;  %2668 = vmatpush.bf16.msrb.mxu2 %v4703_v24  ;;  %v4627_v43 = vor.u32 %v5636_v41, %v4626_v40  ;;  %v5670_v24 = vld [vmem:[#allocation19 + $0x1ac] sm:$0xf0]  ;;  %v4740_v40 = vld [vmem:[#allocation19 + $0x170] sm:$0xf0]  ;;  %v4746_v41 = vld [vmem:[#allocation19 + $0x158] sm:$0xf] }
 0x5c0   : > { %2656 = vmatpush.bf16.msra.mxu1 %v4667_v34  ;;  %v4771_v26 = vor.u32 %v5670_v24, %v4770_v23  ;;  %v4747_v44 = vor.u32 %v5663_v42, %v4746_v41  ;;  %v4612_v23 = vld [vmem:[#allocation19 + $0x70] sm:$0xf0]  ;;  %v4588_v41 = vld [vmem:[#allocation19 + $0x38] sm:$0xf0] }
 0x5c2   : > { %2627 = vmatpush.bf16.msra.mxu3 %v4755_v52  ;;  %v4639_v52 = vor.u32 %v5633_v49, %v4636_v50  ;;  %v5654_v49 = vld [vmem:[#allocation19 + $0x12c] sm:$0xf0]  ;;  %v5650_v50 = vld [vmem:[#allocation19 + $0x114] sm:$0xf] }
 0x5c3   : > { %2640 = vmatpush.bf16.msra.mxu0 %v4759_v53  ;;  %2669 = vmatpush.bf16.msrb.mxu2 %v4671_v36  ;;  %v5628_v53 = vld [vmem:[#allocation19 + $0x5c] sm:$0xf0]  ;;  %v4738_v36 = vld [vmem:[#allocation19 + $0x150] sm:$0xf] }
 0x5c4   : > { %2657 = vmatpush.bf16.msra.mxu1 %v4635_v48  ;;  %v4595_v56 = vor.u32 %v5628_v53, %v4594_v51  ;;  %v4706_v48 = vld [vmem:[#allocation19 + $0x110] sm:$0xf]  ;;  %v4714_v53 = vld [vmem:[#allocation19 + $0x118] sm:$0xf] }
 0x5c5   : > { %v4707_v51 = vor.u32 %v5654_v49, %v4706_v48 }
 0x5c6   : > { %2628 = vmatpush.bf16.msra.mxu3 %v4723_v1  ;;  %v5620_v1 = vld [vmem:[#allocation19 + $0x1c] sm:$0xf0] }
 0x5c7   : > { %2641 = vmatpush.bf16.msra.mxu0 %v4727_v6  ;;  %2670 = vmatpush.bf16.msrb.mxu2 %v4639_v52  ;;  %v4563_v3 = vor.u32 %v5620_v1, %v4562_v0  ;;  %v5621_v6 = vld [vmem:[#allocation19 + $0x24] sm:$0xf0]  ;;  %v4708_v52 = vld [vmem:[#allocation19 + $0x130] sm:$0xf0]  ;;  %v4682_v1 = vld [vmem:[#allocation19 + $0xd8] sm:$0xf] }
 0x5c8   : > { %2658 = vmatpush.bf16.msra.mxu1 %v4603_v61  ;;  %v4711_v55 = vor.u32 %v5650_v50, %v4708_v52  ;;  %v5646_v61 = vld [vmem:[#allocation19 + $0xec] sm:$0xf0]  ;;  %v4676_v0 = vld [vmem:[#allocation19 + $0xf0] sm:$0xf0]  ;;  %v4683_v4 = vor.u32 %v5647_v2, %v4682_v1  ;;  %v4994_v2 = vld [vmem:[#allocation17 + $0x160] sm:$0xf] }
 0x5ca   : > { %2629 = vmatpush.bf16.msra.mxu3 %v4691_v18  ;;  %v4810_v18 = vld [vmem:[#allocation19 + $0x1d8] sm:$0xf] }
 0x5cb   : > { %2642 = vmatpush.bf16.msra.mxu0 %v4695_v19  ;;  %2671 = vmatpush.bf16.msrb.mxu2 %v4607_v63  ;;  %v5679_v19 = vld [vmem:[#allocation19 + $0x1f4] sm:$0xf0]  ;;  %v4675_v63 = vor.u32 %v5646_v61, %v4674_v60 }
 0x5cc   : > { %v4811_v21 = vor.u32 %v5679_v19, %v4810_v18  ;;  %v4610_v18 = vld [vmem:[#allocation19 + $0x50] sm:$0xf]  ;;  %v5567_v61 = vld [vmem:[#allocation17 + $0xf4] sm:$0xf0] }
 0x5cd   : > { %4525 = vmatmul.msk.bf16.vlgmr.msrb.gmra.mxu3 %vm1649_vm2, %v2047_v30  ;;  %4526 = vmatmul.msk.bf16.vlgmr.msrb.gmra.mxu0 %vm1649_vm2, %v2047_v30 }
 0x5ce   : > { %2630 = vmatpush.bf16.msra.mxu3 %v4659_v31  ;;  %v5671_v31 = vld [vmem:[#allocation19 + $0x1b4] sm:$0xf0] }
 0x5cf   : > { %2643 = vmatpush.bf16.msra.mxu0 %v4663_v33  ;;  %2672 = vmatpush.bf16.msrb.mxu2 %v4575_v12  ;;  %v4780_v33 = vld [vmem:[#allocation19 + $0x1b8] sm:$0xf0]  ;;  %v4779_v34 = vor.u32 %v5671_v31, %v4778_v29  ;;  %v4650_v12 = vld [vmem:[#allocation19 + $0x98] sm:$0xf]  ;;  %v4578_v31 = vld [vmem:[#allocation19 + $0x10] sm:$0xf] }
 0x5d0   : > { %v4651_v20 = vor.u32 %v5639_v13, %v4650_v12  ;;  %v5549_v12 = vld [vmem:[#allocation17 + $0x64] sm:$0xf0] }
 0x5d2   : > { %2631 = vmatpush.bf16.msra.mxu3 %v4627_v43 }
 0x5d3   : > { %2644 = vmatpush.bf16.msra.mxu0 %v4631_v47  ;;  %v4751_v47 = vor.u32 %v5659_v45, %v4748_v46 }
 0x5d6   : > { %2632 = vmatpush.bf16.msra.mxu3 %v4595_v56  ;;  %v4715_v56 = vor.u32 %v5655_v54, %v4714_v53 }
 0x5d7   : > { %2645 = vmatpush.bf16.msra.mxu0 %v4599_v57  ;;  %v5651_v57 = vld [vmem:[#allocation19 + $0x11c] sm:$0xf] }
 0x5d8   : > { %v4719_v59 = vor.u32 %v5651_v57, %v4716_v58  ;;  %v5066_v57 = vld [vmem:[#allocation17 + $0x1f0] sm:$0xf]  ;;  %v5599_v58 = vld [vmem:[#allocation17 + $0x1f4] sm:$0xf0] }
 0x5da   : > { %2633 = vmatpush.bf16.msra.mxu3 %v4563_v3  ;;  %v4679_v3 = vor.u32 %v5642_v62, %v4676_v0  ;;  %v4874_v62 = vld [vmem:[#allocation17 + $0x70] sm:$0xf] }
 0x5db   : > { %2646 = vmatpush.bf16.msra.mxu0 %v4567_v7  ;;  %v4642_v7 = vld [vmem:[#allocation19 + $0x90] sm:$0xf] }
 0x5de   : > { %2678 = vmatpush.bf16.msrb.mxu3 %v4803_v16  ;;  %v4647_v16 = vor.u32 %v5634_v10, %v4644_v11  ;;  %v5565_v10 = vld [vmem:[#allocation17 + $0xe4] sm:$0xf0]  ;;  %v4866_v11 = vld [vmem:[#allocation17 + $0x60] sm:$0xf] }
 0x5e2   : > { %2679 = vmatpush.bf16.msrb.mxu3 %v4771_v26  ;;  %v5631_v26 = vld [vmem:[#allocation19 + $0x74] sm:$0xf0] }
 0x640   : > { %v2164_v5 = vpop.f32.mrf.mxu3 }
 0x641   : > { %v2228_v30 = vadd.f32 %v5965_v17, %v2164_v5  ;;  %v4570_v5 = vld [vmem:[#allocation19 + $0x8] sm:$0xf] }
 0x642   : > { %v4571_v8 = vor.u32 %v5621_v6, %v4570_v5  ;;  %v5643_v5 = vld [vmem:[#allocation19 + $0xdc] sm:$0xf] }
 0x643   : > { %v2230_v37 = vmax.f32 %v2228_v30, 0.0  ;;  %v4775_v30 = vor.u32 %v5666_v27, %v4772_v28  ;;  %v4684_v6 = vld [vmem:[#allocation19 + $0xf8] sm:$0xf0] }
 0x644   : > { %2659 = vmatpush.bf16.msra.mxu1 %v4571_v8  ;;  %v4687_v8 = vor.u32 %v5643_v5, %v4684_v6  ;;  %v5627_v27 = vld [vmem:[#allocation19 + $0x5c] sm:$0xf]  ;;  %v5058_v5 = vld [vmem:[#allocation17 + $0x1e0] sm:$0xf]  ;;  %v5597_v6 = vld [vmem:[#allocation17 + $0x1e4] sm:$0xf0] }
 0x645   : > { %v4620_v28 = vld [vmem:[#allocation19 + $0x78] sm:$0xf0] }
 0x648   : > { %v2166_v32 = vpop.f32.mrf.mxu3  ;;  %2704 = vmatpush.bf16.msrb.mxu1 %v4811_v21  ;;  %v5630_v21 = vld [vmem:[#allocation19 + $0x6c] sm:$0xf0] }
 0x649   : > { %v2229_v35 = vadd.f32 %v5965_v17, %v2166_v32  ;;  %v4807_v17 = vor.u32 %v5674_v14, %v4804_v15  ;;  %v5667_v32 = vld [vmem:[#allocation19 + $0x19c] sm:$0xf]  ;;  %v4643_v15 = vor.u32 %v5638_v9, %v4642_v7  ;;  %v4611_v29 = vor.u32 %v5630_v21, %v4610_v18  ;;  %v5595_v18 = vld [vmem:[#allocation17 + $0x1d4] sm:$0xf0] }
 0x64a   : > { %v5635_v14 = vld [vmem:[#allocation19 + $0x9c] sm:$0xf]  ;;  %v4867_v21 = vor.u32 %v5549_v12, %v4866_v11  ;;  %v5585_v12 = vld [vmem:[#allocation17 + $0x184] sm:$0xf0] }
 0x64b   : > { %v2231_v38 = vmax.f32 %v2229_v35, 0.0  ;;  %2691 = vmatpush.bf16.msrb.mxu0 %v4807_v17  ;;  %v4783_v35 = vor.u32 %v5667_v32, %v4780_v33  ;;  %v4652_v17 = vld [vmem:[#allocation19 + $0xb8] sm:$0xf0]  ;;  %v5622_v33 = vld [vmem:[#allocation19 + $0x2c] sm:$0xf0] }
 0x64c   : > { %2705 = vmatpush.bf16.msrb.mxu1 %v4779_v34  ;;  %v4655_v24 = vor.u32 %v5635_v14, %v4652_v17  ;;  %v5618_v34 = vld [vmem:[#allocation19 + $0x14] sm:$0xf]  ;;  %v4579_v42 = vor.u32 %v5622_v33, %v4578_v31  ;;  %v4986_v14 = vld [vmem:[#allocation17 + $0x150] sm:$0xf]  ;;  %v4914_v33 = vld [vmem:[#allocation17 + $0xc0] sm:$0xf] }
 0x64d   : > { %v2232_v39 = vpack.c.bf16 %v2231_v38, %v2230_v37  ;;  %v5662_v37 = vld [vmem:[#allocation19 + $0x16c] sm:$0xf0]  ;;  %v5658_v38 = vld [vmem:[#allocation19 + $0x154] sm:$0xf] }
 0x64e   : > { %v4743_v43 = vor.u32 %v5658_v38, %v4740_v40  ;;  %v4586_v38 = vld [vmem:[#allocation19 + $0x18] sm:$0xf]  ;;  %v5619_v40 = vld [vmem:[#allocation19 + $0x1c] sm:$0xf]  ;;  %v5050_v17 = vld [vmem:[#allocation17 + $0x1d0] sm:$0xf] }
 0x64f   : > { %2292 = vmatmul.bf16.vlgmr.msra.gmra.mxu2 %v2232_v39  ;;  %2692 = vmatpush.bf16.msrb.mxu0 %v4775_v30  ;;  %v4739_v39 = vor.u32 %v5662_v37, %v4738_v36  ;;  %v4615_v30 = vor.u32 %v5626_v22, %v4612_v23  ;;  %v5966_v36 = vld [vmem:[%s7268_s3] ss:$0 sm:$0xff]  ;;  %v4623_v37 = vor.u32 %v5627_v27, %v4620_v28  ;;  %v5563_v22 = vld [vmem:[#allocation17 + $0xd4] sm:$0xf0]  ;;  %v4858_v23 = vld [vmem:[#allocation17 + $0x50] sm:$0xf] }
 0x650   : > { %2717 = vmatpush.bf16.msra.mxu2 %v4815_v25  ;;  %2706 = vmatpush.bf16.msrb.mxu1 %v4747_v44  ;;  %v4618_v25 = vld [vmem:[#allocation19 + $0x58] sm:$0xf]  ;;  %v4591_v48 = vor.u32 %v5619_v40, %v4588_v41  ;;  %v5051_v27 = vor.u32 %v5595_v18, %v5050_v17  ;;  %v5577_v28 = vld [vmem:[#allocation17 + $0x144] sm:$0xf0]  ;;  %v4842_v17 = vld [vmem:[#allocation17 + $0x30] sm:$0xf] }
 0x651   : > { %2680 = vmatpush.bf16.msrb.mxu3 %v4739_v39  ;;  %v4619_v32 = vor.u32 %v5631_v26, %v4618_v25  ;;  %v5623_v39 = vld [vmem:[#allocation19 + $0x34] sm:$0xf0]  ;;  %v4978_v26 = vld [vmem:[#allocation17 + $0x140] sm:$0xf]  ;;  %s7274_s3 = sld [smem:[#allocation55_spill]] }
 0x652   : > { %v4587_v45 = vor.u32 %v5623_v39, %v4586_v38  ;;  %v5575_v38 = vld [vmem:[#allocation17 + $0x134] sm:$0xf0]  ;;  %v5034_v39 = vld [vmem:[#allocation17 + $0x1b0] sm:$0xf] }
 0x653   : > { %2693 = vmatpush.bf16.msrb.mxu0 %v4743_v43  ;;  %v5591_v40 = vld [vmem:[#allocation17 + $0x1b4] sm:$0xf0] }
 0x654   : > { %2718 = vmatpush.bf16.msra.mxu2 %v4783_v35  ;;  %2707 = vmatpush.bf16.msrb.mxu1 %v4715_v56  ;;  %v4580_v35 = vld [vmem:[#allocation19 + $0x30] sm:$0xf0]  ;;  %v5583_v56 = vld [vmem:[#allocation17 + $0x174] sm:$0xf0] }
 0x655   : > { %2681 = vmatpush.bf16.msrb.mxu3 %v4707_v51  ;;  %v4583_v43 = vor.u32 %v5618_v34, %v4580_v35  ;;  %v5561_v34 = vld [vmem:[#allocation17 + $0xc4] sm:$0xf0]  ;;  %v4979_v35 = vor.u32 %v5577_v28, %v4978_v26  ;;  %v5543_v18 = vld [vmem:[#allocation17 + $0x34] sm:$0xf0]  ;;  %v5060_v28 = vld [vmem:[#allocation17 + $0x1e8] sm:$0xf0] }
 0x656   : > { %v4915_v41 = vor.u32 %v5561_v34, %v4914_v33  ;;  %v5576_v33 = vld [vmem:[#allocation17 + $0x144] sm:$0xf]  ;;  %v4980_v34 = vld [vmem:[#allocation17 + $0x148] sm:$0xf0] }
 0x657   : > { %2694 = vmatpush.bf16.msrb.mxu0 %v4711_v55  ;;  %v5002_v55 = vld [vmem:[#allocation17 + $0x170] sm:$0xf] }
 0x658   : > { %2719 = vmatpush.bf16.msra.mxu2 %v4751_v47  ;;  %2708 = vmatpush.bf16.msrb.mxu1 %v4683_v4  ;;  %v5003_v1 = vor.u32 %v5583_v56, %v5002_v55  ;;  %v5067_v4 = vor.u32 %v5599_v58, %v5066_v57  ;;  %v5018_v55 = vld [vmem:[#allocation17 + $0x190] sm:$0xf]  ;;  %v5587_v56 = vld [vmem:[#allocation17 + $0x194] sm:$0xf0] }
 0x659   : > { %2682 = vmatpush.bf16.msrb.mxu3 %v4675_v63  ;;  %v5551_v63 = vld [vmem:[#allocation17 + $0x74] sm:$0xf0]  ;;  %v5019_v58 = vor.u32 %v5587_v56, %v5018_v55  ;;  %v7046_v55 = vpop.f32.mrf.mxu1 }
 0x65a   : > { %v4875_v9 = vor.u32 %v5551_v63, %v4874_v62  ;;  %v5004_v62 = vld [vmem:[#allocation17 + $0x178] sm:$0xf0] }
 0x65b   : > { %2695 = vmatpush.bf16.msrb.mxu0 %v4679_v3  ;;  %v5581_v3 = vld [vmem:[#allocation17 + $0x164] sm:$0xf0] }
 0x65c   : > { %2720 = vmatpush.bf16.msra.mxu2 %v4719_v59  ;;  %2709 = vmatpush.bf16.msrb.mxu1 %v4651_v20  ;;  %v4938_v59 = vld [vmem:[#allocation17 + $0xf0] sm:$0xf]  ;;  %v4995_v13 = vor.u32 %v5581_v3, %v4994_v2  ;;  %v4850_v2 = vld [vmem:[#allocation17 + $0x40] sm:$0xf]  ;;  %v5545_v3 = vld [vmem:[#allocation17 + $0x44] sm:$0xf0] }
 0x65d   : > { %2683 = vmatpush.bf16.msrb.mxu3 %v4643_v15  ;;  %v4939_v7 = vor.u32 %v5567_v61, %v4938_v59  ;;  %v5579_v15 = vld [vmem:[#allocation17 + $0x154] sm:$0xf0]  ;;  %v4922_v20 = vld [vmem:[#allocation17 + $0xd0] sm:$0xf]  ;;  %v4946_v59 = vld [vmem:[#allocation17 + $0x100] sm:$0xf] }
 0x65e   : > { %v4987_v25 = vor.u32 %v5579_v15, %v4986_v14  ;;  %v4923_v31 = vor.u32 %v5563_v22, %v4922_v20  ;;  %v5582_v61 = vld [vmem:[#allocation17 + $0x174] sm:$0xf]  ;;  %v5068_v14 = vld [vmem:[#allocation17 + $0x1f8] sm:$0xf0]  ;;  %v4843_v20 = vor.u32 %v5543_v18, %v4842_v17  ;;  %v5560_v18 = vld [vmem:[#allocation17 + $0xc4] sm:$0xf] }
 0x65f   : > { %2696 = vmatpush.bf16.msrb.mxu0 %v4647_v16  ;;  %v5059_v16 = vor.u32 %v5597_v6, %v5058_v5  ;;  %v5580_v5 = vld [vmem:[#allocation17 + $0x164] sm:$0xf]  ;;  %v4996_v6 = vld [vmem:[#allocation17 + $0x168] sm:$0xf0]  ;;  %v4988_v22 = vld [vmem:[#allocation17 + $0x158] sm:$0xf0] }
 0x660   : > { %2721 = vmatpush.bf16.msra.mxu2 %v4687_v8  ;;  %2710 = vmatpush.bf16.msrb.mxu1 %v4619_v32  ;;  %v4930_v8 = vld [vmem:[#allocation17 + $0xe0] sm:$0xf] }
 0x661   : > { %2684 = vmatpush.bf16.msrb.mxu3 %v4611_v29  ;;  %v5042_v29 = vld [vmem:[#allocation17 + $0x1c0] sm:$0xf] }
 0x663   : > { %2697 = vmatpush.bf16.msrb.mxu0 %v4615_v30  ;;  %v5593_v30 = vld [vmem:[#allocation17 + $0x1c4] sm:$0xf0] }
 0x664   : > { %2722 = vmatpush.bf16.msra.mxu2 %v4655_v24  ;;  %2711 = vmatpush.bf16.msrb.mxu1 %v4587_v45  ;;  %v5547_v24 = vld [vmem:[#allocation17 + $0x54] sm:$0xf0]  ;;  %v4962_v45 = vld [vmem:[#allocation17 + $0x120] sm:$0xf] }
 0x665   : > { %2685 = vmatpush.bf16.msrb.mxu3 %v4579_v42  ;;  %v4859_v32 = vor.u32 %v5547_v24, %v4858_v23  ;;  %v4906_v42 = vld [vmem:[#allocation17 + $0xb0] sm:$0xf] }
 0x666   : > { %v4890_v24 = vld [vmem:[#allocation17 + $0x90] sm:$0xf] }
 0x667   : > { %2698 = vmatpush.bf16.msrb.mxu0 %v4583_v43  ;;  %v5559_v43 = vld [vmem:[#allocation17 + $0xb4] sm:$0xf0] }
 0x668   : > { %2723 = vmatpush.bf16.msra.mxu2 %v4623_v37  ;;  %v5043_v37 = vor.u32 %v5593_v30, %v5042_v29  ;;  %v4834_v30 = vld [vmem:[#allocation17 + $0x20] sm:$0xf] }
 0x66c   : > { %2724 = vmatpush.bf16.msra.mxu2 %v4591_v48  ;;  %v5026_v48 = vld [vmem:[#allocation17 + $0x1a0] sm:$0xf] }
 0x6d2   : > { %v2293_v19 = vpop.f32.mrf.mxu2 }
 0x6d3   : > { %v2294_v46 = vadd.f32 %v5966_v36, %v2293_v19  ;;  %v4931_v19 = vor.u32 %v5565_v10, %v4930_v8  ;;  %v4898_v8 = vld [vmem:[#allocation17 + $0xa0] sm:$0xf] }
 0x6d4   : > { %v5010_v10 = vld [vmem:[#allocation17 + $0x180] sm:$0xf] }
 0x6d5   : > { %v5011_v15 = vor.u32 %v5585_v12, %v5010_v10  ;;  %v7048_v10 = vpop.f32.mrf.mxu3  ;;  %v5548_v12 = vld [vmem:[#allocation17 + $0x64] sm:$0xf] }
 0x6da   : > { %v2295_v44 = vpop.f32.mrf.mxu2 }
 0x6db   : > { %v2296_v47 = vadd.f32 %v5966_v36, %v2295_v44  ;;  %v4970_v36 = vld [vmem:[#allocation17 + $0x130] sm:$0xf] }
 0x6dc   : > { %v4971_v44 = vor.u32 %v5575_v38, %v4970_v36  ;;  %v4882_v36 = vld [vmem:[#allocation17 + $0x80] sm:$0xf] }
 0x6dd   : > { %v2298_v49 = vmax.f32 %v2294_v46, %v2296_v47  ;;  %v5035_v46 = vor.u32 %v5591_v40, %v5034_v39  ;;  %v5573_v47 = vld [vmem:[#allocation17 + $0x124] sm:$0xf0]  ;;  %v5566_v39 = vld [vmem:[#allocation17 + $0xf4] sm:$0xf]  ;;  %v4940_v40 = vld [vmem:[#allocation17 + $0xf8] sm:$0xf0] }
 0x6df   : > { %v2299_v50 = vrot.slane %v2298_v49, 4 }
 0x6e1   : > { %v2300_v51 = vmax.f32 %v2298_v49, %v2299_v50  ;;  %v5589_v49 = vld [vmem:[#allocation17 + $0x1a4] sm:$0xf0]  ;;  %v4907_v50 = vor.u32 %v5559_v43, %v4906_v42  ;;  %v4943_v42 = vor.u32 %v5566_v39, %v4940_v40  ;;  %v5052_v43 = vld [vmem:[#allocation17 + $0x1d8] sm:$0xf0]  ;;  %v5544_v40 = vld [vmem:[#allocation17 + $0x44] sm:$0xf] }
 0x6e3   : > { %v2301_v52 = vrot.slane %v2300_v51, 2 }
 0x6e5   : > { %v2302_v53 = vmax.f32 %v2300_v51, %v2301_v52  ;;  %v4963_v51 = vor.u32 %v5573_v47, %v4962_v45  ;;  %v4954_v52 = vld [vmem:[#allocation17 + $0x110] sm:$0xf]  ;;  %v5539_v45 = vld [vmem:[#allocation17 + $0x14] sm:$0xf0] }
 0x6e7   : > { %v2303_v54 = vrot.slane %v2302_v53, 1 }
 0x6e9   : > { %v2304_v60 = vmax.f32 %v2302_v53, %v2303_v54  ;;  %v5027_v53 = vor.u32 %v5589_v49, %v5026_v48  ;;  %v5571_v54 = vld [vmem:[#allocation17 + $0x114] sm:$0xf0]  ;;  %v5574_v48 = vld [vmem:[#allocation17 + $0x134] sm:$0xf]  ;;  %v4972_v49 = vld [vmem:[#allocation17 + $0x138] sm:$0xf0] }
 0x6ea   : > { %v4955_v57 = vor.u32 %v5571_v54, %v4954_v52  ;;  %v5564_v52 = vld [vmem:[#allocation17 + $0xe4] sm:$0xf] }
 0x6eb   : > { %v7030_v0 = vpack.c.bf16 %v2304_v60, %v2304_v60  ;;  %v5569_v60 = vld [vmem:[#allocation17 + $0x104] sm:$0xf0]  ;;  %v5592_v54 = vld [vmem:[#allocation17 + $0x1c4] sm:$0xf] }
 0x6ec   : > { %v4947_v63 = vor.u32 %v5569_v60, %v4946_v59  ;;  %v5537_v60 = vld [vmem:[#allocation17 + $0x4] sm:$0xf0] }
 0x6ed   : > { %2634 = vmatmul.bf16.vlgmr.msra.gmra.mxu3 %v7030_v0  ;;  %2647 = vmatmul.bf16.vlgmr.msra.gmra.mxu0 %v7030_v0 }
 0x6ee   : > { %2660 = vmatmul.bf16.vlgmr.msra.gmra.mxu1 %v7030_v0  ;;  %2673 = vmatmul.bf16.vlgmr.msrb.gmra.mxu2 %v7030_v0 }
 0x6ef   : > { %3141 = vmatpush.bf16.msra.mxu1 %v5003_v1  ;;  %3155 = vmatpush.bf16.msrb.mxu2 %v5067_v4  ;;  %v7040_v1 = vpop.f32.mrf.mxu0  ;;  %v4851_v4 = vor.u32 %v5545_v3, %v4850_v2  ;;  %v4964_v2 = vld [vmem:[#allocation17 + $0x128] sm:$0xf0] }
 0x6f0   : > { %3127 = vmatpush.bf16.msra.mxu0 %v4939_v7  ;;  %3113 = vmatpush.bf16.msra.mxu3 %v4875_v9  ;;  %v4999_v7 = vor.u32 %v5580_v5, %v4996_v6  ;;  %v5557_v9 = vld [vmem:[#allocation17 + $0xa4] sm:$0xf0]  ;;  %v5562_v5 = vld [vmem:[#allocation17 + $0xd4] sm:$0xf]  ;;  %v4924_v6 = vld [vmem:[#allocation17 + $0xd8] sm:$0xf0] }
 0x6f1   : > { %v4899_v11 = vor.u32 %v5557_v9, %v4898_v8  ;;  %v4927_v8 = vor.u32 %v5562_v5, %v4924_v6  ;;  %v5036_v9 = vld [vmem:[#allocation17 + $0x1b8] sm:$0xf0]  ;;  %v5552_v5 = vld [vmem:[#allocation17 + $0x84] sm:$0xf]  ;;  %v4884_v6 = vld [vmem:[#allocation17 + $0x88] sm:$0xf0] }
 0x6f3   : > { %3142 = vmatpush.bf16.msra.mxu1 %v4995_v13  ;;  %3156 = vmatpush.bf16.msrb.mxu2 %v5059_v16  ;;  %v5598_v13 = vld [vmem:[#allocation17 + $0x1f4] sm:$0xf] }
 0x6f4   : > { %3128 = vmatpush.bf16.msra.mxu0 %v4931_v19  ;;  %3114 = vmatpush.bf16.msra.mxu3 %v4867_v21  ;;  %v5071_v16 = vor.u32 %v5598_v13, %v5068_v14  ;;  %v5578_v21 = vld [vmem:[#allocation17 + $0x154] sm:$0xf]  ;;  %v4868_v13 = vld [vmem:[#allocation17 + $0x68] sm:$0xf0] }
 0x6f5   : > { %v4991_v23 = vor.u32 %v5578_v21, %v4988_v22  ;;  %v5570_v14 = vld [vmem:[#allocation17 + $0x114] sm:$0xf]  ;;  %v5588_v22 = vld [vmem:[#allocation17 + $0x1a4] sm:$0xf] }
 0x6f7   : > { %3143 = vmatpush.bf16.msra.mxu1 %v4987_v25  ;;  %3157 = vmatpush.bf16.msrb.mxu2 %v5051_v27  ;;  %v7042_v19 = vpop.f32.mrf.mxu0  ;;  %v5555_v25 = vld [vmem:[#allocation17 + $0x94] sm:$0xf0]  ;;  %v5596_v27 = vld [vmem:[#allocation17 + $0x1e4] sm:$0xf] }
 0x6f8   : > { %3129 = vmatpush.bf16.msra.mxu0 %v4923_v31  ;;  %3115 = vmatpush.bf16.msra.mxu3 %v4859_v32  ;;  %v4891_v26 = vor.u32 %v5555_v25, %v4890_v24  ;;  %v5063_v29 = vor.u32 %v5596_v27, %v5060_v28  ;;  %v5541_v31 = vld [vmem:[#allocation17 + $0x24] sm:$0xf0]  ;;  %v4860_v27 = vld [vmem:[#allocation17 + $0x58] sm:$0xf0]  ;;  %v5568_v28 = vld [vmem:[#allocation17 + $0x104] sm:$0xf] }
 0x6f9   : > { %v4835_v32 = vor.u32 %v5541_v31, %v4834_v30  ;;  %v4948_v31 = vld [vmem:[#allocation17 + $0x108] sm:$0xf0] }
 0x6fb   : > { %3144 = vmatpush.bf16.msra.mxu1 %v4979_v35  ;;  %3158 = vmatpush.bf16.msrb.mxu2 %v5043_v37  ;;  %v4983_v35 = vor.u32 %v5576_v33, %v4980_v34  ;;  %v5553_v37 = vld [vmem:[#allocation17 + $0x84] sm:$0xf0]  ;;  %v4951_v33 = vor.u32 %v5568_v28, %v4948_v31  ;;  %v5558_v34 = vld [vmem:[#allocation17 + $0xb4] sm:$0xf] }
 0x6fc   : > { %3130 = vmatpush.bf16.msra.mxu0 %v4915_v41  ;;  %3116 = vmatpush.bf16.msra.mxu3 %v4851_v4  ;;  %v4883_v38 = vor.u32 %v5553_v37, %v4882_v36  ;;  %v5594_v41 = vld [vmem:[#allocation17 + $0x1d4] sm:$0xf] }
 0x6fd   : > { %2686 = vmatmul.bf16.vlgmr.msrb.gmra.mxu3 %v7030_v0  ;;  %2699 = vmatmul.bf16.vlgmr.msrb.gmra.mxu0 %v7030_v0  ;;  %v5586_v36 = vld [vmem:[#allocation17 + $0x194] sm:$0xf] }
 0x6fe   : > { %2712 = vmatmul.bf16.vlgmr.msrb.gmra.mxu1 %v7030_v0  ;;  %2725 = vmatmul.bf16.vlgmr.msra.gmra.mxu2 %v7030_v0  ;;  %v5007_v0 = vor.u32 %v5582_v61, %v5004_v62  ;;  %v5550_v61 = vld [vmem:[#allocation17 + $0x74] sm:$0xf] }
 0x6ff   : > { %3145 = vmatpush.bf16.msra.mxu1 %v4971_v44  ;;  %3159 = vmatpush.bf16.msrb.mxu2 %v5035_v46  ;;  %v4826_v44 = vld [vmem:[#allocation17 + $0x10] sm:$0xf]  ;;  %v5055_v46 = vor.u32 %v5594_v41, %v5052_v43  ;;  %v4852_v41 = vld [vmem:[#allocation17 + $0x48] sm:$0xf0] }
 0x700   : > { %3131 = vmatpush.bf16.msra.mxu0 %v4907_v50  ;;  %3117 = vmatpush.bf16.msra.mxu3 %v4843_v20  ;;  %v4827_v47 = vor.u32 %v5539_v45, %v4826_v44  ;;  %v4975_v50 = vor.u32 %v5574_v48, %v4972_v49  ;;  %v4916_v20 = vld [vmem:[#allocation17 + $0xc8] sm:$0xf0]  ;;  %v4855_v44 = vor.u32 %v5544_v40, %v4852_v41  ;;  %v5556_v45 = vld [vmem:[#allocation17 + $0xa4] sm:$0xf]  ;;  %v5194_v40 = vld [vmem:[#allocation20 + $0x70] sm:$0xf] }
 0x701   : > { %v4919_v21 = vor.u32 %v5560_v18, %v4916_v20  ;;  %v4820_v18 = vld [vmem:[#allocation17 + $0x8] sm:$0xf0]  ;;  %v5695_v41 = vld [vmem:[#allocation20 + $0x74] sm:$0xf0] }
 0x703   : > { %3146 = vmatpush.bf16.msra.mxu1 %v4963_v51  ;;  %3160 = vmatpush.bf16.msrb.mxu2 %v5027_v53  ;;  %v7044_v51 = vpop.f32.mrf.mxu0  ;;  %v4932_v53 = vld [vmem:[#allocation17 + $0xe8] sm:$0xf0] }
 0x704   : > { %3132 = vmatpush.bf16.msra.mxu0 %v4899_v11  ;;  %3118 = vmatpush.bf16.msra.mxu3 %v4835_v32  ;;  %v4935_v56 = vor.u32 %v5564_v52, %v4932_v53  ;;  %v7055_v32 = vld [vmem:[%s7269_s24] sm:$0xf]  ;;  %s7275_s24 = sld [smem:[#allocation51_spill]] }
 0x705   : > { %v2733_v43 = vperm.slane %v7055_v32, 2 }
 0x707   : > { %3147 = vmatpush.bf16.msra.mxu1 %v4955_v57  ;;  %3161 = vmatpush.bf16.msrb.mxu2 %v5019_v58  ;;  %v5044_v57 = vld [vmem:[#allocation17 + $0x1c8] sm:$0xf0]  ;;  %v4818_v58 = vld [vmem:[#allocation17] sm:$0xf] }
 0x708   : > { %3133 = vmatpush.bf16.msra.mxu0 %v4891_v26  ;;  %3119 = vmatpush.bf16.msra.mxu3 %v4827_v47  ;;  %v5047_v59 = vor.u32 %v5592_v54, %v5044_v57  ;;  %v4819_v62 = vor.u32 %v5537_v60, %v4818_v58  ;;  %v5546_v26 = vld [vmem:[#allocation17 + $0x54] sm:$0xf]  ;;  %v5584_v47 = vld [vmem:[#allocation17 + $0x184] sm:$0xf]  ;;  %v4892_v60 = vld [vmem:[#allocation17 + $0x98] sm:$0xf0] }
 0x709   : > { %v4863_v30 = vor.u32 %v5546_v26, %v4860_v27  ;;  %v5542_v54 = vld [vmem:[#allocation17 + $0x34] sm:$0xf] }
 0x70b   : > { %3148 = vmatpush.bf16.msra.mxu1 %v4947_v63  ;;  %3162 = vmatpush.bf16.msrb.mxu2 %v5011_v15  ;;  %v4876_v63 = vld [vmem:[#allocation17 + $0x78] sm:$0xf0]  ;;  %v4871_v15 = vor.u32 %v5548_v12, %v4868_v13  ;;  %v7050_v24 = vpop.f32.mrf.mxu0  ;;  %v5538_v12 = vld [vmem:[#allocation17 + $0x14] sm:$0xf] }
 0x70c   : > { %3134 = vmatpush.bf16.msra.mxu0 %v4883_v38  ;;  %v4879_v3 = vor.u32 %v5550_v61, %v4876_v63  ;;  %3120 = vmatpush.bf16.msra.mxu3 %v4819_v62  ;;  %v5020_v38 = vld [vmem:[#allocation17 + $0x198] sm:$0xf0]  ;;  %v2734_v61 = vperm.slane %v7055_v32, 3  ;;  %v5540_v63 = vld [vmem:[#allocation17 + $0x24] sm:$0xf] }
 0x70d   : > { %v5023_v39 = vor.u32 %v5586_v36, %v5020_v38  ;;  %v4828_v13 = vld [vmem:[#allocation17 + $0x18] sm:$0xf0] }
 0x70f   : > { %3197 = vmatpush.bf16.msrb.mxu1 %v5007_v0  ;;  %3211 = vmatpush.bf16.msra.mxu2 %v5071_v16  ;;  %v5572_v0 = vld [vmem:[#allocation17 + $0x124] sm:$0xf]  ;;  %v4956_v16 = vld [vmem:[#allocation17 + $0x118] sm:$0xf0] }
 0x710   : > { %3183 = vmatpush.bf16.msrb.mxu0 %v4943_v42  ;;  %v4967_v4 = vor.u32 %v5572_v0, %v4964_v2  ;;  %3169 = vmatpush.bf16.msrb.mxu3 %v4879_v3  ;;  %v4959_v17 = vor.u32 %v5570_v14, %v4956_v16  ;;  %v2194_v42 = vpop.f32.mrf.mxu3  ;;  %v4836_v0 = vld [vmem:[#allocation17 + $0x28] sm:$0xf0]  ;;  %v1285_v14 = vld [vmem:[%s7270_s10] sm:$0xf]  ;;  %s7276_s10 = sld [smem:[#allocation57_spill]] }
 0x711   : > { %v4839_v3 = vor.u32 %v5540_v63, %v4836_v0  ;;  %v2753_v16 = vperm.slane %v1285_v14, 1  ;;  %v2752_v31 = vperm.slane %v1285_v14, 0  ;;  %v5258_v63 = vld [vmem:[#allocation20 + $0xf0] sm:$0xf]  ;;  %v5711_v0 = vld [vmem:[#allocation20 + $0xf4] sm:$0xf0] }
 0x713   : > { %3198 = vmatpush.bf16.msrb.mxu1 %v4999_v7  ;;  %3212 = vmatpush.bf16.msra.mxu2 %v5063_v29  ;;  %v5590_v7 = vld [vmem:[#allocation17 + $0x1b4] sm:$0xf]  ;;  %v7052_v29 = vpop.f32.mrf.mxu1 }
 0x714   : > { %3184 = vmatpush.bf16.msrb.mxu0 %v4935_v56  ;;  %v5039_v11 = vor.u32 %v5590_v7, %v5036_v9  ;;  %3170 = vmatpush.bf16.msrb.mxu3 %v4871_v15  ;;  %v4844_v56 = vld [vmem:[#allocation17 + $0x38] sm:$0xf0]  ;;  %v4887_v9 = vor.u32 %v5552_v5, %v4884_v6  ;;  %v4831_v15 = vor.u32 %v5538_v12, %v4828_v13  ;;  %v5691_v12 = vld [vmem:[#allocation20 + $0x54] sm:$0xf0] }
 0x715   : > { %v4847_v58 = vor.u32 %v5542_v54, %v4844_v56 }
 0x717   : > { %3199 = vmatpush.bf16.msrb.mxu1 %v4991_v23  ;;  %3213 = vmatpush.bf16.msra.mxu2 %v5055_v46  ;;  %v5028_v23 = vld [vmem:[#allocation17 + $0x1a8] sm:$0xf0] }
 0x718   : > { %3185 = vmatpush.bf16.msrb.mxu0 %v4927_v8  ;;  %v5031_v25 = vor.u32 %v5588_v22, %v5028_v23  ;;  %3171 = vmatpush.bf16.msrb.mxu3 %v4863_v30  ;;  %v4900_v46 = vld [vmem:[#allocation17 + $0xa8] sm:$0xf0] }
 0x719   : > { %v4903_v49 = vor.u32 %v5556_v45, %v4900_v46 }
 0x71b   : > { %3200 = vmatpush.bf16.msrb.mxu1 %v4983_v35  ;;  %3214 = vmatpush.bf16.msra.mxu2 %v5047_v59  ;;  %v4908_v35 = vld [vmem:[#allocation17 + $0xb8] sm:$0xf0]  ;;  %v5554_v59 = vld [vmem:[#allocation17 + $0x94] sm:$0xf] }
 0x71c   : > { %3186 = vmatpush.bf16.msrb.mxu0 %v4919_v21  ;;  %v4911_v37 = vor.u32 %v5558_v34, %v4908_v35  ;;  %3172 = vmatpush.bf16.msrb.mxu3 %v4855_v44  ;;  %v4895_v62 = vor.u32 %v5554_v59, %v4892_v60  ;;  %v2754_v21 = vperm.slane %v1285_v14, 2  ;;  %v2755_v34 = vperm.slane %v1285_v14, 3  ;;  %v5693_v59 = vld [vmem:[#allocation20 + $0x64] sm:$0xf0] }
 0x71f   : > { %3201 = vmatpush.bf16.msrb.mxu1 %v4975_v50  ;;  %3215 = vmatpush.bf16.msra.mxu2 %v5039_v11  ;;  %v5012_v50 = vld [vmem:[#allocation17 + $0x188] sm:$0xf0] }
 0x720   : > { %3187 = vmatpush.bf16.msrb.mxu0 %v4911_v37  ;;  %v5015_v53 = vor.u32 %v5584_v47, %v5012_v50  ;;  %3173 = vmatpush.bf16.msrb.mxu3 %v4847_v58 }
 0x723   : > { %3202 = vmatpush.bf16.msrb.mxu1 %v4967_v4  ;;  %3216 = vmatpush.bf16.msra.mxu2 %v5031_v25 }
 0x724   : > { %3188 = vmatpush.bf16.msrb.mxu0 %v4903_v49  ;;  %3174 = vmatpush.bf16.msrb.mxu3 %v4839_v3 }
 0x727   : > { %3203 = vmatpush.bf16.msrb.mxu1 %v4959_v17  ;;  %3217 = vmatpush.bf16.msra.mxu2 %v5023_v39  ;;  %v5536_v17 = vld [vmem:[#allocation17 + $0x4] sm:$0xf] }
 0x728   : > { %3189 = vmatpush.bf16.msrb.mxu0 %v4895_v62  ;;  %3175 = vmatpush.bf16.msrb.mxu3 %v4831_v15  ;;  %v4823_v22 = vor.u32 %v5536_v17, %v4820_v18  ;;  %v5250_v15 = vld [vmem:[#allocation20 + $0xe0] sm:$0xf]  ;;  %v5689_v17 = vld [vmem:[#allocation20 + $0x44] sm:$0xf0] }
 0x72b   : > { %3204 = vmatpush.bf16.msrb.mxu1 %v4951_v33  ;;  %3218 = vmatpush.bf16.msra.mxu2 %v5015_v53 }
 0x72c   : > { %3190 = vmatpush.bf16.msrb.mxu0 %v4887_v9  ;;  %3176 = vmatpush.bf16.msrb.mxu3 %v4823_v22 }
 0x76a   : > { %v7058_v48 = vpop.f32.mrf.mxu0 }
 0x76b   : > { %v2661_v52 = vpop.f32.mrf.mxu1 }
 0x76c   : > { %v7060_v57 = vadd.f32 %v2733_v43, %v2661_v52 }
 0x770   : > { %v7063_v2 = vpop.f32.mrf.mxu3 }
 0x771   : > { %v2674_v4 = vpop.f32.mrf.mxu2 }
 0x772   : > { %v7065_v7 = vadd.f32 %v2734_v61, %v2674_v4  ;;  %v2650_v8 = vpop.f32.mrf.mxu0 }
 0x773   : > { %v2663_v11 = vpop.f32.mrf.mxu1 }
 0x774   : > { %v5178_v11 = vld [vmem:[#allocation20 + $0x50] sm:$0xf] }
 0x778   : > { %v2637_v20 = vpop.f32.mrf.mxu3 }
 0x779   : > { %v2676_v23 = vpop.f32.mrf.mxu2  ;;  %v5242_v20 = vld [vmem:[#allocation20 + $0xd0] sm:$0xf] }
 0x77a   : > { %v2700_v25 = vpop.f32.mrf.mxu0  ;;  %v5162_v23 = vld [vmem:[#allocation20 + $0x30] sm:$0xf] }
 0x77b   : > { %v2761_v26 = vadd.f32 %v2753_v16, %v2700_v25  ;;  %v2713_v27 = vpop.f32.mrf.mxu1  ;;  %v5170_v16 = vld [vmem:[#allocation20 + $0x40] sm:$0xf]  ;;  %v5687_v25 = vld [vmem:[#allocation20 + $0x34] sm:$0xf0] }
 0x77c   : > { %v2762_v28 = vadd.f32 %v2754_v21, %v2713_v27  ;;  %v5707_v21 = vld [vmem:[#allocation20 + $0xd4] sm:$0xf0]  ;;  %v5171_v22 = vor.u32 %v5689_v17, %v5170_v16  ;;  %v5234_v27 = vld [vmem:[#allocation20 + $0xc0] sm:$0xf]  ;;  %v5244_v16 = vld [vmem:[#allocation20 + $0xd8] sm:$0xf0] }
 0x77d   : > { %v2765_v30 = vperm.slane %v2761_v26, 0  ;;  %v5243_v26 = vor.u32 %v5707_v21, %v5242_v20  ;;  %v5606_v17 = vld [vmem:[%s7271_s8 + $0x30] sm:$0xff]  ;;  %v5164_v21 = vld [vmem:[#allocation20 + $0x38] sm:$0xf0] }
 0x77e   : > { %v2766_v33 = vperm.slane %v2762_v28, 0  ;;  %v5705_v28 = vld [vmem:[#allocation20 + $0xc4] sm:$0xf0]  ;;  %v5686_v20 = vld [vmem:[#allocation20 + $0x34] sm:$0xf] }
 0x77f   : > { %v2769_v35 = vadd.f32 %v2765_v30, %v7048_v10  ;;  %v2773_v36 = vadd.f32 %v2765_v30, %v2194_v42  ;;  %v5195_v10 = vor.u32 %v5695_v41, %v5194_v40  ;;  %v5163_v30 = vor.u32 %v5687_v25, %v5162_v23  ;;  %v5683_v40 = vld [vmem:[#allocation20 + $0x14] sm:$0xf0]  ;;  %v5704_v25 = vld [vmem:[#allocation20 + $0xc4] sm:$0xf] }
 0x780   : > { %v2770_v37 = vadd.f32 %v2766_v33, %v7044_v51  ;;  %v2774_v38 = vadd.f32 %v2766_v33, %v7050_v24  ;;  %v2687_v39 = vpop.f32.mrf.mxu3  ;;  %v5186_v51 = vld [vmem:[#allocation20 + $0x60] sm:$0xf]  ;;  %v5685_v33 = vld [vmem:[#allocation20 + $0x24] sm:$0xf0] }
 0x781   : > { %v2777_v43 = vmax.f32 %v2769_v35, 0.0  ;;  %v2781_v44 = vmax.f32 %v2773_v36, 0.0  ;;  %v2760_v45 = vadd.f32 %v2752_v31, %v2687_v39  ;;  %v2726_v46 = vpop.f32.mrf.mxu2  ;;  %v5187_v5 = vor.u32 %v5693_v59, %v5186_v51  ;;  %v5154_v31 = vld [vmem:[#allocation20 + $0x20] sm:$0xf]  ;;  %v5226_v35 = vld [vmem:[#allocation20 + $0xb0] sm:$0xf] }
 0x782   : > { %v2778_v47 = vmax.f32 %v2770_v37, 0.0  ;;  %v2782_v49 = vmax.f32 %v2774_v38, 0.0  ;;  %v2763_v50 = vadd.f32 %v2755_v34, %v2726_v46  ;;  %v2702_v52 = vpop.f32.mrf.mxu0  ;;  %v5235_v34 = vor.u32 %v5705_v28, %v5234_v27  ;;  %v5703_v36 = vld [vmem:[#allocation20 + $0xb4] sm:$0xf0]  ;;  %v5146_v39 = vld [vmem:[#allocation20 + $0x10] sm:$0xf] }
 0x783   : > { %v2785_v53 = vpack.c.bf16 %v2781_v44, %v2777_v43  ;;  %v2764_v54 = vperm.slane %v2760_v45, 0  ;;  %v2715_v56 = vpop.f32.mrf.mxu1  ;;  %v5155_v37 = vor.u32 %v5685_v33, %v5154_v31  ;;  %v2731_v38 = vperm.slane %v7055_v32, 0  ;;  %v5218_v43 = vld [vmem:[#allocation20 + $0xa0] sm:$0xf]  ;;  %v5701_v44 = vld [vmem:[#allocation20 + $0xa4] sm:$0xf0] }
 0x784   : > { %v2786_v42 = vpack.c.bf16 %v2782_v49, %v2778_v47  ;;  %v2767_v58 = vperm.slane %v2763_v50, 0  ;;  %v5227_v41 = vor.u32 %v5703_v36, %v5226_v35  ;;  %v5147_v45 = vor.u32 %v5683_v40, %v5146_v39  ;;  %v5138_v47 = vld [vmem:[#allocation20] sm:$0xf]  ;;  %v5681_v49 = vld [vmem:[#allocation20 + $0x4] sm:$0xf0] }
 0x785   : > { %v2768_v24 = vadd.f32 %v2764_v54, %v7040_v1  ;;  %v2772_v60 = vadd.f32 %v2764_v54, %v7042_v19  ;;  %3135 = vmatmul.bf16.vlgmr.msra.gmra.mxu0 %v2785_v53  ;;  %v5259_v19 = vor.u32 %v5711_v0, %v5258_v63  ;;  %v2739_v46 = vadd.f32 %v2731_v38, %v7063_v2  ;;  %v5694_v52 = vld [vmem:[#allocation20 + $0x74] sm:$0xf]  ;;  %v5210_v56 = vld [vmem:[#allocation20 + $0x90] sm:$0xf]  ;;  %v5260_v0 = vld [vmem:[#allocation20 + $0xf8] sm:$0xf0] }
 0x786   : > { %v2771_v61 = vadd.f32 %v2767_v58, %v7046_v55  ;;  %v2775_v62 = vadd.f32 %v2767_v58, %v7052_v29  ;;  %3149 = vmatmul.bf16.vlgmr.msra.gmra.mxu1 %v2786_v42  ;;  %v5709_v55 = vld [vmem:[#allocation20 + $0xe4] sm:$0xf0]  ;;  %v5179_v29 = vor.u32 %v5691_v12, %v5178_v11  ;;  %v5219_v50 = vor.u32 %v5701_v44, %v5218_v43  ;;  %v5710_v63 = vld [vmem:[#allocation20 + $0xf4] sm:$0xf]  ;;  %v5252_v11 = vld [vmem:[#allocation20 + $0xe8] sm:$0xf0] }
 0x787   : > { %v2776_v3 = vmax.f32 %v2768_v24, 0.0  ;;  %v2780_v4 = vmax.f32 %v2772_v60, 0.0  ;;  %3717 = vmatpush.bf16.msra.mxu1 %v5195_v10  ;;  %v5251_v18 = vor.u32 %v5709_v55, %v5250_v15  ;;  %v2732_v54 = vperm.slane %v7055_v32, 1  ;;  %v5699_v10 = vld [vmem:[#allocation20 + $0x94] sm:$0xf0]  ;;  %v5605_v27 = vld [vmem:[%s7271_s8 + $0x28] sm:$0xff] }
 0x788   : > { %v2779_v6 = vmax.f32 %v2771_v61, 0.0  ;;  %v2783_v8 = vmax.f32 %v2775_v62, 0.0  ;;  %v2689_v9 = vpop.f32.mrf.mxu3  ;;  %v2743_v58 = vmax.f32 %v2739_v46, 0.0  ;;  %v5211_v59 = vor.u32 %v5699_v10, %v5210_v56  ;;  %v5692_v24 = vld [vmem:[#allocation20 + $0x64] sm:$0xf]  ;;  %v5615_v55 = vld [vmem:[%s7271_s8 + $0x78] sm:$0xff] }
 0x789   : > { %v2784_v1 = vpack.c.bf16 %v2780_v4, %v2776_v3  ;;  %v2728_v13 = vpop.f32.mrf.mxu2  ;;  %v5188_v60 = vld [vmem:[#allocation20 + $0x68] sm:$0xf0]  ;;  %v2740_v2 = vadd.f32 %v2732_v54, %v7058_v48  ;;  %v5202_v61 = vld [vmem:[#allocation20 + $0x80] sm:$0xf]  ;;  %v5697_v62 = vld [vmem:[#allocation20 + $0x84] sm:$0xf0]  ;;  %v5263_v9 = vor.u32 %v5710_v63, %v5260_v0  ;;  %3344 = vmatpush.bf16.msra.mxu0 %v5615_v55  ;;  %v5167_v28 = vor.u32 %v5686_v20, %v5164_v21 }
 0x78a   : > { %v2787_v14 = vpack.c.bf16 %v2783_v8, %v2779_v6  ;;  %v7079_v3 = vpack.c.bf16 %v2743_v58, %v2743_v58  ;;  %v5191_v32 = vor.u32 %v5692_v24, %v5188_v60  ;;  %v5203_v4 = vor.u32 %v5697_v62, %v5202_v61  ;;  %v5180_v6 = vld [vmem:[#allocation20 + $0x58] sm:$0xf0]  ;;  %v5708_v48 = vld [vmem:[#allocation20 + $0xe4] sm:$0xf]  ;;  %v5172_v13 = vld [vmem:[#allocation20 + $0x48] sm:$0xf0] }
 0x78b   : > { %3718 = vmatpush.bf16.msra.mxu1 %v5187_v5  ;;  %3121 = vmatmul.bf16.vlgmr.msra.gmra.mxu3 %v2784_v1  ;;  %v5690_v5 = vld [vmem:[#allocation20 + $0x54] sm:$0xf]  ;;  %v2744_v8 = vmax.f32 %v2740_v2, 0.0  ;;  %v5255_v15 = vor.u32 %v5708_v48, %v5252_v11  ;;  %v5156_v31 = vld [vmem:[#allocation20 + $0x28] sm:$0xf0]  ;;  %v5604_v36 = vld [vmem:[%s7271_s8 + $0x20] sm:$0xff] }
 0x78c   : > { %3163 = vmatmul.bf16.vlgmr.msrb.gmra.mxu2 %v2787_v14  ;;  %v5183_v12 = vor.u32 %v5690_v5, %v5180_v6  ;;  %v5228_v35 = vld [vmem:[#allocation20 + $0xb8] sm:$0xf0]  ;;  %v5682_v38 = vld [vmem:[#allocation20 + $0x14] sm:$0xf]  ;;  %v5220_v43 = vld [vmem:[#allocation20 + $0xa8] sm:$0xf0] }
 0x78d   : > { %3730 = vmatpush.bf16.msrb.mxu2 %v5259_v19  ;;  %v5607_v19 = vld [vmem:[%s7271_s8 + $0x38] sm:$0xff]  ;;  %v5680_v46 = vld [vmem:[#allocation20 + $0x4] sm:$0xf]  ;;  %v5322_v24 = vld [vmem:[#allocation20 + $0x170] sm:$0xf] }
 0x78e   : > { %3330 = vmatpush.bf16.msra.mxu3 %v5607_v19  ;;  %v5148_v39 = vld [vmem:[#allocation20 + $0x18] sm:$0xf0]  ;;  %v5696_v10 = vld [vmem:[#allocation20 + $0x84] sm:$0xf]  ;;  %v5727_v61 = vld [vmem:[#allocation20 + $0x174] sm:$0xf0] }
 0x78f   : > { %3719 = vmatpush.bf16.msra.mxu1 %v5179_v29  ;;  %v5706_v29 = vld [vmem:[#allocation20 + $0xd4] sm:$0xf]  ;;  %v5603_v44 = vld [vmem:[%s7271_s8 + $0x18] sm:$0xff]  ;;  %v5600_v60 = vld [vmem:[%s7271_s8] sm:$0xff]  ;;  %v5323_v62 = vor.u32 %v5727_v61, %v5322_v24 }
 0x790   : > { %v5247_v23 = vor.u32 %v5706_v29, %v5244_v16  ;;  %v5612_v2 = vld [vmem:[%s7271_s8 + $0x60] sm:$0xff]  ;;  %v5611_v63 = vld [vmem:[%s7271_s8 + $0x58] sm:$0xff]  ;;  %v5306_v5 = vld [vmem:[#allocation20 + $0x150] sm:$0xf] }
 0x791   : > { %3731 = vmatpush.bf16.msrb.mxu2 %v5251_v18  ;;  %v5314_v0 = vld [vmem:[#allocation20 + $0x160] sm:$0xf]  ;;  %v5723_v6 = vld [vmem:[#allocation20 + $0x154] sm:$0xf0]  ;;  %v5721_v11 = vld [vmem:[#allocation20 + $0x144] sm:$0xf0] }
 0x792   : > { %3331 = vmatpush.bf16.msra.mxu3 %v5606_v17  ;;  %v5298_v48 = vld [vmem:[#allocation20 + $0x140] sm:$0xf]  ;;  %v5719_v19 = vld [vmem:[#allocation20 + $0x134] sm:$0xf0]  ;;  %v5717_v17 = vld [vmem:[#allocation20 + $0x124] sm:$0xf0] }
 0x793   : > { %3720 = vmatpush.bf16.msra.mxu1 %v5171_v22  ;;  %v5614_v22 = vld [vmem:[%s7271_s8 + $0x70] sm:$0xff]  ;;  %v5743_v55 = vld [vmem:[#allocation20 + $0x1f4] sm:$0xf0]  ;;  %v5282_v16 = vld [vmem:[#allocation20 + $0x120] sm:$0xf] }
 0x794   : > { %3345 = vmatpush.bf16.msra.mxu0 %v5614_v22  ;;  %v5283_v20 = vor.u32 %v5717_v17, %v5282_v16  ;;  %v5741_v21 = vld [vmem:[#allocation20 + $0x1e4] sm:$0xf0]  ;;  %v5316_v16 = vld [vmem:[#allocation20 + $0x168] sm:$0xf0] }
 0x795   : > { %3732 = vmatpush.bf16.msrb.mxu2 %v5243_v26  ;;  %3191 = vmatmul.bf16.vlgmr.msrb.gmra.mxu0 %v2785_v53  ;;  %v5196_v53 = vld [vmem:[#allocation20 + $0x78] sm:$0xf0]  ;;  %v5236_v26 = vld [vmem:[#allocation20 + $0xc8] sm:$0xf0] }
 0x796   : > { %3205 = vmatmul.bf16.vlgmr.msrb.gmra.mxu1 %v2786_v42  ;;  %v5139_v42 = vor.u32 %v5681_v49, %v5138_v47  ;;  %v5199_v51 = vor.u32 %v5694_v52, %v5196_v53  ;;  %v5239_v33 = vor.u32 %v5704_v25, %v5236_v26  ;;  %3332 = vmatpush.bf16.msra.mxu3 %v5605_v27  ;;  %v5140_v47 = vld [vmem:[#allocation20 + $0x8] sm:$0xf0]  ;;  %v5212_v52 = vld [vmem:[#allocation20 + $0x98] sm:$0xf0]  ;;  %v5602_v53 = vld [vmem:[%s7271_s8 + $0x10] sm:$0xff] }
 0x797   : > { %3721 = vmatpush.bf16.msra.mxu1 %v5163_v30  ;;  %v5684_v30 = vld [vmem:[#allocation20 + $0x24] sm:$0xf]  ;;  %v5143_v54 = vor.u32 %v5680_v46, %v5140_v47  ;;  %v5715_v25 = vld [vmem:[#allocation20 + $0x114] sm:$0xf0]  ;;  %v5370_v26 = vld [vmem:[#allocation20 + $0x1d0] sm:$0xf] }
 0x798   : > { %v5733_v46 = vld [vmem:[#allocation20 + $0x1a4] sm:$0xf0] }
 0x799   : > { %3733 = vmatpush.bf16.msrb.mxu2 %v5235_v34  ;;  %v5702_v34 = vld [vmem:[#allocation20 + $0xb4] sm:$0xf] }
 0x79a   : > { %v5231_v40 = vor.u32 %v5702_v34, %v5228_v35  ;;  %3333 = vmatpush.bf16.msra.mxu3 %v5604_v36  ;;  %v5362_v36 = vld [vmem:[#allocation20 + $0x1c0] sm:$0xf] }
 0x79b   : > { %3722 = vmatpush.bf16.msra.mxu1 %v5155_v37  ;;  %3177 = vmatmul.bf16.vlgmr.msrb.gmra.mxu3 %v2784_v1  ;;  %v5688_v1 = vld [vmem:[#allocation20 + $0x44] sm:$0xf]  ;;  %v5159_v37 = vor.u32 %v5684_v30, %v5156_v31  ;;  %v5266_v31 = vld [vmem:[#allocation20 + $0x100] sm:$0xf] }
 0x79c   : > { %3219 = vmatmul.bf16.vlgmr.msra.gmra.mxu2 %v2787_v14  ;;  %v7083_v14 = vpack.c.bf16 %v2744_v8, %v2744_v8  ;;  %v5175_v18 = vor.u32 %v5688_v1, %v5172_v13  ;;  %v5307_v8 = vor.u32 %v5723_v6, %v5306_v5  ;;  %v5608_v1 = vld [vmem:[%s7271_s8 + $0x40] sm:$0xff]  ;;  %v5290_v13 = vld [vmem:[#allocation20 + $0x130] sm:$0xf] }
 0x79d   : > { %3734 = vmatpush.bf16.msrb.mxu2 %v5227_v41  ;;  %v5700_v41 = vld [vmem:[#allocation20 + $0xa4] sm:$0xf] }
 0x79e   : > { %v5223_v49 = vor.u32 %v5700_v41, %v5220_v43  ;;  %3334 = vmatpush.bf16.msra.mxu3 %v5603_v44  ;;  %v1350_v43 = vld [vmem:[%s7272_s2] sm:$0x3]  ;;  %s7277_s2 = sld [smem:[#allocation58_spill]] }
 0x79f   : > { %3723 = vmatpush.bf16.msra.mxu1 %v5147_v45  ;;  %v5151_v45 = vor.u32 %v5682_v38, %v5148_v39  ;;  %v5354_v39 = vld [vmem:[#allocation20 + $0x1b0] sm:$0xf]  ;;  %v2790_v6 = vperm.slane %v1350_v43, 1 }
 0x7a1   : > { %3735 = vmatpush.bf16.msrb.mxu2 %v5219_v50  ;;  %v5698_v50 = vld [vmem:[#allocation20 + $0x94] sm:$0xf] }
 0x7a2   : > { %v5215_v56 = vor.u32 %v5698_v50, %v5212_v52  ;;  %3335 = vmatpush.bf16.msra.mxu3 %v5602_v53  ;;  %v5338_v53 = vld [vmem:[#allocation20 + $0x190] sm:$0xf] }
 0x7a3   : > { %3724 = vmatpush.bf16.msra.mxu1 %v5139_v42  ;;  %v5204_v42 = vld [vmem:[#allocation20 + $0x88] sm:$0xf0] }
 0x7a4   : > { %v5207_v58 = vor.u32 %v5696_v10, %v5204_v42 }
 0x7a5   : > { %3736 = vmatpush.bf16.msrb.mxu2 %v5211_v59  ;;  %v5613_v59 = vld [vmem:[%s7271_s8 + $0x68] sm:$0xff] }
 0x7a6   : > { %3725 = vmatmul.bf16.vlgmr.msra.gmra.mxu1 %v7079_v3  ;;  %3346 = vmatpush.bf16.msra.mxu0 %v5613_v59 }
 0x7a7   : > { %3769 = vmatpush.bf16.msrb.mxu1 %v5199_v51  ;;  %v5601_v51 = vld [vmem:[%s7271_s8 + $0x8] sm:$0xff] }
 0x7a8   : > { %3336 = vmatpush.bf16.msra.mxu3 %v5601_v51  ;;  %v5729_v51 = vld [vmem:[#allocation20 + $0x184] sm:$0xf0] }
 0x7a9   : > { %3737 = vmatpush.bf16.msrb.mxu2 %v5203_v4  ;;  %v5610_v4 = vld [vmem:[%s7271_s8 + $0x50] sm:$0xff] }
 0x7aa   : > { %3347 = vmatpush.bf16.msra.mxu0 %v5612_v2 }
 0x7ab   : > { %3770 = vmatpush.bf16.msrb.mxu1 %v5191_v32 }
 0x7ac   : > { %3738 = vmatmul.bf16.vlgmr.msrb.gmra.mxu2 %v7083_v14  ;;  %3337 = vmatpush.bf16.msra.mxu3 %v5600_v60 }
 0x7ad   : > { %3782 = vmatpush.bf16.msra.mxu2 %v5263_v9  ;;  %v5609_v9 = vld [vmem:[%s7271_s8 + $0x48] sm:$0xff]  ;;  %s3977_s8 = scalar_lea.hbm %s7277_s2, %s6689_s1 }
 0x7ae   : > { %3348 = vmatpush.bf16.msra.mxu0 %v5611_v63  ;;  %s7141_s13 = sshll.u32 %s3977_s8, 4  ;;  %s3982_s13 = int_to_ptr.hbm [resolvable:$true] %s7141_s13 }
 0x7af   : > { %3771 = vmatpush.bf16.msrb.mxu1 %v5183_v12  ;;  %v5299_v12 = vor.u32 %v5721_v11, %v5298_v48  ;;  %v5324_v48 = vld [vmem:[#allocation20 + $0x178] sm:$0xf0] }
 0x7b0   : > { %3743 = vmatpush.bf16.msrb.mxu3 %v5323_v62 }
 0x7b1   : > { %3783 = vmatpush.bf16.msra.mxu2 %v5255_v15  ;;  %v5386_v15 = vld [vmem:[#allocation20 + $0x1f0] sm:$0xf] }
 0x7b2   : > { %3349 = vmatpush.bf16.msra.mxu0 %v5610_v4  ;;  %v5387_v29 = vor.u32 %v5743_v55, %v5386_v15 }
 0x7b3   : > { %3772 = vmatpush.bf16.msrb.mxu1 %v5175_v18  ;;  %v5378_v18 = vld [vmem:[#allocation20 + $0x1e0] sm:$0xf] }
 0x7b4   : > { %v5379_v22 = vor.u32 %v5741_v21, %v5378_v18  ;;  %v5722_v21 = vld [vmem:[#allocation20 + $0x154] sm:$0xf] }
 0x7b5   : > { %3784 = vmatpush.bf16.msra.mxu2 %v5247_v23  ;;  %v5274_v23 = vld [vmem:[#allocation20 + $0x110] sm:$0xf] }
 0x7b6   : > { %3350 = vmatpush.bf16.msra.mxu0 %v5609_v9  ;;  %v5275_v27 = vor.u32 %v5715_v25, %v5274_v23  ;;  %v5726_v9 = vld [vmem:[#allocation20 + $0x174] sm:$0xf] }
 0x7b7   : > { %3773 = vmatpush.bf16.msrb.mxu1 %v5167_v28  ;;  %v5739_v28 = vld [vmem:[#allocation20 + $0x1d4] sm:$0xf0]  ;;  %v5327_v15 = vor.u32 %v5726_v9, %v5324_v48  ;;  %v5364_v9 = vld [vmem:[#allocation20 + $0x1c8] sm:$0xf0] }
 0x7b8   : > { %v5371_v30 = vor.u32 %v5739_v28, %v5370_v26  ;;  %v7105_v26 = vld [vmem:[%s7273_s7] sm:$0x3]  ;;  %s7278_s7 = sld [smem:[#allocation56_spill]] }
 0x7b9   : > { %3785 = vmatpush.bf16.msra.mxu2 %v5239_v33  ;;  %v5713_v33 = vld [vmem:[#allocation20 + $0x104] sm:$0xf0] }
 0x7ba   : > { %3351 = vmatpush.bf16.msra.mxu0 %v5608_v1  ;;  %v5267_v35 = vor.u32 %v5713_v33, %v5266_v31 }
 0x7bb   : > { %3774 = vmatpush.bf16.msrb.mxu1 %v5159_v37  ;;  %v5737_v37 = vld [vmem:[#allocation20 + $0x1c4] sm:$0xf0] }
 0x7bc   : > { %v5363_v38 = vor.u32 %v5737_v37, %v5362_v36  ;;  %v3713_v36 = vperm.slane %v7105_v26, 0 }
 0x7bd   : > { %3786 = vmatpush.bf16.msra.mxu2 %v5231_v40  ;;  %v5735_v40 = vld [vmem:[#allocation20 + $0x1b4] sm:$0xf0] }
 0x7be   : > { %3756 = vmatpush.bf16.msrb.mxu0 %v5387_v29  ;;  %v5355_v41 = vor.u32 %v5735_v40, %v5354_v39  ;;  %v5724_v29 = vld [vmem:[#allocation20 + $0x164] sm:$0xf]  ;;  %v2745_v40 = vmax.f32 %v7060_v57, 0.0  ;;  %v5284_v57 = vld [vmem:[#allocation20 + $0x128] sm:$0xf0] }
 0x7bf   : > { %3775 = vmatpush.bf16.msrb.mxu1 %v5151_v45  ;;  %v5346_v45 = vld [vmem:[#allocation20 + $0x1a0] sm:$0xf] }
 0x7c0   : > { %v5347_v50 = vor.u32 %v5733_v46, %v5346_v45  ;;  %v5292_v45 = vld [vmem:[#allocation20 + $0x138] sm:$0xf0]  ;;  %v5742_v46 = vld [vmem:[#allocation20 + $0x1f4] sm:$0xf] }
 0x7c1   : > { %3787 = vmatpush.bf16.msra.mxu2 %v5223_v49  ;;  %v2789_v49 = vperm.slane %v1350_v43, 0  ;;  %v5718_v43 = vld [vmem:[#allocation20 + $0x134] sm:$0xf] }
 0x7c2   : > { %3757 = vmatpush.bf16.msrb.mxu0 %v5379_v22  ;;  %v5308_v22 = vld [vmem:[#allocation20 + $0x158] sm:$0xf0] }
 0x7c3   : > { %3776 = vmatpush.bf16.msrb.mxu1 %v5143_v54  ;;  %v5731_v54 = vld [vmem:[#allocation20 + $0x194] sm:$0xf0]  ;;  %v5311_v31 = vor.u32 %v5722_v21, %v5308_v22  ;;  %v5728_v22 = vld [vmem:[#allocation20 + $0x184] sm:$0xf] }
 0x7c4   : > { %v5339_v42 = vor.u32 %v5731_v54, %v5338_v53 }
 0x7c5   : > { %3788 = vmatpush.bf16.msra.mxu2 %v5215_v56 }
 0x7c6   : > { %3777 = vmatmul.bf16.vlgmr.msrb.gmra.mxu1 %v7079_v3  ;;  %v5725_v3 = vld [vmem:[#allocation20 + $0x164] sm:$0xf0]  ;;  %3758 = vmatpush.bf16.msrb.mxu0 %v5371_v30 }
 0x7c7   : > { %v5315_v32 = vor.u32 %v5725_v3, %v5314_v0 }
 0x7c9   : > { %3789 = vmatpush.bf16.msra.mxu2 %v5207_v58  ;;  %3744 = vmatpush.bf16.msrb.mxu3 %v5315_v32  ;;  %v5330_v58 = vld [vmem:[#allocation20 + $0x180] sm:$0xf] }
 0x7ca   : > { %3759 = vmatpush.bf16.msrb.mxu0 %v5363_v38  ;;  %v5331_v60 = vor.u32 %v5729_v51, %v5330_v58  ;;  %v2749_v58 = vpack.c.bf16 %v2745_v40, %v2745_v40  ;;  %v5745_v40 = vld [vmem:[%s7274_s3 + $0x8] sm:$0xff] }
 0x7cc   : > { %3790 = vmatmul.bf16.vlgmr.msra.gmra.mxu2 %v7083_v14  ;;  %v5291_v14 = vor.u32 %v5719_v19, %v5290_v13 }
 0x7cd   : > { %3745 = vmatpush.bf16.msrb.mxu3 %v5307_v8 }
 0x7ce   : > { %3760 = vmatpush.bf16.msrb.mxu0 %v5355_v41 }
 0x7d1   : > { %3746 = vmatpush.bf16.msrb.mxu3 %v5299_v12 }
 0x7d2   : > { %3761 = vmatpush.bf16.msrb.mxu0 %v5347_v50 }
 0x7d5   : > { %3747 = vmatpush.bf16.msrb.mxu3 %v5291_v14 }
 0x7d6   : > { %3762 = vmatpush.bf16.msrb.mxu0 %v5339_v42  ;;  %v5716_v42 = vld [vmem:[#allocation20 + $0x124] sm:$0xf] }
 0x7d9   : > { %3748 = vmatpush.bf16.msrb.mxu3 %v5283_v20  ;;  %v5319_v20 = vor.u32 %v5724_v29, %v5316_v16  ;;  %v5348_v29 = vld [vmem:[#allocation20 + $0x1a8] sm:$0xf0] }
 0x7da   : > { %3763 = vmatpush.bf16.msrb.mxu0 %v5331_v60  ;;  %v5287_v60 = vor.u32 %v5716_v42, %v5284_v57  ;;  %v5752_v42 = vld [vmem:[%s7274_s3 + $0x40] sm:$0xff] }
 0x7dd   : > { %3749 = vmatpush.bf16.msrb.mxu3 %v5275_v27 }
 0x7e1   : > { %3750 = vmatpush.bf16.msrb.mxu3 %v5267_v35  ;;  %v5300_v35 = vld [vmem:[#allocation20 + $0x148] sm:$0xf0] }
 0x802   : > { %v3136_v44 = vpop.f32.mrf.mxu0 }
 0x803   : > { %v3150_v34 = vpop.f32.mrf.mxu1 }
 0x80a   : > { %v3138_v2 = vpop.f32.mrf.mxu0 }
 0x80b   : > { %v3152_v47 = vpop.f32.mrf.mxu1 }
 0x80e   : > { %v3122_v52 = vpop.f32.mrf.mxu3 }
 0x80f   : > { %v3123_v56 = vadd.f32 %v3122_v52, %v2789_v49  ;;  %v3164_v10 = vpop.f32.mrf.mxu2 }
 0x811   : > { %v3137_v59 = vadd.f32 %v3136_v44, %v3123_v56  ;;  %v5295_v56 = vor.u32 %v5718_v43, %v5292_v45  ;;  %v5744_v43 = vld [vmem:[%s7274_s3] sm:$0xff] }
 0x812   : > { %v3192_v11 = vpop.f32.mrf.mxu0 }
 0x813   : > { %v3206_v24 = vpop.f32.mrf.mxu1  ;;  %v3151_v62 = vadd.f32 %v3150_v34, %v3137_v59  ;;  %v5720_v34 = vld [vmem:[#allocation20 + $0x144] sm:$0xf] }
 0x814   : > { %v5303_v41 = vor.u32 %v5720_v34, %v5300_v35  ;;  %v5740_v59 = vld [vmem:[#allocation20 + $0x1e4] sm:$0xf]  ;;  %v5749_v34 = vld [vmem:[%s7274_s3 + $0x28] sm:$0xff] }
 0x815   : > { %v3165_v32 = vadd.f32 %v3164_v10, %v3151_v62  ;;  %v5276_v62 = vld [vmem:[#allocation20 + $0x118] sm:$0xf0]  ;;  %v5748_v35 = vld [vmem:[%s7274_s3 + $0x20] sm:$0xff] }
 0x816   : > { %v3124_v61 = vpop.f32.mrf.mxu3 }
 0x817   : > { %v3125_v63 = vadd.f32 %v3124_v61, %v2789_v49  ;;  %v3166_v0 = vpop.f32.mrf.mxu2  ;;  %v3225_v1 = vmax.f32 %v3165_v32, 0.0  ;;  %v5714_v61 = vld [vmem:[#allocation20 + $0x114] sm:$0xf] }
 0x818   : > { %v5279_v32 = vor.u32 %v5714_v61, %v5276_v62 }
 0x819   : > { %v3139_v3 = vadd.f32 %v3138_v2, %v3125_v63  ;;  %v5738_v63 = vld [vmem:[#allocation20 + $0x1d4] sm:$0xf] }
 0x81a   : > { %v3194_v30 = vpop.f32.mrf.mxu0 }
 0x81b   : > { %v3153_v4 = vadd.f32 %v3152_v47, %v3139_v3  ;;  %v3208_v5 = vpop.f32.mrf.mxu1  ;;  %v5388_v47 = vld [vmem:[#allocation20 + $0x1f8] sm:$0xf0] }
 0x81c   : > { %v5391_v10 = vor.u32 %v5742_v46, %v5388_v47  ;;  %v5755_v46 = vld [vmem:[%s7274_s3 + $0x58] sm:$0xff]  ;;  %v5754_v47 = vld [vmem:[%s7274_s3 + $0x50] sm:$0xff] }
 0x81d   : > { %v3167_v8 = vadd.f32 %v3166_v0, %v3153_v4  ;;  %v5372_v0 = vld [vmem:[#allocation20 + $0x1d8] sm:$0xf0] }
 0x81e   : > { %v3178_v12 = vpop.f32.mrf.mxu3  ;;  %v5375_v4 = vor.u32 %v5738_v63, %v5372_v0 }
 0x81f   : > { %v3227_v13 = vmax.f32 %v3167_v8, 0.0  ;;  %v3179_v19 = vadd.f32 %v3178_v12, %v2790_v6  ;;  %v3220_v14 = vpop.f32.mrf.mxu2  ;;  %v5736_v8 = vld [vmem:[#allocation20 + $0x1c4] sm:$0xf]  ;;  %v2746_v12 = vmax.f32 %v7065_v7, 0.0 }
 0x821   : > { %v3229_v55 = vpack.c.bf16 %v3227_v13, %v3225_v1  ;;  %v3193_v17 = vadd.f32 %v3192_v11, %v3179_v19  ;;  %v5367_v11 = vor.u32 %v5736_v8, %v5364_v9  ;;  %v5734_v1 = vld [vmem:[#allocation20 + $0x1b4] sm:$0xf]  ;;  %v5356_v13 = vld [vmem:[#allocation20 + $0x1b8] sm:$0xf0] }
 0x823   : > { %v3726_v18 = vpop.f32.mrf.mxu1  ;;  %3338 = vmatmul.bf16.vlgmr.msra.gmra.mxu3 %v3229_v55  ;;  %v3207_v25 = vadd.f32 %v3206_v24, %v3193_v17  ;;  %v5380_v24 = vld [vmem:[#allocation20 + $0x1e8] sm:$0xf0]  ;;  %v5732_v55 = vld [vmem:[#allocation20 + $0x1a4] sm:$0xf]  ;;  %v5730_v17 = vld [vmem:[#allocation20 + $0x194] sm:$0xf] }
 0x824   : > { %3795 = vmatpush.bf16.msra.mxu3 %v5327_v15  ;;  %v3727_v49 = vadd.f32 %v3726_v18, %v3713_v36  ;;  %v5383_v2 = vor.u32 %v5740_v59, %v5380_v24  ;;  %v2750_v15 = vpack.c.bf16 %v2746_v12, %v2746_v12  ;;  %v5351_v16 = vor.u32 %v5732_v55, %v5348_v29  ;;  %v5340_v18 = vld [vmem:[#allocation20 + $0x198] sm:$0xf0]  ;;  %v1546_v12 = vld [vmem:[%s7278_s7] sm:$0x1] }
 0x825   : > { %v3221_v37 = vadd.f32 %v3220_v14, %v3207_v25  ;;  %v5359_v14 = vor.u32 %v5734_v1, %v5356_v13  ;;  %v5343_v21 = vor.u32 %v5730_v17, %v5340_v18  ;;  %v5747_v36 = vld [vmem:[%s7274_s3 + $0x18] sm:$0xff] }
 0x826   : > { %v3180_v23 = vpop.f32.mrf.mxu3 }
 0x827   : > { %v3181_v27 = vadd.f32 %v3180_v23, %v2790_v6  ;;  %v3222_v28 = vpop.f32.mrf.mxu2  ;;  %v3226_v50 = vmax.f32 %v3221_v37, 0.0  ;;  %v5268_v6 = vld [vmem:[#allocation20 + $0x108] sm:$0xf0]  ;;  %v5759_v37 = vld [vmem:[%s7274_s3 + $0x78] sm:$0xff] }
 0x828   : > { %3796 = vmatpush.bf16.msra.mxu3 %v5319_v20  ;;  %v3714_v20 = vperm.slane %v7105_v26, 1  ;;  %v5332_v23 = vld [vmem:[#allocation20 + $0x188] sm:$0xf0]  ;;  %3934 = vmatpush.bf16.msrb.mxu2 %v5759_v37 }
 0x829   : > { %v3195_v33 = vadd.f32 %v3194_v30, %v3181_v27 }
 0x82b   : > { %v3209_v38 = vadd.f32 %v3208_v5, %v3195_v33  ;;  %v3728_v39 = vpop.f32.mrf.mxu1  ;;  %v5712_v5 = vld [vmem:[#allocation20 + $0x104] sm:$0xf]  ;;  %v5750_v33 = vld [vmem:[%s7274_s3 + $0x30] sm:$0xff] }
 0x82c   : > { %3797 = vmatpush.bf16.msra.mxu3 %v5311_v31  ;;  %v5271_v48 = vor.u32 %v5712_v5, %v5268_v6  ;;  %v5751_v31 = vld [vmem:[%s7274_s3 + $0x38] sm:$0xff]  ;;  %v5758_v39 = vld [vmem:[%s7274_s3 + $0x70] sm:$0xff] }
 0x82d   : > { %v3223_v44 = vadd.f32 %v3222_v28, %v3209_v38  ;;  %v5335_v28 = vor.u32 %v5728_v22, %v5332_v23  ;;  %3921 = vmatpush.bf16.msra.mxu1 %v5751_v31  ;;  %v5746_v38 = vld [vmem:[%s7274_s3 + $0x10] sm:$0xff]  ;;  %3935 = vmatpush.bf16.msrb.mxu2 %v5758_v39 }
 0x82f   : > { %v3228_v52 = vmax.f32 %v3223_v44, 0.0  ;;  %v3739_v53 = vpop.f32.mrf.mxu2  ;;  %v5756_v44 = vld [vmem:[%s7274_s3 + $0x60] sm:$0xff] }
 0x830   : > { %v7109_v54 = vadd.f32 %v3739_v53, %v3727_v49  ;;  %3798 = vmatpush.bf16.msra.mxu3 %v5303_v41  ;;  %v5757_v41 = vld [vmem:[%s7274_s3 + $0x68] sm:$0xff]  ;;  %v5967_v49 = vld [vmem:[%s7275_s24] ss:$0 sm:$0xff]  ;;  %s5457_s24 = sshll.u32 %s6689_s1, 3  ;;  %s6348_s1 = scalar_lea.hbm %s7276_s10, 16 }
 0x831   : > { %v3230_v51 = vpack.c.bf16 %v3228_v52, %v3226_v50  ;;  %3922 = vmatpush.bf16.msra.mxu1 %v5750_v33  ;;  %3936 = vmatpush.bf16.msrb.mxu2 %v5757_v41  ;;  %s3964_s28 = scalar_lea.hbm %s7276_s10, %s5457_s24  ;;  %s3950_s24 = scalar_lea.sflag [#allocation4], %s6877_s16 }
 0x832   : > { %s3968_s6 = sshll.u32 %s3964_s28, 4  ;;  %s3969_s6 = int_to_ptr.hbm [resolvable:$true] %s3968_s6 }
 0x833   : > { %3352 = vmatmul.bf16.vlgmr.msra.gmra.mxu0 %v3230_v51  ;;  %3751 = vmatmul.bf16.vlgmr.msrb.gmra.mxu3 %v2749_v58 }
 0x834   : > { %3799 = vmatpush.bf16.msra.mxu3 %v5295_v56  ;;  %3808 = vmatpush.bf16.msra.mxu0 %v5391_v10  ;;  %v5753_v56 = vld [vmem:[%s7274_s3 + $0x48] sm:$0xff]  ;;  %s7279_s3 = sshll.u32 %s6877_s16, 3 }
 0x835   : > { %3923 = vmatpush.bf16.msra.mxu1 %v5749_v34  ;;  %3937 = vmatpush.bf16.msrb.mxu2 %v5756_v44  ;;  %s1147_s4 = scalar_lea.vmem [#allocation22], %s7279_s3  ;;  %s6342_s3 = sshra.s32 %s3969_s6, 4  ;;  %s6343_s3 = int_to_ptr.hbm [resolvable:$true] %s6342_s3 }
 0x836   : > { %s3966_s5 = sshll.u32 %s1147_s4, 4  ;;  %s6344_s28 = scalar_lea.hbm %s6343_s3, 8  ;;  %s3967_s5 = int_to_ptr.vmem [resolvable:$true] %s3966_s5 }
 0x837   : > { %v3741_v3 = vpop.f32.mrf.mxu2  ;;  %p6345_p9 = scmp.ne.s32.totalorder %s6343_s3, %s6344_s28  ;;  %p6349_p4 = scmp.lt.s32.totalorder %s6343_s3, %s7276_s10 }
 0x838   : > { %3800 = vmatpush.bf16.msra.mxu3 %v5287_v60  ;;  %3809 = vmatpush.bf16.msra.mxu0 %v5383_v2  ;;  %p6350_p11 = scmp.lt.s32.totalorder %s6348_s1, %s6344_s28 }
 0x839   : > { %3924 = vmatpush.bf16.msra.mxu1 %v5748_v35  ;;  %3938 = vmatpush.bf16.msrb.mxu2 %v5755_v46  ;;  %p6346_p1 = pnand %p6345_p9, %p6852_p6 }
 0x83a   : > { %p6351_p10 = por %p6350_p11, %p6349_p4 }
 0x83b   : > { %p6347_p3 = pneg %p6346_p1 }
 0x83c   : > { %3801 = vmatpush.bf16.msra.mxu3 %v5279_v32  ;;  %3810 = vmatpush.bf16.msra.mxu0 %v5375_v4 }
 0x83d   : > { %3925 = vmatpush.bf16.msra.mxu1 %v5747_v36  ;;  %3939 = vmatpush.bf16.msrb.mxu2 %v5754_v47  ;;  %p6352_p12 = pnand %p6351_p10, %p6347_p3 }
 0x840   : > { %3802 = vmatpush.bf16.msra.mxu3 %v5271_v48  ;;  %3811 = vmatpush.bf16.msra.mxu0 %v5367_v11 }
 0x841   : > { %3926 = vmatpush.bf16.msra.mxu1 %v5746_v38  ;;  %3940 = vmatpush.bf16.msrb.mxu2 %v5753_v56 }
 0x843   : > { %v3778_v19 = vpop.f32.mrf.mxu1  ;;  %3764 = vmatmul.bf16.vlgmr.msrb.gmra.mxu0 %v2750_v15  ;;  %3803 = vmatmul.bf16.vlgmr.msra.gmra.mxu3 %v2749_v58 }
 0x844   : > { %3812 = vmatpush.bf16.msra.mxu0 %v5359_v14  ;;  %v3779_v25 = vadd.f32 %v3778_v19, %v3714_v20 }
 0x845   : > { %3927 = vmatpush.bf16.msra.mxu1 %v5745_v40  ;;  %3941 = vmatpush.bf16.msrb.mxu2 %v5752_v42 }
 0x848   : > { %3813 = vmatpush.bf16.msra.mxu0 %v5351_v16 }
 0x849   : > { %3928 = vmatpush.bf16.msra.mxu1 %v5744_v43 }
 0x84b   : > { %v3780_v7 = vpop.f32.mrf.mxu1 }
 0x84c   : > { %3814 = vmatpush.bf16.msra.mxu0 %v5343_v21 }
 0x84f   : > { %v3791_v27 = vpop.f32.mrf.mxu2 }
 0x850   : > { %v3792_v30 = vadd.f32 %v3791_v27, %v3779_v25  ;;  %3815 = vmatpush.bf16.msra.mxu0 %v5335_v28 }
 0x853   : > { %3816 = vmatmul.bf16.vlgmr.msra.gmra.mxu0 %v2750_v15 }
 0x857   : > { %v3793_v26 = vpop.f32.mrf.mxu2 }
 0x8a6   : > { %v3339_v45 = vpop.f32.mrf.mxu3 }
 0x8a7   : > { %v3340_v52 = vadd.f32 %v5967_v49, %v3339_v45 }
 0x8ae   : > { %v3341_v50 = vpop.f32.mrf.mxu3 }
 0x8af   : > { %v3342_v51 = vadd.f32 %v5967_v49, %v3341_v50 }
 0x8b0   : > { %v3353_v53 = vpop.f32.mrf.mxu0 }
 0x8b1   : > { %v3354_v10 = vadd.f32 %v3353_v53, %v3340_v52 }
 0x8b3   : > { %3358 = vxpose.xlu0.b32.start [1/2] (short) (narrow) %v3354_v10, 8 }
 0x8b6   : > { %v3752_v58 = vpop.f32.mrf.mxu3 }
 0x8b7   : > { %v3753_v60 = vadd.f32 %v3752_v58, %v7109_v54 }
 0x8b8   : > { %v3355_v57 = vpop.f32.mrf.mxu0 }
 0x8b9   : > { %v3356_v59 = vadd.f32 %v3355_v57, %v3342_v51 }
 0x8bb   : > { %3359 = vxpose.xlu0.b32.end [2/2] (short) (narrow) %v3356_v59, 8 }
 0x8be   : > { %v3754_v24 = vpop.f32.mrf.mxu3 }
 0x8c0   : > { %v3765_v2 = vpop.f32.mrf.mxu0 }
 0x8c1   : > { %v3766_v61 = vadd.f32 %v3765_v2, %v3753_v60 }
 0x8c3   : > { %v3821_v62 = vmax.f32 %v3766_v61, 0.0 }
 0x8c5   : > { %v3823_v63 = vpack.c.bf16 %v3821_v62, %v3821_v62 }
 0x8c6   : > { %v3804_v0 = vpop.f32.mrf.mxu3 }
 0x8c7   : > { %3929 = vmatmul.bf16.vlgmr.msra.gmra.mxu1 %v3823_v63  ;;  %v3805_v4 = vadd.f32 %v3804_v0, %v3792_v30 }
 0x8c8   : > { %v3767_v3 = vpop.f32.mrf.mxu0 }
 0x8ce   : > { %v3806_v32 = vpop.f32.mrf.mxu3 }
 0x8d0   : > { %v3817_v5 = vpop.f32.mrf.mxu0 }
 0x8d1   : > { %v3818_v6 = vadd.f32 %v3817_v5, %v3805_v4 }
 0x8d3   : > { %v3822_v8 = vmax.f32 %v3818_v6, 0.0 }
 0x8d5   : > { %v3824_v9 = vpack.c.bf16 %v3822_v8, %v3822_v8 }
 0x8d7   : > { %3942 = vmatmul.bf16.vlgmr.msrb.gmra.mxu2 %v3824_v9 }
 0x8d8   : > { %v3819_v54 = vpop.f32.mrf.mxu0 }
 0x944   : > { %v3930_v48 = vpop.f32.mrf.mxu1 }
 0x945   : > { %v3931_v13 = vadd.f32 %v3930_v48, %v1546_v12 }
 0x94c   : > { %v3932_v11 = vpop.f32.mrf.mxu1 }
 0x957   : > { %v3374_v1 = vpop.trf.xlu0 }
 0x958   : > { %3391 = vst.msk [vmem:[%s1147_s4] sm:$0xff] %vm3390_vm3, %v3374_v1 }
 0x959   : > { %6355 = shalt.err (!%p6352_p12)
}
 0x95a   : > { %5806 = dma.vmem_to_hbm [thread:$0]  (%p6852_p6), %s3967_s5, 128, %s3969_s6, %s3950_s24   ;;  %v3943_v19 = vpop.f32.mrf.mxu2  ;;  %vm3947_vm4 = vcmask 32768  }
 0x95b   : > { %v3944_v14 = vadd.f32 %v3943_v19, %v3931_v13  ;;  %s3955_s4 = scalar_lea.sflag [#allocation24], %s6877_s16  ;;  %s6370_s8 = sshra.s32 %s3982_s13, 4  ;;  %s6371_s8 = int_to_ptr.hbm [resolvable:$true] %s6370_s8 }
 0x95c   : > { %s6372_s7 = scalar_lea.hbm %s6371_s8, 1  ;;  %s6376_s3 = scalar_lea.hbm %s7277_s2, 2 }
 0x95d   : > { %3948 = vst.msk [vmem:[%s1153_s11] sm:$0x1] %vm3947_vm4, %v3944_v14  ;;  %p6373_p7 = scmp.ne.s32.totalorder %s6371_s8, %s6372_s7  ;;  %p6377_p0 = scmp.lt.s32.totalorder %s6371_s8, %s7277_s2 }
 0x95e   : > { %p6378_p2 = scmp.lt.s32.totalorder %s6376_s3, %s6372_s7 }
 0x95f   : > { %p6374_p13 = pnand %p6373_p7, %p6852_p6 }
 0x960   : > { %p6379_p5 = por %p6378_p2, %p6377_p0 }
 0x961   : > { %p6375_p8 = pneg %p6374_p13 }
 0x963   : > { %p6380_p9 = pnand %p6379_p5, %p6375_p8 }
 0x965   : > { %6383 = shalt.err (!%p6380_p9)
}
 0x966   : > { %5807 = dma.vmem_to_hbm [thread:$0]  (%p6852_p6), %s3980_s12, 16, %s3982_s13, %s3955_s4   ;;  %v3945_v15 = vpop.f32.mrf.mxu2 }
 0x967 PF: > { %s3993_s5 = sand.u32 1, %s6438_s22   ;;  %p7280_p1 = scmp.ne.s32.totalorder %s7247_s9, 0 }
 0x968   : > { %p7281_p3 = scmp.ge.s32.totalorder %s6450_s0, 2  ;;  %s3994_s16 = scalar_lea.sflag [#allocation4], %s3993_s5 }
 0x96a   : > { %p5849_p4 = pnand %p7281_p3, %p7280_p1 }
 0x96c   : > { %p5850_p11 = pneg %p5849_p4 }
 0x96e   : > { %6429 = dma.done.wait (%p5850_p11), %s3994_s16, 128  }
 0x96f   : > { %6431 = vsyncadd (%p5850_p11), %s3994_s16, 4294967168  ;;  %s4004_s6 = scalar_lea.sflag [#allocation24], %s3993_s5 }
 0x970   : > { %6433 = dma.done.wait (%p5850_p11), %s4004_s6, 16  }
 0x971   : > { %6435 = vsyncadd (%p5850_p11), %s4004_s6, 4294967280  ;;  %p86_p6 = scmp.ge.s32.totalorder %s6832_s15, 4   ;;  %s7282_s22 = smov %s6442_s23 }
 0x972   : > { %s7283_s23 = smov %s6446_s26  ;;  %s7284_s26 = smov %s6844_s14 }
 0x973   : > { %s7285_s0 = smov %s6832_s15  ;;  %88 = sbr.rel (!%p86_p6) target bundleno = 77 (0x4d), region = 277 }
 0x978   :  { %4009 = vsyncpa [#allocation3], 1 }
 0x979   :  { %4011 = vsyncpa [#allocation3 + $0x1], 1 }
 0x97a   :  { %4012 = vsyncpa [#allocation6], 1 }
 0x97b   :  { %4013 = vsyncpa [#allocation9], 1 }
 0x97c   :  { %4014 = vsyncpa [#allocation12], 1 }
 0x97d   :  { %4015 = vsyncpa [#allocation15], 1 }
 0x97e   :  { %4016 = vsyncpa [#allocation18], 1 }
 0x97f   :  { %4017 = vsyncpa [#allocation21], 1 }
 0x980   :  { %4018 = vsyncpa [#allocation4], 1 }
 0x981   :  { %4020 = vsyncpa [#allocation4 + $0x1], 1 }
 0x982   :  { %4021 = vsyncpa [#allocation24], 1 }
 0x983   :  { %4023 = vsyncpa [#allocation24 + $0x1], 1 }

// kernel: tpu_custom_call.1
= control target key start
LH: loop header
LB: loop body
LE: loop exit
PB: predicated region body
PF: predicated region fallthrough
CT: control target
= control target key end

     0   :  { %s6452_s6 = smov 1   ;;  %s6453_s10 = smov 2   ;;  %s7177_s0 = inlined_call_operand.smem [shape: u32[32], index: -1, kind: input, shape index: {}] }
   0x1   :  { %s6508_s5 = sld [smem:[%s7177_s0]]   ;;  %s6454_s14 = smov 3  }
   0x2   :  { %s6513_s9 = sld [smem:[%s7177_s0 + %s6452_s6]]   ;;  %s6455_s18 = smov 4  }
   0x3   :  { %s6518_s13 = sld [smem:[%s7177_s0 + %s6453_s10]]   ;;  %s6456_s22 = smov 5  }
   0x4   :  { %s6523_s17 = sld [smem:[%s7177_s0 + %s6454_s14]]   ;;  %s6457_s26 = smov 6  }
   0x5   :  { %s6528_s21 = sld [smem:[%s7177_s0 + %s6455_s18]]   ;;  %s6458_s30 = smov 7  }
   0x6   :  { %s6533_s25 = sld [smem:[%s7177_s0 + %s6456_s22]]   ;;  %s6459_s4 = smov 8  }
   0x7   :  { %7205 = sst [smem:[#allocation34_spill]] %s6508_s5  ;;  %s6460_s10 = smov 9  }
   0x8   :  { %7206 = sst [smem:[#allocation35_spill]] %s6513_s9  ;;  %s6461_s15 = smov 10  }
   0x9   :  { %7207 = sst [smem:[#allocation36_spill]] %s6518_s13  ;;  %s6462_s20 = smov 11  }
   0xa   :  { %s6538_s29 = sld [smem:[%s7177_s0 + %s6457_s26]]   ;;  %s6463_s26 = smov 12  }
   0xb   :  { %s6543_s3 = sld [smem:[%s7177_s0 + %s6458_s30]]   ;;  %s6464_s1 = smov 13  }
   0xc   :  { %s6548_s8 = sld [smem:[%s7177_s0 + %s6459_s4]]   ;;  %s6465_s7 = smov 14  }
   0xd   :  { %s6553_s14 = sld [smem:[%s7177_s0 + %s6460_s10]]   ;;  %s6467_s22 = smov 16  }
   0xe   :  { %s6558_s19 = sld [smem:[%s7177_s0 + %s6461_s15]]   ;;  %s6466_s15 = smov 15  }
   0xf   :  { %s6563_s24 = sld [smem:[%s7177_s0 + %s6462_s20]]   ;;  %s6468_s28 = smov 17  }
  0x10   :  { %7208 = sst [smem:[#allocation37_spill]] %s6538_s29 }
  0x11   :  { %7209 = sst [smem:[#allocation38_spill]] %s6543_s3 }
  0x12   :  { %7210 = sst [smem:[#allocation39_spill]] %s6548_s8 }
  0x13   :  { %7211 = sst [smem:[#allocation40_spill]] %s6553_s14 }
  0x14   :  { %s6568_s30 = sld [smem:[%s7177_s0 + %s6463_s26]]  }
  0x15   :  { %7212 = sst [smem:[#allocation41_spill]] %s6563_s24 }
  0x16   :  { %s6573_s6 = sld [smem:[%s7177_s0 + %s6464_s1]]  }
  0x17   :  { %s6578_s12 = sld [smem:[%s7177_s0 + %s6465_s7]]   ;;  %s6469_s7 = smov 18  }
  0x18   :  { %s6583_s20 = sld [smem:[%s7177_s0 + %s6466_s15]]   ;;  %s6470_s15 = smov 19  }
  0x19   :  { %s6588_s27 = sld [smem:[%s7177_s0 + %s6467_s22]]   ;;  %s6471_s22 = smov 20  }
  0x1a   :  { %s6593_s4 = sld [smem:[%s7177_s0 + %s6468_s28]]   ;;  %s6472_s28 = smov 21  }
  0x1b   :  { %s6613_s24 = sld [smem:[%s7177_s0 + %s6472_s28]]   ;;  %s6476_s28 = smov 25  }
  0x1c   :  { %7213 = sst [smem:[#allocation42_spill]] %s6573_s6 }
  0x1d   :  { %7214 = sst [smem:[#allocation43_spill]] %s6578_s12 }
  0x1e   :  { %7215 = sst [smem:[#allocation44_spill]] %s6583_s20 }
  0x1f   :  { %7216 = sst [smem:[#allocation45_spill]] %s6588_s27 }
  0x20   :  { %7217 = sst [smem:[#allocation46_spill]] %s6593_s4 }
  0x21   :  { %s6598_s6 = sld [smem:[%s7177_s0 + %s6469_s7]]   ;;  %s6473_s7 = smov 22  }
  0x22   :  { %s6603_s20 = sld [smem:[%s7177_s0 + %s6470_s15]]   ;;  %s6474_s15 = smov 23  }
  0x23   :  { %s6608_s27 = sld [smem:[%s7177_s0 + %s6471_s22]]   ;;  %s6475_s22 = smov 24  }
  0x24   :  { %7220 = sst [smem:[#allocation49_spill]] %s6613_s24 }
  0x25   :  { %s6628_s29 = sld [smem:[%s7177_s0 + %s6475_s22]]   ;;  %s6479_s22 = smov 28  }
  0x26   :  { %s6633_s24 = sld [smem:[%s7177_s0 + %s6476_s28]]   ;;  %s6480_s28 = smov 29  }
  0x27   :  { %7218 = sst [smem:[#allocation47_spill]] %s6598_s6 }
  0x28   :  { %7219 = sst [smem:[#allocation48_spill]] %s6603_s20 }
  0x29   :  { %s6618_s6 = sld [smem:[%s7177_s0 + %s6473_s7]]   ;;  %s6477_s7 = smov 26  }
  0x2a   :  { %s6623_s20 = sld [smem:[%s7177_s0 + %s6474_s15]]   ;;  %s6478_s15 = smov 27  }
  0x2b   :  { %s6648_s14 = sld [smem:[%s7177_s0 + %s6479_s22]]  }
  0x2c   :  { %7223 = sst [smem:[#allocation52_spill]] %s6633_s24 }
  0x2d   :  { %s6653_s24 = sld [smem:[%s7177_s0 + %s6480_s28]]  }
  0x2f   :  { %7221 = sst [smem:[#allocation50_spill]] %s6618_s6 }
  0x30   :  { %7222 = sst [smem:[#allocation51_spill]] %s6623_s20 }
  0x31   :  { %s6638_s6 = sld [smem:[%s7177_s0 + %s6477_s7]]   ;;  %s6481_s7 = smov 30  }
  0x32   :  { %s6643_s20 = sld [smem:[%s7177_s0 + %s6478_s15]]   ;;  %s6482_s15 = smov 31  }
  0x33   :  { %7226 = sst [smem:[#allocation55_spill]] %s6648_s14 }
  0x34   :  { %7227 = sst [smem:[#allocation56_spill]] %s6653_s24 }
  0x35   :  { %s6658_s3 = sld [smem:[%s7177_s0 + %s6481_s7]]  }
  0x37   :  { %7224 = sst [smem:[#allocation53_spill]] %s6638_s6 }
  0x38   :  { %7225 = sst [smem:[#allocation54_spill]] %s6643_s20 }
  0x39   :  { %s6663_s20 = sld [smem:[%s7177_s0 + %s6482_s15]]  }
  0x3b   :  { %7228 = sst [smem:[#allocation57_spill]] %s6658_s3 }
  0x3f   :  { %7229 = sst [smem:[#allocation58_spill]] %s6663_s20 }
  0x40   :  { %69 = vsyncpa [#allocation3], 0 }
  0x41   :  { %71 = vsyncpa [#allocation3 + $0x1], 0 }
  0x42   :  { %72 = vsyncpa [#allocation6], 0 }
  0x43   :  { %73 = vsyncpa [#allocation9], 0 }
  0x44   :  { %74 = vsyncpa [#allocation12], 0 }
  0x45   :  { %75 = vsyncpa [#allocation15], 0 }
  0x46   :  { %76 = vsyncpa [#allocation18], 0 }
  0x47   :  { %77 = vsyncpa [#allocation21], 0 }
  0x48   :  { %78 = vsyncpa [#allocation4], 0 }
  0x49   :  { %80 = vsyncpa [#allocation4 + $0x1], 0 }
  0x4a   :  { %81 = vsyncpa [#allocation24], 0 }
  0x4b   :  { %83 = vsyncpa [#allocation24 + $0x1], 0  ;;  %s6665_s22 = smov 0   ;;  %s6667_s23 = smov 0  }
  0x4c   :  { %s6669_s26 = smov 0   ;;  %s6671_s0 = smov 0  }
  0x4d LB: > { %s7230_s13 = sld [smem:[#allocation36_spill]]  ;;  %s6689_s1 = sadd.s32 4294967295, %s6450_s0   ;;  %s6446_s26 = sphi %s6669_s26, %s7284_s26   ;;  %s6442_s23 = sphi %s6667_s23, %s7283_s23   ;;  %s6438_s22 = sphi %s6665_s22, %s7282_s22   ;;  %s6450_s0 = sphi %s6671_s0, %s7285_s0  }
  0x4e   : > { %s7231_s5 = sld [smem:[#allocation34_spill]]  ;;  %p4217_p0 = scmp.ge.s32.totalorder %s6450_s0, 1 }
  0x4f   : > { %s7232_s8 = sld [smem:[#allocation39_spill]]  ;;  %p7195_p1 = scmp.eq.s32.totalorder %s6689_s1, 0 }
  0x50   : > { %s7233_s6 = sld [smem:[#allocation53_spill]]  ;;  %p781_p2 = scmp.lt.s32.totalorder %s6450_s0, 3 }
  0x51   : > { %s7234_s4 = sld [smem:[#allocation46_spill]]  ;;  %s6483_s7 = smov [#allocation5]  }
  0x52   : > { %s7235_s12 = sld [smem:[#allocation43_spill]]  ;;  %p6694_p3 = pnand %p4217_p0, %p781_p2 }
  0x53   : > { %s7236_s9 = sld [smem:[#allocation35_spill]]  ;;  %s795_s10 = sshll.u32 %s6483_s7, 4  ;;  %s796_s10 = int_to_ptr.vmem [resolvable:$true] %s795_s10 }
  0x54   : > { %p5810_p5 = pneg %p6694_p3  ;;  %s820_s11 = sshll.u32 %s6528_s21, 4  ;;  %s6702_s11 = int_to_ptr.hbm [resolvable:$true] %s820_s11 }
  0x55   : > { %s6484_s16 = smov [#allocation8]   ;;  %s856_s7 = sshll.u32 %s6558_s19, 4  ;;  %s6714_s7 = int_to_ptr.hbm [resolvable:$true] %s856_s7 }
  0x56   : > { %p6706_p6 = pnand %p5810_p5, %p7195_p1  ;;  %s6710_s18 = sshll.u32 %s6484_s16, 4 }
  0x57   : > { %7239 = sst [smem:[#allocation59_spill]] %s6710_s18 }
  0x58   : > { %p6719_p8 = pneg %p6706_p6 }
  0x59   : > { %s793_s28 = sshll.u32 %s7236_s9, 4  ;;  %s5975_s16 = scalar_lea.hbm %s7236_s9, 4  ;;  %s6686_s28 = int_to_ptr.hbm [resolvable:$true] %s793_s28 }
  0x5a   : > { %s5968_s24 = sshra.s32 %s6686_s28, 4  ;;  %s5969_s24 = int_to_ptr.hbm [resolvable:$true] %s5968_s24 }
  0x5b   : > { %s5970_s20 = scalar_lea.hbm %s5969_s24, 4  ;;  %p5976_p11 = scmp.lt.s32.totalorder %s5969_s24, %s7236_s9 }
  0x5c   : > { %p5971_p7 = scmp.ne.s32.totalorder %s5969_s24, %s5970_s20  ;;  %p5977_p12 = scmp.lt.s32.totalorder %s5975_s16, %s5970_s20 }
  0x5e   : > { %p5973_p9 = pnand %p6719_p8, %p5971_p7  ;;  %p5978_p13 = por %p5977_p12, %p5976_p11 }
  0x60   : > { %p5974_p10 = pneg %p5973_p9 }
  0x62   : > { %p5979_p0 = pnand %p5978_p13, %p5974_p10 }
  0x64   : > { %5982 = shalt.err (!%p5979_p0)
}
  0x65   : > { %5813 = dma.hbm_to_vmem [thread:$0]  (!%p6706_p6), %s6686_s28, 64, %s796_s10, [#allocation6]  }
  0x66   : > { %s5998_s18 = sshra.s32 %s6702_s11, 4  ;;  %s6005_s24 = scalar_lea.hbm %s6528_s21, 1  ;;  %s5999_s18 = int_to_ptr.hbm [resolvable:$true] %s5998_s18 }
  0x67   : > { %s6000_s14 = scalar_lea.hbm %s5999_s18, 1  ;;  %p6006_p9 = scmp.lt.s32.totalorder %s5999_s18, %s6528_s21 }
  0x68   : > { %p6001_p2 = scmp.ne.s32.totalorder %s5999_s18, %s6000_s14  ;;  %p6007_p11 = scmp.lt.s32.totalorder %s6005_s24, %s6000_s14 }
  0x6a   : > { %p6003_p5 = pnand %p6001_p2, %p6719_p8  ;;  %p6008_p10 = por %p6007_p11, %p6006_p9 }
  0x6c   : > { %p6004_p7 = pneg %p6003_p5 }
  0x6e   : > { %p6009_p12 = pnand %p6008_p10, %p6004_p7 }
  0x70   : > { %6012 = shalt.err (!%p6009_p12)
}
  0x71   : > { %s7241_s20 = sld [smem:[#allocation59_spill]]  ;;  %s886_s28 = sshll.u32 %s7235_s12, 4  ;;  %s6741_s28 = int_to_ptr.hbm [resolvable:$true] %s886_s28 }
  0x72   : > { %s6485_s10 = smov [#allocation11]   ;;  %s6028_s14 = sshra.s32 %s6714_s7, 4  ;;  %s6029_s14 = int_to_ptr.hbm [resolvable:$true] %s6028_s14 }
  0x73   : > { %s858_s9 = sshll.u32 %s6485_s10, 4  ;;  %s6030_s18 = scalar_lea.hbm %s6029_s14, 1  ;;  %s859_s9 = int_to_ptr.vmem [resolvable:$true] %s858_s9 }
  0x74   : > { %p6031_p13 = scmp.ne.s32.totalorder %s6029_s14, %s6030_s18  ;;  %s6035_s24 = scalar_lea.hbm %s6558_s19, 1 }
  0x75   : > { %p6036_p5 = scmp.lt.s32.totalorder %s6029_s14, %s6558_s19  ;;  %p6037_p7 = scmp.lt.s32.totalorder %s6035_s24, %s6030_s18 }
  0x76   : > { %p6033_p0 = pnand %p6031_p13, %p6719_p8 }
  0x77   : > { %s7242_s16 = int_to_ptr.vmem [resolvable:$true] %s7241_s20  ;;  %p6038_p9 = por %p6037_p7, %p6036_p5 }
  0x78   : > { %5819 = dma.hbm_to_vmem [thread:$0]  (!%p6706_p6), %s6702_s11, 16, %s7242_s16, [#allocation9]  }
  0x79   : > { %p6034_p2 = pneg %p6033_p0 }
  0x7b   : > { %p6039_p11 = pnand %p6038_p9, %p6034_p2 }
  0x7d   : > { %6042 = shalt.err (!%p6039_p11)
}
  0x7e   : > { %5825 = dma.hbm_to_vmem [thread:$0]  (!%p6706_p6), %s6714_s7, 16, %s859_s9, [#allocation12]  }
  0x7f   : > { %s6486_s11 = smov [#allocation14]   ;;  %s923_s16 = sshll.u32 %s6608_s27, 4  ;;  %s6752_s16 = int_to_ptr.hbm [resolvable:$true] %s923_s16 }
  0x80   : > { %s888_s20 = sshll.u32 %s6486_s11, 4  ;;  %s6058_s10 = sshra.s32 %s6741_s28, 4  ;;  %s889_s20 = int_to_ptr.vmem [resolvable:$true] %s888_s20  ;;  %s6059_s10 = int_to_ptr.hbm [resolvable:$true] %s6058_s10 }
  0x81   : > { %s6060_s14 = scalar_lea.hbm %s6059_s10, 1  ;;  %s6065_s18 = scalar_lea.hbm %s7235_s12, 1 }
  0x82   : > { %p6061_p10 = scmp.ne.s32.totalorder %s6059_s10, %s6060_s14  ;;  %p6066_p0 = scmp.lt.s32.totalorder %s6059_s10, %s7235_s12 }
  0x83   : > { %p6067_p2 = scmp.lt.s32.totalorder %s6065_s18, %s6060_s14 }
  0x84   : > { %p6063_p12 = pnand %p6061_p10, %p6719_p8 }
  0x85   : > { %p6068_p5 = por %p6067_p2, %p6066_p0 }
  0x86   : > { %p6064_p13 = pneg %p6063_p12 }
  0x88   : > { %p6069_p7 = pnand %p6068_p5, %p6064_p13 }
  0x8a   : > { %6072 = shalt.err (!%p6069_p7)
}
  0x8b   : > { %5831 = dma.hbm_to_vmem [thread:$0]  (!%p6706_p6), %s6741_s28, 16, %s889_s20, [#allocation15]  }
  0x8c   : > { %s6487_s9 = smov [#allocation17]   ;;  %s805_s24 = sshll.u32 %s7230_s13, 4  ;;  %s806_s24 = int_to_ptr.hbm [resolvable:$true] %s805_s24 }
  0x8d   : > { %s925_s7 = sshll.u32 %s6487_s9, 4  ;;  %s6088_s11 = sshra.s32 %s6752_s16, 4  ;;  %s926_s7 = int_to_ptr.vmem [resolvable:$true] %s925_s7  ;;  %s6089_s11 = int_to_ptr.hbm [resolvable:$true] %s6088_s11 }
  0x8e   : > { %s6090_s10 = scalar_lea.hbm %s6089_s11, 512  ;;  %s6095_s14 = scalar_lea.hbm %s6608_s27, 512 }
  0x8f   : > { %p6091_p9 = scmp.ne.s32.totalorder %s6089_s11, %s6090_s10  ;;  %p6096_p12 = scmp.lt.s32.totalorder %s6089_s11, %s6608_s27 }
  0x90   : > { %p6097_p13 = scmp.lt.s32.totalorder %s6095_s14, %s6090_s10 }
  0x91   : > { %p6093_p11 = pnand %p6091_p9, %p6719_p8 }
  0x92   : > { %p6098_p0 = por %p6097_p13, %p6096_p12 }
  0x93   : > { %p6094_p10 = pneg %p6093_p11 }
  0x95   : > { %p6099_p2 = pnand %p6098_p0, %p6094_p10 }
  0x97   : > { %6102 = shalt.err (!%p6099_p2)
}
  0x98   : > { %s7190_s18 = smov 128   ;;  %s7191_s28 = smov 8  }
  0x99   : > { %5837 = dma.hbm_to_vmem [thread:$0]  (!%p6706_p6), %s6752_s16, 8192, %s926_s7, [#allocation18], %s7190_s18, %s7190_s18, %s7191_s28  }
  0x9a   : > { %s6490_s20 = smov [#allocation7]   ;;  %s841_s11 = sshll.u32 %s7232_s8, 4  ;;  %s6775_s11 = int_to_ptr.hbm [resolvable:$true] %s841_s11 }
  0x9b   : > { %s807_s9 = sshll.u32 %s6490_s20, 4  ;;  %s6118_s10 = sshra.s32 %s806_s24, 4  ;;  %s808_s9 = int_to_ptr.vmem [resolvable:$true] %s807_s9  ;;  %s6119_s10 = int_to_ptr.hbm [resolvable:$true] %s6118_s10 }
  0x9c   : > { %s6120_s14 = scalar_lea.hbm %s6119_s10, 1  ;;  %s6125_s12 = scalar_lea.hbm %s7230_s13, 1 }
  0x9d   : > { %p6121_p5 = scmp.ne.s32.totalorder %s6119_s10, %s6120_s14  ;;  %p6126_p11 = scmp.lt.s32.totalorder %s6119_s10, %s7230_s13 }
  0x9e   : > { %p6127_p10 = scmp.lt.s32.totalorder %s6125_s12, %s6120_s14 }
  0x9f   : > { %p6123_p7 = pnand %p6121_p5, %p6719_p8 }
  0xa0   : > { %p6128_p12 = por %p6127_p10, %p6126_p11 }
  0xa1   : > { %p6124_p9 = pneg %p6123_p7 }
  0xa3   : > { %p6129_p13 = pnand %p6128_p12, %p6124_p9 }
  0xa5   : > { %6132 = shalt.err (!%p6129_p13)
}
  0xa6   : > { %5816 = dma.hbm_to_vmem [thread:$0]  (!%p6706_p6), %s806_s24, 16, %s808_s9, [#allocation6]  }
  0xa7   : > { %s871_s16 = sshll.u32 %s6568_s30, 4  ;;  %s6491_s7 = smov [#allocation10]   ;;  %s6784_s16 = int_to_ptr.hbm [resolvable:$true] %s871_s16 }
  0xa8   : > { %s843_s20 = sshll.u32 %s6491_s7, 4  ;;  %s6148_s18 = sshra.s32 %s6775_s11, 4  ;;  %s844_s20 = int_to_ptr.vmem [resolvable:$true] %s843_s20  ;;  %s6149_s18 = int_to_ptr.hbm [resolvable:$true] %s6148_s18 }
  0xa9   : > { %s6150_s12 = scalar_lea.hbm %s6149_s18, 1  ;;  %s6155_s10 = scalar_lea.hbm %s7232_s8, 1 }
  0xaa   : > { %p6151_p0 = scmp.ne.s32.totalorder %s6149_s18, %s6150_s12  ;;  %p6156_p7 = scmp.lt.s32.totalorder %s6149_s18, %s7232_s8 }
  0xab   : > { %p6157_p9 = scmp.lt.s32.totalorder %s6155_s10, %s6150_s12 }
  0xac   : > { %p6153_p2 = pnand %p6151_p0, %p6719_p8 }
  0xad   : > { %p6158_p11 = por %p6157_p9, %p6156_p7 }
  0xae   : > { %p6154_p5 = pneg %p6153_p2 }
  0xb0   : > { %p6159_p10 = pnand %p6158_p11, %p6154_p5 }
  0xb2   : > { %6162 = shalt.err (!%p6159_p10)
}
  0xb3   : > { %5822 = dma.hbm_to_vmem [thread:$0]  (!%p6706_p6), %s6775_s11, 16, %s844_s20, [#allocation9]  }
  0xb4   : > { %s6492_s24 = smov [#allocation13]   ;;  %s903_s14 = sshll.u32 %s7234_s4, 4  ;;  %s6795_s14 = int_to_ptr.hbm [resolvable:$true] %s903_s14 }
  0xb5   : > { %s873_s9 = sshll.u32 %s6492_s24, 4  ;;  %s6178_s18 = sshra.s32 %s6784_s16, 4  ;;  %s874_s9 = int_to_ptr.vmem [resolvable:$true] %s873_s9  ;;  %s6179_s18 = int_to_ptr.hbm [resolvable:$true] %s6178_s18 }
  0xb6   : > { %s6180_s7 = scalar_lea.hbm %s6179_s18, 1  ;;  %s6185_s12 = scalar_lea.hbm %s6568_s30, 1 }
  0xb7   : > { %p6181_p12 = scmp.ne.s32.totalorder %s6179_s18, %s6180_s7  ;;  %p6186_p2 = scmp.lt.s32.totalorder %s6179_s18, %s6568_s30 }
  0xb8   : > { %p6187_p5 = scmp.lt.s32.totalorder %s6185_s12, %s6180_s7 }
  0xb9   : > { %p6183_p13 = pnand %p6181_p12, %p6719_p8 }
  0xba   : > { %p6188_p7 = por %p6187_p5, %p6186_p2 }
  0xbb   : > { %p6184_p0 = pneg %p6183_p13 }
  0xbd   : > { %p6189_p9 = pnand %p6188_p7, %p6184_p0 }
  0xbf   : > { %6192 = shalt.err (!%p6189_p9)
}
  0xc0   : > { %5828 = dma.hbm_to_vmem [thread:$0]  (!%p6706_p6), %s6784_s16, 16, %s874_s9, [#allocation12]  }
  0xc1   : > { %s6493_s11 = smov [#allocation16]   ;;  %s946_s10 = sshll.u32 %s6628_s29, 4  ;;  %s947_s10 = int_to_ptr.hbm [resolvable:$true] %s946_s10 }
  0xc2   : > { %s905_s20 = sshll.u32 %s6493_s11, 4  ;;  %s6208_s24 = sshra.s32 %s6795_s14, 4  ;;  %s906_s20 = int_to_ptr.vmem [resolvable:$true] %s905_s20  ;;  %s6209_s24 = int_to_ptr.hbm [resolvable:$true] %s6208_s24 }
  0xc3   : > { %s6210_s18 = scalar_lea.hbm %s6209_s24, 64  ;;  %s6215_s7 = scalar_lea.hbm %s7234_s4, 64 }
  0xc4   : > { %p6211_p11 = scmp.ne.s32.totalorder %s6209_s24, %s6210_s18  ;;  %p6216_p13 = scmp.lt.s32.totalorder %s6209_s24, %s7234_s4 }
  0xc5   : > { %p6217_p0 = scmp.lt.s32.totalorder %s6215_s7, %s6210_s18 }
  0xc6   : > { %p6213_p10 = pnand %p6211_p11, %p6719_p8 }
  0xc7   : > { %p6218_p2 = por %p6217_p0, %p6216_p13 }
  0xc8   : > { %p6214_p12 = pneg %p6213_p10 }
  0xca   : > { %p6219_p5 = pnand %p6218_p2, %p6214_p12 }
  0xcc   : > { %6222 = shalt.err (!%p6219_p5)
}
  0xcd   : > { %s6494_s12 = smov 64   ;;  %s6495_s16 = smov 4  }
  0xce   : > { %5834 = dma.hbm_to_vmem [thread:$0]  (!%p6706_p6), %s6795_s14, 1024, %s906_s20, [#allocation15], %s6494_s12, %s6494_s12, %s6495_s16  }
  0xcf   : > { %s6496_s9 = smov [#allocation19]   ;;  %s6238_s28 = sshra.s32 %s947_s10, 4  ;;  %s6239_s28 = int_to_ptr.hbm [resolvable:$true] %s6238_s28 }
  0xd0   : > { %s948_s11 = sshll.u32 %s6496_s9, 4  ;;  %s6240_s24 = scalar_lea.hbm %s6239_s28, 512  ;;  %s949_s11 = int_to_ptr.vmem [resolvable:$true] %s948_s11 }
  0xd1   : > { %p6241_p7 = scmp.ne.s32.totalorder %s6239_s28, %s6240_s24  ;;  %s6245_s18 = scalar_lea.hbm %s6628_s29, 512 }
  0xd2   : > { %p6246_p10 = scmp.lt.s32.totalorder %s6239_s28, %s6628_s29  ;;  %p6247_p12 = scmp.lt.s32.totalorder %s6245_s18, %s6240_s24 }
  0xd3   : > { %p6243_p9 = pnand %p6241_p7, %p6719_p8 }
  0xd4   : > { %p6248_p13 = por %p6247_p12, %p6246_p10 }
  0xd5   : > { %p6244_p11 = pneg %p6243_p9 }
  0xd7   : > { %p6249_p0 = pnand %p6248_p13, %p6244_p11 }
  0xd9   : > { %6252 = shalt.err (!%p6249_p0)
}
  0xda   : > { %s6497_s7 = smov 512   ;;  %s6498_s14 = smov 32  }
  0xdb   : > { %5840 = dma.hbm_to_vmem [thread:$0]  (!%p6706_p6), %s947_s10, 8192, %s949_s11, [#allocation18], %s6497_s7, %s6497_s7, %s6498_s14  }
  0xdc   : > { %s963_s20 = sshll.u32 %s7233_s6, 4  ;;  %s6499_s12 = smov [#allocation20]   ;;  %s964_s20 = int_to_ptr.hbm [resolvable:$true] %s963_s20 }
  0xdd   : > { %s965_s16 = sshll.u32 %s6499_s12, 4  ;;  %s6268_s9 = sshra.s32 %s964_s20, 4  ;;  %s966_s16 = int_to_ptr.vmem [resolvable:$true] %s965_s16  ;;  %s6269_s9 = int_to_ptr.hbm [resolvable:$true] %s6268_s9 }
  0xde   : > { %s6270_s28 = scalar_lea.hbm %s6269_s9, 512  ;;  %s6275_s24 = scalar_lea.hbm %s7233_s6, 512 }
  0xdf   : > { %p6271_p2 = scmp.ne.s32.totalorder %s6269_s9, %s6270_s28  ;;  %p6276_p9 = scmp.lt.s32.totalorder %s6269_s9, %s7233_s6 }
  0xe0   : > { %p6277_p11 = scmp.lt.s32.totalorder %s6275_s24, %s6270_s28 }
  0xe1   : > { %p6273_p5 = pnand %p6271_p2, %p6719_p8 }
  0xe2   : > { %p6278_p10 = por %p6277_p11, %p6276_p9 }
  0xe3   : > { %p6274_p7 = pneg %p6273_p5 }
  0xe5   : > { %p6279_p12 = pnand %p6278_p10, %p6274_p7 }
  0xe7   : > { %6282 = shalt.err (!%p6279_p12)
}
  0xe8   : > { %s7243_s10 = smov 8   ;;  %s7244_s11 = smov 128  }
  0xe9   : > { %5843 = dma.hbm_to_vmem [thread:$0]  (!%p6706_p6), %s964_s20, 8192, %s966_s16, [#allocation21], %s7244_s11, %s7244_s11, %s7243_s10  }
  0xea   : > { %s4216_s3 = sadd.s32 4294967294, %s6450_s0   ;;  %s6832_s15 = sadd.s32 1, %s6450_s0  }
  0xeb   : > { %s96_s18 = sadd.s32 1, %s6446_s26  ;;  %s93_s7 = ssub.s32 %s6450_s0, %s6832_s15 }
  0xec   : > { %p103_p8 = scmp.ne.s32.totalorder %s6446_s26, %s6442_s23  ;;  %p94_p13 = scmp.eq.s32.totalorder %s93_s7, 0 }
  0xed   : > { %p104_p0 = scmp.eq.s32.totalorder %s6450_s0, 0  ;;  %p109_p2 = scmp.ne.s32.totalorder %s6442_s23, %s6438_s22 }
  0xee   : > { %p742_p5 = scmp.eq.s32.totalorder %s6689_s1, 1  ;;  %p748_p9 = scmp.eq.s32.totalorder %s4216_s3, 1 }
  0xef   : > { %s6844_s14 = scalar_select %p94_p13, %s6446_s26, %s96_s18  }
  0xf0   : > { %p6848_p7 = por %p7195_p1, %p109_p2  ;;  %p6852_p6 = por %p742_p5, %p103_p8 }
  0xf1   : > { %p105_p11 = por %p104_p0, %p103_p8  ;;  %s988_s16 = sand.u32 1, %s6446_s26  }
  0xf2   : > { %p6857_p10 = por %p748_p9, %p109_p2  ;;  %p5866_p12 = scmp.lt.s32.totalorder %s6450_s0, 2 }
  0xf3   : > { %s4230_s28 = sshll.u32 %s988_s16, 3  ;;  %s4231_s24 = sshll.u32 %s6450_s0, 3 }
  0xf4   : > { %s7247_s9 = scalar_select %p6857_p10, 1, 0 }
  0xf5   : > { %s996_s10 = scalar_lea.hbm %s7231_s5, %s4231_s24  ;;  %s992_s18 = scalar_lea.vmem [#allocation2], %s4230_s28 }
  0xf6   : > { %s998_s11 = sshll.u32 %s996_s10, 4  ;;  %s1000_s7 = sshll.u32 %s992_s18, 4  ;;  %s999_s11 = int_to_ptr.hbm [resolvable:$true] %s998_s11  ;;  %s1001_s7 = int_to_ptr.vmem [resolvable:$true] %s1000_s7 }
  0xf7   : > { %p6864_p13 = pnand %p5866_p12, %p105_p11  ;;  %s989_s3 = scalar_lea.sflag [#allocation3], %s988_s16 }
  0xf8   : > { %s6298_s6 = sshra.s32 %s999_s11, 4  ;;  %s6305_s24 = scalar_lea.hbm %s7231_s5, 16  ;;  %s6299_s6 = int_to_ptr.hbm [resolvable:$true] %s6298_s6 }
  0xf9   : > { %s6300_s8 = scalar_lea.hbm %s6299_s6, 8  ;;  %p6302_p0 = pneg %p6864_p13 }
  0xfa   : > { %p6301_p8 = scmp.ne.s32.totalorder %s6299_s6, %s6300_s8  ;;  %p6306_p9 = scmp.lt.s32.totalorder %s6299_s6, %s7231_s5 }
  0xfb   : > { %p6307_p4 = scmp.lt.s32.totalorder %s6305_s24, %s6300_s8 }
  0xfc   : > { %p6303_p2 = pnand %p6302_p0, %p6301_p8 }
  0xfd   : > { %p6308_p1 = por %p6307_p4, %p6306_p9 }
  0xfe   : > { %p6304_p5 = pneg %p6303_p2 }
 0x100   : > { %p6309_p10 = pnand %p6308_p1, %p6304_p5 }
 0x102   : > { %6312 = shalt.err (!%p6309_p10)
}
 0x103   : > { %5847 = dma.hbm_to_vmem [thread:$0]  (!%p6864_p13), %s999_s11, 128, %s1001_s7, %s989_s3  }
 0x104   : > { %1009 = sbr.rel (%p6694_p3) target bundleno = 2407 (0x967), region = 140  ;;  %s6877_s16 = sand.u32 (!%p6694_p3), 1, %s6442_s23  }
 0x105   : > { %s7196_s28 = sshll.u32 (!%p6694_p3), %s6877_s16, 3  ;;  %s1012_s10 = scalar_lea.sflag (!%p6694_p3), [#allocation3], %s6877_s16 }
 0x106   : > { %s1015_s8 = scalar_lea.vmem (!%p6694_p3), [#allocation2], %s7196_s28 }
 0x109   : > { %6401 = dma.done.wait (%p6848_p7), %s1012_s10, 128  }
 0x10a   : > { %6403 = vsyncadd (%p6848_p7), %s1012_s10, 4294967168  ;;  %p7249_p1 = scmp.eq.s32.totalorder %s6689_s1, 0 }
 0x10c   : > { %6405 = dma.done.wait (%p7249_p1), [#allocation6], 80   ;;  %p7250_p3 = pmov %p7249_p1 }
 0x10d   : > { %p7251_p4 = pmov %p7249_p1 }
 0x10e   : > { %6407 = vsyncadd (%p7250_p3), [#allocation6], 4294967216 }
 0x10f   : > { %6409 = dma.done.wait (%p7251_p4), [#allocation9], 32   ;;  %p7252_p11 = pmov %p7249_p1 }
 0x110   : > { %p7253_p10 = pmov %p7249_p1 }
 0x111   : > { %6411 = vsyncadd (%p7252_p11), [#allocation9], 4294967264 }
 0x112   : > { %6413 = dma.done.wait (%p7253_p10), [#allocation12], 32   ;;  %p7254_p12 = pmov %p7249_p1 }
 0x113   : > { %p7255_p7 = pmov %p7249_p1 }
 0x114   : > { %6415 = vsyncadd (%p7254_p12), [#allocation12], 4294967264 }
 0x115   : > { %6417 = dma.done.wait (%p7255_p7), [#allocation15], 1040   ;;  %p7256_p13 = pmov %p7249_p1 }
 0x116   : > { %p7257_p8 = pmov %p7249_p1 }
 0x117   : > { %6419 = vsyncadd (%p7256_p13), [#allocation15], 4294966256 }
 0x118   : > { %6421 = dma.done.wait (%p7257_p8), [#allocation18], 16384   ;;  %p7258_p0 = pmov %p7249_p1 }
 0x11a   : > { %6423 = vsyncadd (%p7258_p0), [#allocation18], 4294950912  ;;  %p7259_p2 = pmov %p7258_p0 }
 0x11b   : > { %p7260_p5 = pmov %p7258_p0 }
 0x11c   : > { %6425 = dma.done.wait (%p7259_p2), [#allocation21], 8192  }
 0x11d   : > { %6427 = vsyncadd (%p7260_p5), [#allocation21], 4294959104  ;;  %v1547_v0 = vld [vmem:[%s1015_s8] sm:$0xff]  ;;  %v1155_v1 = vld [vmem:[#allocation5] sm:$0xf]  ;;  %vm1588_vm0 = vcmask 1043456  }
 0x11e   : > { %1548 = vxpose.xlu0.b32.start.end [1/1] (short) (narrow) %v1547_v0, 16  ;;  %v1590_v2 = vsel %vm1588_vm0, %v1155_v1, 0  ;;  %vm1584_vm1 = vcmask 64512   ;;  %v4273_v6 = vld [vmem:[%s6523_s17 + $0x30] sm:$0xf]  ;;  %v5475_v30 = vld [vmem:[%s6533_s25 + $0x38] sm:$0xff] }
 0x11f   : > { %1599 = vmatpush.bf16.msra.mxu0 %v1590_v2  ;;  %v5467_v7 = vld [vmem:[%s6523_s17 + $0x34] sm:$0xf0]  ;;  %v5466_v8 = vld [vmem:[%s6523_s17 + $0x34] sm:$0xf]  ;;  %v4275_v10 = vld [vmem:[%s6523_s17 + $0x38] sm:$0xf0] }
 0x120   : > { %v4274_v9 = vor.u32 %v5467_v7, %v4273_v6  ;;  %v4278_v11 = vor.u32 %v5466_v8, %v4275_v10  ;;  %v4265_v12 = vld [vmem:[%s6523_s17 + $0x20] sm:$0xf]  ;;  %v5465_v13 = vld [vmem:[%s6523_s17 + $0x24] sm:$0xf0]  ;;  %v5464_v14 = vld [vmem:[%s6523_s17 + $0x24] sm:$0xf] }
 0x121   : > { %v4266_v15 = vor.u32 %v5465_v13, %v4265_v12  ;;  %v4267_v16 = vld [vmem:[%s6523_s17 + $0x28] sm:$0xf0]  ;;  %v4257_v18 = vld [vmem:[%s6523_s17 + $0x10] sm:$0xf]  ;;  %v5463_v19 = vld [vmem:[%s6523_s17 + $0x14] sm:$0xf0] }
 0x122   : > { %1657 = vmatpush.bf16.msra.mxu1 %v4274_v9  ;;  %1671 = vmatpush.bf16.msra.mxu3 %v4278_v11  ;;  %v4270_v17 = vor.u32 %v5464_v14, %v4267_v16  ;;  %v5462_v20 = vld [vmem:[%s6523_s17 + $0x14] sm:$0xf]  ;;  %v4258_v21 = vor.u32 %v5463_v19, %v4257_v18  ;;  %v4259_v22 = vld [vmem:[%s6523_s17 + $0x18] sm:$0xf0]  ;;  %v4249_v24 = vld [vmem:[%s6523_s17] sm:$0xf] }
 0x123   : > { %v4262_v23 = vor.u32 %v5462_v20, %v4259_v22  ;;  %v5461_v25 = vld [vmem:[%s6523_s17 + $0x4] sm:$0xf0]  ;;  %v5460_v26 = vld [vmem:[%s6523_s17 + $0x4] sm:$0xf]  ;;  %v4251_v28 = vld [vmem:[%s6523_s17 + $0x8] sm:$0xf0] }
 0x124   : > { %v4250_v27 = vor.u32 %v5461_v25, %v4249_v24  ;;  %v4254_v29 = vor.u32 %v5460_v26, %v4251_v28  ;;  %v5474_v31 = vld [vmem:[%s6533_s25 + $0x30] sm:$0xff]  ;;  %v5473_v32 = vld [vmem:[%s6533_s25 + $0x28] sm:$0xff]  ;;  %v5472_v33 = vld [vmem:[%s6533_s25 + $0x20] sm:$0xff]  ;;  %s7261_s6 = sld [smem:[#allocation38_spill]]  ;;  %vm1649_vm2 = vcmask 523264   ;;  %vm3390_vm3 = vcmask 130048  }
 0x125   : > { %v5960_v35 = vld [vmem:[#allocation7] ss:$0 sm:$0xff]  ;;  %v5471_v42 = vld [vmem:[%s6533_s25 + $0x18] sm:$0xff]  ;;  %v5469_v44 = vld [vmem:[%s6533_s25 + $0x8] sm:$0xff]  ;;  %s7262_s4 = sld [smem:[#allocation40_spill]] }
 0x126   : > { %1658 = vmatpush.bf16.msra.mxu1 %v4266_v15  ;;  %1672 = vmatpush.bf16.msra.mxu3 %v4270_v17  ;;  %v5470_v43 = vld [vmem:[%s6533_s25 + $0x10] sm:$0xff]  ;;  %v5468_v45 = vld [vmem:[%s6533_s25] sm:$0xff]  ;;  %s7263_s2 = sld [smem:[#allocation37_spill]] }
 0x127   : > { %v5961_v48 = vld [vmem:[#allocation8] ss:$0 sm:$0xff]  ;;  %s7264_s12 = sld [smem:[#allocation41_spill]] }
 0x128   : > { %s7265_s11 = sld [smem:[#allocation42_spill]] }
 0x129   : > { %s7266_s18 = sld [smem:[#allocation44_spill]] }
 0x12a   : > { %1659 = vmatpush.bf16.msra.mxu1 %v4258_v21  ;;  %1673 = vmatpush.bf16.msra.mxu3 %v4262_v23  ;;  %v5483_v46 = vld [vmem:[%s7261_s6 + $0x38] sm:$0xff]  ;;  %v5482_v55 = vld [vmem:[%s7261_s6 + $0x30] sm:$0xff]  ;;  %v5481_v56 = vld [vmem:[%s7261_s6 + $0x28] sm:$0xff]  ;;  %s7267_s7 = sld [smem:[#allocation45_spill]] }
 0x12b   : > { %1810 = vmatpush.bf16.msrb.mxu0 %v5483_v46  ;;  %v5480_v57 = vld [vmem:[%s7261_s6 + $0x20] sm:$0xff]  ;;  %v5479_v58 = vld [vmem:[%s7261_s6 + $0x18] sm:$0xff]  ;;  %v5478_v60 = vld [vmem:[%s7261_s6 + $0x10] sm:$0xff]  ;;  %s7268_s3 = sld [smem:[#allocation47_spill]] }
 0x12c   : > { %v5477_v61 = vld [vmem:[%s7261_s6 + $0x8] sm:$0xff]  ;;  %v5476_v62 = vld [vmem:[%s7261_s6] sm:$0xff]  ;;  %v4371_v0 = vld [vmem:[%s7262_s4 + $0x30] sm:$0xf]  ;;  %s7269_s24 = sld [smem:[#allocation52_spill]] }
 0x12d   : > { %v5491_v1 = vld [vmem:[%s7262_s4 + $0x34] sm:$0xf0]  ;;  %v5490_v2 = vld [vmem:[%s7262_s4 + $0x34] sm:$0xf]  ;;  %v5489_v6 = vld [vmem:[%s7262_s4 + $0x24] sm:$0xf0] }
 0x12e   : > { %1660 = vmatpush.bf16.msra.mxu1 %v4250_v27  ;;  %1674 = vmatpush.bf16.msra.mxu3 %v4254_v29  ;;  %v5962_v10 = vld [vmem:[%s7263_s2] ss:$0 sm:$0xff]  ;;  %v5488_v22 = vld [vmem:[%s7262_s4 + $0x24] sm:$0xf]  ;;  %v4365_v23 = vld [vmem:[%s7262_s4 + $0x28] sm:$0xf0] }
 0x12f   : > { %1811 = vmatpush.bf16.msrb.mxu0 %v5482_v55  ;;  %v4368_v24 = vor.u32 %v5488_v22, %v4365_v23  ;;  %v4355_v25 = vld [vmem:[%s7262_s4 + $0x10] sm:$0xf]  ;;  %v5487_v26 = vld [vmem:[%s7262_s4 + $0x14] sm:$0xf0]  ;;  %v5486_v27 = vld [vmem:[%s7262_s4 + $0x14] sm:$0xf] }
 0x130   : > { %v4356_v28 = vor.u32 %v5487_v26, %v4355_v25  ;;  %v4357_v29 = vld [vmem:[%s7262_s4 + $0x18] sm:$0xf0]  ;;  %s7270_s10 = sld [smem:[#allocation48_spill]] }
 0x131   : > { %v5507_v55 = vld [vmem:[%s7265_s11 + $0x38] sm:$0xff]  ;;  %s7271_s8 = sld [smem:[#allocation50_spill]] }
 0x132   : > { %1740 = vmatpush.bf16.msrb.mxu3 %v5475_v30  ;;  %v4360_v30 = vor.u32 %v5486_v27, %v4357_v29  ;;  %s7272_s2 = sld [smem:[#allocation49_spill]] }
 0x133   : > { %1812 = vmatpush.bf16.msrb.mxu0 %v5481_v56 }
 0x136   : > { %1741 = vmatpush.bf16.msrb.mxu3 %v5474_v31  ;;  %v4347_v31 = vld [vmem:[%s7262_s4] sm:$0xf] }
 0x137   : > { %1813 = vmatpush.bf16.msrb.mxu0 %v5480_v57  ;;  %v5963_v57 = vld [vmem:[#allocation11] ss:$0 sm:$0xff] }
 0x13a   : > { %1742 = vmatpush.bf16.msrb.mxu3 %v5473_v32  ;;  %v5485_v32 = vld [vmem:[%s7262_s4 + $0x4] sm:$0xf0] }
 0x13b   : > { %1814 = vmatpush.bf16.msrb.mxu0 %v5479_v58 }
 0x13e   : > { %1743 = vmatpush.bf16.msrb.mxu3 %v5472_v33  ;;  %v5484_v33 = vld [vmem:[%s7262_s4 + $0x4] sm:$0xf] }
 0x13f   : > { %1815 = vmatpush.bf16.msrb.mxu0 %v5478_v60 }
 0x142   : > { %1744 = vmatpush.bf16.msrb.mxu3 %v5471_v42 }
 0x143   : > { %1816 = vmatpush.bf16.msrb.mxu0 %v5477_v61 }
 0x146   : > { %1745 = vmatpush.bf16.msrb.mxu3 %v5470_v43 }
 0x147   : > { %1817 = vmatpush.bf16.msrb.mxu0 %v5476_v62 }
 0x14a   : > { %1746 = vmatpush.bf16.msrb.mxu3 %v5469_v44 }
 0x14e   : > { %1747 = vmatpush.bf16.msrb.mxu3 %v5468_v45 }
 0x1c2   : > { %v1564_v3 = vpop.trf.xlu0 }
 0x1ca   : > { %v1565_v4 = vpop.trf.xlu0 }
 0x1cb   : > { %v1580_v5 = vpack.c.bf16 %v1565_v4, %v1564_v3  ;;  %v4372_v3 = vor.u32 %v5491_v1, %v4371_v0  ;;  %v4373_v4 = vld [vmem:[%s7262_s4 + $0x38] sm:$0xf0]  ;;  %v5506_v0 = vld [vmem:[%s7265_s11 + $0x30] sm:$0xff]  ;;  %v5505_v1 = vld [vmem:[%s7265_s11 + $0x28] sm:$0xff] }
 0x1cc   : > { %v4376_v7 = vor.u32 %v5490_v2, %v4373_v4  ;;  %v5504_v2 = vld [vmem:[%s7265_s11 + $0x20] sm:$0xff]  ;;  %v5502_v4 = vld [vmem:[%s7265_s11 + $0x10] sm:$0xff] }
 0x1cd   : > { %4246 = vmatmul.msk.bf16.vlgmr.msra.gmra.mxu0 %vm1584_vm1, %v1580_v5  ;;  %v4363_v5 = vld [vmem:[%s7262_s4 + $0x20] sm:$0xf]  ;;  %1876 = vmatpush.bf16.msrb.mxu1 %v4372_v3  ;;  %v5503_v3 = vld [vmem:[%s7265_s11 + $0x18] sm:$0xff] }
 0x1ce   : > { %v4364_v8 = vor.u32 %v5489_v6, %v4363_v5  ;;  %1890 = vmatpush.bf16.msra.mxu2 %v4376_v7  ;;  %v5501_v5 = vld [vmem:[%s7265_s11 + $0x8] sm:$0xff]  ;;  %v5500_v6 = vld [vmem:[%s7265_s11] sm:$0xff]  ;;  %v4505_v7 = vld [vmem:[%s7266_s18 + $0x78] sm:$0xf]  ;;  %s1153_s11 = scalar_lea.vmem [#allocation23], %s6877_s16 }
 0x1d1   : > { %1877 = vmatpush.bf16.msrb.mxu1 %v4364_v8  ;;  %v5525_v8 = vld [vmem:[%s7266_s18 + $0x88] sm:$0xf0] }
 0x1d2   : > { %1891 = vmatpush.bf16.msra.mxu2 %v4368_v24 }
 0x1d5   : > { %1878 = vmatpush.bf16.msrb.mxu1 %v4356_v28 }
 0x1d6   : > { %1892 = vmatpush.bf16.msra.mxu2 %v4360_v30 }
 0x24a   : > { %v1601_v34 = vpop.f32.mrf.mxu0 }
 0x24b   : > { %v1602_v36 = vadd.f32 %v5960_v35, %v1601_v34  ;;  %v4348_v34 = vor.u32 %v5485_v32, %v4347_v31  ;;  %v5518_v32 = vld [vmem:[%s7266_s18 + $0x54] sm:$0xf] }
 0x24d   : > { %v1606_v39 = vmax.f32 %v1602_v36, 0.0  ;;  %1879 = vmatpush.bf16.msrb.mxu1 %v4348_v34  ;;  %v4501_v34 = vld [vmem:[%s7266_s18 + $0x60] sm:$0xf] }
 0x252   : > { %v1603_v37 = vpop.f32.mrf.mxu0 }
 0x253   : > { %v1604_v38 = vadd.f32 %v5960_v35, %v1603_v37  ;;  %v4349_v35 = vld [vmem:[%s7262_s4 + $0x8] sm:$0xf0]  ;;  %v5499_v37 = vld [vmem:[%s7264_s12 + $0x38] sm:$0xff] }
 0x254   : > { %v4352_v36 = vor.u32 %v5484_v33, %v4349_v35  ;;  %v4487_v33 = vld [vmem:[%s7266_s18 + $0x64] sm:$0xf0] }
 0x255   : > { %v1607_v40 = vmax.f32 %v1604_v38, 0.0  ;;  %v5498_v38 = vld [vmem:[%s7264_s12 + $0x30] sm:$0xff]  ;;  %v4490_v35 = vor.u32 %v5518_v32, %v4487_v33  ;;  %v5531_v32 = vld [vmem:[#allocation16 + $0x18] sm:$0xff] }
 0x256   : > { %1893 = vmatpush.bf16.msra.mxu2 %v4352_v36  ;;  %v5522_v36 = vld [vmem:[%s7266_s18 + $0x70] sm:$0xf0] }
 0x257   : > { %v1608_v41 = vpack.c.bf16 %v1607_v40, %v1606_v39  ;;  %v5497_v39 = vld [vmem:[%s7264_s12 + $0x28] sm:$0xff]  ;;  %v5496_v40 = vld [vmem:[%s7264_s12 + $0x20] sm:$0xff]  ;;  %v5530_v33 = vld [vmem:[#allocation16 + $0x10] sm:$0xff] }
 0x259   : > { %4279 = vmatmul.msk.bf16.vlgmr.msra.gmra.mxu1 %vm1649_vm2, %v1608_v41  ;;  %4280 = vmatmul.msk.bf16.vlgmr.msra.gmra.mxu3 %vm1649_vm2, %v1608_v41  ;;  %v1199_v41 = vld [vmem:[#allocation10] sm:$0x1] }
 0x25a   : > { %1959 = vmatpush.bf16.msra.mxu1 %v5499_v37  ;;  %2029 = vmatpush.bf16.msrb.mxu2 %v5507_v55  ;;  %v4502_v37 = vor.u32 %v5522_v36, %v4501_v34  ;;  %v5529_v34 = vld [vmem:[#allocation16 + $0x8] sm:$0xff]  ;;  %v4786_v36 = vld [vmem:[#allocation19 + $0x1c0] sm:$0xf] }
 0x25e   : > { %1960 = vmatpush.bf16.msra.mxu1 %v5498_v38  ;;  %2030 = vmatpush.bf16.msrb.mxu2 %v5506_v0  ;;  %v4465_v38 = vld [vmem:[%s7266_s18 + $0x28] sm:$0xf]  ;;  %v5519_v0 = vld [vmem:[%s7266_s18 + $0x5c] sm:$0xf] }
 0x262   : > { %1961 = vmatpush.bf16.msra.mxu1 %v5497_v39  ;;  %2031 = vmatpush.bf16.msrb.mxu2 %v5505_v1  ;;  %v5515_v39 = vld [vmem:[%s7266_s18 + $0x38] sm:$0xf0] }
 0x266   : > { %1962 = vmatpush.bf16.msra.mxu1 %v5496_v40  ;;  %2032 = vmatpush.bf16.msrb.mxu2 %v5504_v2  ;;  %v5513_v40 = vld [vmem:[%s7266_s18 + $0x2c] sm:$0xf]  ;;  %v4495_v2 = vld [vmem:[%s7266_s18 + $0x6c] sm:$0xf0] }
 0x26a   : > { %2033 = vmatpush.bf16.msrb.mxu2 %v5503_v3 }
 0x26e   : > { %2034 = vmatpush.bf16.msrb.mxu2 %v5502_v4  ;;  %v4498_v4 = vor.u32 %v5519_v0, %v4495_v2  ;;  %v4730_v0 = vld [vmem:[#allocation19 + $0x148] sm:$0xf] }
 0x26f   : > { %v5661_v2 = vld [vmem:[#allocation19 + $0x164] sm:$0xf0] }
 0x272   : > { %2035 = vmatpush.bf16.msrb.mxu2 %v5501_v5  ;;  %v4473_v5 = vld [vmem:[%s7266_s18 + $0x30] sm:$0xf] }
 0x276   : > { %2036 = vmatpush.bf16.msrb.mxu2 %v5500_v6  ;;  %v5516_v6 = vld [vmem:[%s7266_s18 + $0x40] sm:$0xf0] }
 0x2d6   : > { %v1662_v47 = vpop.f32.mrf.mxu1 }
 0x2d7   : > { %v1684_v49 = vadd.f32 %v5961_v48, %v1662_v47 }
 0x2d9   : > { %v1686_v52 = vmax.f32 %v1684_v49, 0.0 }
 0x2dc   : > { %v6942_v59 = vpop.f32.mrf.mxu3 }
 0x2de   : > { %v1664_v50 = vpop.f32.mrf.mxu1 }
 0x2df   : > { %v1685_v51 = vadd.f32 %v5961_v48, %v1664_v50 }
 0x2e1   : > { %v1687_v53 = vmax.f32 %v1685_v51, 0.0  ;;  %v5495_v51 = vld [vmem:[%s7264_s12 + $0x18] sm:$0xff] }
 0x2e2   : > { %1963 = vmatpush.bf16.msra.mxu1 %v5495_v51  ;;  %v4447_v51 = vld [vmem:[%s7266_s18 + $0x14] sm:$0xf0] }
 0x2e3   : > { %v1688_v54 = vpack.c.bf16 %v1687_v53, %v1686_v52  ;;  %v5494_v52 = vld [vmem:[%s7264_s12 + $0x10] sm:$0xff]  ;;  %v5493_v53 = vld [vmem:[%s7264_s12 + $0x8] sm:$0xff] }
 0x2e4   : > { %v1678_v63 = vpop.f32.mrf.mxu3 }
 0x2e5   : > { %1748 = vmatmul.bf16.vlgmr.msrb.gmra.mxu3 %v1688_v54  ;;  %v5492_v54 = vld [vmem:[%s7264_s12] sm:$0xff]  ;;  %s7139_s12 = sshll.u32 %s1153_s11, 4  ;;  %s3980_s12 = int_to_ptr.vmem [resolvable:$true] %s7139_s12 }
 0x2e6   : > { %1964 = vmatpush.bf16.msra.mxu1 %v5494_v52  ;;  %v4461_v52 = vld [vmem:[%s7266_s18 + $0x10] sm:$0xf] }
 0x2ea   : > { %1965 = vmatpush.bf16.msra.mxu1 %v5493_v53  ;;  %v5512_v53 = vld [vmem:[%s7266_s18 + $0x20] sm:$0xf0] }
 0x2eb   : > { %v4462_v55 = vor.u32 %v5512_v53, %v4461_v52 }
 0x2ee   : > { %1966 = vmatpush.bf16.msra.mxu1 %v5492_v54 }
 0x368   : > { %v1749_v9 = vpop.f32.mrf.mxu3 }
 0x369   : > { %v1750_v12 = vadd.f32 %v5962_v10, %v1749_v9  ;;  %v5523_v9 = vld [vmem:[%s7266_s18 + $0x7c] sm:$0xf] }
 0x370   : > { %v1751_v11 = vpop.f32.mrf.mxu3 }
 0x371   : > { %v1752_v13 = vadd.f32 %v5962_v10, %v1751_v11  ;;  %v4506_v10 = vor.u32 %v5525_v8, %v4505_v7  ;;  %v4507_v11 = vld [vmem:[%s7266_s18 + $0x8c] sm:$0xf0]  ;;  %v5514_v7 = vld [vmem:[%s7266_s18 + $0x34] sm:$0xf]  ;;  %v4475_v8 = vld [vmem:[%s7266_s18 + $0x44] sm:$0xf0] }
 0x373   : > { %v1754_v14 = vmax.f32 %v1750_v12, %v1752_v13  ;;  %v4521_v12 = vld [vmem:[%s7266_s18 + $0x88] sm:$0xf]  ;;  %v5527_v13 = vld [vmem:[%s7266_s18 + $0x98] sm:$0xf0]  ;;  %2159 = vmatpush.bf16.msra.mxu3 %v4506_v10  ;;  %v4478_v10 = vor.u32 %v5514_v7, %v4475_v8  ;;  %v4731_v7 = vor.u32 %v5661_v2, %v4730_v0  ;;  %v4690_v8 = vld [vmem:[#allocation19 + $0x100] sm:$0xf] }
 0x374   : > { %v4562_v0 = vld [vmem:[#allocation19] sm:$0xf]  ;;  %v5616_v2 = vld [vmem:[#allocation19 + $0x4] sm:$0xf] }
 0x375   : > { %v1755_v15 = vrot.slane %v1754_v14, 4 }
 0x377   : > { %v1756_v16 = vmax.f32 %v1754_v14, %v1755_v15  ;;  %v4510_v14 = vor.u32 %v5523_v9, %v4507_v11  ;;  %v4522_v15 = vor.u32 %v5527_v13, %v4521_v12  ;;  %v4474_v9 = vor.u32 %v5516_v6, %v4473_v5  ;;  %v4453_v11 = vld [vmem:[%s7266_s18 + $0x8] sm:$0xf]  ;;  %v5511_v12 = vld [vmem:[%s7266_s18 + $0x18] sm:$0xf0]  ;;  %v5509_v13 = vld [vmem:[%s7266_s18 + $0xc] sm:$0xf] }
 0x379   : > { %v1757_v17 = vrot.slane %v1756_v16, 2  ;;  %2173 = vmatpush.bf16.msra.mxu0 %v4510_v14  ;;  %v4455_v14 = vld [vmem:[%s7266_s18 + $0x1c] sm:$0xf0] }
 0x37b   : > { %v1758_v18 = vmax.f32 %v1756_v16, %v1757_v17  ;;  %v4485_v16 = vld [vmem:[%s7266_s18 + $0x50] sm:$0xf]  ;;  %v5520_v17 = vld [vmem:[%s7266_s18 + $0x60] sm:$0xf0] }
 0x37d   : > { %v1759_v19 = vrot.slane %v1758_v18, 1  ;;  %2174 = vmatpush.bf16.msra.mxu0 %v4490_v35  ;;  %v5528_v35 = vld [vmem:[#allocation16] sm:$0xff] }
 0x37f   : > { %v1760_v20 = vmax.f32 %v1758_v18, %v1759_v19  ;;  %v4486_v18 = vor.u32 %v5520_v17, %v4485_v16  ;;  %v4458_v16 = vor.u32 %v5509_v13, %v4455_v14  ;;  %v4698_v13 = vld [vmem:[#allocation19 + $0x108] sm:$0xf] }
 0x380   : > { %v5653_v14 = vld [vmem:[#allocation19 + $0x124] sm:$0xf0] }
 0x381   : > { %v1761_v21 = vpack.c.bf16 %v1760_v20, %v1760_v20  ;;  %2160 = vmatpush.bf16.msra.mxu3 %v4486_v18  ;;  %v5964_v20 = vld [vmem:[#allocation13] ss:$0 sm:$0xff] }
 0x382   : > { %v5535_v18 = vld [vmem:[#allocation16 + $0x38] sm:$0xff] }
 0x383   : > { %1818 = vmatmul.bf16.vlgmr.msrb.gmra.mxu0 %v1761_v21 }
 0x400   : > { %v1819_v42 = vpop.f32.mrf.mxu0 }
 0x401   : > { %v1820_v43 = vadd.f32 %v1819_v42, %v1199_v41  ;;  %v4466_v41 = vor.u32 %v5515_v39, %v4465_v38  ;;  %v4467_v42 = vld [vmem:[%s7266_s18 + $0x3c] sm:$0xf0]  ;;  %v5672_v38 = vld [vmem:[#allocation19 + $0x1c4] sm:$0xf] }
 0x403   : > { %v1823_v44 = vperm.slane %v1820_v43, 0  ;;  %v4481_v43 = vld [vmem:[%s7266_s18 + $0x38] sm:$0xf]  ;;  %2161 = vmatpush.bf16.msra.mxu3 %v4466_v41  ;;  %v4794_v41 = vld [vmem:[#allocation19 + $0x1c8] sm:$0xf] }
 0x405   : > { %v1824_v45 = vadd.f32 %v1823_v44, %v6942_v59  ;;  %v1825_v46 = vadd.f32 %v1823_v44, %v1678_v63  ;;  %v5517_v44 = vld [vmem:[%s7266_s18 + $0x48] sm:$0xf0] }
 0x407   : > { %v1826_v47 = vmax.f32 %v1824_v45, 0.0  ;;  %v1827_v48 = vmax.f32 %v1825_v46, 0.0  ;;  %v4470_v45 = vor.u32 %v5513_v40, %v4467_v42  ;;  %v4482_v46 = vor.u32 %v5517_v44, %v4481_v43  ;;  %v4788_v40 = vld [vmem:[#allocation19 + $0x1e0] sm:$0xf0]  ;;  %v5677_v42 = vld [vmem:[#allocation19 + $0x1e4] sm:$0xf0] }
 0x408   : > { %v1821_v49 = vpop.f32.mrf.mxu0  ;;  %v4791_v43 = vor.u32 %v5672_v38, %v4788_v40  ;;  %v4795_v44 = vor.u32 %v5677_v42, %v4794_v41  ;;  %v4626_v40 = vld [vmem:[#allocation19 + $0x80] sm:$0xf]  ;;  %v5632_v42 = vld [vmem:[#allocation19 + $0x84] sm:$0xf] }
 0x409   : > { %v1828_v50 = vpack.c.bf16 %v1827_v48, %v1826_v47  ;;  %2175 = vmatpush.bf16.msra.mxu0 %v4470_v45  ;;  %v4445_v47 = vld [vmem:[%s7266_s18] sm:$0xf]  ;;  %v5510_v48 = vld [vmem:[%s7266_s18 + $0x10] sm:$0xf0]  ;;  %v5508_v49 = vld [vmem:[%s7266_s18 + $0x4] sm:$0xf] }
 0x40a   : > { %v4450_v54 = vor.u32 %v5508_v49, %v4447_v51  ;;  %v5673_v45 = vld [vmem:[#allocation19 + $0x1cc] sm:$0xf]  ;;  %v5668_v49 = vld [vmem:[#allocation19 + $0x19c] sm:$0xf0]  ;;  %v4756_v51 = vld [vmem:[#allocation19 + $0x1a0] sm:$0xf0] }
 0x40b   : > { %4377 = vmatmul.msk.bf16.vlgmr.msrb.gmra.mxu1 %vm1649_vm2, %v1828_v50  ;;  %4378 = vmatmul.msk.bf16.vlgmr.msra.gmra.mxu2 %vm1649_vm2, %v1828_v50  ;;  %v4446_v50 = vor.u32 %v5510_v48, %v4445_v47  ;;  %v4754_v47 = vld [vmem:[#allocation19 + $0x180] sm:$0xf] }
 0x40c   : > { %2215 = vmatpush.bf16.msrb.mxu1 %v4522_v15  ;;  %v4454_v15 = vor.u32 %v5511_v12, %v4453_v11  ;;  %2284 = vmatpush.bf16.msra.mxu2 %v5535_v18  ;;  %v4755_v52 = vor.u32 %v5668_v49, %v4754_v47  ;;  %v4692_v12 = vld [vmem:[#allocation19 + $0x120] sm:$0xf0]  ;;  %v5636_v41 = vld [vmem:[#allocation19 + $0x9c] sm:$0xf0]  ;;  %v5633_v49 = vld [vmem:[#allocation19 + $0x8c] sm:$0xf] }
 0x40d   : > { %2162 = vmatpush.bf16.msra.mxu3 %v4446_v50  ;;  %2176 = vmatpush.bf16.msra.mxu0 %v4450_v54  ;;  %v5664_v50 = vld [vmem:[#allocation19 + $0x184] sm:$0xf]  ;;  %v4762_v54 = vld [vmem:[#allocation19 + $0x188] sm:$0xf] }
 0x40e   : > { %v4759_v53 = vor.u32 %v5664_v50, %v4756_v51  ;;  %v4636_v50 = vld [vmem:[#allocation19 + $0xa8] sm:$0xf0]  ;;  %v4594_v51 = vld [vmem:[#allocation19 + $0x40] sm:$0xf] }
 0x410   : > { %2216 = vmatpush.bf16.msrb.mxu1 %v4502_v37  ;;  %v5676_v37 = vld [vmem:[#allocation19 + $0x1dc] sm:$0xf0] }
 0x411   : > { %v4787_v39 = vor.u32 %v5676_v37, %v4786_v36 }
 0x414   : > { %2217 = vmatpush.bf16.msrb.mxu1 %v4482_v46  ;;  %v4796_v46 = vld [vmem:[#allocation19 + $0x1e8] sm:$0xf0] }
 0x415   : > { %v4799_v48 = vor.u32 %v5673_v45, %v4796_v46  ;;  %v4634_v45 = vld [vmem:[#allocation19 + $0x88] sm:$0xf] }
 0x416   : > { %v5637_v46 = vld [vmem:[#allocation19 + $0xa4] sm:$0xf0] }
 0x418   : > { %2218 = vmatpush.bf16.msrb.mxu1 %v4462_v55  ;;  %v5669_v55 = vld [vmem:[#allocation19 + $0x1a4] sm:$0xf0] }
 0x488   : > { %v1881_v56 = vpop.f32.mrf.mxu1 }
 0x489   : > { %v1903_v58 = vadd.f32 %v5963_v57, %v1881_v56  ;;  %v4513_v56 = vld [vmem:[%s7266_s18 + $0x80] sm:$0xf] }
 0x48b   : > { %v1905_v61 = vmax.f32 %v1903_v58, 0.0  ;;  %v5524_v58 = vld [vmem:[%s7266_s18 + $0x84] sm:$0xf] }
 0x48e   : > { %v1895_v3 = vpop.f32.mrf.mxu2 }
 0x490   : > { %v1883_v59 = vpop.f32.mrf.mxu1 }
 0x491   : > { %v1904_v60 = vadd.f32 %v5963_v57, %v1883_v59  ;;  %v5526_v57 = vld [vmem:[%s7266_s18 + $0x90] sm:$0xf0] }
 0x492   : > { %v4514_v59 = vor.u32 %v5526_v57, %v4513_v56  ;;  %v5665_v56 = vld [vmem:[#allocation19 + $0x18c] sm:$0xf]  ;;  %v4763_v57 = vor.u32 %v5669_v55, %v4762_v54  ;;  %v5624_v54 = vld [vmem:[#allocation19 + $0x44] sm:$0xf] }
 0x493   : > { %v1906_v62 = vmax.f32 %v1904_v60, 0.0  ;;  %v4515_v60 = vld [vmem:[%s7266_s18 + $0x94] sm:$0xf0]  ;;  %v4596_v55 = vld [vmem:[#allocation19 + $0x60] sm:$0xf0] }
 0x494   : > { %2187 = vmatpush.bf16.msrb.mxu3 %v4514_v59  ;;  %v4722_v59 = vld [vmem:[#allocation19 + $0x140] sm:$0xf] }
 0x495   : > { %v1907_v63 = vpack.c.bf16 %v1906_v62, %v1905_v61  ;;  %v4518_v61 = vor.u32 %v5524_v58, %v4515_v60  ;;  %v4493_v62 = vld [vmem:[%s7266_s18 + $0x58] sm:$0xf]  ;;  %v4764_v58 = vld [vmem:[#allocation19 + $0x1a8] sm:$0xf0]  ;;  %v5660_v60 = vld [vmem:[#allocation19 + $0x15c] sm:$0xf0] }
 0x496   : > { %v1897_v17 = vpop.f32.mrf.mxu2 }
 0x497   : > { %1967 = vmatmul.bf16.vlgmr.msra.gmra.mxu1 %v1907_v63  ;;  %v5521_v63 = vld [vmem:[%s7266_s18 + $0x68] sm:$0xf0]  ;;  %2201 = vmatpush.bf16.msrb.mxu0 %v4518_v61  ;;  %v4767_v61 = vor.u32 %v5665_v56, %v4764_v58  ;;  %v4602_v58 = vld [vmem:[#allocation19 + $0x48] sm:$0xf] }
 0x498   : > { %v4494_v1 = vor.u32 %v5521_v63, %v4493_v62  ;;  %2652 = vmatpush.bf16.msra.mxu1 %v4795_v44  ;;  %v5656_v62 = vld [vmem:[#allocation19 + $0x144] sm:$0xf] }
 0x499   : > { %v4724_v63 = vld [vmem:[#allocation19 + $0x160] sm:$0xf0] }
 0x49a   : > { %2188 = vmatpush.bf16.msrb.mxu3 %v4494_v1  ;;  %v4723_v1 = vor.u32 %v5660_v60, %v4722_v59  ;;  %v4727_v6 = vor.u32 %v5656_v62, %v4724_v63  ;;  %v4628_v44 = vld [vmem:[#allocation19 + $0xa0] sm:$0xf0]  ;;  %v5629_v59 = vld [vmem:[#allocation19 + $0x64] sm:$0xf0]  ;;  %v5625_v60 = vld [vmem:[#allocation19 + $0x4c] sm:$0xf] }
 0x49b   : > { %2202 = vmatpush.bf16.msrb.mxu0 %v4498_v4  ;;  %v4732_v4 = vld [vmem:[#allocation19 + $0x168] sm:$0xf0]  ;;  %v4631_v47 = vor.u32 %v5632_v42, %v4628_v44  ;;  %v5663_v42 = vld [vmem:[#allocation19 + $0x174] sm:$0xf0] }
 0x49c   : > { %2653 = vmatpush.bf16.msra.mxu1 %v4763_v57  ;;  %v4599_v57 = vor.u32 %v5624_v54, %v4596_v55  ;;  %v4604_v62 = vld [vmem:[#allocation19 + $0x68] sm:$0xf0]  ;;  %v5655_v54 = vld [vmem:[#allocation19 + $0x134] sm:$0xf0] }
 0x49d   : > { %v4607_v63 = vor.u32 %v5625_v60, %v4604_v62  ;;  %v4674_v60 = vld [vmem:[#allocation19 + $0xd0] sm:$0xf]  ;;  %v5642_v62 = vld [vmem:[#allocation19 + $0xd4] sm:$0xf] }
 0x49e   : > { %2189 = vmatpush.bf16.msrb.mxu3 %v4474_v9  ;;  %v5652_v9 = vld [vmem:[#allocation19 + $0x11c] sm:$0xf0] }
 0x49f   : > { %2203 = vmatpush.bf16.msrb.mxu0 %v4478_v10  ;;  %v5648_v10 = vld [vmem:[#allocation19 + $0x104] sm:$0xf]  ;;  %v4691_v18 = vor.u32 %v5652_v9, %v4690_v8  ;;  %v5617_v9 = vld [vmem:[#allocation19 + $0xc] sm:$0xf] }
 0x4a0   : > { %2654 = vmatpush.bf16.msra.mxu1 %v4731_v7 }
 0x4a2   : > { %2190 = vmatpush.bf16.msrb.mxu3 %v4454_v15  ;;  %v5649_v15 = vld [vmem:[#allocation19 + $0x10c] sm:$0xf] }
 0x4a3   : > { %2204 = vmatpush.bf16.msrb.mxu0 %v4458_v16  ;;  %v4700_v16 = vld [vmem:[#allocation19 + $0x128] sm:$0xf0] }
 0x514   : > { %v1968_v19 = vpop.f32.mrf.mxu1 }
 0x515   : > { %v1969_v22 = vadd.f32 %v5964_v20, %v1968_v19  ;;  %v5534_v19 = vld [vmem:[#allocation16 + $0x30] sm:$0xff] }
 0x516   : > { %2285 = vmatpush.bf16.msra.mxu2 %v5534_v19  ;;  %v4695_v19 = vor.u32 %v5648_v10, %v4692_v12  ;;  %v4572_v10 = vld [vmem:[#allocation19 + $0x28] sm:$0xf0] }
 0x517   : > { %v4575_v12 = vor.u32 %v5617_v9, %v4572_v10  ;;  %v5638_v9 = vld [vmem:[#allocation19 + $0xac] sm:$0xf0]  ;;  %v5634_v10 = vld [vmem:[#allocation19 + $0x94] sm:$0xf] }
 0x51c   : > { %v1970_v21 = vpop.f32.mrf.mxu1 }
 0x51d   : > { %v1971_v23 = vadd.f32 %v5964_v20, %v1970_v21  ;;  %v1242_v20 = vld [vmem:[#allocation14] sm:$0x1] }
 0x51f   : > { %v1973_v24 = vmax.f32 %v1969_v22, %v1971_v23  ;;  %v5533_v23 = vld [vmem:[#allocation16 + $0x28] sm:$0xff] }
 0x520   : > { %2286 = vmatpush.bf16.msra.mxu2 %v5533_v23  ;;  %v5640_v23 = vld [vmem:[#allocation19 + $0xc4] sm:$0xf] }
 0x521   : > { %v1974_v25 = vrot.slane %v1973_v24, 4 }
 0x523   : > { %v1975_v26 = vmax.f32 %v1973_v24, %v1974_v25 }
 0x525   : > { %v1976_v27 = vrot.slane %v1975_v26, 2 }
 0x527   : > { %v1977_v28 = vmax.f32 %v1975_v26, %v1976_v27 }
 0x529   : > { %v1978_v29 = vrot.slane %v1977_v28, 1 }
 0x52b   : > { %v1979_v30 = vmax.f32 %v1977_v28, %v1978_v29 }
 0x52d   : > { %v1980_v31 = vpack.c.bf16 %v1979_v30, %v1979_v30 }
 0x52f   : > { %2037 = vmatmul.bf16.vlgmr.msrb.gmra.mxu2 %v1980_v31  ;;  %v5532_v31 = vld [vmem:[#allocation16 + $0x20] sm:$0xff] }
 0x530   : > { %2287 = vmatpush.bf16.msra.mxu2 %v5532_v31 }
 0x534   : > { %2288 = vmatpush.bf16.msra.mxu2 %v5531_v32 }
 0x538   : > { %2289 = vmatpush.bf16.msra.mxu2 %v5530_v33 }
 0x53c   : > { %2290 = vmatpush.bf16.msra.mxu2 %v5529_v34 }
 0x540   : > { %2291 = vmatpush.bf16.msra.mxu2 %v5528_v35 }
 0x544   : > { %2665 = vmatpush.bf16.msrb.mxu2 %v4799_v48  ;;  %v4635_v48 = vor.u32 %v5637_v46, %v4634_v45  ;;  %v5659_v45 = vld [vmem:[#allocation19 + $0x15c] sm:$0xf] }
 0x545   : > { %v4748_v46 = vld [vmem:[#allocation19 + $0x178] sm:$0xf0] }
 0x548   : > { %2666 = vmatpush.bf16.msrb.mxu2 %v4767_v61  ;;  %v4603_v61 = vor.u32 %v5629_v59, %v4602_v58  ;;  %v4716_v58 = vld [vmem:[#allocation19 + $0x138] sm:$0xf0] }
 0x5b2   : > { %v2038_v21 = vpop.f32.mrf.mxu2 }
 0x5b3   : > { %v2039_v22 = vadd.f32 %v2038_v21, %v1242_v20  ;;  %v4699_v20 = vor.u32 %v5653_v14, %v4698_v13  ;;  %v4658_v21 = vld [vmem:[#allocation19 + $0xc0] sm:$0xf]  ;;  %v5678_v13 = vld [vmem:[#allocation19 + $0x1ec] sm:$0xf0]  ;;  %v5674_v14 = vld [vmem:[#allocation19 + $0x1d4] sm:$0xf] }
 0x5b5   : > { %v2042_v24 = vperm.slane %v2039_v22, 0  ;;  %v5644_v22 = vld [vmem:[#allocation19 + $0xdc] sm:$0xf0]  ;;  %2655 = vmatpush.bf16.msra.mxu1 %v4699_v20  ;;  %v5675_v20 = vld [vmem:[#allocation19 + $0x1dc] sm:$0xf] }
 0x5b6   : > { %v4659_v31 = vor.u32 %v5644_v22, %v4658_v21  ;;  %v4812_v22 = vld [vmem:[#allocation19 + $0x1f8] sm:$0xf0] }
 0x5b7   : > { %v2043_v25 = vadd.f32 %v2042_v24, %v1895_v3  ;;  %v2044_v26 = vadd.f32 %v2042_v24, %v1897_v17  ;;  %v5657_v3 = vld [vmem:[#allocation19 + $0x14c] sm:$0xf]  ;;  %v5965_v17 = vld [vmem:[%s7267_s7] ss:$0 sm:$0xff]  ;;  %v4703_v24 = vor.u32 %v5649_v15, %v4700_v16  ;;  %v4804_v15 = vld [vmem:[#allocation19 + $0x1f0] sm:$0xf0] }
 0x5b8   : > { %v4735_v11 = vor.u32 %v5657_v3, %v4732_v4  ;;  %v4564_v4 = vld [vmem:[#allocation19 + $0x20] sm:$0xf0]  ;;  %s7273_s7 = sld [smem:[#allocation54_spill]] }
 0x5b9   : > { %v2045_v27 = vmax.f32 %v2043_v25, 0.0  ;;  %v2046_v28 = vmax.f32 %v2044_v26, 0.0  ;;  %v4660_v25 = vld [vmem:[#allocation19 + $0xe0] sm:$0xf0]  ;;  %v4666_v26 = vld [vmem:[#allocation19 + $0xc8] sm:$0xf]  ;;  %v4567_v7 = vor.u32 %v5616_v2, %v4564_v4 }
 0x5ba   : > { %v2040_v29 = vpop.f32.mrf.mxu2  ;;  %2667 = vmatpush.bf16.msrb.mxu2 %v4735_v11  ;;  %v4663_v33 = vor.u32 %v5640_v23, %v4660_v25  ;;  %v4802_v11 = vld [vmem:[#allocation19 + $0x1d0] sm:$0xf]  ;;  %v4815_v25 = vor.u32 %v5675_v20, %v4812_v22  ;;  %v5647_v2 = vld [vmem:[#allocation19 + $0xf4] sm:$0xf0]  ;;  %v5626_v22 = vld [vmem:[#allocation19 + $0x54] sm:$0xf] }
 0x5bb   : > { %v2047_v30 = vpack.c.bf16 %v2046_v28, %v2045_v27  ;;  %v5645_v27 = vld [vmem:[#allocation19 + $0xe4] sm:$0xf0]  ;;  %v5641_v28 = vld [vmem:[#allocation19 + $0xcc] sm:$0xf]  ;;  %v4803_v16 = vor.u32 %v5678_v13, %v4802_v11  ;;  %v4770_v23 = vld [vmem:[#allocation19 + $0x190] sm:$0xf] }
 0x5bc   : > { %v4668_v29 = vld [vmem:[#allocation19 + $0xe8] sm:$0xf0]  ;;  %v4667_v34 = vor.u32 %v5645_v27, %v4666_v26  ;;  %v5666_v27 = vld [vmem:[#allocation19 + $0x194] sm:$0xf]  ;;  %v5639_v13 = vld [vmem:[#allocation19 + $0xb4] sm:$0xf0] }
 0x5bd   : > { %4523 = vmatmul.msk.bf16.vlgmr.msra.gmra.mxu3 %vm1649_vm2, %v2047_v30  ;;  %4524 = vmatmul.msk.bf16.vlgmr.msra.gmra.mxu0 %vm1649_vm2, %v2047_v30  ;;  %v4671_v36 = vor.u32 %v5641_v28, %v4668_v29  ;;  %v4772_v28 = vld [vmem:[#allocation19 + $0x1b0] sm:$0xf0]  ;;  %v4778_v29 = vld [vmem:[#allocation19 + $0x198] sm:$0xf] }
 0x5be   : > { %4527 = vmatmul.msk.bf16.vlgmr.msrb.gmra.mxu1 %vm1649_vm2, %v2047_v30  ;;  %2626 = vmatpush.bf16.msra.mxu3 %v4787_v39  ;;  %v4644_v11 = vld [vmem:[#allocation19 + $0xb0] sm:$0xf0] }
 0x5bf   : > { %2639 = vmatpush.bf16.msra.mxu0 %v4791_v43  ;;  %2668 = vmatpush.bf16.msrb.mxu2 %v4703_v24  ;;  %v4627_v43 = vor.u32 %v5636_v41, %v4626_v40  ;;  %v5670_v24 = vld [vmem:[#allocation19 + $0x1ac] sm:$0xf0]  ;;  %v4740_v40 = vld [vmem:[#allocation19 + $0x170] sm:$0xf0]  ;;  %v4746_v41 = vld [vmem:[#allocation19 + $0x158] sm:$0xf] }
 0x5c0   : > { %2656 = vmatpush.bf16.msra.mxu1 %v4667_v34  ;;  %v4771_v26 = vor.u32 %v5670_v24, %v4770_v23  ;;  %v4747_v44 = vor.u32 %v5663_v42, %v4746_v41  ;;  %v4612_v23 = vld [vmem:[#allocation19 + $0x70] sm:$0xf0]  ;;  %v4588_v41 = vld [vmem:[#allocation19 + $0x38] sm:$0xf0] }
 0x5c2   : > { %2627 = vmatpush.bf16.msra.mxu3 %v4755_v52  ;;  %v4639_v52 = vor.u32 %v5633_v49, %v4636_v50  ;;  %v5654_v49 = vld [vmem:[#allocation19 + $0x12c] sm:$0xf0]  ;;  %v5650_v50 = vld [vmem:[#allocation19 + $0x114] sm:$0xf] }
 0x5c3   : > { %2640 = vmatpush.bf16.msra.mxu0 %v4759_v53  ;;  %2669 = vmatpush.bf16.msrb.mxu2 %v4671_v36  ;;  %v5628_v53 = vld [vmem:[#allocation19 + $0x5c] sm:$0xf0]  ;;  %v4738_v36 = vld [vmem:[#allocation19 + $0x150] sm:$0xf] }
 0x5c4   : > { %2657 = vmatpush.bf16.msra.mxu1 %v4635_v48  ;;  %v4595_v56 = vor.u32 %v5628_v53, %v4594_v51  ;;  %v4706_v48 = vld [vmem:[#allocation19 + $0x110] sm:$0xf]  ;;  %v4714_v53 = vld [vmem:[#allocation19 + $0x118] sm:$0xf] }
 0x5c5   : > { %v4707_v51 = vor.u32 %v5654_v49, %v4706_v48 }
 0x5c6   : > { %2628 = vmatpush.bf16.msra.mxu3 %v4723_v1  ;;  %v5620_v1 = vld [vmem:[#allocation19 + $0x1c] sm:$0xf0] }
 0x5c7   : > { %2641 = vmatpush.bf16.msra.mxu0 %v4727_v6  ;;  %2670 = vmatpush.bf16.msrb.mxu2 %v4639_v52  ;;  %v4563_v3 = vor.u32 %v5620_v1, %v4562_v0  ;;  %v5621_v6 = vld [vmem:[#allocation19 + $0x24] sm:$0xf0]  ;;  %v4708_v52 = vld [vmem:[#allocation19 + $0x130] sm:$0xf0]  ;;  %v4682_v1 = vld [vmem:[#allocation19 + $0xd8] sm:$0xf] }
 0x5c8   : > { %2658 = vmatpush.bf16.msra.mxu1 %v4603_v61  ;;  %v4711_v55 = vor.u32 %v5650_v50, %v4708_v52  ;;  %v5646_v61 = vld [vmem:[#allocation19 + $0xec] sm:$0xf0]  ;;  %v4676_v0 = vld [vmem:[#allocation19 + $0xf0] sm:$0xf0]  ;;  %v4683_v4 = vor.u32 %v5647_v2, %v4682_v1  ;;  %v4994_v2 = vld [vmem:[#allocation17 + $0x160] sm:$0xf] }
 0x5ca   : > { %2629 = vmatpush.bf16.msra.mxu3 %v4691_v18  ;;  %v4810_v18 = vld [vmem:[#allocation19 + $0x1d8] sm:$0xf] }
 0x5cb   : > { %2642 = vmatpush.bf16.msra.mxu0 %v4695_v19  ;;  %2671 = vmatpush.bf16.msrb.mxu2 %v4607_v63  ;;  %v5679_v19 = vld [vmem:[#allocation19 + $0x1f4] sm:$0xf0]  ;;  %v4675_v63 = vor.u32 %v5646_v61, %v4674_v60 }
 0x5cc   : > { %v4811_v21 = vor.u32 %v5679_v19, %v4810_v18  ;;  %v4610_v18 = vld [vmem:[#allocation19 + $0x50] sm:$0xf]  ;;  %v5567_v61 = vld [vmem:[#allocation17 + $0xf4] sm:$0xf0] }
 0x5cd   : > { %4525 = vmatmul.msk.bf16.vlgmr.msrb.gmra.mxu3 %vm1649_vm2, %v2047_v30  ;;  %4526 = vmatmul.msk.bf16.vlgmr.msrb.gmra.mxu0 %vm1649_vm2, %v2047_v30 }
 0x5ce   : > { %2630 = vmatpush.bf16.msra.mxu3 %v4659_v31  ;;  %v5671_v31 = vld [vmem:[#allocation19 + $0x1b4] sm:$0xf0] }
 0x5cf   : > { %2643 = vmatpush.bf16.msra.mxu0 %v4663_v33  ;;  %2672 = vmatpush.bf16.msrb.mxu2 %v4575_v12  ;;  %v4780_v33 = vld [vmem:[#allocation19 + $0x1b8] sm:$0xf0]  ;;  %v4779_v34 = vor.u32 %v5671_v31, %v4778_v29  ;;  %v4650_v12 = vld [vmem:[#allocation19 + $0x98] sm:$0xf]  ;;  %v4578_v31 = vld [vmem:[#allocation19 + $0x10] sm:$0xf] }
 0x5d0   : > { %v4651_v20 = vor.u32 %v5639_v13, %v4650_v12  ;;  %v5549_v12 = vld [vmem:[#allocation17 + $0x64] sm:$0xf0] }
 0x5d2   : > { %2631 = vmatpush.bf16.msra.mxu3 %v4627_v43 }
 0x5d3   : > { %2644 = vmatpush.bf16.msra.mxu0 %v4631_v47  ;;  %v4751_v47 = vor.u32 %v5659_v45, %v4748_v46 }
 0x5d6   : > { %2632 = vmatpush.bf16.msra.mxu3 %v4595_v56  ;;  %v4715_v56 = vor.u32 %v5655_v54, %v4714_v53 }
 0x5d7   : > { %2645 = vmatpush.bf16.msra.mxu0 %v4599_v57  ;;  %v5651_v57 = vld [vmem:[#allocation19 + $0x11c] sm:$0xf] }
 0x5d8   : > { %v4719_v59 = vor.u32 %v5651_v57, %v4716_v58  ;;  %v5066_v57 = vld [vmem:[#allocation17 + $0x1f0] sm:$0xf]  ;;  %v5599_v58 = vld [vmem:[#allocation17 + $0x1f4] sm:$0xf0] }
 0x5da   : > { %2633 = vmatpush.bf16.msra.mxu3 %v4563_v3  ;;  %v4679_v3 = vor.u32 %v5642_v62, %v4676_v0  ;;  %v4874_v62 = vld [vmem:[#allocation17 + $0x70] sm:$0xf] }
 0x5db   : > { %2646 = vmatpush.bf16.msra.mxu0 %v4567_v7  ;;  %v4642_v7 = vld [vmem:[#allocation19 + $0x90] sm:$0xf] }
 0x5de   : > { %2678 = vmatpush.bf16.msrb.mxu3 %v4803_v16  ;;  %v4647_v16 = vor.u32 %v5634_v10, %v4644_v11  ;;  %v5565_v10 = vld [vmem:[#allocation17 + $0xe4] sm:$0xf0]  ;;  %v4866_v11 = vld [vmem:[#allocation17 + $0x60] sm:$0xf] }
 0x5e2   : > { %2679 = vmatpush.bf16.msrb.mxu3 %v4771_v26  ;;  %v5631_v26 = vld [vmem:[#allocation19 + $0x74] sm:$0xf0] }
 0x640   : > { %v2164_v5 = vpop.f32.mrf.mxu3 }
 0x641   : > { %v2228_v30 = vadd.f32 %v5965_v17, %v2164_v5  ;;  %v4570_v5 = vld [vmem:[#allocation19 + $0x8] sm:$0xf] }
 0x642   : > { %v4571_v8 = vor.u32 %v5621_v6, %v4570_v5  ;;  %v5643_v5 = vld [vmem:[#allocation19 + $0xdc] sm:$0xf] }
 0x643   : > { %v2230_v37 = vmax.f32 %v2228_v30, 0.0  ;;  %v4775_v30 = vor.u32 %v5666_v27, %v4772_v28  ;;  %v4684_v6 = vld [vmem:[#allocation19 + $0xf8] sm:$0xf0] }
 0x644   : > { %2659 = vmatpush.bf16.msra.mxu1 %v4571_v8  ;;  %v4687_v8 = vor.u32 %v5643_v5, %v4684_v6  ;;  %v5627_v27 = vld [vmem:[#allocation19 + $0x5c] sm:$0xf]  ;;  %v5058_v5 = vld [vmem:[#allocation17 + $0x1e0] sm:$0xf]  ;;  %v5597_v6 = vld [vmem:[#allocation17 + $0x1e4] sm:$0xf0] }
 0x645   : > { %v4620_v28 = vld [vmem:[#allocation19 + $0x78] sm:$0xf0] }
 0x648   : > { %v2166_v32 = vpop.f32.mrf.mxu3  ;;  %2704 = vmatpush.bf16.msrb.mxu1 %v4811_v21  ;;  %v5630_v21 = vld [vmem:[#allocation19 + $0x6c] sm:$0xf0] }
 0x649   : > { %v2229_v35 = vadd.f32 %v5965_v17, %v2166_v32  ;;  %v4807_v17 = vor.u32 %v5674_v14, %v4804_v15  ;;  %v5667_v32 = vld [vmem:[#allocation19 + $0x19c] sm:$0xf]  ;;  %v4643_v15 = vor.u32 %v5638_v9, %v4642_v7  ;;  %v4611_v29 = vor.u32 %v5630_v21, %v4610_v18  ;;  %v5595_v18 = vld [vmem:[#allocation17 + $0x1d4] sm:$0xf0] }
 0x64a   : > { %v5635_v14 = vld [vmem:[#allocation19 + $0x9c] sm:$0xf]  ;;  %v4867_v21 = vor.u32 %v5549_v12, %v4866_v11  ;;  %v5585_v12 = vld [vmem:[#allocation17 + $0x184] sm:$0xf0] }
 0x64b   : > { %v2231_v38 = vmax.f32 %v2229_v35, 0.0  ;;  %2691 = vmatpush.bf16.msrb.mxu0 %v4807_v17  ;;  %v4783_v35 = vor.u32 %v5667_v32, %v4780_v33  ;;  %v4652_v17 = vld [vmem:[#allocation19 + $0xb8] sm:$0xf0]  ;;  %v5622_v33 = vld [vmem:[#allocation19 + $0x2c] sm:$0xf0] }
 0x64c   : > { %2705 = vmatpush.bf16.msrb.mxu1 %v4779_v34  ;;  %v4655_v24 = vor.u32 %v5635_v14, %v4652_v17  ;;  %v5618_v34 = vld [vmem:[#allocation19 + $0x14] sm:$0xf]  ;;  %v4579_v42 = vor.u32 %v5622_v33, %v4578_v31  ;;  %v4986_v14 = vld [vmem:[#allocation17 + $0x150] sm:$0xf]  ;;  %v4914_v33 = vld [vmem:[#allocation17 + $0xc0] sm:$0xf] }
 0x64d   : > { %v2232_v39 = vpack.c.bf16 %v2231_v38, %v2230_v37  ;;  %v5662_v37 = vld [vmem:[#allocation19 + $0x16c] sm:$0xf0]  ;;  %v5658_v38 = vld [vmem:[#allocation19 + $0x154] sm:$0xf] }
 0x64e   : > { %v4743_v43 = vor.u32 %v5658_v38, %v4740_v40  ;;  %v4586_v38 = vld [vmem:[#allocation19 + $0x18] sm:$0xf]  ;;  %v5619_v40 = vld [vmem:[#allocation19 + $0x1c] sm:$0xf]  ;;  %v5050_v17 = vld [vmem:[#allocation17 + $0x1d0] sm:$0xf] }
 0x64f   : > { %2292 = vmatmul.bf16.vlgmr.msra.gmra.mxu2 %v2232_v39  ;;  %2692 = vmatpush.bf16.msrb.mxu0 %v4775_v30  ;;  %v4739_v39 = vor.u32 %v5662_v37, %v4738_v36  ;;  %v4615_v30 = vor.u32 %v5626_v22, %v4612_v23  ;;  %v5966_v36 = vld [vmem:[%s7268_s3] ss:$0 sm:$0xff]  ;;  %v4623_v37 = vor.u32 %v5627_v27, %v4620_v28  ;;  %v5563_v22 = vld [vmem:[#allocation17 + $0xd4] sm:$0xf0]  ;;  %v4858_v23 = vld [vmem:[#allocation17 + $0x50] sm:$0xf] }
 0x650   : > { %2717 = vmatpush.bf16.msra.mxu2 %v4815_v25  ;;  %2706 = vmatpush.bf16.msrb.mxu1 %v4747_v44  ;;  %v4618_v25 = vld [vmem:[#allocation19 + $0x58] sm:$0xf]  ;;  %v4591_v48 = vor.u32 %v5619_v40, %v4588_v41  ;;  %v5051_v27 = vor.u32 %v5595_v18, %v5050_v17  ;;  %v5577_v28 = vld [vmem:[#allocation17 + $0x144] sm:$0xf0]  ;;  %v4842_v17 = vld [vmem:[#allocation17 + $0x30] sm:$0xf] }
 0x651   : > { %2680 = vmatpush.bf16.msrb.mxu3 %v4739_v39  ;;  %v4619_v32 = vor.u32 %v5631_v26, %v4618_v25  ;;  %v5623_v39 = vld [vmem:[#allocation19 + $0x34] sm:$0xf0]  ;;  %v4978_v26 = vld [vmem:[#allocation17 + $0x140] sm:$0xf]  ;;  %s7274_s3 = sld [smem:[#allocation55_spill]] }
 0x652   : > { %v4587_v45 = vor.u32 %v5623_v39, %v4586_v38  ;;  %v5575_v38 = vld [vmem:[#allocation17 + $0x134] sm:$0xf0]  ;;  %v5034_v39 = vld [vmem:[#allocation17 + $0x1b0] sm:$0xf] }
 0x653   : > { %2693 = vmatpush.bf16.msrb.mxu0 %v4743_v43  ;;  %v5591_v40 = vld [vmem:[#allocation17 + $0x1b4] sm:$0xf0] }
 0x654   : > { %2718 = vmatpush.bf16.msra.mxu2 %v4783_v35  ;;  %2707 = vmatpush.bf16.msrb.mxu1 %v4715_v56  ;;  %v4580_v35 = vld [vmem:[#allocation19 + $0x30] sm:$0xf0]  ;;  %v5583_v56 = vld [vmem:[#allocation17 + $0x174] sm:$0xf0] }
 0x655   : > { %2681 = vmatpush.bf16.msrb.mxu3 %v4707_v51  ;;  %v4583_v43 = vor.u32 %v5618_v34, %v4580_v35  ;;  %v5561_v34 = vld [vmem:[#allocation17 + $0xc4] sm:$0xf0]  ;;  %v4979_v35 = vor.u32 %v5577_v28, %v4978_v26  ;;  %v5543_v18 = vld [vmem:[#allocation17 + $0x34] sm:$0xf0]  ;;  %v5060_v28 = vld [vmem:[#allocation17 + $0x1e8] sm:$0xf0] }
 0x656   : > { %v4915_v41 = vor.u32 %v5561_v34, %v4914_v33  ;;  %v5576_v33 = vld [vmem:[#allocation17 + $0x144] sm:$0xf]  ;;  %v4980_v34 = vld [vmem:[#allocation17 + $0x148] sm:$0xf0] }
 0x657   : > { %2694 = vmatpush.bf16.msrb.mxu0 %v4711_v55  ;;  %v5002_v55 = vld [vmem:[#allocation17 + $0x170] sm:$0xf] }
 0x658   : > { %2719 = vmatpush.bf16.msra.mxu2 %v4751_v47  ;;  %2708 = vmatpush.bf16.msrb.mxu1 %v4683_v4  ;;  %v5003_v1 = vor.u32 %v5583_v56, %v5002_v55  ;;  %v5067_v4 = vor.u32 %v5599_v58, %v5066_v57  ;;  %v5018_v55 = vld [vmem:[#allocation17 + $0x190] sm:$0xf]  ;;  %v5587_v56 = vld [vmem:[#allocation17 + $0x194] sm:$0xf0] }
 0x659   : > { %2682 = vmatpush.bf16.msrb.mxu3 %v4675_v63  ;;  %v5551_v63 = vld [vmem:[#allocation17 + $0x74] sm:$0xf0]  ;;  %v5019_v58 = vor.u32 %v5587_v56, %v5018_v55  ;;  %v7046_v55 = vpop.f32.mrf.mxu1 }
 0x65a   : > { %v4875_v9 = vor.u32 %v5551_v63, %v4874_v62  ;;  %v5004_v62 = vld [vmem:[#allocation17 + $0x178] sm:$0xf0] }
 0x65b   : > { %2695 = vmatpush.bf16.msrb.mxu0 %v4679_v3  ;;  %v5581_v3 = vld [vmem:[#allocation17 + $0x164] sm:$0xf0] }
 0x65c   : > { %2720 = vmatpush.bf16.msra.mxu2 %v4719_v59  ;;  %2709 = vmatpush.bf16.msrb.mxu1 %v4651_v20  ;;  %v4938_v59 = vld [vmem:[#allocation17 + $0xf0] sm:$0xf]  ;;  %v4995_v13 = vor.u32 %v5581_v3, %v4994_v2  ;;  %v4850_v2 = vld [vmem:[#allocation17 + $0x40] sm:$0xf]  ;;  %v5545_v3 = vld [vmem:[#allocation17 + $0x44] sm:$0xf0] }
 0x65d   : > { %2683 = vmatpush.bf16.msrb.mxu3 %v4643_v15  ;;  %v4939_v7 = vor.u32 %v5567_v61, %v4938_v59  ;;  %v5579_v15 = vld [vmem:[#allocation17 + $0x154] sm:$0xf0]  ;;  %v4922_v20 = vld [vmem:[#allocation17 + $0xd0] sm:$0xf]  ;;  %v4946_v59 = vld [vmem:[#allocation17 + $0x100] sm:$0xf] }
 0x65e   : > { %v4987_v25 = vor.u32 %v5579_v15, %v4986_v14  ;;  %v4923_v31 = vor.u32 %v5563_v22, %v4922_v20  ;;  %v5582_v61 = vld [vmem:[#allocation17 + $0x174] sm:$0xf]  ;;  %v5068_v14 = vld [vmem:[#allocation17 + $0x1f8] sm:$0xf0]  ;;  %v4843_v20 = vor.u32 %v5543_v18, %v4842_v17  ;;  %v5560_v18 = vld [vmem:[#allocation17 + $0xc4] sm:$0xf] }
 0x65f   : > { %2696 = vmatpush.bf16.msrb.mxu0 %v4647_v16  ;;  %v5059_v16 = vor.u32 %v5597_v6, %v5058_v5  ;;  %v5580_v5 = vld [vmem:[#allocation17 + $0x164] sm:$0xf]  ;;  %v4996_v6 = vld [vmem:[#allocation17 + $0x168] sm:$0xf0]  ;;  %v4988_v22 = vld [vmem:[#allocation17 + $0x158] sm:$0xf0] }
 0x660   : > { %2721 = vmatpush.bf16.msra.mxu2 %v4687_v8  ;;  %2710 = vmatpush.bf16.msrb.mxu1 %v4619_v32  ;;  %v4930_v8 = vld [vmem:[#allocation17 + $0xe0] sm:$0xf] }
 0x661   : > { %2684 = vmatpush.bf16.msrb.mxu3 %v4611_v29  ;;  %v5042_v29 = vld [vmem:[#allocation17 + $0x1c0] sm:$0xf] }
 0x663   : > { %2697 = vmatpush.bf16.msrb.mxu0 %v4615_v30  ;;  %v5593_v30 = vld [vmem:[#allocation17 + $0x1c4] sm:$0xf0] }
 0x664   : > { %2722 = vmatpush.bf16.msra.mxu2 %v4655_v24  ;;  %2711 = vmatpush.bf16.msrb.mxu1 %v4587_v45  ;;  %v5547_v24 = vld [vmem:[#allocation17 + $0x54] sm:$0xf0]  ;;  %v4962_v45 = vld [vmem:[#allocation17 + $0x120] sm:$0xf] }
 0x665   : > { %2685 = vmatpush.bf16.msrb.mxu3 %v4579_v42  ;;  %v4859_v32 = vor.u32 %v5547_v24, %v4858_v23  ;;  %v4906_v42 = vld [vmem:[#allocation17 + $0xb0] sm:$0xf] }
 0x666   : > { %v4890_v24 = vld [vmem:[#allocation17 + $0x90] sm:$0xf] }
 0x667   : > { %2698 = vmatpush.bf16.msrb.mxu0 %v4583_v43  ;;  %v5559_v43 = vld [vmem:[#allocation17 + $0xb4] sm:$0xf0] }
 0x668   : > { %2723 = vmatpush.bf16.msra.mxu2 %v4623_v37  ;;  %v5043_v37 = vor.u32 %v5593_v30, %v5042_v29  ;;  %v4834_v30 = vld [vmem:[#allocation17 + $0x20] sm:$0xf] }
 0x66c   : > { %2724 = vmatpush.bf16.msra.mxu2 %v4591_v48  ;;  %v5026_v48 = vld [vmem:[#allocation17 + $0x1a0] sm:$0xf] }
 0x6d2   : > { %v2293_v19 = vpop.f32.mrf.mxu2 }
 0x6d3   : > { %v2294_v46 = vadd.f32 %v5966_v36, %v2293_v19  ;;  %v4931_v19 = vor.u32 %v5565_v10, %v4930_v8  ;;  %v4898_v8 = vld [vmem:[#allocation17 + $0xa0] sm:$0xf] }
 0x6d4   : > { %v5010_v10 = vld [vmem:[#allocation17 + $0x180] sm:$0xf] }
 0x6d5   : > { %v5011_v15 = vor.u32 %v5585_v12, %v5010_v10  ;;  %v7048_v10 = vpop.f32.mrf.mxu3  ;;  %v5548_v12 = vld [vmem:[#allocation17 + $0x64] sm:$0xf] }
 0x6da   : > { %v2295_v44 = vpop.f32.mrf.mxu2 }
 0x6db   : > { %v2296_v47 = vadd.f32 %v5966_v36, %v2295_v44  ;;  %v4970_v36 = vld [vmem:[#allocation17 + $0x130] sm:$0xf] }
 0x6dc   : > { %v4971_v44 = vor.u32 %v5575_v38, %v4970_v36  ;;  %v4882_v36 = vld [vmem:[#allocation17 + $0x80] sm:$0xf] }
 0x6dd   : > { %v2298_v49 = vmax.f32 %v2294_v46, %v2296_v47  ;;  %v5035_v46 = vor.u32 %v5591_v40, %v5034_v39  ;;  %v5573_v47 = vld [vmem:[#allocation17 + $0x124] sm:$0xf0]  ;;  %v5566_v39 = vld [vmem:[#allocation17 + $0xf4] sm:$0xf]  ;;  %v4940_v40 = vld [vmem:[#allocation17 + $0xf8] sm:$0xf0] }
 0x6df   : > { %v2299_v50 = vrot.slane %v2298_v49, 4 }
 0x6e1   : > { %v2300_v51 = vmax.f32 %v2298_v49, %v2299_v50  ;;  %v5589_v49 = vld [vmem:[#allocation17 + $0x1a4] sm:$0xf0]  ;;  %v4907_v50 = vor.u32 %v5559_v43, %v4906_v42  ;;  %v4943_v42 = vor.u32 %v5566_v39, %v4940_v40  ;;  %v5052_v43 = vld [vmem:[#allocation17 + $0x1d8] sm:$0xf0]  ;;  %v5544_v40 = vld [vmem:[#allocation17 + $0x44] sm:$0xf] }
 0x6e3   : > { %v2301_v52 = vrot.slane %v2300_v51, 2 }
 0x6e5   : > { %v2302_v53 = vmax.f32 %v2300_v51, %v2301_v52  ;;  %v4963_v51 = vor.u32 %v5573_v47, %v4962_v45  ;;  %v4954_v52 = vld [vmem:[#allocation17 + $0x110] sm:$0xf]  ;;  %v5539_v45 = vld [vmem:[#allocation17 + $0x14] sm:$0xf0] }
 0x6e7   : > { %v2303_v54 = vrot.slane %v2302_v53, 1 }
 0x6e9   : > { %v2304_v60 = vmax.f32 %v2302_v53, %v2303_v54  ;;  %v5027_v53 = vor.u32 %v5589_v49, %v5026_v48  ;;  %v5571_v54 = vld [vmem:[#allocation17 + $0x114] sm:$0xf0]  ;;  %v5574_v48 = vld [vmem:[#allocation17 + $0x134] sm:$0xf]  ;;  %v4972_v49 = vld [vmem:[#allocation17 + $0x138] sm:$0xf0] }
 0x6ea   : > { %v4955_v57 = vor.u32 %v5571_v54, %v4954_v52  ;;  %v5564_v52 = vld [vmem:[#allocation17 + $0xe4] sm:$0xf] }
 0x6eb   : > { %v7030_v0 = vpack.c.bf16 %v2304_v60, %v2304_v60  ;;  %v5569_v60 = vld [vmem:[#allocation17 + $0x104] sm:$0xf0]  ;;  %v5592_v54 = vld [vmem:[#allocation17 + $0x1c4] sm:$0xf] }
 0x6ec   : > { %v4947_v63 = vor.u32 %v5569_v60, %v4946_v59  ;;  %v5537_v60 = vld [vmem:[#allocation17 + $0x4] sm:$0xf0] }
 0x6ed   : > { %2634 = vmatmul.bf16.vlgmr.msra.gmra.mxu3 %v7030_v0  ;;  %2647 = vmatmul.bf16.vlgmr.msra.gmra.mxu0 %v7030_v0 }
 0x6ee   : > { %2660 = vmatmul.bf16.vlgmr.msra.gmra.mxu1 %v7030_v0  ;;  %2673 = vmatmul.bf16.vlgmr.msrb.gmra.mxu2 %v7030_v0 }
 0x6ef   : > { %3141 = vmatpush.bf16.msra.mxu1 %v5003_v1  ;;  %3155 = vmatpush.bf16.msrb.mxu2 %v5067_v4  ;;  %v7040_v1 = vpop.f32.mrf.mxu0  ;;  %v4851_v4 = vor.u32 %v5545_v3, %v4850_v2  ;;  %v4964_v2 = vld [vmem:[#allocation17 + $0x128] sm:$0xf0] }
 0x6f0   : > { %3127 = vmatpush.bf16.msra.mxu0 %v4939_v7  ;;  %3113 = vmatpush.bf16.msra.mxu3 %v4875_v9  ;;  %v4999_v7 = vor.u32 %v5580_v5, %v4996_v6  ;;  %v5557_v9 = vld [vmem:[#allocation17 + $0xa4] sm:$0xf0]  ;;  %v5562_v5 = vld [vmem:[#allocation17 + $0xd4] sm:$0xf]  ;;  %v4924_v6 = vld [vmem:[#allocation17 + $0xd8] sm:$0xf0] }
 0x6f1   : > { %v4899_v11 = vor.u32 %v5557_v9, %v4898_v8  ;;  %v4927_v8 = vor.u32 %v5562_v5, %v4924_v6  ;;  %v5036_v9 = vld [vmem:[#allocation17 + $0x1b8] sm:$0xf0]  ;;  %v5552_v5 = vld [vmem:[#allocation17 + $0x84] sm:$0xf]  ;;  %v4884_v6 = vld [vmem:[#allocation17 + $0x88] sm:$0xf0] }
 0x6f3   : > { %3142 = vmatpush.bf16.msra.mxu1 %v4995_v13  ;;  %3156 = vmatpush.bf16.msrb.mxu2 %v5059_v16  ;;  %v5598_v13 = vld [vmem:[#allocation17 + $0x1f4] sm:$0xf] }
 0x6f4   : > { %3128 = vmatpush.bf16.msra.mxu0 %v4931_v19  ;;  %3114 = vmatpush.bf16.msra.mxu3 %v4867_v21  ;;  %v5071_v16 = vor.u32 %v5598_v13, %v5068_v14  ;;  %v5578_v21 = vld [vmem:[#allocation17 + $0x154] sm:$0xf]  ;;  %v4868_v13 = vld [vmem:[#allocation17 + $0x68] sm:$0xf0] }
 0x6f5   : > { %v4991_v23 = vor.u32 %v5578_v21, %v4988_v22  ;;  %v5570_v14 = vld [vmem:[#allocation17 + $0x114] sm:$0xf]  ;;  %v5588_v22 = vld [vmem:[#allocation17 + $0x1a4] sm:$0xf] }
 0x6f7   : > { %3143 = vmatpush.bf16.msra.mxu1 %v4987_v25  ;;  %3157 = vmatpush.bf16.msrb.mxu2 %v5051_v27  ;;  %v7042_v19 = vpop.f32.mrf.mxu0  ;;  %v5555_v25 = vld [vmem:[#allocation17 + $0x94] sm:$0xf0]  ;;  %v5596_v27 = vld [vmem:[#allocation17 + $0x1e4] sm:$0xf] }
 0x6f8   : > { %3129 = vmatpush.bf16.msra.mxu0 %v4923_v31  ;;  %3115 = vmatpush.bf16.msra.mxu3 %v4859_v32  ;;  %v4891_v26 = vor.u32 %v5555_v25, %v4890_v24  ;;  %v5063_v29 = vor.u32 %v5596_v27, %v5060_v28  ;;  %v5541_v31 = vld [vmem:[#allocation17 + $0x24] sm:$0xf0]  ;;  %v4860_v27 = vld [vmem:[#allocation17 + $0x58] sm:$0xf0]  ;;  %v5568_v28 = vld [vmem:[#allocation17 + $0x104] sm:$0xf] }
 0x6f9   : > { %v4835_v32 = vor.u32 %v5541_v31, %v4834_v30  ;;  %v4948_v31 = vld [vmem:[#allocation17 + $0x108] sm:$0xf0] }
 0x6fb   : > { %3144 = vmatpush.bf16.msra.mxu1 %v4979_v35  ;;  %3158 = vmatpush.bf16.msrb.mxu2 %v5043_v37  ;;  %v4983_v35 = vor.u32 %v5576_v33, %v4980_v34  ;;  %v5553_v37 = vld [vmem:[#allocation17 + $0x84] sm:$0xf0]  ;;  %v4951_v33 = vor.u32 %v5568_v28, %v4948_v31  ;;  %v5558_v34 = vld [vmem:[#allocation17 + $0xb4] sm:$0xf] }
 0x6fc   : > { %3130 = vmatpush.bf16.msra.mxu0 %v4915_v41  ;;  %3116 = vmatpush.bf16.msra.mxu3 %v4851_v4  ;;  %v4883_v38 = vor.u32 %v5553_v37, %v4882_v36  ;;  %v5594_v41 = vld [vmem:[#allocation17 + $0x1d4] sm:$0xf] }
 0x6fd   : > { %2686 = vmatmul.bf16.vlgmr.msrb.gmra.mxu3 %v7030_v0  ;;  %2699 = vmatmul.bf16.vlgmr.msrb.gmra.mxu0 %v7030_v0  ;;  %v5586_v36 = vld [vmem:[#allocation17 + $0x194] sm:$0xf] }
 0x6fe   : > { %2712 = vmatmul.bf16.vlgmr.msrb.gmra.mxu1 %v7030_v0  ;;  %2725 = vmatmul.bf16.vlgmr.msra.gmra.mxu2 %v7030_v0  ;;  %v5007_v0 = vor.u32 %v5582_v61, %v5004_v62  ;;  %v5550_v61 = vld [vmem:[#allocation17 + $0x74] sm:$0xf] }
 0x6ff   : > { %3145 = vmatpush.bf16.msra.mxu1 %v4971_v44  ;;  %3159 = vmatpush.bf16.msrb.mxu2 %v5035_v46  ;;  %v4826_v44 = vld [vmem:[#allocation17 + $0x10] sm:$0xf]  ;;  %v5055_v46 = vor.u32 %v5594_v41, %v5052_v43  ;;  %v4852_v41 = vld [vmem:[#allocation17 + $0x48] sm:$0xf0] }
 0x700   : > { %3131 = vmatpush.bf16.msra.mxu0 %v4907_v50  ;;  %3117 = vmatpush.bf16.msra.mxu3 %v4843_v20  ;;  %v4827_v47 = vor.u32 %v5539_v45, %v4826_v44  ;;  %v4975_v50 = vor.u32 %v5574_v48, %v4972_v49  ;;  %v4916_v20 = vld [vmem:[#allocation17 + $0xc8] sm:$0xf0]  ;;  %v4855_v44 = vor.u32 %v5544_v40, %v4852_v41  ;;  %v5556_v45 = vld [vmem:[#allocation17 + $0xa4] sm:$0xf]  ;;  %v5194_v40 = vld [vmem:[#allocation20 + $0x70] sm:$0xf] }
 0x701   : > { %v4919_v21 = vor.u32 %v5560_v18, %v4916_v20  ;;  %v4820_v18 = vld [vmem:[#allocation17 + $0x8] sm:$0xf0]  ;;  %v5695_v41 = vld [vmem:[#allocation20 + $0x74] sm:$0xf0] }
 0x703   : > { %3146 = vmatpush.bf16.msra.mxu1 %v4963_v51  ;;  %3160 = vmatpush.bf16.msrb.mxu2 %v5027_v53  ;;  %v7044_v51 = vpop.f32.mrf.mxu0  ;;  %v4932_v53 = vld [vmem:[#allocation17 + $0xe8] sm:$0xf0] }
 0x704   : > { %3132 = vmatpush.bf16.msra.mxu0 %v4899_v11  ;;  %3118 = vmatpush.bf16.msra.mxu3 %v4835_v32  ;;  %v4935_v56 = vor.u32 %v5564_v52, %v4932_v53  ;;  %v7055_v32 = vld [vmem:[%s7269_s24] sm:$0xf]  ;;  %s7275_s24 = sld [smem:[#allocation51_spill]] }
 0x705   : > { %v2733_v43 = vperm.slane %v7055_v32, 2 }
 0x707   : > { %3147 = vmatpush.bf16.msra.mxu1 %v4955_v57  ;;  %3161 = vmatpush.bf16.msrb.mxu2 %v5019_v58  ;;  %v5044_v57 = vld [vmem:[#allocation17 + $0x1c8] sm:$0xf0]  ;;  %v4818_v58 = vld [vmem:[#allocation17] sm:$0xf] }
 0x708   : > { %3133 = vmatpush.bf16.msra.mxu0 %v4891_v26  ;;  %3119 = vmatpush.bf16.msra.mxu3 %v4827_v47  ;;  %v5047_v59 = vor.u32 %v5592_v54, %v5044_v57  ;;  %v4819_v62 = vor.u32 %v5537_v60, %v4818_v58  ;;  %v5546_v26 = vld [vmem:[#allocation17 + $0x54] sm:$0xf]  ;;  %v5584_v47 = vld [vmem:[#allocation17 + $0x184] sm:$0xf]  ;;  %v4892_v60 = vld [vmem:[#allocation17 + $0x98] sm:$0xf0] }
 0x709   : > { %v4863_v30 = vor.u32 %v5546_v26, %v4860_v27  ;;  %v5542_v54 = vld [vmem:[#allocation17 + $0x34] sm:$0xf] }
 0x70b   : > { %3148 = vmatpush.bf16.msra.mxu1 %v4947_v63  ;;  %3162 = vmatpush.bf16.msrb.mxu2 %v5011_v15  ;;  %v4876_v63 = vld [vmem:[#allocation17 + $0x78] sm:$0xf0]  ;;  %v4871_v15 = vor.u32 %v5548_v12, %v4868_v13  ;;  %v7050_v24 = vpop.f32.mrf.mxu0  ;;  %v5538_v12 = vld [vmem:[#allocation17 + $0x14] sm:$0xf] }
 0x70c   : > { %3134 = vmatpush.bf16.msra.mxu0 %v4883_v38  ;;  %v4879_v3 = vor.u32 %v5550_v61, %v4876_v63  ;;  %3120 = vmatpush.bf16.msra.mxu3 %v4819_v62  ;;  %v5020_v38 = vld [vmem:[#allocation17 + $0x198] sm:$0xf0]  ;;  %v2734_v61 = vperm.slane %v7055_v32, 3  ;;  %v5540_v63 = vld [vmem:[#allocation17 + $0x24] sm:$0xf] }
 0x70d   : > { %v5023_v39 = vor.u32 %v5586_v36, %v5020_v38  ;;  %v4828_v13 = vld [vmem:[#allocation17 + $0x18] sm:$0xf0] }
 0x70f   : > { %3197 = vmatpush.bf16.msrb.mxu1 %v5007_v0  ;;  %3211 = vmatpush.bf16.msra.mxu2 %v5071_v16  ;;  %v5572_v0 = vld [vmem:[#allocation17 + $0x124] sm:$0xf]  ;;  %v4956_v16 = vld [vmem:[#allocation17 + $0x118] sm:$0xf0] }
 0x710   : > { %3183 = vmatpush.bf16.msrb.mxu0 %v4943_v42  ;;  %v4967_v4 = vor.u32 %v5572_v0, %v4964_v2  ;;  %3169 = vmatpush.bf16.msrb.mxu3 %v4879_v3  ;;  %v4959_v17 = vor.u32 %v5570_v14, %v4956_v16  ;;  %v2194_v42 = vpop.f32.mrf.mxu3  ;;  %v4836_v0 = vld [vmem:[#allocation17 + $0x28] sm:$0xf0]  ;;  %v1285_v14 = vld [vmem:[%s7270_s10] sm:$0xf]  ;;  %s7276_s10 = sld [smem:[#allocation57_spill]] }
 0x711   : > { %v4839_v3 = vor.u32 %v5540_v63, %v4836_v0  ;;  %v2753_v16 = vperm.slane %v1285_v14, 1  ;;  %v2752_v31 = vperm.slane %v1285_v14, 0  ;;  %v5258_v63 = vld [vmem:[#allocation20 + $0xf0] sm:$0xf]  ;;  %v5711_v0 = vld [vmem:[#allocation20 + $0xf4] sm:$0xf0] }
 0x713   : > { %3198 = vmatpush.bf16.msrb.mxu1 %v4999_v7  ;;  %3212 = vmatpush.bf16.msra.mxu2 %v5063_v29  ;;  %v5590_v7 = vld [vmem:[#allocation17 + $0x1b4] sm:$0xf]  ;;  %v7052_v29 = vpop.f32.mrf.mxu1 }
 0x714   : > { %3184 = vmatpush.bf16.msrb.mxu0 %v4935_v56  ;;  %v5039_v11 = vor.u32 %v5590_v7, %v5036_v9  ;;  %3170 = vmatpush.bf16.msrb.mxu3 %v4871_v15  ;;  %v4844_v56 = vld [vmem:[#allocation17 + $0x38] sm:$0xf0]  ;;  %v4887_v9 = vor.u32 %v5552_v5, %v4884_v6  ;;  %v4831_v15 = vor.u32 %v5538_v12, %v4828_v13  ;;  %v5691_v12 = vld [vmem:[#allocation20 + $0x54] sm:$0xf0] }
 0x715   : > { %v4847_v58 = vor.u32 %v5542_v54, %v4844_v56 }
 0x717   : > { %3199 = vmatpush.bf16.msrb.mxu1 %v4991_v23  ;;  %3213 = vmatpush.bf16.msra.mxu2 %v5055_v46  ;;  %v5028_v23 = vld [vmem:[#allocation17 + $0x1a8] sm:$0xf0] }
 0x718   : > { %3185 = vmatpush.bf16.msrb.mxu0 %v4927_v8  ;;  %v5031_v25 = vor.u32 %v5588_v22, %v5028_v23  ;;  %3171 = vmatpush.bf16.msrb.mxu3 %v4863_v30  ;;  %v4900_v46 = vld [vmem:[#allocation17 + $0xa8] sm:$0xf0] }
 0x719   : > { %v4903_v49 = vor.u32 %v5556_v45, %v4900_v46 }
 0x71b   : > { %3200 = vmatpush.bf16.msrb.mxu1 %v4983_v35  ;;  %3214 = vmatpush.bf16.msra.mxu2 %v5047_v59  ;;  %v4908_v35 = vld [vmem:[#allocation17 + $0xb8] sm:$0xf0]  ;;  %v5554_v59 = vld [vmem:[#allocation17 + $0x94] sm:$0xf] }
 0x71c   : > { %3186 = vmatpush.bf16.msrb.mxu0 %v4919_v21  ;;  %v4911_v37 = vor.u32 %v5558_v34, %v4908_v35  ;;  %3172 = vmatpush.bf16.msrb.mxu3 %v4855_v44  ;;  %v4895_v62 = vor.u32 %v5554_v59, %v4892_v60  ;;  %v2754_v21 = vperm.slane %v1285_v14, 2  ;;  %v2755_v34 = vperm.slane %v1285_v14, 3  ;;  %v5693_v59 = vld [vmem:[#allocation20 + $0x64] sm:$0xf0] }
 0x71f   : > { %3201 = vmatpush.bf16.msrb.mxu1 %v4975_v50  ;;  %3215 = vmatpush.bf16.msra.mxu2 %v5039_v11  ;;  %v5012_v50 = vld [vmem:[#allocation17 + $0x188] sm:$0xf0] }
 0x720   : > { %3187 = vmatpush.bf16.msrb.mxu0 %v4911_v37  ;;  %v5015_v53 = vor.u32 %v5584_v47, %v5012_v50  ;;  %3173 = vmatpush.bf16.msrb.mxu3 %v4847_v58 }
 0x723   : > { %3202 = vmatpush.bf16.msrb.mxu1 %v4967_v4  ;;  %3216 = vmatpush.bf16.msra.mxu2 %v5031_v25 }
 0x724   : > { %3188 = vmatpush.bf16.msrb.mxu0 %v4903_v49  ;;  %3174 = vmatpush.bf16.msrb.mxu3 %v4839_v3 }
 0x727   : > { %3203 = vmatpush.bf16.msrb.mxu1 %v4959_v17  ;;  %3217 = vmatpush.bf16.msra.mxu2 %v5023_v39  ;;  %v5536_v17 = vld [vmem:[#allocation17 + $0x4] sm:$0xf] }
 0x728   : > { %3189 = vmatpush.bf16.msrb.mxu0 %v4895_v62  ;;  %3175 = vmatpush.bf16.msrb.mxu3 %v4831_v15  ;;  %v4823_v22 = vor.u32 %v5536_v17, %v4820_v18  ;;  %v5250_v15 = vld [vmem:[#allocation20 + $0xe0] sm:$0xf]  ;;  %v5689_v17 = vld [vmem:[#allocation20 + $0x44] sm:$0xf0] }
 0x72b   : > { %3204 = vmatpush.bf16.msrb.mxu1 %v4951_v33  ;;  %3218 = vmatpush.bf16.msra.mxu2 %v5015_v53 }
 0x72c   : > { %3190 = vmatpush.bf16.msrb.mxu0 %v4887_v9  ;;  %3176 = vmatpush.bf16.msrb.mxu3 %v4823_v22 }
 0x76a   : > { %v7058_v48 = vpop.f32.mrf.mxu0 }
 0x76b   : > { %v2661_v52 = vpop.f32.mrf.mxu1 }
 0x76c   : > { %v7060_v57 = vadd.f32 %v2733_v43, %v2661_v52 }
 0x770   : > { %v7063_v2 = vpop.f32.mrf.mxu3 }
 0x771   : > { %v2674_v4 = vpop.f32.mrf.mxu2 }
 0x772   : > { %v7065_v7 = vadd.f32 %v2734_v61, %v2674_v4  ;;  %v2650_v8 = vpop.f32.mrf.mxu0 }
 0x773   : > { %v2663_v11 = vpop.f32.mrf.mxu1 }
 0x774   : > { %v5178_v11 = vld [vmem:[#allocation20 + $0x50] sm:$0xf] }
 0x778   : > { %v2637_v20 = vpop.f32.mrf.mxu3 }
 0x779   : > { %v2676_v23 = vpop.f32.mrf.mxu2  ;;  %v5242_v20 = vld [vmem:[#allocation20 + $0xd0] sm:$0xf] }
 0x77a   : > { %v2700_v25 = vpop.f32.mrf.mxu0  ;;  %v5162_v23 = vld [vmem:[#allocation20 + $0x30] sm:$0xf] }
 0x77b   : > { %v2761_v26 = vadd.f32 %v2753_v16, %v2700_v25  ;;  %v2713_v27 = vpop.f32.mrf.mxu1  ;;  %v5170_v16 = vld [vmem:[#allocation20 + $0x40] sm:$0xf]  ;;  %v5687_v25 = vld [vmem:[#allocation20 + $0x34] sm:$0xf0] }
 0x77c   : > { %v2762_v28 = vadd.f32 %v2754_v21, %v2713_v27  ;;  %v5707_v21 = vld [vmem:[#allocation20 + $0xd4] sm:$0xf0]  ;;  %v5171_v22 = vor.u32 %v5689_v17, %v5170_v16  ;;  %v5234_v27 = vld [vmem:[#allocation20 + $0xc0] sm:$0xf]  ;;  %v5244_v16 = vld [vmem:[#allocation20 + $0xd8] sm:$0xf0] }
 0x77d   : > { %v2765_v30 = vperm.slane %v2761_v26, 0  ;;  %v5243_v26 = vor.u32 %v5707_v21, %v5242_v20  ;;  %v5606_v17 = vld [vmem:[%s7271_s8 + $0x30] sm:$0xff]  ;;  %v5164_v21 = vld [vmem:[#allocation20 + $0x38] sm:$0xf0] }
 0x77e   : > { %v2766_v33 = vperm.slane %v2762_v28, 0  ;;  %v5705_v28 = vld [vmem:[#allocation20 + $0xc4] sm:$0xf0]  ;;  %v5686_v20 = vld [vmem:[#allocation20 + $0x34] sm:$0xf] }
 0x77f   : > { %v2769_v35 = vadd.f32 %v2765_v30, %v7048_v10  ;;  %v2773_v36 = vadd.f32 %v2765_v30, %v2194_v42  ;;  %v5195_v10 = vor.u32 %v5695_v41, %v5194_v40  ;;  %v5163_v30 = vor.u32 %v5687_v25, %v5162_v23  ;;  %v5683_v40 = vld [vmem:[#allocation20 + $0x14] sm:$0xf0]  ;;  %v5704_v25 = vld [vmem:[#allocation20 + $0xc4] sm:$0xf] }
 0x780   : > { %v2770_v37 = vadd.f32 %v2766_v33, %v7044_v51  ;;  %v2774_v38 = vadd.f32 %v2766_v33, %v7050_v24  ;;  %v2687_v39 = vpop.f32.mrf.mxu3  ;;  %v5186_v51 = vld [vmem:[#allocation20 + $0x60] sm:$0xf]  ;;  %v5685_v33 = vld [vmem:[#allocation20 + $0x24] sm:$0xf0] }
 0x781   : > { %v2777_v43 = vmax.f32 %v2769_v35, 0.0  ;;  %v2781_v44 = vmax.f32 %v2773_v36, 0.0  ;;  %v2760_v45 = vadd.f32 %v2752_v31, %v2687_v39  ;;  %v2726_v46 = vpop.f32.mrf.mxu2  ;;  %v5187_v5 = vor.u32 %v5693_v59, %v5186_v51  ;;  %v5154_v31 = vld [vmem:[#allocation20 + $0x20] sm:$0xf]  ;;  %v5226_v35 = vld [vmem:[#allocation20 + $0xb0] sm:$0xf] }
 0x782   : > { %v2778_v47 = vmax.f32 %v2770_v37, 0.0  ;;  %v2782_v49 = vmax.f32 %v2774_v38, 0.0  ;;  %v2763_v50 = vadd.f32 %v2755_v34, %v2726_v46  ;;  %v2702_v52 = vpop.f32.mrf.mxu0  ;;  %v5235_v34 = vor.u32 %v5705_v28, %v5234_v27  ;;  %v5703_v36 = vld [vmem:[#allocation20 + $0xb4] sm:$0xf0]  ;;  %v5146_v39 = vld [vmem:[#allocation20 + $0x10] sm:$0xf] }
 0x783   : > { %v2785_v53 = vpack.c.bf16 %v2781_v44, %v2777_v43  ;;  %v2764_v54 = vperm.slane %v2760_v45, 0  ;;  %v2715_v56 = vpop.f32.mrf.mxu1  ;;  %v5155_v37 = vor.u32 %v5685_v33, %v5154_v31  ;;  %v2731_v38 = vperm.slane %v7055_v32, 0  ;;  %v5218_v43 = vld [vmem:[#allocation20 + $0xa0] sm:$0xf]  ;;  %v5701_v44 = vld [vmem:[#allocation20 + $0xa4] sm:$0xf0] }
 0x784   : > { %v2786_v42 = vpack.c.bf16 %v2782_v49, %v2778_v47  ;;  %v2767_v58 = vperm.slane %v2763_v50, 0  ;;  %v5227_v41 = vor.u32 %v5703_v36, %v5226_v35  ;;  %v5147_v45 = vor.u32 %v5683_v40, %v5146_v39  ;;  %v5138_v47 = vld [vmem:[#allocation20] sm:$0xf]  ;;  %v5681_v49 = vld [vmem:[#allocation20 + $0x4] sm:$0xf0] }
 0x785   : > { %v2768_v24 = vadd.f32 %v2764_v54, %v7040_v1  ;;  %v2772_v60 = vadd.f32 %v2764_v54, %v7042_v19  ;;  %3135 = vmatmul.bf16.vlgmr.msra.gmra.mxu0 %v2785_v53  ;;  %v5259_v19 = vor.u32 %v5711_v0, %v5258_v63  ;;  %v2739_v46 = vadd.f32 %v2731_v38, %v7063_v2  ;;  %v5694_v52 = vld [vmem:[#allocation20 + $0x74] sm:$0xf]  ;;  %v5210_v56 = vld [vmem:[#allocation20 + $0x90] sm:$0xf]  ;;  %v5260_v0 = vld [vmem:[#allocation20 + $0xf8] sm:$0xf0] }
 0x786   : > { %v2771_v61 = vadd.f32 %v2767_v58, %v7046_v55  ;;  %v2775_v62 = vadd.f32 %v2767_v58, %v7052_v29  ;;  %3149 = vmatmul.bf16.vlgmr.msra.gmra.mxu1 %v2786_v42  ;;  %v5709_v55 = vld [vmem:[#allocation20 + $0xe4] sm:$0xf0]  ;;  %v5179_v29 = vor.u32 %v5691_v12, %v5178_v11  ;;  %v5219_v50 = vor.u32 %v5701_v44, %v5218_v43  ;;  %v5710_v63 = vld [vmem:[#allocation20 + $0xf4] sm:$0xf]  ;;  %v5252_v11 = vld [vmem:[#allocation20 + $0xe8] sm:$0xf0] }
 0x787   : > { %v2776_v3 = vmax.f32 %v2768_v24, 0.0  ;;  %v2780_v4 = vmax.f32 %v2772_v60, 0.0  ;;  %3717 = vmatpush.bf16.msra.mxu1 %v5195_v10  ;;  %v5251_v18 = vor.u32 %v5709_v55, %v5250_v15  ;;  %v2732_v54 = vperm.slane %v7055_v32, 1  ;;  %v5699_v10 = vld [vmem:[#allocation20 + $0x94] sm:$0xf0]  ;;  %v5605_v27 = vld [vmem:[%s7271_s8 + $0x28] sm:$0xff] }
 0x788   : > { %v2779_v6 = vmax.f32 %v2771_v61, 0.0  ;;  %v2783_v8 = vmax.f32 %v2775_v62, 0.0  ;;  %v2689_v9 = vpop.f32.mrf.mxu3  ;;  %v2743_v58 = vmax.f32 %v2739_v46, 0.0  ;;  %v5211_v59 = vor.u32 %v5699_v10, %v5210_v56  ;;  %v5692_v24 = vld [vmem:[#allocation20 + $0x64] sm:$0xf]  ;;  %v5615_v55 = vld [vmem:[%s7271_s8 + $0x78] sm:$0xff] }
 0x789   : > { %v2784_v1 = vpack.c.bf16 %v2780_v4, %v2776_v3  ;;  %v2728_v13 = vpop.f32.mrf.mxu2  ;;  %v5188_v60 = vld [vmem:[#allocation20 + $0x68] sm:$0xf0]  ;;  %v2740_v2 = vadd.f32 %v2732_v54, %v7058_v48  ;;  %v5202_v61 = vld [vmem:[#allocation20 + $0x80] sm:$0xf]  ;;  %v5697_v62 = vld [vmem:[#allocation20 + $0x84] sm:$0xf0]  ;;  %v5263_v9 = vor.u32 %v5710_v63, %v5260_v0  ;;  %3344 = vmatpush.bf16.msra.mxu0 %v5615_v55  ;;  %v5167_v28 = vor.u32 %v5686_v20, %v5164_v21 }
 0x78a   : > { %v2787_v14 = vpack.c.bf16 %v2783_v8, %v2779_v6  ;;  %v7079_v3 = vpack.c.bf16 %v2743_v58, %v2743_v58  ;;  %v5191_v32 = vor.u32 %v5692_v24, %v5188_v60  ;;  %v5203_v4 = vor.u32 %v5697_v62, %v5202_v61  ;;  %v5180_v6 = vld [vmem:[#allocation20 + $0x58] sm:$0xf0]  ;;  %v5708_v48 = vld [vmem:[#allocation20 + $0xe4] sm:$0xf]  ;;  %v5172_v13 = vld [vmem:[#allocation20 + $0x48] sm:$0xf0] }
 0x78b   : > { %3718 = vmatpush.bf16.msra.mxu1 %v5187_v5  ;;  %3121 = vmatmul.bf16.vlgmr.msra.gmra.mxu3 %v2784_v1  ;;  %v5690_v5 = vld [vmem:[#allocation20 + $0x54] sm:$0xf]  ;;  %v2744_v8 = vmax.f32 %v2740_v2, 0.0  ;;  %v5255_v15 = vor.u32 %v5708_v48, %v5252_v11  ;;  %v5156_v31 = vld [vmem:[#allocation20 + $0x28] sm:$0xf0]  ;;  %v5604_v36 = vld [vmem:[%s7271_s8 + $0x20] sm:$0xff] }
 0x78c   : > { %3163 = vmatmul.bf16.vlgmr.msrb.gmra.mxu2 %v2787_v14  ;;  %v5183_v12 = vor.u32 %v5690_v5, %v5180_v6  ;;  %v5228_v35 = vld [vmem:[#allocation20 + $0xb8] sm:$0xf0]  ;;  %v5682_v38 = vld [vmem:[#allocation20 + $0x14] sm:$0xf]  ;;  %v5220_v43 = vld [vmem:[#allocation20 + $0xa8] sm:$0xf0] }
 0x78d   : > { %3730 = vmatpush.bf16.msrb.mxu2 %v5259_v19  ;;  %v5607_v19 = vld [vmem:[%s7271_s8 + $0x38] sm:$0xff]  ;;  %v5680_v46 = vld [vmem:[#allocation20 + $0x4] sm:$0xf]  ;;  %v5322_v24 = vld [vmem:[#allocation20 + $0x170] sm:$0xf] }
 0x78e   : > { %3330 = vmatpush.bf16.msra.mxu3 %v5607_v19  ;;  %v5148_v39 = vld [vmem:[#allocation20 + $0x18] sm:$0xf0]  ;;  %v5696_v10 = vld [vmem:[#allocation20 + $0x84] sm:$0xf]  ;;  %v5727_v61 = vld [vmem:[#allocation20 + $0x174] sm:$0xf0] }
 0x78f   : > { %3719 = vmatpush.bf16.msra.mxu1 %v5179_v29  ;;  %v5706_v29 = vld [vmem:[#allocation20 + $0xd4] sm:$0xf]  ;;  %v5603_v44 = vld [vmem:[%s7271_s8 + $0x18] sm:$0xff]  ;;  %v5600_v60 = vld [vmem:[%s7271_s8] sm:$0xff]  ;;  %v5323_v62 = vor.u32 %v5727_v61, %v5322_v24 }
 0x790   : > { %v5247_v23 = vor.u32 %v5706_v29, %v5244_v16  ;;  %v5612_v2 = vld [vmem:[%s7271_s8 + $0x60] sm:$0xff]  ;;  %v5611_v63 = vld [vmem:[%s7271_s8 + $0x58] sm:$0xff]  ;;  %v5306_v5 = vld [vmem:[#allocation20 + $0x150] sm:$0xf] }
 0x791   : > { %3731 = vmatpush.bf16.msrb.mxu2 %v5251_v18  ;;  %v5314_v0 = vld [vmem:[#allocation20 + $0x160] sm:$0xf]  ;;  %v5723_v6 = vld [vmem:[#allocation20 + $0x154] sm:$0xf0]  ;;  %v5721_v11 = vld [vmem:[#allocation20 + $0x144] sm:$0xf0] }
 0x792   : > { %3331 = vmatpush.bf16.msra.mxu3 %v5606_v17  ;;  %v5298_v48 = vld [vmem:[#allocation20 + $0x140] sm:$0xf]  ;;  %v5719_v19 = vld [vmem:[#allocation20 + $0x134] sm:$0xf0]  ;;  %v5717_v17 = vld [vmem:[#allocation20 + $0x124] sm:$0xf0] }
 0x793   : > { %3720 = vmatpush.bf16.msra.mxu1 %v5171_v22  ;;  %v5614_v22 = vld [vmem:[%s7271_s8 + $0x70] sm:$0xff]  ;;  %v5743_v55 = vld [vmem:[#allocation20 + $0x1f4] sm:$0xf0]  ;;  %v5282_v16 = vld [vmem:[#allocation20 + $0x120] sm:$0xf] }
 0x794   : > { %3345 = vmatpush.bf16.msra.mxu0 %v5614_v22  ;;  %v5283_v20 = vor.u32 %v5717_v17, %v5282_v16  ;;  %v5741_v21 = vld [vmem:[#allocation20 + $0x1e4] sm:$0xf0]  ;;  %v5316_v16 = vld [vmem:[#allocation20 + $0x168] sm:$0xf0] }
 0x795   : > { %3732 = vmatpush.bf16.msrb.mxu2 %v5243_v26  ;;  %3191 = vmatmul.bf16.vlgmr.msrb.gmra.mxu0 %v2785_v53  ;;  %v5196_v53 = vld [vmem:[#allocation20 + $0x78] sm:$0xf0]  ;;  %v5236_v26 = vld [vmem:[#allocation20 + $0xc8] sm:$0xf0] }
 0x796   : > { %3205 = vmatmul.bf16.vlgmr.msrb.gmra.mxu1 %v2786_v42  ;;  %v5139_v42 = vor.u32 %v5681_v49, %v5138_v47  ;;  %v5199_v51 = vor.u32 %v5694_v52, %v5196_v53  ;;  %v5239_v33 = vor.u32 %v5704_v25, %v5236_v26  ;;  %3332 = vmatpush.bf16.msra.mxu3 %v5605_v27  ;;  %v5140_v47 = vld [vmem:[#allocation20 + $0x8] sm:$0xf0]  ;;  %v5212_v52 = vld [vmem:[#allocation20 + $0x98] sm:$0xf0]  ;;  %v5602_v53 = vld [vmem:[%s7271_s8 + $0x10] sm:$0xff] }
 0x797   : > { %3721 = vmatpush.bf16.msra.mxu1 %v5163_v30  ;;  %v5684_v30 = vld [vmem:[#allocation20 + $0x24] sm:$0xf]  ;;  %v5143_v54 = vor.u32 %v5680_v46, %v5140_v47  ;;  %v5715_v25 = vld [vmem:[#allocation20 + $0x114] sm:$0xf0]  ;;  %v5370_v26 = vld [vmem:[#allocation20 + $0x1d0] sm:$0xf] }
 0x798   : > { %v5733_v46 = vld [vmem:[#allocation20 + $0x1a4] sm:$0xf0] }
 0x799   : > { %3733 = vmatpush.bf16.msrb.mxu2 %v5235_v34  ;;  %v5702_v34 = vld [vmem:[#allocation20 + $0xb4] sm:$0xf] }
 0x79a   : > { %v5231_v40 = vor.u32 %v5702_v34, %v5228_v35  ;;  %3333 = vmatpush.bf16.msra.mxu3 %v5604_v36  ;;  %v5362_v36 = vld [vmem:[#allocation20 + $0x1c0] sm:$0xf] }
 0x79b   : > { %3722 = vmatpush.bf16.msra.mxu1 %v5155_v37  ;;  %3177 = vmatmul.bf16.vlgmr.msrb.gmra.mxu3 %v2784_v1  ;;  %v5688_v1 = vld [vmem:[#allocation20 + $0x44] sm:$0xf]  ;;  %v5159_v37 = vor.u32 %v5684_v30, %v5156_v31  ;;  %v5266_v31 = vld [vmem:[#allocation20 + $0x100] sm:$0xf] }
 0x79c   : > { %3219 = vmatmul.bf16.vlgmr.msra.gmra.mxu2 %v2787_v14  ;;  %v7083_v14 = vpack.c.bf16 %v2744_v8, %v2744_v8  ;;  %v5175_v18 = vor.u32 %v5688_v1, %v5172_v13  ;;  %v5307_v8 = vor.u32 %v5723_v6, %v5306_v5  ;;  %v5608_v1 = vld [vmem:[%s7271_s8 + $0x40] sm:$0xff]  ;;  %v5290_v13 = vld [vmem:[#allocation20 + $0x130] sm:$0xf] }
 0x79d   : > { %3734 = vmatpush.bf16.msrb.mxu2 %v5227_v41  ;;  %v5700_v41 = vld [vmem:[#allocation20 + $0xa4] sm:$0xf] }
 0x79e   : > { %v5223_v49 = vor.u32 %v5700_v41, %v5220_v43  ;;  %3334 = vmatpush.bf16.msra.mxu3 %v5603_v44  ;;  %v1350_v43 = vld [vmem:[%s7272_s2] sm:$0x3]  ;;  %s7277_s2 = sld [smem:[#allocation58_spill]] }
 0x79f   : > { %3723 = vmatpush.bf16.msra.mxu1 %v5147_v45  ;;  %v5151_v45 = vor.u32 %v5682_v38, %v5148_v39  ;;  %v5354_v39 = vld [vmem:[#allocation20 + $0x1b0] sm:$0xf]  ;;  %v2790_v6 = vperm.slane %v1350_v43, 1 }
 0x7a1   : > { %3735 = vmatpush.bf16.msrb.mxu2 %v5219_v50  ;;  %v5698_v50 = vld [vmem:[#allocation20 + $0x94] sm:$0xf] }
 0x7a2   : > { %v5215_v56 = vor.u32 %v5698_v50, %v5212_v52  ;;  %3335 = vmatpush.bf16.msra.mxu3 %v5602_v53  ;;  %v5338_v53 = vld [vmem:[#allocation20 + $0x190] sm:$0xf] }
 0x7a3   : > { %3724 = vmatpush.bf16.msra.mxu1 %v5139_v42  ;;  %v5204_v42 = vld [vmem:[#allocation20 + $0x88] sm:$0xf0] }
 0x7a4   : > { %v5207_v58 = vor.u32 %v5696_v10, %v5204_v42 }
 0x7a5   : > { %3736 = vmatpush.bf16.msrb.mxu2 %v5211_v59  ;;  %v5613_v59 = vld [vmem:[%s7271_s8 + $0x68] sm:$0xff] }
 0x7a6   : > { %3725 = vmatmul.bf16.vlgmr.msra.gmra.mxu1 %v7079_v3  ;;  %3346 = vmatpush.bf16.msra.mxu0 %v5613_v59 }
 0x7a7   : > { %3769 = vmatpush.bf16.msrb.mxu1 %v5199_v51  ;;  %v5601_v51 = vld [vmem:[%s7271_s8 + $0x8] sm:$0xff] }
 0x7a8   : > { %3336 = vmatpush.bf16.msra.mxu3 %v5601_v51  ;;  %v5729_v51 = vld [vmem:[#allocation20 + $0x184] sm:$0xf0] }
 0x7a9   : > { %3737 = vmatpush.bf16.msrb.mxu2 %v5203_v4  ;;  %v5610_v4 = vld [vmem:[%s7271_s8 + $0x50] sm:$0xff] }
 0x7aa   : > { %3347 = vmatpush.bf16.msra.mxu0 %v5612_v2 }
 0x7ab   : > { %3770 = vmatpush.bf16.msrb.mxu1 %v5191_v32 }
 0x7ac   : > { %3738 = vmatmul.bf16.vlgmr.msrb.gmra.mxu2 %v7083_v14  ;;  %3337 = vmatpush.bf16.msra.mxu3 %v5600_v60 }
 0x7ad   : > { %3782 = vmatpush.bf16.msra.mxu2 %v5263_v9  ;;  %v5609_v9 = vld [vmem:[%s7271_s8 + $0x48] sm:$0xff]  ;;  %s3977_s8 = scalar_lea.hbm %s7277_s2, %s6689_s1 }
 0x7ae   : > { %3348 = vmatpush.bf16.msra.mxu0 %v5611_v63  ;;  %s7141_s13 = sshll.u32 %s3977_s8, 4  ;;  %s3982_s13 = int_to_ptr.hbm [resolvable:$true] %s7141_s13 }
 0x7af   : > { %3771 = vmatpush.bf16.msrb.mxu1 %v5183_v12  ;;  %v5299_v12 = vor.u32 %v5721_v11, %v5298_v48  ;;  %v5324_v48 = vld [vmem:[#allocation20 + $0x178] sm:$0xf0] }
 0x7b0   : > { %3743 = vmatpush.bf16.msrb.mxu3 %v5323_v62 }
 0x7b1   : > { %3783 = vmatpush.bf16.msra.mxu2 %v5255_v15  ;;  %v5386_v15 = vld [vmem:[#allocation20 + $0x1f0] sm:$0xf] }
 0x7b2   : > { %3349 = vmatpush.bf16.msra.mxu0 %v5610_v4  ;;  %v5387_v29 = vor.u32 %v5743_v55, %v5386_v15 }
 0x7b3   : > { %3772 = vmatpush.bf16.msrb.mxu1 %v5175_v18  ;;  %v5378_v18 = vld [vmem:[#allocation20 + $0x1e0] sm:$0xf] }
 0x7b4   : > { %v5379_v22 = vor.u32 %v5741_v21, %v5378_v18  ;;  %v5722_v21 = vld [vmem:[#allocation20 + $0x154] sm:$0xf] }
 0x7b5   : > { %3784 = vmatpush.bf16.msra.mxu2 %v5247_v23  ;;  %v5274_v23 = vld [vmem:[#allocation20 + $0x110] sm:$0xf] }
 0x7b6   : > { %3350 = vmatpush.bf16.msra.mxu0 %v5609_v9  ;;  %v5275_v27 = vor.u32 %v5715_v25, %v5274_v23  ;;  %v5726_v9 = vld [vmem:[#allocation20 + $0x174] sm:$0xf] }
 0x7b7   : > { %3773 = vmatpush.bf16.msrb.mxu1 %v5167_v28  ;;  %v5739_v28 = vld [vmem:[#allocation20 + $0x1d4] sm:$0xf0]  ;;  %v5327_v15 = vor.u32 %v5726_v9, %v5324_v48  ;;  %v5364_v9 = vld [vmem:[#allocation20 + $0x1c8] sm:$0xf0] }
 0x7b8   : > { %v5371_v30 = vor.u32 %v5739_v28, %v5370_v26  ;;  %v7105_v26 = vld [vmem:[%s7273_s7] sm:$0x3]  ;;  %s7278_s7 = sld [smem:[#allocation56_spill]] }
 0x7b9   : > { %3785 = vmatpush.bf16.msra.mxu2 %v5239_v33  ;;  %v5713_v33 = vld [vmem:[#allocation20 + $0x104] sm:$0xf0] }
 0x7ba   : > { %3351 = vmatpush.bf16.msra.mxu0 %v5608_v1  ;;  %v5267_v35 = vor.u32 %v5713_v33, %v5266_v31 }
 0x7bb   : > { %3774 = vmatpush.bf16.msrb.mxu1 %v5159_v37  ;;  %v5737_v37 = vld [vmem:[#allocation20 + $0x1c4] sm:$0xf0] }
 0x7bc   : > { %v5363_v38 = vor.u32 %v5737_v37, %v5362_v36  ;;  %v3713_v36 = vperm.slane %v7105_v26, 0 }
 0x7bd   : > { %3786 = vmatpush.bf16.msra.mxu2 %v5231_v40  ;;  %v5735_v40 = vld [vmem:[#allocation20 + $0x1b4] sm:$0xf0] }
 0x7be   : > { %3756 = vmatpush.bf16.msrb.mxu0 %v5387_v29  ;;  %v5355_v41 = vor.u32 %v5735_v40, %v5354_v39  ;;  %v5724_v29 = vld [vmem:[#allocation20 + $0x164] sm:$0xf]  ;;  %v2745_v40 = vmax.f32 %v7060_v57, 0.0  ;;  %v5284_v57 = vld [vmem:[#allocation20 + $0x128] sm:$0xf0] }
 0x7bf   : > { %3775 = vmatpush.bf16.msrb.mxu1 %v5151_v45  ;;  %v5346_v45 = vld [vmem:[#allocation20 + $0x1a0] sm:$0xf] }
 0x7c0   : > { %v5347_v50 = vor.u32 %v5733_v46, %v5346_v45  ;;  %v5292_v45 = vld [vmem:[#allocation20 + $0x138] sm:$0xf0]  ;;  %v5742_v46 = vld [vmem:[#allocation20 + $0x1f4] sm:$0xf] }
 0x7c1   : > { %3787 = vmatpush.bf16.msra.mxu2 %v5223_v49  ;;  %v2789_v49 = vperm.slane %v1350_v43, 0  ;;  %v5718_v43 = vld [vmem:[#allocation20 + $0x134] sm:$0xf] }
 0x7c2   : > { %3757 = vmatpush.bf16.msrb.mxu0 %v5379_v22  ;;  %v5308_v22 = vld [vmem:[#allocation20 + $0x158] sm:$0xf0] }
 0x7c3   : > { %3776 = vmatpush.bf16.msrb.mxu1 %v5143_v54  ;;  %v5731_v54 = vld [vmem:[#allocation20 + $0x194] sm:$0xf0]  ;;  %v5311_v31 = vor.u32 %v5722_v21, %v5308_v22  ;;  %v5728_v22 = vld [vmem:[#allocation20 + $0x184] sm:$0xf] }
 0x7c4   : > { %v5339_v42 = vor.u32 %v5731_v54, %v5338_v53 }
 0x7c5   : > { %3788 = vmatpush.bf16.msra.mxu2 %v5215_v56 }
 0x7c6   : > { %3777 = vmatmul.bf16.vlgmr.msrb.gmra.mxu1 %v7079_v3  ;;  %v5725_v3 = vld [vmem:[#allocation20 + $0x164] sm:$0xf0]  ;;  %3758 = vmatpush.bf16.msrb.mxu0 %v5371_v30 }
 0x7c7   : > { %v5315_v32 = vor.u32 %v5725_v3, %v5314_v0 }
 0x7c9   : > { %3789 = vmatpush.bf16.msra.mxu2 %v5207_v58  ;;  %3744 = vmatpush.bf16.msrb.mxu3 %v5315_v32  ;;  %v5330_v58 = vld [vmem:[#allocation20 + $0x180] sm:$0xf] }
 0x7ca   : > { %3759 = vmatpush.bf16.msrb.mxu0 %v5363_v38  ;;  %v5331_v60 = vor.u32 %v5729_v51, %v5330_v58  ;;  %v2749_v58 = vpack.c.bf16 %v2745_v40, %v2745_v40  ;;  %v5745_v40 = vld [vmem:[%s7274_s3 + $0x8] sm:$0xff] }
 0x7cc   : > { %3790 = vmatmul.bf16.vlgmr.msra.gmra.mxu2 %v7083_v14  ;;  %v5291_v14 = vor.u32 %v5719_v19, %v5290_v13 }
 0x7cd   : > { %3745 = vmatpush.bf16.msrb.mxu3 %v5307_v8 }
 0x7ce   : > { %3760 = vmatpush.bf16.msrb.mxu0 %v5355_v41 }
 0x7d1   : > { %3746 = vmatpush.bf16.msrb.mxu3 %v5299_v12 }
 0x7d2   : > { %3761 = vmatpush.bf16.msrb.mxu0 %v5347_v50 }
 0x7d5   : > { %3747 = vmatpush.bf16.msrb.mxu3 %v5291_v14 }
 0x7d6   : > { %3762 = vmatpush.bf16.msrb.mxu0 %v5339_v42  ;;  %v5716_v42 = vld [vmem:[#allocation20 + $0x124] sm:$0xf] }
 0x7d9   : > { %3748 = vmatpush.bf16.msrb.mxu3 %v5283_v20  ;;  %v5319_v20 = vor.u32 %v5724_v29, %v5316_v16  ;;  %v5348_v29 = vld [vmem:[#allocation20 + $0x1a8] sm:$0xf0] }
 0x7da   : > { %3763 = vmatpush.bf16.msrb.mxu0 %v5331_v60  ;;  %v5287_v60 = vor.u32 %v5716_v42, %v5284_v57  ;;  %v5752_v42 = vld [vmem:[%s7274_s3 + $0x40] sm:$0xff] }
 0x7dd   : > { %3749 = vmatpush.bf16.msrb.mxu3 %v5275_v27 }
 0x7e1   : > { %3750 = vmatpush.bf16.msrb.mxu3 %v5267_v35  ;;  %v5300_v35 = vld [vmem:[#allocation20 + $0x148] sm:$0xf0] }
 0x802   : > { %v3136_v44 = vpop.f32.mrf.mxu0 }
 0x803   : > { %v3150_v34 = vpop.f32.mrf.mxu1 }
 0x80a   : > { %v3138_v2 = vpop.f32.mrf.mxu0 }
 0x80b   : > { %v3152_v47 = vpop.f32.mrf.mxu1 }
 0x80e   : > { %v3122_v52 = vpop.f32.mrf.mxu3 }
 0x80f   : > { %v3123_v56 = vadd.f32 %v3122_v52, %v2789_v49  ;;  %v3164_v10 = vpop.f32.mrf.mxu2 }
 0x811   : > { %v3137_v59 = vadd.f32 %v3136_v44, %v3123_v56  ;;  %v5295_v56 = vor.u32 %v5718_v43, %v5292_v45  ;;  %v5744_v43 = vld [vmem:[%s7274_s3] sm:$0xff] }
 0x812   : > { %v3192_v11 = vpop.f32.mrf.mxu0 }
 0x813   : > { %v3206_v24 = vpop.f32.mrf.mxu1  ;;  %v3151_v62 = vadd.f32 %v3150_v34, %v3137_v59  ;;  %v5720_v34 = vld [vmem:[#allocation20 + $0x144] sm:$0xf] }
 0x814   : > { %v5303_v41 = vor.u32 %v5720_v34, %v5300_v35  ;;  %v5740_v59 = vld [vmem:[#allocation20 + $0x1e4] sm:$0xf]  ;;  %v5749_v34 = vld [vmem:[%s7274_s3 + $0x28] sm:$0xff] }
 0x815   : > { %v3165_v32 = vadd.f32 %v3164_v10, %v3151_v62  ;;  %v5276_v62 = vld [vmem:[#allocation20 + $0x118] sm:$0xf0]  ;;  %v5748_v35 = vld [vmem:[%s7274_s3 + $0x20] sm:$0xff] }
 0x816   : > { %v3124_v61 = vpop.f32.mrf.mxu3 }
 0x817   : > { %v3125_v63 = vadd.f32 %v3124_v61, %v2789_v49  ;;  %v3166_v0 = vpop.f32.mrf.mxu2  ;;  %v3225_v1 = vmax.f32 %v3165_v32, 0.0  ;;  %v5714_v61 = vld [vmem:[#allocation20 + $0x114] sm:$0xf] }
 0x818   : > { %v5279_v32 = vor.u32 %v5714_v61, %v5276_v62 }
 0x819   : > { %v3139_v3 = vadd.f32 %v3138_v2, %v3125_v63  ;;  %v5738_v63 = vld [vmem:[#allocation20 + $0x1d4] sm:$0xf] }
 0x81a   : > { %v3194_v30 = vpop.f32.mrf.mxu0 }
 0x81b   : > { %v3153_v4 = vadd.f32 %v3152_v47, %v3139_v3  ;;  %v3208_v5 = vpop.f32.mrf.mxu1  ;;  %v5388_v47 = vld [vmem:[#allocation20 + $0x1f8] sm:$0xf0] }
 0x81c   : > { %v5391_v10 = vor.u32 %v5742_v46, %v5388_v47  ;;  %v5755_v46 = vld [vmem:[%s7274_s3 + $0x58] sm:$0xff]  ;;  %v5754_v47 = vld [vmem:[%s7274_s3 + $0x50] sm:$0xff] }
 0x81d   : > { %v3167_v8 = vadd.f32 %v3166_v0, %v3153_v4  ;;  %v5372_v0 = vld [vmem:[#allocation20 + $0x1d8] sm:$0xf0] }
 0x81e   : > { %v3178_v12 = vpop.f32.mrf.mxu3  ;;  %v5375_v4 = vor.u32 %v5738_v63, %v5372_v0 }
 0x81f   : > { %v3227_v13 = vmax.f32 %v3167_v8, 0.0  ;;  %v3179_v19 = vadd.f32 %v3178_v12, %v2790_v6  ;;  %v3220_v14 = vpop.f32.mrf.mxu2  ;;  %v5736_v8 = vld [vmem:[#allocation20 + $0x1c4] sm:$0xf]  ;;  %v2746_v12 = vmax.f32 %v7065_v7, 0.0 }
 0x821   : > { %v3229_v55 = vpack.c.bf16 %v3227_v13, %v3225_v1  ;;  %v3193_v17 = vadd.f32 %v3192_v11, %v3179_v19  ;;  %v5367_v11 = vor.u32 %v5736_v8, %v5364_v9  ;;  %v5734_v1 = vld [vmem:[#allocation20 + $0x1b4] sm:$0xf]  ;;  %v5356_v13 = vld [vmem:[#allocation20 + $0x1b8] sm:$0xf0] }
 0x823   : > { %v3726_v18 = vpop.f32.mrf.mxu1  ;;  %3338 = vmatmul.bf16.vlgmr.msra.gmra.mxu3 %v3229_v55  ;;  %v3207_v25 = vadd.f32 %v3206_v24, %v3193_v17  ;;  %v5380_v24 = vld [vmem:[#allocation20 + $0x1e8] sm:$0xf0]  ;;  %v5732_v55 = vld [vmem:[#allocation20 + $0x1a4] sm:$0xf]  ;;  %v5730_v17 = vld [vmem:[#allocation20 + $0x194] sm:$0xf] }
 0x824   : > { %3795 = vmatpush.bf16.msra.mxu3 %v5327_v15  ;;  %v3727_v49 = vadd.f32 %v3726_v18, %v3713_v36  ;;  %v5383_v2 = vor.u32 %v5740_v59, %v5380_v24  ;;  %v2750_v15 = vpack.c.bf16 %v2746_v12, %v2746_v12  ;;  %v5351_v16 = vor.u32 %v5732_v55, %v5348_v29  ;;  %v5340_v18 = vld [vmem:[#allocation20 + $0x198] sm:$0xf0]  ;;  %v1546_v12 = vld [vmem:[%s7278_s7] sm:$0x1] }
 0x825   : > { %v3221_v37 = vadd.f32 %v3220_v14, %v3207_v25  ;;  %v5359_v14 = vor.u32 %v5734_v1, %v5356_v13  ;;  %v5343_v21 = vor.u32 %v5730_v17, %v5340_v18  ;;  %v5747_v36 = vld [vmem:[%s7274_s3 + $0x18] sm:$0xff] }
 0x826   : > { %v3180_v23 = vpop.f32.mrf.mxu3 }
 0x827   : > { %v3181_v27 = vadd.f32 %v3180_v23, %v2790_v6  ;;  %v3222_v28 = vpop.f32.mrf.mxu2  ;;  %v3226_v50 = vmax.f32 %v3221_v37, 0.0  ;;  %v5268_v6 = vld [vmem:[#allocation20 + $0x108] sm:$0xf0]  ;;  %v5759_v37 = vld [vmem:[%s7274_s3 + $0x78] sm:$0xff] }
 0x828   : > { %3796 = vmatpush.bf16.msra.mxu3 %v5319_v20  ;;  %v3714_v20 = vperm.slane %v7105_v26, 1  ;;  %v5332_v23 = vld [vmem:[#allocation20 + $0x188] sm:$0xf0]  ;;  %3934 = vmatpush.bf16.msrb.mxu2 %v5759_v37 }
 0x829   : > { %v3195_v33 = vadd.f32 %v3194_v30, %v3181_v27 }
 0x82b   : > { %v3209_v38 = vadd.f32 %v3208_v5, %v3195_v33  ;;  %v3728_v39 = vpop.f32.mrf.mxu1  ;;  %v5712_v5 = vld [vmem:[#allocation20 + $0x104] sm:$0xf]  ;;  %v5750_v33 = vld [vmem:[%s7274_s3 + $0x30] sm:$0xff] }
 0x82c   : > { %3797 = vmatpush.bf16.msra.mxu3 %v5311_v31  ;;  %v5271_v48 = vor.u32 %v5712_v5, %v5268_v6  ;;  %v5751_v31 = vld [vmem:[%s7274_s3 + $0x38] sm:$0xff]  ;;  %v5758_v39 = vld [vmem:[%s7274_s3 + $0x70] sm:$0xff] }
 0x82d   : > { %v3223_v44 = vadd.f32 %v3222_v28, %v3209_v38  ;;  %v5335_v28 = vor.u32 %v5728_v22, %v5332_v23  ;;  %3921 = vmatpush.bf16.msra.mxu1 %v5751_v31  ;;  %v5746_v38 = vld [vmem:[%s7274_s3 + $0x10] sm:$0xff]  ;;  %3935 = vmatpush.bf16.msrb.mxu2 %v5758_v39 }
 0x82f   : > { %v3228_v52 = vmax.f32 %v3223_v44, 0.0  ;;  %v3739_v53 = vpop.f32.mrf.mxu2  ;;  %v5756_v44 = vld [vmem:[%s7274_s3 + $0x60] sm:$0xff] }
 0x830   : > { %v7109_v54 = vadd.f32 %v3739_v53, %v3727_v49  ;;  %3798 = vmatpush.bf16.msra.mxu3 %v5303_v41  ;;  %v5757_v41 = vld [vmem:[%s7274_s3 + $0x68] sm:$0xff]  ;;  %v5967_v49 = vld [vmem:[%s7275_s24] ss:$0 sm:$0xff]  ;;  %s5457_s24 = sshll.u32 %s6689_s1, 3  ;;  %s6348_s1 = scalar_lea.hbm %s7276_s10, 16 }
 0x831   : > { %v3230_v51 = vpack.c.bf16 %v3228_v52, %v3226_v50  ;;  %3922 = vmatpush.bf16.msra.mxu1 %v5750_v33  ;;  %3936 = vmatpush.bf16.msrb.mxu2 %v5757_v41  ;;  %s3964_s28 = scalar_lea.hbm %s7276_s10, %s5457_s24  ;;  %s3950_s24 = scalar_lea.sflag [#allocation4], %s6877_s16 }
 0x832   : > { %s3968_s6 = sshll.u32 %s3964_s28, 4  ;;  %s3969_s6 = int_to_ptr.hbm [resolvable:$true] %s3968_s6 }
 0x833   : > { %3352 = vmatmul.bf16.vlgmr.msra.gmra.mxu0 %v3230_v51  ;;  %3751 = vmatmul.bf16.vlgmr.msrb.gmra.mxu3 %v2749_v58 }
 0x834   : > { %3799 = vmatpush.bf16.msra.mxu3 %v5295_v56  ;;  %3808 = vmatpush.bf16.msra.mxu0 %v5391_v10  ;;  %v5753_v56 = vld [vmem:[%s7274_s3 + $0x48] sm:$0xff]  ;;  %s7279_s3 = sshll.u32 %s6877_s16, 3 }
 0x835   : > { %3923 = vmatpush.bf16.msra.mxu1 %v5749_v34  ;;  %3937 = vmatpush.bf16.msrb.mxu2 %v5756_v44  ;;  %s1147_s4 = scalar_lea.vmem [#allocation22], %s7279_s3  ;;  %s6342_s3 = sshra.s32 %s3969_s6, 4  ;;  %s6343_s3 = int_to_ptr.hbm [resolvable:$true] %s6342_s3 }
 0x836   : > { %s3966_s5 = sshll.u32 %s1147_s4, 4  ;;  %s6344_s28 = scalar_lea.hbm %s6343_s3, 8  ;;  %s3967_s5 = int_to_ptr.vmem [resolvable:$true] %s3966_s5 }
 0x837   : > { %v3741_v3 = vpop.f32.mrf.mxu2  ;;  %p6345_p9 = scmp.ne.s32.totalorder %s6343_s3, %s6344_s28  ;;  %p6349_p4 = scmp.lt.s32.totalorder %s6343_s3, %s7276_s10 }
 0x838   : > { %3800 = vmatpush.bf16.msra.mxu3 %v5287_v60  ;;  %3809 = vmatpush.bf16.msra.mxu0 %v5383_v2  ;;  %p6350_p11 = scmp.lt.s32.totalorder %s6348_s1, %s6344_s28 }
 0x839   : > { %3924 = vmatpush.bf16.msra.mxu1 %v5748_v35  ;;  %3938 = vmatpush.bf16.msrb.mxu2 %v5755_v46  ;;  %p6346_p1 = pnand %p6345_p9, %p6852_p6 }
 0x83a   : > { %p6351_p10 = por %p6350_p11, %p6349_p4 }
 0x83b   : > { %p6347_p3 = pneg %p6346_p1 }
 0x83c   : > { %3801 = vmatpush.bf16.msra.mxu3 %v5279_v32  ;;  %3810 = vmatpush.bf16.msra.mxu0 %v5375_v4 }
 0x83d   : > { %3925 = vmatpush.bf16.msra.mxu1 %v5747_v36  ;;  %3939 = vmatpush.bf16.msrb.mxu2 %v5754_v47  ;;  %p6352_p12 = pnand %p6351_p10, %p6347_p3 }
 0x840   : > { %3802 = vmatpush.bf16.msra.mxu3 %v5271_v48  ;;  %3811 = vmatpush.bf16.msra.mxu0 %v5367_v11 }
 0x841   : > { %3926 = vmatpush.bf16.msra.mxu1 %v5746_v38  ;;  %3940 = vmatpush.bf16.msrb.mxu2 %v5753_v56 }
 0x843   : > { %v3778_v19 = vpop.f32.mrf.mxu1  ;;  %3764 = vmatmul.bf16.vlgmr.msrb.gmra.mxu0 %v2750_v15  ;;  %3803 = vmatmul.bf16.vlgmr.msra.gmra.mxu3 %v2749_v58 }
 0x844   : > { %3812 = vmatpush.bf16.msra.mxu0 %v5359_v14  ;;  %v3779_v25 = vadd.f32 %v3778_v19, %v3714_v20 }
 0x845   : > { %3927 = vmatpush.bf16.msra.mxu1 %v5745_v40  ;;  %3941 = vmatpush.bf16.msrb.mxu2 %v5752_v42 }
 0x848   : > { %3813 = vmatpush.bf16.msra.mxu0 %v5351_v16 }
 0x849   : > { %3928 = vmatpush.bf16.msra.mxu1 %v5744_v43 }
 0x84b   : > { %v3780_v7 = vpop.f32.mrf.mxu1 }
 0x84c   : > { %3814 = vmatpush.bf16.msra.mxu0 %v5343_v21 }
 0x84f   : > { %v3791_v27 = vpop.f32.mrf.mxu2 }
 0x850   : > { %v3792_v30 = vadd.f32 %v3791_v27, %v3779_v25  ;;  %3815 = vmatpush.bf16.msra.mxu0 %v5335_v28 }
 0x853   : > { %3816 = vmatmul.bf16.vlgmr.msra.gmra.mxu0 %v2750_v15 }
 0x857   : > { %v3793_v26 = vpop.f32.mrf.mxu2 }
 0x8a6   : > { %v3339_v45 = vpop.f32.mrf.mxu3 }
 0x8a7   : > { %v3340_v52 = vadd.f32 %v5967_v49, %v3339_v45 }
 0x8ae   : > { %v3341_v50 = vpop.f32.mrf.mxu3 }
 0x8af   : > { %v3342_v51 = vadd.f32 %v5967_v49, %v3341_v50 }
 0x8b0   : > { %v3353_v53 = vpop.f32.mrf.mxu0 }
 0x8b1   : > { %v3354_v10 = vadd.f32 %v3353_v53, %v3340_v52 }
 0x8b3   : > { %3358 = vxpose.xlu0.b32.start [1/2] (short) (narrow) %v3354_v10, 8 }
 0x8b6   : > { %v3752_v58 = vpop.f32.mrf.mxu3 }
 0x8b7   : > { %v3753_v60 = vadd.f32 %v3752_v58, %v7109_v54 }
 0x8b8   : > { %v3355_v57 = vpop.f32.mrf.mxu0 }
 0x8b9   : > { %v3356_v59 = vadd.f32 %v3355_v57, %v3342_v51 }
 0x8bb   : > { %3359 = vxpose.xlu0.b32.end [2/2] (short) (narrow) %v3356_v59, 8 }
 0x8be   : > { %v3754_v24 = vpop.f32.mrf.mxu3 }
 0x8c0   : > { %v3765_v2 = vpop.f32.mrf.mxu0 }
 0x8c1   : > { %v3766_v61 = vadd.f32 %v3765_v2, %v3753_v60 }
 0x8c3   : > { %v3821_v62 = vmax.f32 %v3766_v61, 0.0 }
 0x8c5   : > { %v3823_v63 = vpack.c.bf16 %v3821_v62, %v3821_v62 }
 0x8c6   : > { %v3804_v0 = vpop.f32.mrf.mxu3 }
 0x8c7   : > { %3929 = vmatmul.bf16.vlgmr.msra.gmra.mxu1 %v3823_v63  ;;  %v3805_v4 = vadd.f32 %v3804_v0, %v3792_v30 }
 0x8c8   : > { %v3767_v3 = vpop.f32.mrf.mxu0 }
 0x8ce   : > { %v3806_v32 = vpop.f32.mrf.mxu3 }
 0x8d0   : > { %v3817_v5 = vpop.f32.mrf.mxu0 }
 0x8d1   : > { %v3818_v6 = vadd.f32 %v3817_v5, %v3805_v4 }
 0x8d3   : > { %v3822_v8 = vmax.f32 %v3818_v6, 0.0 }
 0x8d5   : > { %v3824_v9 = vpack.c.bf16 %v3822_v8, %v3822_v8 }
 0x8d7   : > { %3942 = vmatmul.bf16.vlgmr.msrb.gmra.mxu2 %v3824_v9 }
 0x8d8   : > { %v3819_v54 = vpop.f32.mrf.mxu0 }
 0x944   : > { %v3930_v48 = vpop.f32.mrf.mxu1 }
 0x945   : > { %v3931_v13 = vadd.f32 %v3930_v48, %v1546_v12 }
 0x94c   : > { %v3932_v11 = vpop.f32.mrf.mxu1 }
 0x957   : > { %v3374_v1 = vpop.trf.xlu0 }
 0x958   : > { %3391 = vst.msk [vmem:[%s1147_s4] sm:$0xff] %vm3390_vm3, %v3374_v1 }
 0x959   : > { %6355 = shalt.err (!%p6352_p12)
}
 0x95a   : > { %5806 = dma.vmem_to_hbm [thread:$0]  (%p6852_p6), %s3967_s5, 128, %s3969_s6, %s3950_s24   ;;  %v3943_v19 = vpop.f32.mrf.mxu2  ;;  %vm3947_vm4 = vcmask 32768  }
 0x95b   : > { %v3944_v14 = vadd.f32 %v3943_v19, %v3931_v13  ;;  %s3955_s4 = scalar_lea.sflag [#allocation24], %s6877_s16  ;;  %s6370_s8 = sshra.s32 %s3982_s13, 4  ;;  %s6371_s8 = int_to_ptr.hbm [resolvable:$true] %s6370_s8 }
 0x95c   : > { %s6372_s7 = scalar_lea.hbm %s6371_s8, 1  ;;  %s6376_s3 = scalar_lea.hbm %s7277_s2, 2 }
 0x95d   : > { %3948 = vst.msk [vmem:[%s1153_s11] sm:$0x1] %vm3947_vm4, %v3944_v14  ;;  %p6373_p7 = scmp.ne.s32.totalorder %s6371_s8, %s6372_s7  ;;  %p6377_p0 = scmp.lt.s32.totalorder %s6371_s8, %s7277_s2 }
 0x95e   : > { %p6378_p2 = scmp.lt.s32.totalorder %s6376_s3, %s6372_s7 }
 0x95f   : > { %p6374_p13 = pnand %p6373_p7, %p6852_p6 }
 0x960   : > { %p6379_p5 = por %p6378_p2, %p6377_p0 }
 0x961   : > { %p6375_p8 = pneg %p6374_p13 }
 0x963   : > { %p6380_p9 = pnand %p6379_p5, %p6375_p8 }
 0x965   : > { %6383 = shalt.err (!%p6380_p9)
}
 0x966   : > { %5807 = dma.vmem_to_hbm [thread:$0]  (%p6852_p6), %s3980_s12, 16, %s3982_s13, %s3955_s4   ;;  %v3945_v15 = vpop.f32.mrf.mxu2 }
 0x967 PF: > { %s3993_s5 = sand.u32 1, %s6438_s22   ;;  %p7280_p1 = scmp.ne.s32.totalorder %s7247_s9, 0 }
 0x968   : > { %p7281_p3 = scmp.ge.s32.totalorder %s6450_s0, 2  ;;  %s3994_s16 = scalar_lea.sflag [#allocation4], %s3993_s5 }
 0x96a   : > { %p5849_p4 = pnand %p7281_p3, %p7280_p1 }
 0x96c   : > { %p5850_p11 = pneg %p5849_p4 }
 0x96e   : > { %6429 = dma.done.wait (%p5850_p11), %s3994_s16, 128  }
 0x96f   : > { %6431 = vsyncadd (%p5850_p11), %s3994_s16, 4294967168  ;;  %s4004_s6 = scalar_lea.sflag [#allocation24], %s3993_s5 }
 0x970   : > { %6433 = dma.done.wait (%p5850_p11), %s4004_s6, 16  }
 0x971   : > { %6435 = vsyncadd (%p5850_p11), %s4004_s6, 4294967280  ;;  %p86_p6 = scmp.ge.s32.totalorder %s6832_s15, 4   ;;  %s7282_s22 = smov %s6442_s23 }
 0x972   : > { %s7283_s23 = smov %s6446_s26  ;;  %s7284_s26 = smov %s6844_s14 }
 0x973   : > { %s7285_s0 = smov %s6832_s15  ;;  %88 = sbr.rel (!%p86_p6) target bundleno = 77 (0x4d), region = 277 }
 0x978   :  { %4009 = vsyncpa [#allocation3], 1 }
 0x979   :  { %4011 = vsyncpa [#allocation3 + $0x1], 1 }
 0x97a   :  { %4012 = vsyncpa [#allocation6], 1 }
 0x97b   :  { %4013 = vsyncpa [#allocation9], 1 }
 0x97c   :  { %4014 = vsyncpa [#allocation12], 1 }
 0x97d   :  { %4015 = vsyncpa [#allocation15], 1 }
 0x97e   :  { %4016 = vsyncpa [#allocation18], 1 }
 0x97f   :  { %4017 = vsyncpa [#allocation21], 1 }
 0x980   :  { %4018 = vsyncpa [#allocation4], 1 }
 0x981   :  { %4020 = vsyncpa [#allocation4 + $0x1], 1 }
 0x982   :  { %4021 = vsyncpa [#allocation24], 1 }
 0x983   :  { %4023 = vsyncpa [#allocation24 + $0x1], 1 }

</bundles_post_ra>
